<compile_context>
chip_gen: v7x
topology: tpu7x:2x2x1
jax: 0.10.0
libtpu: 0.0.40
codegen_flags: <defaults>
</compile_context>

<pallas_src>
import functools
import math

import jax
import jax.numpy as jnp
from jax.experimental import pallas as pl
from jax.experimental.pallas import tpu as pltpu

# v7x has 64 MiB physical VMEM per TC; 48 MiB scoped limit also works on
# v5e/v6e (128 MiB physical).  Per-kernel working sets are budgeted well below.
VMEM_LIMIT = 48 * 1024 * 1024


def _round_up(x, m):
    return ((x + m - 1) // m) * m


def _pick_tile(total, cap):
    """Largest multiple of 128 that divides `total` (a multiple of 128), <= cap."""
    best = 128
    t = 128
    while t <= min(total, cap):
        if total % t == 0:
            best = t
        t += 128
    return best


def _pad_chunks(x, chunk, chunk_pad, axis):
    """Split `axis` into chunks of `chunk` and zero-pad each chunk to `chunk_pad`."""
    if chunk == chunk_pad:
        return x
    n = x.shape[axis] // chunk
    pad = [(0, 0)] * x.ndim
    pad[axis] = (0, chunk_pad - chunk)
    pieces = jnp.split(x, n, axis=axis)
    return jnp.concatenate([jnp.pad(p, pad) for p in pieces], axis=axis)


# ----------------------------- tiled linear (MXU) ---------------------------

def _linear_kernel(x_ref, w_ref, b_ref, o_ref, acc_ref, *, activation):
    k = pl.program_id(2)

    @pl.when(k == 0)
    def _():
        acc_ref[...] = jnp.zeros_like(acc_ref)

    # cast activation tile to bf16 in-kernel (weights are pre-cast bf16)
    acc_ref[...] += jnp.dot(x_ref[...].astype(jnp.bfloat16), w_ref[...],
                            preferred_element_type=jnp.float32)

    @pl.when(k == pl.num_programs(2) - 1)
    def _():
        acc = acc_ref[...] + b_ref[...]
        if activation == "relu":
            acc = jnp.maximum(acc, 0.0)
        elif activation == "tanh":
            acc = jnp.tanh(acc)
        o_ref[...] = acc.astype(o_ref.dtype)


def pallas_linear(x, w, b, activation="none"):
    """x: (M, K) f32; w: (K, N) bf16 pre-padded (K, N multiples of 128);
    b: (1, N) f32.  Returns (M, N) f32 (lane-dense padded N kept)."""
    M, K = x.shape
    Kp, Np = w.shape
    assert K == Kp and Kp % 128 == 0 and Np % 128 == 0
    tm = min(512, _round_up(M, 8))
    tn = _pick_tile(Np, 512)
    tk = Kp if Kp <= 1024 else _pick_tile(Kp, 512)
    Mp = _round_up(M, tm)
    if Mp != M:
        x = jnp.pad(x, ((0, Mp - M), (0, 0)))

    out = pl.pallas_call(
        functools.partial(_linear_kernel, activation=activation),
        grid=(Mp // tm, Np // tn, Kp // tk),
        in_specs=[
            pl.BlockSpec((tm, tk), lambda i, j, k: (i, k)),
            pl.BlockSpec((tk, tn), lambda i, j, k: (k, j)),
            pl.BlockSpec((1, tn), lambda i, j, k: (0, j)),
        ],
        out_specs=pl.BlockSpec((tm, tn), lambda i, j, k: (i, j)),
        out_shape=jax.ShapeDtypeStruct((Mp, Np), jnp.float32),
        scratch_shapes=[pltpu.VMEM((tm, tn), jnp.float32)],
        compiler_params=pltpu.CompilerParams(
            dimension_semantics=("parallel", "parallel", "arbitrary"),
            vmem_limit_bytes=VMEM_LIMIT),
    )(x, w, b)
    return out[:M] if Mp != M else out


# ------------------------- fused enhancement + projection -------------------
# ReLU(concat([enc, att, enc-att, enc*att]) @ W + b) without materializing the
# 8H-wide enhanced tensor in HBM: the four (2Hp, Hp) weight slabs are applied
# to the four chunks formed in VMEM.  Slabs are grid-invariant (fetched once).

def _enhance_proj_kernel(enc_ref, att_ref, w1_ref, w2_ref, w3_ref, w4_ref,
                         b_ref, o_ref):
    enc = enc_ref[...]
    att = att_ref[...]
    bf = jnp.bfloat16
    acc = jnp.dot(enc.astype(bf), w1_ref[...], preferred_element_type=jnp.float32)
    acc = acc + jnp.dot(att.astype(bf), w2_ref[...],
                        preferred_element_type=jnp.float32)
    acc = acc + jnp.dot((enc - att).astype(bf), w3_ref[...],
                        preferred_element_type=jnp.float32)
    acc = acc + jnp.dot((enc * att).astype(bf), w4_ref[...],
                        preferred_element_type=jnp.float32)
    acc = acc + b_ref[...]
    o_ref[...] = jnp.maximum(acc, 0.0)


def pallas_enhance_project(enc, att, slabs, b):
    """enc, att: (M, 2Hp) f32; slabs: 4x (2Hp, Hp) bf16; b: (1, Hp) f32."""
    M, D = enc.shape
    Hp = slabs[0].shape[1]
    tm = min(512, _round_up(M, 8))
    Mp = _round_up(M, tm)
    if Mp != M:
        enc = jnp.pad(enc, ((0, Mp - M), (0, 0)))
        att = jnp.pad(att, ((0, Mp - M), (0, 0)))

    out = pl.pallas_call(
        _enhance_proj_kernel,
        grid=(Mp // tm,),
        in_specs=[
            pl.BlockSpec((tm, D), lambda i: (i, 0)),
            pl.BlockSpec((tm, D), lambda i: (i, 0)),
            pl.BlockSpec((D, Hp), lambda i: (0, 0)),
            pl.BlockSpec((D, Hp), lambda i: (0, 0)),
            pl.BlockSpec((D, Hp), lambda i: (0, 0)),
            pl.BlockSpec((D, Hp), lambda i: (0, 0)),
            pl.BlockSpec((1, Hp), lambda i: (0, 0)),
        ],
        out_specs=pl.BlockSpec((tm, Hp), lambda i: (i, 0)),
        out_shape=jax.ShapeDtypeStruct((Mp, Hp), jnp.float32),
        compiler_params=pltpu.CompilerParams(
            dimension_semantics=("parallel",), vmem_limit_bytes=VMEM_LIMIT),
    )(enc, att, *slabs, b)
    return out[:M] if Mp != M else out


# ------------------------------ soft attention -------------------------------

def _attention_kernel(p_ref, h_ref, pmc_ref, hmr_ref, hmc_ref, ap_ref, ah_ref):
    p = p_ref[...].astype(jnp.bfloat16)     # (Bb, Lp, D)
    h = h_ref[...].astype(jnp.bfloat16)     # (Bb, Lh, D)
    pm_col = pmc_ref[...]                   # (Bb, Lp, 1)
    hm_row = hmr_ref[...]                   # (Bb, 1, Lh)
    hm_col = hmc_ref[...]                   # (Bb, Lh, 1)

    sim = jnp.einsum("bpd,bhd->bph", p, h,
                     preferred_element_type=jnp.float32)        # (Bb, Lp, Lh)

    # premise -> hypothesis attention: masked softmax over the Lh axis
    x1 = sim * hm_row
    x1 = x1 - jnp.max(x1, axis=2, keepdims=True)
    e1 = jnp.exp(x1)
    a1 = (e1 / jnp.sum(e1, axis=2, keepdims=True)) * hm_row
    attn_ph = a1 / (jnp.sum(a1, axis=2, keepdims=True) + 1e-13)

    # hypothesis -> premise attention kept in sim's (p, h) axes: masked softmax
    # over Lp (axis=1) — no materialized transpose of sim.
    x2 = sim * pm_col
    x2 = x2 - jnp.max(x2, axis=1, keepdims=True)
    e2 = jnp.exp(x2)
    a2 = (e2 / jnp.sum(e2, axis=1, keepdims=True)) * pm_col
    attn_hp = a2 / (jnp.sum(a2, axis=1, keepdims=True) + 1e-13)

    ap = jnp.einsum("bph,bhd->bpd", attn_ph.astype(jnp.bfloat16), h,
                    preferred_element_type=jnp.float32) * pm_col
    # contraction over axis 1 of both operands (transpose folded into MXU operand)
    ah = jnp.einsum("bph,bpd->bhd", attn_hp.astype(jnp.bfloat16), p,
                    preferred_element_type=jnp.float32) * hm_col
    ap_ref[...] = ap
    ah_ref[...] = ah


def _attention_batch_block(B, Lp, Lh, D):
    # f32 sim + softmax temporaries + p/h/ap/ah tiles, per batch item
    per_item = 6 * Lp * Lh * 4 + (Lp + Lh) * D * 12
    budget = 12 * 1024 * 1024
    bb = max(1, min(B, budget // max(per_item, 1)))
    while B % bb:
        bb -= 1
    return bb


def pallas_attention(enc_p, pm, enc_h, hm):
    # TODO(synk): for very long sequences (L >~ 512) tile Lh with an online
    # softmax (flash-style) loop to bound the O(Lp*Lh) VMEM temporaries on v7x.
    B, Lp, D = enc_p.shape
    Lh = enc_h.shape[1]
    Bb = _attention_batch_block(B, Lp, Lh, D)

    pm_col = pm[:, :, None]       # (B, Lp, 1)
    hm_row = hm[:, None, :]       # (B, 1, Lh)
    hm_col = hm[:, :, None]       # (B, Lh, 1)

    ap, ah = pl.pallas_call(
        _attention_kernel,
        grid=(B // Bb,),
        in_specs=[
            pl.BlockSpec((Bb, Lp, D), lambda b: (b, 0, 0)),
            pl.BlockSpec((Bb, Lh, D), lambda b: (b, 0, 0)),
            pl.BlockSpec((Bb, Lp, 1), lambda b: (b, 0, 0)),
            pl.BlockSpec((Bb, 1, Lh), lambda b: (b, 0, 0)),
            pl.BlockSpec((Bb, Lh, 1), lambda b: (b, 0, 0)),
        ],
        out_specs=(
            pl.BlockSpec((Bb, Lp, D), lambda b: (b, 0, 0)),
            pl.BlockSpec((Bb, Lh, D), lambda b: (b, 0, 0)),
        ),
        out_shape=(
            jax.ShapeDtypeStruct((B, Lp, D), jnp.float32),
            jax.ShapeDtypeStruct((B, Lh, D), jnp.float32),
        ),
        compiler_params=pltpu.CompilerParams(
            dimension_semantics=("parallel",), vmem_limit_bytes=VMEM_LIMIT),
    )(enc_p, enc_h, pm_col, hm_row, hm_col)
    return ap, ah


# --------------------------------- pooling ----------------------------------

def _pool_kernel(v_ref, m_ref, avg_ref, max_ref):
    v = v_ref[...]            # (Bb, L, D)
    m = m_ref[...]            # (Bb, L, 1)
    s = jnp.sum(v * m, axis=1)                                  # (Bb, D)
    denom = jnp.sum(m, axis=1)                                  # (Bb, 1); len >= 1
    avg_ref[...] = s / denom                                    # exact division
    masked = v * m + (-1e7) * (1.0 - m)                         # replace_masked
    max_ref[...] = jnp.max(masked, axis=1)


def _pool_batch_block(B, L, D):
    per_item = L * D * 4 * 2 + D * 4 * 4
    budget = 16 * 1024 * 1024
    if B * per_item <= budget:
        return B
    bb = max(8, (budget // per_item) // 8 * 8)
    while bb > 8 and (B % bb):
        bb -= 8
    return B if (B % bb) else bb


def pallas_pool(v, mask):
    B, L, D = v.shape
    Bb = _pool_batch_block(B, L, D)
    avg, mx = pl.pallas_call(
        _pool_kernel,
        grid=(B // Bb,),
        in_specs=[
            pl.BlockSpec((Bb, L, D), lambda b: (b, 0, 0)),
            pl.BlockSpec((Bb, L, 1), lambda b: (b, 0, 0)),
        ],
        out_specs=(
            pl.BlockSpec((Bb, D), lambda b: (b, 0)),
            pl.BlockSpec((Bb, D), lambda b: (b, 0)),
        ),
        out_shape=(
            jax.ShapeDtypeStruct((B, D), jnp.float32),
            jax.ShapeDtypeStruct((B, D), jnp.float32),
        ),
        compiler_params=pltpu.CompilerParams(
            dimension_semantics=("parallel",), vmem_limit_bytes=VMEM_LIMIT),
    )(v, mask[:, :, None])
    return avg, mx


# ------------------------------ BiLSTM encoder -------------------------------
# Seq2SeqEncoder(nn.LSTM, bidirectional=True) with packed-sequence semantics:
# hidden state is frozen and outputs are zero at padded positions.  The input
# projection for both directions and both sequences is one fused Pallas
# matmul; the sequential recurrence runs in a single Pallas call with
# grid=(batch_blocks, T//U), U=8 timesteps unrolled per grid step, h/c in VMEM
# scratch, forward/reverse gate halves picked via BlockSpec last-dim block
# indices (no XLA slicing or time-major transposes).

def _bilstm_kernel(gxf_ref, gxr_ref, mf_ref, mr_ref, whf_ref, whr_ref,
                   of_ref, or_ref, hf, cf, hr, cr, *, hidden_p, unroll):
    t = pl.program_id(1)

    @pl.when(t == 0)
    def _():
        hf[...] = jnp.zeros_like(hf)
        cf[...] = jnp.zeros_like(cf)
        hr[...] = jnp.zeros_like(hr)
        cr[...] = jnp.zeros_like(cr)

    wf = whf_ref[...]                                  # (Hp, 4Hp) bf16
    wr = whr_ref[...]

    def cell(gx, m, w, h_sc, c_sc):
        h = h_sc[...]
        c = c_sc[...]
        g = gx + jnp.dot(h.astype(jnp.bfloat16), w,
                         preferred_element_type=jnp.float32)   # (Bb, 4Hp)
        # gate slices are lane-aligned (Hp is a multiple of 128)
        i = jax.nn.sigmoid(g[:, :hidden_p])
        f = jax.nn.sigmoid(g[:, hidden_p:2 * hidden_p])
        gg = jnp.tanh(g[:, 2 * hidden_p:3 * hidden_p])
        o = jax.nn.sigmoid(g[:, 3 * hidden_p:])
        c_new = f * c + i * gg
        h_new = o * jnp.tanh(c_new)
        c_sc[...] = m * c_new + (1.0 - m) * c          # freeze state past length
        h_sc[...] = m * h_new + (1.0 - m) * h
        return m * h_new                               # zero output at padding

    for u in range(unroll):                            # static unroll (U small)
        of_ref[:, u, :] = cell(gxf_ref[:, u, :], mf_ref[:, u, :], wf, hf, cf)
        ur = unroll - 1 - u                            # reverse dir: decreasing t
        or_ref[:, ur, :] = cell(gxr_ref[:, ur, :], mr_ref[:, ur, :], wr, hr, cr)


def _lstm_batch_block(B, U, Hp):
    per_item = (2 * U * 4 * Hp * 4) * 2 + (2 * U * Hp * 4) * 2 + 4 * Hp * 4
    budget = 24 * 1024 * 1024
    bb = max(1, min(B, budget // max(per_item, 1)))
    while B % bb:
        bb -= 1
    return bb


def bilstm_recurrence(gx, lengths, w_hh_f, w_hh_r, Hp):
    """gx: (B, T, 8*Hp) fused [fwd 4Hp | rev 4Hp] gates (input proj + biases)."""
    B, T, _ = gx.shape
    if T % 8 == 0:
        U, T_pad = 8, T
    elif T < 8:
        U, T_pad = T, T
    else:
        T_pad = _round_up(T, 8)
        U = 8
        gx = jnp.pad(gx, ((0, 0), (0, T_pad - T), (0, 0)))
    G = T_pad // U

    Bb = _lstm_batch_block(B, U, Hp)
    nb = B // Bb

    mask = (jnp.arange(T_pad)[None, :] < lengths[:, None]).astype(jnp.float32)
    mask = mask[:, :, None]                            # (B, T_pad, 1)

    out_f, out_r = pl.pallas_call(
        functools.partial(_bilstm_kernel, hidden_p=Hp, unroll=U),
        grid=(nb, G),
        in_specs=[
            pl.BlockSpec((Bb, U, 4 * Hp), lambda b, s: (b, s, 0)),
            pl.BlockSpec((Bb, U, 4 * Hp), lambda b, s: (b, G - 1 - s, 1)),
            pl.BlockSpec((Bb, U, 1), lambda b, s: (b, s, 0)),
            pl.BlockSpec((Bb, U, 1), lambda b, s: (b, G - 1 - s, 0)),
            pl.BlockSpec((Hp, 4 * Hp), lambda b, s: (0, 0)),
            pl.BlockSpec((Hp, 4 * Hp), lambda b, s: (0, 0)),
        ],
        out_specs=(
            pl.BlockSpec((Bb, U, Hp), lambda b, s: (b, s, 0)),
            pl.BlockSpec((Bb, U, Hp), lambda b, s: (b, G - 1 - s, 0)),
        ),
        out_shape=(
            jax.ShapeDtypeStruct((B, T_pad, Hp), jnp.float32),
            jax.ShapeDtypeStruct((B, T_pad, Hp), jnp.float32),
        ),
        scratch_shapes=[pltpu.VMEM((Bb, Hp), jnp.float32)] * 4,
        compiler_params=pltpu.CompilerParams(
            dimension_semantics=("parallel", "arbitrary"),
            vmem_limit_bytes=VMEM_LIMIT),
    )(gx, gx, mask, mask, w_hh_f, w_hh_r)

    out = jnp.concatenate([out_f, out_r], axis=-1)     # (B, T_pad, 2Hp)
    if T_pad != T:
        out = out[:, :T]
    return out


def bilstm_pair(x_p, len_p, x_h, len_h, lp):
    """One bidirectional LSTM layer over premise and hypothesis; the input
    projections for both directions AND both sequences are one fused matmul."""
    B, Tp, Kp = x_p.shape
    Th = x_h.shape[1]
    Hp = lp["w_hh_f"].shape[0]

    x_all = jnp.concatenate([x_p.reshape(B * Tp, Kp),
                             x_h.reshape(B * Th, Kp)], axis=0)
    gx_all = pallas_linear(x_all, lp["w_ih"], lp["b"])           # (M, 8Hp)
    gx_p = gx_all[:B * Tp].reshape(B, Tp, 8 * Hp)
    gx_h = gx_all[B * Tp:].reshape(B, Th, 8 * Hp)

    out_p = bilstm_recurrence(gx_p, len_p, lp["w_hh_f"], lp["w_hh_r"], Hp)
    out_h = bilstm_recurrence(gx_h, len_h, lp["w_hh_f"], lp["w_hh_r"], Hp)
    return out_p, out_h


# ------------------------------ parameter init -------------------------------
# All matmul weights are stored pre-padded (lane-aligned gate/feature chunks)
# and pre-cast to bf16 so the forward pass does no pad/cast passes over them.

def xavier_uniform(key, shape):
    fan_out, fan_in = shape  # torch Linear/LSTM weight convention (out, in)
    a = math.sqrt(6.0 / (fan_in + fan_out))
    return jax.random.uniform(key, shape, jnp.float32, -a, a)


def orthogonal(key, shape):
    return jax.nn.initializers.orthogonal()(key, shape, jnp.float32)


def init_lstm_padded(key, input_size, H, Hp):
    In_p = _round_up(input_size, 128)
    ks = jax.random.split(key, 4)

    def one_dir(k1, k2):
        w_ih = xavier_uniform(k1, (4 * H, input_size))      # torch (4H, In)
        w_hh = orthogonal(k2, (4 * H, H))                   # torch (4H, H)
        b = jnp.zeros((4 * H,), jnp.float32).at[H:2 * H].set(1.0)  # b_ih + b_hh
        w_ih_t = _pad_chunks(w_ih.T, H, Hp, axis=1)         # (In, 4Hp)
        w_ih_t = jnp.pad(w_ih_t, ((0, In_p - input_size), (0, 0)))
        w_hh_t = _pad_chunks(w_hh.T, H, Hp, axis=1)         # (H, 4Hp)
        w_hh_t = jnp.pad(w_hh_t, ((0, Hp - H), (0, 0)))
        b_p = _pad_chunks(b[None, :], H, Hp, axis=1)        # (1, 4Hp)
        return w_ih_t, w_hh_t, b_p

    f = one_dir(ks[0], ks[1])
    r = one_dir(ks[2], ks[3])
    return {
        # fused (In_p, 8Hp) input-projection weight: [fwd 4Hp | rev 4Hp] columns
        "w_ih": jnp.concatenate([f[0], r[0]], axis=1).astype(jnp.bfloat16),
        "b": jnp.concatenate([f[2], r[2]], axis=1),          # (1, 8Hp) f32
        "w_hh_f": f[1].astype(jnp.bfloat16),                 # (Hp, 4Hp)
        "w_hh_r": r[1].astype(jnp.bfloat16),
    }


def init_esim_params(key, vocab_size, embedding_dim, hidden_size, num_classes):
    H = hidden_size
    Hp = _round_up(H, 128)
    Ep = _round_up(embedding_dim, 128)
    Cp = _round_up(num_classes, 128)
    keys = jax.random.split(key, 8)

    emb = jax.random.normal(keys[0], (vocab_size, embedding_dim), jnp.float32)
    emb = emb.at[0].set(0.0)  # padding_idx=0
    emb_p = jnp.pad(emb, ((0, 0), (0, Ep - embedding_dim)))

    # projection Linear(4*2H -> H) + ReLU, stored as 4 slabs of (2Hp, Hp)
    proj_w_t = xavier_uniform(keys[3], (H, 8 * H)).T          # (8H, H) (in, out)
    slabs = []
    for k in range(4):
        slab = proj_w_t[k * 2 * H:(k + 1) * 2 * H, :]         # (2H, H)
        slab = _pad_chunks(slab, H, Hp, axis=0)               # (2Hp, H)
        slab = jnp.pad(slab, ((0, 0), (0, Hp - H))).astype(jnp.bfloat16)
        slabs.append(slab)

    cls1_w = xavier_uniform(keys[4], (H, 8 * H)).T            # (8H, H)
    cls1_w = _pad_chunks(cls1_w, H, Hp, axis=0)               # (8Hp, H)
    cls1_w = jnp.pad(cls1_w, ((0, 0), (0, Hp - H))).astype(jnp.bfloat16)

    cls2_w = xavier_uniform(keys[5], (num_classes, H)).T      # (H, C)
    cls2_w = jnp.pad(cls2_w, ((0, Hp - H), (0, Cp - num_classes))
                     ).astype(jnp.bfloat16)

    return {
        "embedding": emb_p,
        "enc": init_lstm_padded(keys[1], embedding_dim, H, Hp),
        "comp": init_lstm_padded(keys[2], H, H, Hp),
        "proj_slabs": tuple(slabs),
        "proj_b": jnp.zeros((1, Hp), jnp.float32),
        "cls1_w": cls1_w,
        "cls1_b": jnp.zeros((1, Hp), jnp.float32),
        "cls2_w": cls2_w,
        "cls2_b": jnp.zeros((1, Cp), jnp.float32),
    }


# -------------------------------- ESIM forward -------------------------------

def esim_forward(params, premises, prem_lengths, hypotheses, hyp_lengths, *,
                 num_classes):
    B, Tp = premises.shape
    _, Th = hypotheses.shape
    Hp = params["enc"]["w_hh_f"].shape[0]
    Dp = 2 * Hp

    # get_mask: 1.0 at valid (non-pad) positions
    pm = (jnp.arange(Tp)[None, :] < prem_lengths[:, None]).astype(jnp.float32)
    hm = (jnp.arange(Th)[None, :] < hyp_lengths[:, None]).astype(jnp.float32)

    # TODO(synk): embedding gather stays in XLA (no clean blocked Pallas equivalent).
    emb_p = params["embedding"][premises]    # (B, Tp, Ep)
    emb_h = params["embedding"][hypotheses]  # (B, Th, Ep)
    # TimestepDropout / Dropout: identity at inference.

    enc_p, enc_h = bilstm_pair(emb_p, prem_lengths, emb_h, hyp_lengths,
                               params["enc"])                    # (B, T, 2Hp)

    att_p, att_h = pallas_attention(enc_p, pm, enc_h, hm)

    # fused enhancement concat + projection (premise + hypothesis in one call)
    enc_all = jnp.concatenate([enc_p.reshape(B * Tp, Dp),
                               enc_h.reshape(B * Th, Dp)], axis=0)
    att_all = jnp.concatenate([att_p.reshape(B * Tp, Dp),
                               att_h.reshape(B * Th, Dp)], axis=0)
    proj_all = pallas_enhance_project(enc_all, att_all,
                                      params["proj_slabs"], params["proj_b"])
    proj_p = proj_all[:B * Tp].reshape(B, Tp, Hp)
    proj_h = proj_all[B * Tp:].reshape(B, Th, Hp)

    v_ai, v_bj = bilstm_pair(proj_p, prem_lengths, proj_h, hyp_lengths,
                             params["comp"])                     # (B, T, 2Hp)

    va_avg, va_max = pallas_pool(v_ai, pm)
    vb_avg, vb_max = pallas_pool(v_bj, hm)

    v = jnp.concatenate([va_avg, va_max, vb_avg, vb_max], axis=1)  # (B, 8Hp)

    h1 = pallas_linear(v, params["cls1_w"], params["cls1_b"], "tanh")
    logits = pallas_linear(h1, params["cls2_w"], params["cls2_b"])[:, :num_classes]
    return {"pred": jax.nn.softmax(logits, axis=-1)}


# ----------------------------------- main ------------------------------------

if __name__ == "__main__":
    VOCAB, E, H, T, B, NUM_CLASSES = 100, 32, 32, 8, 2, 3

    key = jax.random.PRNGKey(0)
    k_params, k_p, k_h = jax.random.split(key, 3)
    params = init_esim_params(k_params, VOCAB, E, H, NUM_CLASSES)

    prem_lengths = jnp.array([8, 5], dtype=jnp.int32)   # max length == T
    hyp_lengths = jnp.array([6, 8], dtype=jnp.int32)    # max length == T

    t_idx = jnp.arange(T)[None, :]
    premises = jax.random.randint(k_p, (B, T), 1, VOCAB, dtype=jnp.int32)
    premises = jnp.where(t_idx < prem_lengths[:, None], premises, 0)
    hypotheses = jax.random.randint(k_h, (B, T), 1, VOCAB, dtype=jnp.int32)
    hypotheses = jnp.where(t_idx < hyp_lengths[:, None], hypotheses, 0)

    fwd = jax.jit(functools.partial(esim_forward, num_classes=NUM_CLASSES))
    out = fwd(params, premises, prem_lengths, hypotheses, hyp_lengths)
    probs = jax.block_until_ready(out["pred"])
    assert probs.shape == (B, NUM_CLASSES)
    assert bool(jnp.all(jnp.isfinite(probs)))
    print("KERNEL_OK")
</pallas_src>

<mosaic_0001>
module attributes {stable_mosaic.version = 11 : i64} {
  func.func @_linear_kernel(%arg0: i32, %arg1: i32, %arg2: i32, %arg3: memref<32x128xf32, #tpu.memory_space<vmem>>, %arg4: memref<128x512xbf16, #tpu.memory_space<vmem>>, %arg5: memref<1x512xf32, #tpu.memory_space<vmem>>, %arg6: memref<32x512xf32, #tpu.memory_space<vmem>>, %arg7: memref<32x512xf32, #tpu.memory_space<vmem>>) attributes {dimension_semantics = [#tpu.dimension_semantics<parallel>, #tpu.dimension_semantics<parallel>, #tpu.dimension_semantics<arbitrary>], iteration_bounds = array<i64: 1, 2, 1>, scalar_prefetch = 0 : i64, scratch_operands = 1 : i64, tpu.core_type = #tpu.core_type<tc>, window_params = [{transform_indices = @transform_0, window_bounds = array<i64: 32, 128>}, {transform_indices = @transform_1, window_bounds = array<i64: 128, 512>}, {transform_indices = @transform_2, window_bounds = array<i64: 1, 512>}, {transform_indices = @transform_3, window_bounds = array<i64: 32, 512>}]} {
    %c0_i32 = arith.constant 0 : i32
    %0 = arith.cmpi eq, %arg2, %c0_i32 : i32
    %1 = arith.extui %0 : i1 to i32
    %c0_i32_0 = arith.constant 0 : i32
    %2 = arith.cmpi ne, %1, %c0_i32_0 : i32
    scf.if %2 {
      %cst_10 = arith.constant 0.000000e+00 : f32
      %13 = vector.broadcast %cst_10 : f32 to vector<32x512xf32>
      %c0_11 = arith.constant 0 : index
      %c0_12 = arith.constant 0 : index
      %14 = vector.load %arg7[%c0_11, %c0_12] : memref<32x512xf32, #tpu.memory_space<vmem>>, vector<32x512xf32>
      tpu.vector_store %arg7[%c0_11, %c0_12], %13 {strides = array<i32>} : memref<32x512xf32, #tpu.memory_space<vmem>>, vector<32x512xf32>,
    } else {
    }
    %c0 = arith.constant 0 : index
    %c0_1 = arith.constant 0 : index
    %3 = vector.load %arg7[%c0, %c0_1] : memref<32x512xf32, #tpu.memory_space<vmem>>, vector<32x512xf32>
    %c0_2 = arith.constant 0 : index
    %c0_3 = arith.constant 0 : index
    %4 = vector.load %arg3[%c0_2, %c0_3] : memref<32x128xf32, #tpu.memory_space<vmem>>, vector<32x128xf32>
    %5 = arith.truncf %4 : vector<32x128xf32> to vector<32x128xbf16>
    %c0_4 = arith.constant 0 : index
    %c0_5 = arith.constant 0 : index
    %6 = vector.load %arg4[%c0_4, %c0_5] : memref<128x512xbf16, #tpu.memory_space<vmem>>, vector<128x512xbf16>
    %cst = arith.constant dense<0.000000e+00> : vector<32x512xf32>
    %7 = tpu.matmul %5, %6, %cst {dimension_numbers = #tpu.dot_dimension_numbers<[1], [0], [0], [1], [0, 0, 1, 1], [], []>} : vector<32x128xbf16>, vector<128x512xbf16>, vector<32x512xf32> -> vector<32x512xf32>
    %8 = arith.addf %3, %7 : vector<32x512xf32>
    %c0_6 = arith.constant 0 : index
    %c0_7 = arith.constant 0 : index
    %9 = vector.load %arg7[%c0_6, %c0_7] : memref<32x512xf32, #tpu.memory_space<vmem>>, vector<32x512xf32>
    tpu.vector_store %arg7[%c0_6, %c0_7], %8 {strides = array<i32>} : memref<32x512xf32, #tpu.memory_space<vmem>>, vector<32x512xf32>,
    %c0_i32_8 = arith.constant 0 : i32
    %10 = arith.cmpi eq, %arg2, %c0_i32_8 : i32
    %11 = arith.extui %10 : i1 to i32
    %c0_i32_9 = arith.constant 0 : i32
    %12 = arith.cmpi ne, %11, %c0_i32_9 : i32
    scf.if %12 {
      %c0_10 = arith.constant 0 : index
      %c0_11 = arith.constant 0 : index
      %13 = vector.load %arg7[%c0_10, %c0_11] : memref<32x512xf32, #tpu.memory_space<vmem>>, vector<32x512xf32>
      %c0_12 = arith.constant 0 : index
      %c0_13 = arith.constant 0 : index
      %14 = vector.load %arg5[%c0_12, %c0_13] : memref<1x512xf32, #tpu.memory_space<vmem>>, vector<1x512xf32>
      %15 = vector.broadcast %14 : vector<1x512xf32> to vector<32x512xf32>
      %16 = arith.addf %13, %15 : vector<32x512xf32>
      %c0_14 = arith.constant 0 : index
      %c0_15 = arith.constant 0 : index
      %17 = vector.load %arg6[%c0_14, %c0_15] : memref<32x512xf32, #tpu.memory_space<vmem>>, vector<32x512xf32>
      tpu.vector_store %arg6[%c0_14, %c0_15], %16 {strides = array<i32>} : memref<32x512xf32, #tpu.memory_space<vmem>>, vector<32x512xf32>,
    } else {
    }
    return
  }
  func.func @transform_0(%arg0: i32, %arg1: i32, %arg2: i32) -> (i32, i32) {
    %c0_i32 = arith.constant 0 : i32
    return %arg0, %arg2 : i32, i32
  }
  func.func @transform_1(%arg0: i32, %arg1: i32, %arg2: i32) -> (i32, i32) {
    %c0_i32 = arith.constant 0 : i32
    return %arg2, %arg1 : i32, i32
  }
  func.func @transform_2(%arg0: i32, %arg1: i32, %arg2: i32) -> (i32, i32) {
    %c0_i32 = arith.constant 0 : i32
    %c0_i32_0 = arith.constant 0 : i32
    return %c0_i32, %arg1 : i32, i32
  }
  func.func @transform_3(%arg0: i32, %arg1: i32, %arg2: i32) -> (i32, i32) {
    %c0_i32 = arith.constant 0 : i32
    return %arg0, %arg1 : i32, i32
  }
}

module attributes {stable_mosaic.version = 11 : i64} {
  func.func @_enhance_proj_kernel(%arg0: i32, %arg1: memref<32x256xf32, #tpu.memory_space<vmem>>, %arg2: memref<32x256xf32, #tpu.memory_space<vmem>>, %arg3: memref<256x128xbf16, #tpu.memory_space<vmem>>, %arg4: memref<256x128xbf16, #tpu.memory_space<vmem>>, %arg5: memref<256x128xbf16, #tpu.memory_space<vmem>>, %arg6: memref<256x128xbf16, #tpu.memory_space<vmem>>, %arg7: memref<1x128xf32, #tpu.memory_space<vmem>>, %arg8: memref<32x128xf32, #tpu.memory_space<vmem>>) attributes {dimension_semantics = [#tpu.dimension_semantics<parallel>], iteration_bounds = array<i64: 1>, scalar_prefetch = 0 : i64, scratch_operands = 0 : i64, tpu.core_type = #tpu.core_type<tc>, window_params = [{transform_indices = @transform_0, window_bounds = array<i64: 32, 256>}, {transform_indices = @transform_1, window_bounds = array<i64: 32, 256>}, {pipeline_mode = #tpu.pipeline_mode<synchronous>, transform_indices = @transform_2, window_bounds = array<i64: 256, 128>}, {pipeline_mode = #tpu.pipeline_mode<synchronous>, transform_indices = @transform_3, window_bounds = array<i64: 256, 128>}, {pipeline_mode = #tpu.pipeline_mode<synchronous>, transform_indices = @transform_4, window_bounds = array<i64: 256, 128>}, {pipeline_mode = #tpu.pipeline_mode<synchronous>, transform_indices = @transform_5, window_bounds = array<i64: 256, 128>}, {pipeline_mode = #tpu.pipeline_mode<synchronous>, transform_indices = @transform_6, window_bounds = array<i64: 1, 128>}, {transform_indices = @transform_7, window_bounds = array<i64: 32, 128>}]} {
    %c0 = arith.constant 0 : index
    %c0_0 = arith.constant 0 : index
    %0 = vector.load %arg1[%c0, %c0_0] : memref<32x256xf32, #tpu.memory_space<vmem>>, vector<32x256xf32>
    %c0_1 = arith.constant 0 : index
    %c0_2 = arith.constant 0 : index
    %1 = vector.load %arg2[%c0_1, %c0_2] : memref<32x256xf32, #tpu.memory_space<vmem>>, vector<32x256xf32>
    %2 = arith.truncf %0 : vector<32x256xf32> to vector<32x256xbf16>
    %c0_3 = arith.constant 0 : index
    %c0_4 = arith.constant 0 : index
    %3 = vector.load %arg3[%c0_3, %c0_4] : memref<256x128xbf16, #tpu.memory_space<vmem>>, vector<256x128xbf16>
    %cst = arith.constant dense<0.000000e+00> : vector<32x128xf32>
    %4 = tpu.matmul %2, %3, %cst {dimension_numbers = #tpu.dot_dimension_numbers<[1], [0], [0], [1], [0, 0, 1, 1], [], []>} : vector<32x256xbf16>, vector<256x128xbf16>, vector<32x128xf32> -> vector<32x128xf32>
    %5 = arith.truncf %1 : vector<32x256xf32> to vector<32x256xbf16>
    %c0_5 = arith.constant 0 : index
    %c0_6 = arith.constant 0 : index
    %6 = vector.load %arg4[%c0_5, %c0_6] : memref<256x128xbf16, #tpu.memory_space<vmem>>, vector<256x128xbf16>
    %cst_7 = arith.constant dense<0.000000e+00> : vector<32x128xf32>
    %7 = tpu.matmul %5, %6, %cst_7 {dimension_numbers = #tpu.dot_dimension_numbers<[1], [0], [0], [1], [0, 0, 1, 1], [], []>} : vector<32x256xbf16>, vector<256x128xbf16>, vector<32x128xf32> -> vector<32x128xf32>
    %8 = arith.addf %4, %7 : vector<32x128xf32>
    %9 = arith.subf %0, %1 : vector<32x256xf32>
    %10 = arith.truncf %9 : vector<32x256xf32> to vector<32x256xbf16>
    %c0_8 = arith.constant 0 : index
    %c0_9 = arith.constant 0 : index
    %11 = vector.load %arg5[%c0_8, %c0_9] : memref<256x128xbf16, #tpu.memory_space<vmem>>, vector<256x128xbf16>
    %cst_10 = arith.constant dense<0.000000e+00> : vector<32x128xf32>
    %12 = tpu.matmul %10, %11, %cst_10 {dimension_numbers = #tpu.dot_dimension_numbers<[1], [0], [0], [1], [0, 0, 1, 1], [], []>} : vector<32x256xbf16>, vector<256x128xbf16>, vector<32x128xf32> -> vector<32x128xf32>
    %13 = arith.addf %8, %12 : vector<32x128xf32>
    %14 = arith.mulf %0, %1 : vector<32x256xf32>
    %15 = arith.truncf %14 : vector<32x256xf32> to vector<32x256xbf16>
    %c0_11 = arith.constant 0 : index
    %c0_12 = arith.constant 0 : index
    %16 = vector.load %arg6[%c0_11, %c0_12] : memref<256x128xbf16, #tpu.memory_space<vmem>>, vector<256x128xbf16>
    %cst_13 = arith.constant dense<0.000000e+00> : vector<32x128xf32>
    %17 = tpu.matmul %15, %16, %cst_13 {dimension_numbers = #tpu.dot_dimension_numbers<[1], [0], [0], [1], [0, 0, 1, 1], [], []>} : vector<32x256xbf16>, vector<256x128xbf16>, vector<32x128xf32> -> vector<32x128xf32>
    %18 = arith.addf %13, %17 : vector<32x128xf32>
    %c0_14 = arith.constant 0 : index
    %c0_15 = arith.constant 0 : index
    %19 = vector.load %arg7[%c0_14, %c0_15] : memref<1x128xf32, #tpu.memory_space<vmem>>, vector<1x128xf32>
    %20 = vector.broadcast %19 : vector<1x128xf32> to vector<32x128xf32>
    %21 = arith.addf %18, %20 : vector<32x128xf32>
    %cst_16 = arith.constant 0.000000e+00 : f32
    %22 = vector.broadcast %cst_16 : f32 to vector<32x128xf32>
    %23 = arith.maximumf %21, %22 : vector<32x128xf32>
    %c0_17 = arith.constant 0 : index
    %c0_18 = arith.constant 0 : index
    %24 = vector.load %arg8[%c0_17, %c0_18] : memref<32x128xf32, #tpu.memory_space<vmem>>, vector<32x128xf32>
    tpu.vector_store %arg8[%c0_17, %c0_18], %23 {strides = array<i32>} : memref<32x128xf32, #tpu.memory_space<vmem>>, vector<32x128xf32>,
    return
  }
  func.func @transform_0(%arg0: i32) -> (i32, i32) {
    %c0_i32 = arith.constant 0 : i32
    %c0_i32_0 = arith.constant 0 : i32
    return %arg0, %c0_i32 : i32, i32
  }
  func.func @transform_1(%arg0: i32) -> (i32, i32) {
    %c0_i32 = arith.constant 0 : i32
    %c0_i32_0 = arith.constant 0 : i32
    return %arg0, %c0_i32 : i32, i32
  }
  func.func @transform_2(%arg0: i32) -> (i32, i32) {
    %c0_i32 = arith.constant 0 : i32
    %c0_i32_0 = arith.constant 0 : i32
    %c0_i32_1 = arith.constant 0 : i32
    return %c0_i32, %c0_i32_0 : i32, i32
  }
  func.func @transform_3(%arg0: i32) -> (i32, i32) {
    %c0_i32 = arith.constant 0 : i32
    %c0_i32_0 = arith.constant 0 : i32
    %c0_i32_1 = arith.constant 0 : i32
    return %c0_i32, %c0_i32_0 : i32, i32
  }
  func.func @transform_4(%arg0: i32) -> (i32, i32) {
    %c0_i32 = arith.constant 0 : i32
    %c0_i32_0 = arith.constant 0 : i32
    %c0_i32_1 = arith.constant 0 : i32
    return %c0_i32, %c0_i32_0 : i32, i32
  }
  func.func @transform_5(%arg0: i32) -> (i32, i32) {
    %c0_i32 = arith.constant 0 : i32
    %c0_i32_0 = arith.constant 0 : i32
    %c0_i32_1 = arith.constant 0 : i32
    return %c0_i32, %c0_i32_0 : i32, i32
  }
  func.func @transform_6(%arg0: i32) -> (i32, i32) {
    %c0_i32 = arith.constant 0 : i32
    %c0_i32_0 = arith.constant 0 : i32
    %c0_i32_1 = arith.constant 0 : i32
    return %c0_i32, %c0_i32_0 : i32, i32
  }
  func.func @transform_7(%arg0: i32) -> (i32, i32) {
    %c0_i32 = arith.constant 0 : i32
    %c0_i32_0 = arith.constant 0 : i32
    return %arg0, %c0_i32 : i32, i32
  }
}

module attributes {stable_mosaic.version = 11 : i64} {
  func.func @_attention_kernel(%arg0: i32, %arg1: memref<2x8x256xf32, #tpu.memory_space<vmem>>, %arg2: memref<2x8x256xf32, #tpu.memory_space<vmem>>, %arg3: memref<2x8x1xf32, #tpu.memory_space<vmem>>, %arg4: memref<2x1x8xf32, #tpu.memory_space<vmem>>, %arg5: memref<2x8x1xf32, #tpu.memory_space<vmem>>, %arg6: memref<2x8x256xf32, #tpu.memory_space<vmem>>, %arg7: memref<2x8x256xf32, #tpu.memory_space<vmem>>) attributes {dimension_semantics = [#tpu.dimension_semantics<parallel>], iteration_bounds = array<i64: 1>, scalar_prefetch = 0 : i64, scratch_operands = 0 : i64, tpu.core_type = #tpu.core_type<tc>, window_params = [{transform_indices = @transform_0, window_bounds = array<i64: 2, 8, 256>}, {transform_indices = @transform_1, window_bounds = array<i64: 2, 8, 256>}, {transform_indices = @transform_2, window_bounds = array<i64: 2, 8, 1>}, {transform_indices = @transform_3, window_bounds = array<i64: 2, 1, 8>}, {transform_indices = @transform_4, window_bounds = array<i64: 2, 8, 1>}, {transform_indices = @transform_5, window_bounds = array<i64: 2, 8, 256>}, {transform_indices = @transform_6, window_bounds = array<i64: 2, 8, 256>}]} {
    %c0 = arith.constant 0 : index
    %c0_0 = arith.constant 0 : index
    %c0_1 = arith.constant 0 : index
    %0 = vector.load %arg1[%c0, %c0_0, %c0_1] : memref<2x8x256xf32, #tpu.memory_space<vmem>>, vector<2x8x256xf32>
    %1 = arith.truncf %0 : vector<2x8x256xf32> to vector<2x8x256xbf16>
    %c0_2 = arith.constant 0 : index
    %c0_3 = arith.constant 0 : index
    %c0_4 = arith.constant 0 : index
    %2 = vector.load %arg2[%c0_2, %c0_3, %c0_4] : memref<2x8x256xf32, #tpu.memory_space<vmem>>, vector<2x8x256xf32>
    %3 = arith.truncf %2 : vector<2x8x256xf32> to vector<2x8x256xbf16>
    %c0_5 = arith.constant 0 : index
    %c0_6 = arith.constant 0 : index
    %c0_7 = arith.constant 0 : index
    %4 = vector.load %arg3[%c0_5, %c0_6, %c0_7] : memref<2x8x1xf32, #tpu.memory_space<vmem>>, vector<2x8x1xf32>
    %c0_8 = arith.constant 0 : index
    %c0_9 = arith.constant 0 : index
    %c0_10 = arith.constant 0 : index
    %5 = vector.load %arg4[%c0_8, %c0_9, %c0_10] : memref<2x1x8xf32, #tpu.memory_space<vmem>>, vector<2x1x8xf32>
    %c0_11 = arith.constant 0 : index
    %c0_12 = arith.constant 0 : index
    %c0_13 = arith.constant 0 : index
    %6 = vector.load %arg5[%c0_11, %c0_12, %c0_13] : memref<2x8x1xf32, #tpu.memory_space<vmem>>, vector<2x8x1xf32>
    "tpu.trace_start"() <{level = 10 : i32, message = "bpd,bhd->bph"}> : () -> ()
    %cst = arith.constant dense<0.000000e+00> : vector<2x8x8xf32>
    %7 = tpu.matmul %1, %3, %cst {dimension_numbers = #tpu.dot_dimension_numbers<[2], [2], [1], [1], [0, 0, 0, 1, 1, 1], [0], [0]>} : vector<2x8x256xbf16>, vector<2x8x256xbf16>, vector<2x8x8xf32> -> vector<2x8x8xf32>
    "tpu.trace_stop"() : () -> ()
    %8 = vector.broadcast %5 : vector<2x1x8xf32> to vector<2x8x8xf32>
    %9 = arith.mulf %7, %8 : vector<2x8x8xf32>
    %cst_14 = arith.constant dense<0xFF800000> : vector<2x8xf32>
    %10 = vector.multi_reduction <maximumf>, %9, %cst_14 [2] : vector<2x8x8xf32> to vector<2x8xf32>
    %11 = vector.shape_cast %10 : vector<2x8xf32> to vector<2x8x1xf32>
    %12 = vector.broadcast %11 : vector<2x8x1xf32> to vector<2x8x8xf32>
    %13 = arith.subf %9, %12 : vector<2x8x8xf32>
    %14 = math.exp %13 : vector<2x8x8xf32>
    %cst_15 = arith.constant dense<0.000000e+00> : vector<2x8xf32>
    %15 = vector.multi_reduction <add>, %14, %cst_15 [2] : vector<2x8x8xf32> to vector<2x8xf32>
    %16 = vector.shape_cast %15 : vector<2x8xf32> to vector<2x8x1xf32>
    %17 = vector.broadcast %16 : vector<2x8x1xf32> to vector<2x8x8xf32>
    %18 = arith.divf %14, %17 : vector<2x8x8xf32>
    %19 = vector.broadcast %5 : vector<2x1x8xf32> to vector<2x8x8xf32>
    %20 = arith.mulf %18, %19 : vector<2x8x8xf32>
    %cst_16 = arith.constant dense<0.000000e+00> : vector<2x8xf32>
    %21 = vector.multi_reduction <add>, %20, %cst_16 [2] : vector<2x8x8xf32> to vector<2x8xf32>
    %22 = vector.shape_cast %21 : vector<2x8xf32> to vector<2x8x1xf32>
    %cst_17 = arith.constant 9.99999982E-14 : f32
    %23 = vector.broadcast %cst_17 : f32 to vector<2x8x1xf32>
    %24 = arith.addf %22, %23 : vector<2x8x1xf32>
    %25 = vector.broadcast %24 : vector<2x8x1xf32> to vector<2x8x8xf32>
    %26 = arith.divf %20, %25 : vector<2x8x8xf32>
    %27 = vector.broadcast %4 : vector<2x8x1xf32> to vector<2x8x8xf32>
    %28 = arith.mulf %7, %27 : vector<2x8x8xf32>
    %cst_18 = arith.constant dense<0xFF800000> : vector<2x8xf32>
    %29 = vector.multi_reduction <maximumf>, %28, %cst_18 [1] : vector<2x8x8xf32> to vector<2x8xf32>
    %30 = vector.shape_cast %29 : vector<2x8xf32> to vector<2x1x8xf32>
    %31 = vector.broadcast %30 : vector<2x1x8xf32> to vector<2x8x8xf32>
    %32 = arith.subf %28, %31 : vector<2x8x8xf32>
    %33 = math.exp %32 : vector<2x8x8xf32>
    %cst_19 = arith.constant dense<0.000000e+00> : vector<2x8xf32>
    %34 = vector.multi_reduction <add>, %33, %cst_19 [1] : vector<2x8x8xf32> to vector<2x8xf32>
    %35 = vector.shape_cast %34 : vector<2x8xf32> to vector<2x1x8xf32>
    %36 = vector.broadcast %35 : vector<2x1x8xf32> to vector<2x8x8xf32>
    %37 = arith.divf %33, %36 : vector<2x8x8xf32>
    %38 = vector.broadcast %4 : vector<2x8x1xf32> to vector<2x8x8xf32>
    %39 = arith.mulf %37, %38 : vector<2x8x8xf32>
    %cst_20 = arith.constant dense<0.000000e+00> : vector<2x8xf32>
    %40 = vector.multi_reduction <add>, %39, %cst_20 [1] : vector<2x8x8xf32> to vector<2x8xf32>
    %41 = vector.shape_cast %40 : vector<2x8xf32> to vector<2x1x8xf32>
    %cst_21 = arith.constant 9.99999982E-14 : f32
    %42 = vector.broadcast %cst_21 : f32 to vector<2x1x8xf32>
    %43 = arith.addf %41, %42 : vector<2x1x8xf32>
    %44 = vector.broadcast %43 : vector<2x1x8xf32> to vector<2x8x8xf32>
    %45 = arith.divf %39, %44 : vector<2x8x8xf32>
    %46 = arith.truncf %26 : vector<2x8x8xf32> to vector<2x8x8xbf16>
    "tpu.trace_start"() <{level = 10 : i32, message = "bph,bhd->bpd"}> : () -> ()
    %cst_22 = arith.constant dense<0.000000e+00> : vector<2x8x256xf32>
    %47 = tpu.matmul %46, %3, %cst_22 {dimension_numbers = #tpu.dot_dimension_numbers<[2], [1], [1], [2], [0, 0, 0, 1, 1, 2], [0], [0]>} : vector<2x8x8xbf16>, vector<2x8x256xbf16>, vector<2x8x256xf32> -> vector<2x8x256xf32>
    "tpu.trace_stop"() : () -> ()
    %48 = vector.broadcast %4 : vector<2x8x1xf32> to vector<2x8x256xf32>
    %49 = arith.mulf %47, %48 : vector<2x8x256xf32>
    %50 = arith.truncf %45 : vector<2x8x8xf32> to vector<2x8x8xbf16>
    "tpu.trace_start"() <{level = 10 : i32, message = "bph,bpd->bhd"}> : () -> ()
    %cst_23 = arith.constant dense<0.000000e+00> : vector<2x8x256xf32>
    %51 = tpu.matmul %50, %1, %cst_23 {dimension_numbers = #tpu.dot_dimension_numbers<[1], [1], [2], [2], [0, 0, 0, 2, 1, 2], [0], [0]>} : vector<2x8x8xbf16>, vector<2x8x256xbf16>, vector<2x8x256xf32> -> vector<2x8x256xf32>
    "tpu.trace_stop"() : () -> ()
    %52 = vector.broadcast %6 : vector<2x8x1xf32> to vector<2x8x256xf32>
    %53 = arith.mulf %51, %52 : vector<2x8x256xf32>
    %c0_24 = arith.constant 0 : index
    %c0_25 = arith.constant 0 : index
    %c0_26 = arith.constant 0 : index
    %54 = vector.load %arg6[%c0_24, %c0_25, %c0_26] : memref<2x8x256xf32, #tpu.memory_space<vmem>>, vector<2x8x256xf32>
    tpu.vector_store %arg6[%c0_24, %c0_25, %c0_26], %49 {strides = array<i32>} : memref<2x8x256xf32, #tpu.memory_space<vmem>>, vector<2x8x256xf32>,
    %c0_27 = arith.constant 0 : index
    %c0_28 = arith.constant 0 : index
    %c0_29 = arith.constant 0 : index
    %55 = vector.load %arg7[%c0_27, %c0_28, %c0_29] : memref<2x8x256xf32, #tpu.memory_space<vmem>>, vector<2x8x256xf32>
    tpu.vector_store %arg7[%c0_27, %c0_28, %c0_29], %53 {strides = array<i32>} : memref<2x8x256xf32, #tpu.memory_space<vmem>>, vector<2x8x256xf32>,
    return
  }
  func.func @transform_0(%arg0: i32) -> (i32, i32, i32) {
    %c0_i32 = arith.constant 0 : i32
    %c0_i32_0 = arith.constant 0 : i32
    %c0_i32_1 = arith.constant 0 : i32
    return %arg0, %c0_i32, %c0_i32_0 : i32, i32, i32
  }
  func.func @transform_1(%arg0: i32) -> (i32, i32, i32) {
    %c0_i32 = arith.constant 0 : i32
    %c0_i32_0 = arith.constant 0 : i32
    %c0_i32_1 = arith.constant 0 : i32
    return %arg0, %c0_i32, %c0_i32_0 : i32, i32, i32
  }
  func.func @transform_2(%arg0: i32) -> (i32, i32, i32) {
    %c0_i32 = arith.constant 0 : i32
    %c0_i32_0 = arith.constant 0 : i32
    %c0_i32_1 = arith.constant 0 : i32
    return %arg0, %c0_i32, %c0_i32_0 : i32, i32, i32
  }
  func.func @transform_3(%arg0: i32) -> (i32, i32, i32) {
    %c0_i32 = arith.constant 0 : i32
    %c0_i32_0 = arith.constant 0 : i32
    %c0_i32_1 = arith.constant 0 : i32
    return %arg0, %c0_i32, %c0_i32_0 : i32, i32, i32
  }
  func.func @transform_4(%arg0: i32) -> (i32, i32, i32) {
    %c0_i32 = arith.constant 0 : i32
    %c0_i32_0 = arith.constant 0 : i32
    %c0_i32_1 = arith.constant 0 : i32
    return %arg0, %c0_i32, %c0_i32_0 : i32, i32, i32
  }
  func.func @transform_5(%arg0: i32) -> (i32, i32, i32) {
    %c0_i32 = arith.constant 0 : i32
    %c0_i32_0 = arith.constant 0 : i32
    %c0_i32_1 = arith.constant 0 : i32
    return %arg0, %c0_i32, %c0_i32_0 : i32, i32, i32
  }
  func.func @transform_6(%arg0: i32) -> (i32, i32, i32) {
    %c0_i32 = arith.constant 0 : i32
    %c0_i32_0 = arith.constant 0 : i32
    %c0_i32_1 = arith.constant 0 : i32
    return %arg0, %c0_i32, %c0_i32_0 : i32, i32, i32
  }
}

module attributes {stable_mosaic.version = 11 : i64} {
  func.func @_bilstm_kernel(%arg0: i32, %arg1: i32, %arg2: memref<2x8x512xf32, #tpu.memory_space<vmem>>, %arg3: memref<2x8x512xf32, #tpu.memory_space<vmem>>, %arg4: memref<2x8x1xf32, #tpu.memory_space<vmem>>, %arg5: memref<2x8x1xf32, #tpu.memory_space<vmem>>, %arg6: memref<128x512xbf16, #tpu.memory_space<vmem>>, %arg7: memref<128x512xbf16, #tpu.memory_space<vmem>>, %arg8: memref<2x8x128xf32, #tpu.memory_space<vmem>>, %arg9: memref<2x8x128xf32, #tpu.memory_space<vmem>>, %arg10: memref<2x128xf32, #tpu.memory_space<vmem>>, %arg11: memref<2x128xf32, #tpu.memory_space<vmem>>, %arg12: memref<2x128xf32, #tpu.memory_space<vmem>>, %arg13: memref<2x128xf32, #tpu.memory_space<vmem>>) attributes {dimension_semantics = [#tpu.dimension_semantics<parallel>, #tpu.dimension_semantics<arbitrary>], iteration_bounds = array<i64: 1, 1>, scalar_prefetch = 0 : i64, scratch_operands = 4 : i64, tpu.core_type = #tpu.core_type<tc>, window_params = [{transform_indices = @transform_0, window_bounds = array<i64: 2, 8, 512>}, {transform_indices = @transform_1, window_bounds = array<i64: 2, 8, 512>}, {transform_indices = @transform_2, window_bounds = array<i64: 2, 8, 1>}, {transform_indices = @transform_3, window_bounds = array<i64: 2, 8, 1>}, {pipeline_mode = #tpu.pipeline_mode<synchronous>, transform_indices = @transform_4, window_bounds = array<i64: 128, 512>}, {pipeline_mode = #tpu.pipeline_mode<synchronous>, transform_indices = @transform_5, window_bounds = array<i64: 128, 512>}, {transform_indices = @transform_6, window_bounds = array<i64: 2, 8, 128>}, {transform_indices = @transform_7, window_bounds = array<i64: 2, 8, 128>}]} {
    %c0_i32 = arith.constant 0 : i32
    %0 = arith.cmpi eq, %arg1, %c0_i32 : i32
    %1 = arith.extui %0 : i1 to i32
    %c0_i32_0 = arith.constant 0 : i32
    %2 = arith.cmpi ne, %1, %c0_i32_0 : i32
    scf.if %2 {
      %cst_364 = arith.constant 0.000000e+00 : f32
      %885 = vector.broadcast %cst_364 : f32 to vector<2x128xf32>
      %c0_365 = arith.constant 0 : index
      %c0_366 = arith.constant 0 : index
      %886 = vector.load %arg10[%c0_365, %c0_366] : memref<2x128xf32, #tpu.memory_space<vmem>>, vector<2x128xf32>
      tpu.vector_store %arg10[%c0_365, %c0_366], %885 {strides = array<i32>} : memref<2x128xf32, #tpu.memory_space<vmem>>, vector<2x128xf32>,
      %cst_367 = arith.constant 0.000000e+00 : f32
      %887 = vector.broadcast %cst_367 : f32 to vector<2x128xf32>
      %c0_368 = arith.constant 0 : index
      %c0_369 = arith.constant 0 : index
      %888 = vector.load %arg11[%c0_368, %c0_369] : memref<2x128xf32, #tpu.memory_space<vmem>>, vector<2x128xf32>
      tpu.vector_store %arg11[%c0_368, %c0_369], %887 {strides = array<i32>} : memref<2x128xf32, #tpu.memory_space<vmem>>, vector<2x128xf32>,
      %cst_370 = arith.constant 0.000000e+00 : f32
      %889 = vector.broadcast %cst_370 : f32 to vector<2x128xf32>
      %c0_371 = arith.constant 0 : index
      %c0_372 = arith.constant 0 : index
      %890 = vector.load %arg12[%c0_371, %c0_372] : memref<2x128xf32, #tpu.memory_space<vmem>>, vector<2x128xf32>
      tpu.vector_store %arg12[%c0_371, %c0_372], %889 {strides = array<i32>} : memref<2x128xf32, #tpu.memory_space<vmem>>, vector<2x128xf32>,
      %cst_373 = arith.constant 0.000000e+00 : f32
      %891 = vector.broadcast %cst_373 : f32 to vector<2x128xf32>
      %c0_374 = arith.constant 0 : index
      %c0_375 = arith.constant 0 : index
      %892 = vector.load %arg13[%c0_374, %c0_375] : memref<2x128xf32, #tpu.memory_space<vmem>>, vector<2x128xf32>
      tpu.vector_store %arg13[%c0_374, %c0_375], %891 {strides = array<i32>} : memref<2x128xf32, #tpu.memory_space<vmem>>, vector<2x128xf32>,
    } else {
    }
    %c0 = arith.constant 0 : index
    %c0_1 = arith.constant 0 : index
    %3 = vector.load %arg6[%c0, %c0_1] : memref<128x512xbf16, #tpu.memory_space<vmem>>, vector<128x512xbf16>
    %c0_2 = arith.constant 0 : index
    %c0_3 = arith.constant 0 : index
    %4 = vector.load %arg7[%c0_2, %c0_3] : memref<128x512xbf16, #tpu.memory_space<vmem>>, vector<128x512xbf16>
    %c0_4 = arith.constant 0 : index
    %c0_5 = arith.constant 0 : index
    %c0_6 = arith.constant 0 : index
    %5 = vector.load %arg2[%c0_4, %c0_5, %c0_6] : memref<2x8x512xf32, #tpu.memory_space<vmem>>, vector<2x1x512xf32>
    %6 = vector.shape_cast %5 : vector<2x1x512xf32> to vector<2x512xf32>
    %c0_7 = arith.constant 0 : index
    %c0_8 = arith.constant 0 : index
    %c0_9 = arith.constant 0 : index
    %7 = vector.load %arg4[%c0_7, %c0_8, %c0_9] : memref<2x8x1xf32, #tpu.memory_space<vmem>>, vector<2x1x1xf32>
    %8 = vector.shape_cast %7 : vector<2x1x1xf32> to vector<2x1xf32>
    %c0_10 = arith.constant 0 : index
    %c0_11 = arith.constant 0 : index
    %9 = vector.load %arg10[%c0_10, %c0_11] : memref<2x128xf32, #tpu.memory_space<vmem>>, vector<2x128xf32>
    %c0_12 = arith.constant 0 : index
    %c0_13 = arith.constant 0 : index
    %10 = vector.load %arg11[%c0_12, %c0_13] : memref<2x128xf32, #tpu.memory_space<vmem>>, vector<2x128xf32>
    %11 = arith.truncf %9 : vector<2x128xf32> to vector<2x128xbf16>
    %cst = arith.constant dense<0.000000e+00> : vector<2x512xf32>
    %12 = tpu.matmul %11, %3, %cst {dimension_numbers = #tpu.dot_dimension_numbers<[1], [0], [0], [1], [0, 0, 1, 1], [], []>} : vector<2x128xbf16>, vector<128x512xbf16>, vector<2x512xf32> -> vector<2x512xf32>
    %13 = arith.addf %6, %12 : vector<2x512xf32>
    %14 = vector.extract_strided_slice %13 {offsets = [0, 0], sizes = [2, 128], strides = [1, 1]} : vector<2x512xf32> to vector<2x128xf32>
    %15 = arith.negf %14 : vector<2x128xf32>
    %16 = math.exp %15 : vector<2x128xf32>
    %cst_14 = arith.constant 1.000000e+00 : f32
    %17 = vector.broadcast %cst_14 : f32 to vector<2x128xf32>
    %18 = arith.addf %17, %16 : vector<2x128xf32>
    %19 = arith.divf %17, %18 : vector<2x128xf32>
    %20 = vector.extract_strided_slice %13 {offsets = [0, 128], sizes = [2, 128], strides = [1, 1]} : vector<2x512xf32> to vector<2x128xf32>
    %21 = arith.negf %20 : vector<2x128xf32>
    %22 = math.exp %21 : vector<2x128xf32>
    %cst_15 = arith.constant 1.000000e+00 : f32
    %23 = vector.broadcast %cst_15 : f32 to vector<2x128xf32>
    %24 = arith.addf %23, %22 : vector<2x128xf32>
    %25 = arith.divf %23, %24 : vector<2x128xf32>
    %26 = vector.extract_strided_slice %13 {offsets = [0, 256], sizes = [2, 128], strides = [1, 1]} : vector<2x512xf32> to vector<2x128xf32>
    %27 = math.tanh %26 : vector<2x128xf32>
    %28 = vector.extract_strided_slice %13 {offsets = [0, 384], sizes = [2, 128], strides = [1, 1]} : vector<2x512xf32> to vector<2x128xf32>
    %29 = arith.negf %28 : vector<2x128xf32>
    %30 = math.exp %29 : vector<2x128xf32>
    %cst_16 = arith.constant 1.000000e+00 : f32
    %31 = vector.broadcast %cst_16 : f32 to vector<2x128xf32>
    %32 = arith.addf %31, %30 : vector<2x128xf32>
    %33 = arith.divf %31, %32 : vector<2x128xf32>
    %34 = arith.mulf %25, %10 : vector<2x128xf32>
    %35 = arith.mulf %19, %27 : vector<2x128xf32>
    %36 = arith.addf %34, %35 : vector<2x128xf32>
    %37 = math.tanh %36 : vector<2x128xf32>
    %38 = arith.mulf %33, %37 : vector<2x128xf32>
    %39 = vector.broadcast %8 : vector<2x1xf32> to vector<2x128xf32>
    %40 = arith.mulf %39, %36 : vector<2x128xf32>
    %cst_17 = arith.constant 1.000000e+00 : f32
    %41 = vector.broadcast %cst_17 : f32 to vector<2x1xf32>
    %42 = arith.subf %41, %8 : vector<2x1xf32>
    %43 = vector.broadcast %42 : vector<2x1xf32> to vector<2x128xf32>
    %44 = arith.mulf %43, %10 : vector<2x128xf32>
    %45 = arith.addf %40, %44 : vector<2x128xf32>
    %c0_18 = arith.constant 0 : index
    %c0_19 = arith.constant 0 : index
    %46 = vector.load %arg11[%c0_18, %c0_19] : memref<2x128xf32, #tpu.memory_space<vmem>>, vector<2x128xf32>
    tpu.vector_store %arg11[%c0_18, %c0_19], %45 {strides = array<i32>} : memref<2x128xf32, #tpu.memory_space<vmem>>, vector<2x128xf32>,
    %47 = vector.broadcast %8 : vector<2x1xf32> to vector<2x128xf32>
    %48 = arith.mulf %47, %38 : vector<2x128xf32>
    %cst_20 = arith.constant 1.000000e+00 : f32
    %49 = vector.broadcast %cst_20 : f32 to vector<2x1xf32>
    %50 = arith.subf %49, %8 : vector<2x1xf32>
    %51 = vector.broadcast %50 : vector<2x1xf32> to vector<2x128xf32>
    %52 = arith.mulf %51, %9 : vector<2x128xf32>
    %53 = arith.addf %48, %52 : vector<2x128xf32>
    %c0_21 = arith.constant 0 : index
    %c0_22 = arith.constant 0 : index
    %54 = vector.load %arg10[%c0_21, %c0_22] : memref<2x128xf32, #tpu.memory_space<vmem>>, vector<2x128xf32>
    tpu.vector_store %arg10[%c0_21, %c0_22], %53 {strides = array<i32>} : memref<2x128xf32, #tpu.memory_space<vmem>>, vector<2x128xf32>,
    %55 = vector.broadcast %8 : vector<2x1xf32> to vector<2x128xf32>
    %56 = arith.mulf %55, %38 : vector<2x128xf32>
    %c0_23 = arith.constant 0 : index
    %c0_24 = arith.constant 0 : index
    %c0_25 = arith.constant 0 : index
    %57 = vector.load %arg8[%c0_23, %c0_24, %c0_25] : memref<2x8x128xf32, #tpu.memory_space<vmem>>, vector<2x1x128xf32>
    %58 = vector.shape_cast %57 : vector<2x1x128xf32> to vector<2x128xf32>
    %59 = vector.shape_cast %56 : vector<2x128xf32> to vector<2x1x128xf32>
    tpu.vector_store %arg8[%c0_23, %c0_24, %c0_25], %59 {strides = array<i32>} : memref<2x8x128xf32, #tpu.memory_space<vmem>>, vector<2x1x128xf32>,
    %c0_26 = arith.constant 0 : index
    %c7 = arith.constant 7 : index
    %c0_27 = arith.constant 0 : index
    %60 = vector.load %arg3[%c0_26, %c7, %c0_27] : memref<2x8x512xf32, #tpu.memory_space<vmem>>, vector<2x1x512xf32>
    %61 = vector.shape_cast %60 : vector<2x1x512xf32> to vector<2x512xf32>
    %c0_28 = arith.constant 0 : index
    %c7_29 = arith.constant 7 : index
    %c0_30 = arith.constant 0 : index
    %62 = vector.load %arg5[%c0_28, %c7_29, %c0_30] : memref<2x8x1xf32, #tpu.memory_space<vmem>>, vector<2x1x1xf32>
    %63 = vector.shape_cast %62 : vector<2x1x1xf32> to vector<2x1xf32>
    %c0_31 = arith.constant 0 : index
    %c0_32 = arith.constant 0 : index
    %64 = vector.load %arg12[%c0_31, %c0_32] : memref<2x128xf32, #tpu.memory_space<vmem>>, vector<2x128xf32>
    %c0_33 = arith.constant 0 : index
    %c0_34 = arith.constant 0 : index
    %65 = vector.load %arg13[%c0_33, %c0_34] : memref<2x128xf32, #tpu.memory_space<vmem>>, vector<2x128xf32>
    %66 = arith.truncf %64 : vector<2x128xf32> to vector<2x128xbf16>
    %cst_35 = arith.constant dense<0.000000e+00> : vector<2x512xf32>
    %67 = tpu.matmul %66, %4, %cst_35 {dimension_numbers = #tpu.dot_dimension_numbers<[1], [0], [0], [1], [0, 0, 1, 1], [], []>} : vector<2x128xbf16>, vector<128x512xbf16>, vector<2x512xf32> -> vector<2x512xf32>
    %68 = arith.addf %61, %67 : vector<2x512xf32>
    %69 = vector.extract_strided_slice %68 {offsets = [0, 0], sizes = [2, 128], strides = [1, 1]} : vector<2x512xf32> to vector<2x128xf32>
    %70 = arith.negf %69 : vector<2x128xf32>
    %71 = math.exp %70 : vector<2x128xf32>
    %cst_36 = arith.constant 1.000000e+00 : f32
    %72 = vector.broadcast %cst_36 : f32 to vector<2x128xf32>
    %73 = arith.addf %72, %71 : vector<2x128xf32>
    %74 = arith.divf %72, %73 : vector<2x128xf32>
    %75 = vector.extract_strided_slice %68 {offsets = [0, 128], sizes = [2, 128], strides = [1, 1]} : vector<2x512xf32> to vector<2x128xf32>
    %76 = arith.negf %75 : vector<2x128xf32>
    %77 = math.exp %76 : vector<2x128xf32>
    %cst_37 = arith.constant 1.000000e+00 : f32
    %78 = vector.broadcast %cst_37 : f32 to vector<2x128xf32>
    %79 = arith.addf %78, %77 : vector<2x128xf32>
    %80 = arith.divf %78, %79 : vector<2x128xf32>
    %81 = vector.extract_strided_slice %68 {offsets = [0, 256], sizes = [2, 128], strides = [1, 1]} : vector<2x512xf32> to vector<2x128xf32>
    %82 = math.tanh %81 : vector<2x128xf32>
    %83 = vector.extract_strided_slice %68 {offsets = [0, 384], sizes = [2, 128], strides = [1, 1]} : vector<2x512xf32> to vector<2x128xf32>
    %84 = arith.negf %83 : vector<2x128xf32>
    %85 = math.exp %84 : vector<2x128xf32>
    %cst_38 = arith.constant 1.000000e+00 : f32
    %86 = vector.broadcast %cst_38 : f32 to vector<2x128xf32>
    %87 = arith.addf %86, %85 : vector<2x128xf32>
    %88 = arith.divf %86, %87 : vector<2x128xf32>
    %89 = arith.mulf %80, %65 : vector<2x128xf32>
    %90 = arith.mulf %74, %82 : vector<2x128xf32>
    %91 = arith.addf %89, %90 : vector<2x128xf32>
    %92 = math.tanh %91 : vector<2x128xf32>
    %93 = arith.mulf %88, %92 : vector<2x128xf32>
    %94 = vector.broadcast %63 : vector<2x1xf32> to vector<2x128xf32>
    %95 = arith.mulf %94, %91 : vector<2x128xf32>
    %cst_39 = arith.constant 1.000000e+00 : f32
    %96 = vector.broadcast %cst_39 : f32 to vector<2x1xf32>
    %97 = arith.subf %96, %63 : vector<2x1xf32>
    %98 = vector.broadcast %97 : vector<2x1xf32> to vector<2x128xf32>
    %99 = arith.mulf %98, %65 : vector<2x128xf32>
    %100 = arith.addf %95, %99 : vector<2x128xf32>
    %c0_40 = arith.constant 0 : index
    %c0_41 = arith.constant 0 : index
    %101 = vector.load %arg13[%c0_40, %c0_41] : memref<2x128xf32, #tpu.memory_space<vmem>>, vector<2x128xf32>
    tpu.vector_store %arg13[%c0_40, %c0_41], %100 {strides = array<i32>} : memref<2x128xf32, #tpu.memory_space<vmem>>, vector<2x128xf32>,
    %102 = vector.broadcast %63 : vector<2x1xf32> to vector<2x128xf32>
    %103 = arith.mulf %102, %93 : vector<2x128xf32>
    %cst_42 = arith.constant 1.000000e+00 : f32
    %104 = vector.broadcast %cst_42 : f32 to vector<2x1xf32>
    %105 = arith.subf %104, %63 : vector<2x1xf32>
    %106 = vector.broadcast %105 : vector<2x1xf32> to vector<2x128xf32>
    %107 = arith.mulf %106, %64 : vector<2x128xf32>
    %108 = arith.addf %103, %107 : vector<2x128xf32>
    %c0_43 = arith.constant 0 : index
    %c0_44 = arith.constant 0 : index
    %109 = vector.load %arg12[%c0_43, %c0_44] : memref<2x128xf32, #tpu.memory_space<vmem>>, vector<2x128xf32>
    tpu.vector_store %arg12[%c0_43, %c0_44], %108 {strides = array<i32>} : memref<2x128xf32, #tpu.memory_space<vmem>>, vector<2x128xf32>,
    %110 = vector.broadcast %63 : vector<2x1xf32> to vector<2x128xf32>
    %111 = arith.mulf %110, %93 : vector<2x128xf32>
    %c0_45 = arith.constant 0 : index
    %c7_46 = arith.constant 7 : index
    %c0_47 = arith.constant 0 : index
    %112 = vector.load %arg9[%c0_45, %c7_46, %c0_47] : memref<2x8x128xf32, #tpu.memory_space<vmem>>, vector<2x1x128xf32>
    %113 = vector.shape_cast %112 : vector<2x1x128xf32> to vector<2x128xf32>
    %114 = vector.shape_cast %111 : vector<2x128xf32> to vector<2x1x128xf32>
    tpu.vector_store %arg9[%c0_45, %c7_46, %c0_47], %114 {strides = array<i32>} : memref<2x8x128xf32, #tpu.memory_space<vmem>>, vector<2x1x128xf32>,
    %c0_48 = arith.constant 0 : index
    %c1 = arith.constant 1 : index
    %c0_49 = arith.constant 0 : index
    %115 = vector.load %arg2[%c0_48, %c1, %c0_49] : memref<2x8x512xf32, #tpu.memory_space<vmem>>, vector<2x1x512xf32>
    %116 = vector.shape_cast %115 : vector<2x1x512xf32> to vector<2x512xf32>
    %c0_50 = arith.constant 0 : index
    %c1_51 = arith.constant 1 : index
    %c0_52 = arith.constant 0 : index
    %117 = vector.load %arg4[%c0_50, %c1_51, %c0_52] : memref<2x8x1xf32, #tpu.memory_space<vmem>>, vector<2x1x1xf32>
    %118 = vector.shape_cast %117 : vector<2x1x1xf32> to vector<2x1xf32>
    %c0_53 = arith.constant 0 : index
    %c0_54 = arith.constant 0 : index
    %119 = vector.load %arg10[%c0_53, %c0_54] : memref<2x128xf32, #tpu.memory_space<vmem>>, vector<2x128xf32>
    %c0_55 = arith.constant 0 : index
    %c0_56 = arith.constant 0 : index
    %120 = vector.load %arg11[%c0_55, %c0_56] : memref<2x128xf32, #tpu.memory_space<vmem>>, vector<2x128xf32>
    %121 = arith.truncf %119 : vector<2x128xf32> to vector<2x128xbf16>
    %cst_57 = arith.constant dense<0.000000e+00> : vector<2x512xf32>
    %122 = tpu.matmul %121, %3, %cst_57 {dimension_numbers = #tpu.dot_dimension_numbers<[1], [0], [0], [1], [0, 0, 1, 1], [], []>} : vector<2x128xbf16>, vector<128x512xbf16>, vector<2x512xf32> -> vector<2x512xf32>
    %123 = arith.addf %116, %122 : vector<2x512xf32>
    %124 = vector.extract_strided_slice %123 {offsets = [0, 0], sizes = [2, 128], strides = [1, 1]} : vector<2x512xf32> to vector<2x128xf32>
    %125 = arith.negf %124 : vector<2x128xf32>
    %126 = math.exp %125 : vector<2x128xf32>
    %cst_58 = arith.constant 1.000000e+00 : f32
    %127 = vector.broadcast %cst_58 : f32 to vector<2x128xf32>
    %128 = arith.addf %127, %126 : vector<2x128xf32>
    %129 = arith.divf %127, %128 : vector<2x128xf32>
    %130 = vector.extract_strided_slice %123 {offsets = [0, 128], sizes = [2, 128], strides = [1, 1]} : vector<2x512xf32> to vector<2x128xf32>
    %131 = arith.negf %130 : vector<2x128xf32>
    %132 = math.exp %131 : vector<2x128xf32>
    %cst_59 = arith.constant 1.000000e+00 : f32
    %133 = vector.broadcast %cst_59 : f32 to vector<2x128xf32>
    %134 = arith.addf %133, %132 : vector<2x128xf32>
    %135 = arith.divf %133, %134 : vector<2x128xf32>
    %136 = vector.extract_strided_slice %123 {offsets = [0, 256], sizes = [2, 128], strides = [1, 1]} : vector<2x512xf32> to vector<2x128xf32>
    %137 = math.tanh %136 : vector<2x128xf32>
    %138 = vector.extract_strided_slice %123 {offsets = [0, 384], sizes = [2, 128], strides = [1, 1]} : vector<2x512xf32> to vector<2x128xf32>
    %139 = arith.negf %138 : vector<2x128xf32>
    %140 = math.exp %139 : vector<2x128xf32>
    %cst_60 = arith.constant 1.000000e+00 : f32
    %141 = vector.broadcast %cst_60 : f32 to vector<2x128xf32>
    %142 = arith.addf %141, %140 : vector<2x128xf32>
    %143 = arith.divf %141, %142 : vector<2x128xf32>
    %144 = arith.mulf %135, %120 : vector<2x128xf32>
    %145 = arith.mulf %129, %137 : vector<2x128xf32>
    %146 = arith.addf %144, %145 : vector<2x128xf32>
    %147 = math.tanh %146 : vector<2x128xf32>
    %148 = arith.mulf %143, %147 : vector<2x128xf32>
    %149 = vector.broadcast %118 : vector<2x1xf32> to vector<2x128xf32>
    %150 = arith.mulf %149, %146 : vector<2x128xf32>
    %cst_61 = arith.constant 1.000000e+00 : f32
    %151 = vector.broadcast %cst_61 : f32 to vector<2x1xf32>
    %152 = arith.subf %151, %118 : vector<2x1xf32>
    %153 = vector.broadcast %152 : vector<2x1xf32> to vector<2x128xf32>
    %154 = arith.mulf %153, %120 : vector<2x128xf32>
    %155 = arith.addf %150, %154 : vector<2x128xf32>
    %c0_62 = arith.constant 0 : index
    %c0_63 = arith.constant 0 : index
    %156 = vector.load %arg11[%c0_62, %c0_63] : memref<2x128xf32, #tpu.memory_space<vmem>>, vector<2x128xf32>
    tpu.vector_store %arg11[%c0_62, %c0_63], %155 {strides = array<i32>} : memref<2x128xf32, #tpu.memory_space<vmem>>, vector<2x128xf32>,
    %157 = vector.broadcast %118 : vector<2x1xf32> to vector<2x128xf32>
    %158 = arith.mulf %157, %148 : vector<2x128xf32>
    %cst_64 = arith.constant 1.000000e+00 : f32
    %159 = vector.broadcast %cst_64 : f32 to vector<2x1xf32>
    %160 = arith.subf %159, %118 : vector<2x1xf32>
    %161 = vector.broadcast %160 : vector<2x1xf32> to vector<2x128xf32>
    %162 = arith.mulf %161, %119 : vector<2x128xf32>
    %163 = arith.addf %158, %162 : vector<2x128xf32>
    %c0_65 = arith.constant 0 : index
    %c0_66 = arith.constant 0 : index
    %164 = vector.load %arg10[%c0_65, %c0_66] : memref<2x128xf32, #tpu.memory_space<vmem>>, vector<2x128xf32>
    tpu.vector_store %arg10[%c0_65, %c0_66], %163 {strides = array<i32>} : memref<2x128xf32, #tpu.memory_space<vmem>>, vector<2x128xf32>,
    %165 = vector.broadcast %118 : vector<2x1xf32> to vector<2x128xf32>
    %166 = arith.mulf %165, %148 : vector<2x128xf32>
    %c0_67 = arith.constant 0 : index
    %c1_68 = arith.constant 1 : index
    %c0_69 = arith.constant 0 : index
    %167 = vector.load %arg8[%c0_67, %c1_68, %c0_69] : memref<2x8x128xf32, #tpu.memory_space<vmem>>, vector<2x1x128xf32>
    %168 = vector.shape_cast %167 : vector<2x1x128xf32> to vector<2x128xf32>
    %169 = vector.shape_cast %166 : vector<2x128xf32> to vector<2x1x128xf32>
    tpu.vector_store %arg8[%c0_67, %c1_68, %c0_69], %169 {strides = array<i32>} : memref<2x8x128xf32, #tpu.memory_space<vmem>>, vector<2x1x128xf32>,
    %c0_70 = arith.constant 0 : index
    %c6 = arith.constant 6 : index
    %c0_71 = arith.constant 0 : index
    %170 = vector.load %arg3[%c0_70, %c6, %c0_71] : memref<2x8x512xf32, #tpu.memory_space<vmem>>, vector<2x1x512xf32>
    %171 = vector.shape_cast %170 : vector<2x1x512xf32> to vector<2x512xf32>
    %c0_72 = arith.constant 0 : index
    %c6_73 = arith.constant 6 : index
    %c0_74 = arith.constant 0 : index
    %172 = vector.load %arg5[%c0_72, %c6_73, %c0_74] : memref<2x8x1xf32, #tpu.memory_space<vmem>>, vector<2x1x1xf32>
    %173 = vector.shape_cast %172 : vector<2x1x1xf32> to vector<2x1xf32>
    %c0_75 = arith.constant 0 : index
    %c0_76 = arith.constant 0 : index
    %174 = vector.load %arg12[%c0_75, %c0_76] : memref<2x128xf32, #tpu.memory_space<vmem>>, vector<2x128xf32>
    %c0_77 = arith.constant 0 : index
    %c0_78 = arith.constant 0 : index
    %175 = vector.load %arg13[%c0_77, %c0_78] : memref<2x128xf32, #tpu.memory_space<vmem>>, vector<2x128xf32>
    %176 = arith.truncf %174 : vector<2x128xf32> to vector<2x128xbf16>
    %cst_79 = arith.constant dense<0.000000e+00> : vector<2x512xf32>
    %177 = tpu.matmul %176, %4, %cst_79 {dimension_numbers = #tpu.dot_dimension_numbers<[1], [0], [0], [1], [0, 0, 1, 1], [], []>} : vector<2x128xbf16>, vector<128x512xbf16>, vector<2x512xf32> -> vector<2x512xf32>
    %178 = arith.addf %171, %177 : vector<2x512xf32>
    %179 = vector.extract_strided_slice %178 {offsets = [0, 0], sizes = [2, 128], strides = [1, 1]} : vector<2x512xf32> to vector<2x128xf32>
    %180 = arith.negf %179 : vector<2x128xf32>
    %181 = math.exp %180 : vector<2x128xf32>
    %cst_80 = arith.constant 1.000000e+00 : f32
    %182 = vector.broadcast %cst_80 : f32 to vector<2x128xf32>
    %183 = arith.addf %182, %181 : vector<2x128xf32>
    %184 = arith.divf %182, %183 : vector<2x128xf32>
    %185 = vector.extract_strided_slice %178 {offsets = [0, 128], sizes = [2, 128], strides = [1, 1]} : vector<2x512xf32> to vector<2x128xf32>
    %186 = arith.negf %185 : vector<2x128xf32>
    %187 = math.exp %186 : vector<2x128xf32>
    %cst_81 = arith.constant 1.000000e+00 : f32
    %188 = vector.broadcast %cst_81 : f32 to vector<2x128xf32>
    %189 = arith.addf %188, %187 : vector<2x128xf32>
    %190 = arith.divf %188, %189 : vector<2x128xf32>
    %191 = vector.extract_strided_slice %178 {offsets = [0, 256], sizes = [2, 128], strides = [1, 1]} : vector<2x512xf32> to vector<2x128xf32>
    %192 = math.tanh %191 : vector<2x128xf32>
    %193 = vector.extract_strided_slice %178 {offsets = [0, 384], sizes = [2, 128], strides = [1, 1]} : vector<2x512xf32> to vector<2x128xf32>
    %194 = arith.negf %193 : vector<2x128xf32>
    %195 = math.exp %194 : vector<2x128xf32>
    %cst_82 = arith.constant 1.000000e+00 : f32
    %196 = vector.broadcast %cst_82 : f32 to vector<2x128xf32>
    %197 = arith.addf %196, %195 : vector<2x128xf32>
    %198 = arith.divf %196, %197 : vector<2x128xf32>
    %199 = arith.mulf %190, %175 : vector<2x128xf32>
    %200 = arith.mulf %184, %192 : vector<2x128xf32>
    %201 = arith.addf %199, %200 : vector<2x128xf32>
    %202 = math.tanh %201 : vector<2x128xf32>
    %203 = arith.mulf %198, %202 : vector<2x128xf32>
    %204 = vector.broadcast %173 : vector<2x1xf32> to vector<2x128xf32>
    %205 = arith.mulf %204, %201 : vector<2x128xf32>
    %cst_83 = arith.constant 1.000000e+00 : f32
    %206 = vector.broadcast %cst_83 : f32 to vector<2x1xf32>
    %207 = arith.subf %206, %173 : vector<2x1xf32>
    %208 = vector.broadcast %207 : vector<2x1xf32> to vector<2x128xf32>
    %209 = arith.mulf %208, %175 : vector<2x128xf32>
    %210 = arith.addf %205, %209 : vector<2x128xf32>
    %c0_84 = arith.constant 0 : index
    %c0_85 = arith.constant 0 : index
    %211 = vector.load %arg13[%c0_84, %c0_85] : memref<2x128xf32, #tpu.memory_space<vmem>>, vector<2x128xf32>
    tpu.vector_store %arg13[%c0_84, %c0_85], %210 {strides = array<i32>} : memref<2x128xf32, #tpu.memory_space<vmem>>, vector<2x128xf32>,
    %212 = vector.broadcast %173 : vector<2x1xf32> to vector<2x128xf32>
    %213 = arith.mulf %212, %203 : vector<2x128xf32>
    %cst_86 = arith.constant 1.000000e+00 : f32
    %214 = vector.broadcast %cst_86 : f32 to vector<2x1xf32>
    %215 = arith.subf %214, %173 : vector<2x1xf32>
    %216 = vector.broadcast %215 : vector<2x1xf32> to vector<2x128xf32>
    %217 = arith.mulf %216, %174 : vector<2x128xf32>
    %218 = arith.addf %213, %217 : vector<2x128xf32>
    %c0_87 = arith.constant 0 : index
    %c0_88 = arith.constant 0 : index
    %219 = vector.load %arg12[%c0_87, %c0_88] : memref<2x128xf32, #tpu.memory_space<vmem>>, vector<2x128xf32>
    tpu.vector_store %arg12[%c0_87, %c0_88], %218 {strides = array<i32>} : memref<2x128xf32, #tpu.memory_space<vmem>>, vector<2x128xf32>,
    %220 = vector.broadcast %173 : vector<2x1xf32> to vector<2x128xf32>
    %221 = arith.mulf %220, %203 : vector<2x128xf32>
    %c0_89 = arith.constant 0 : index
    %c6_90 = arith.constant 6 : index
    %c0_91 = arith.constant 0 : index
    %222 = vector.load %arg9[%c0_89, %c6_90, %c0_91] : memref<2x8x128xf32, #tpu.memory_space<vmem>>, vector<2x1x128xf32>
    %223 = vector.shape_cast %222 : vector<2x1x128xf32> to vector<2x128xf32>
    %224 = vector.shape_cast %221 : vector<2x128xf32> to vector<2x1x128xf32>
    tpu.vector_store %arg9[%c0_89, %c6_90, %c0_91], %224 {strides = array<i32>} : memref<2x8x128xf32, #tpu.memory_space<vmem>>, vector<2x1x128xf32>,
    %c0_92 = arith.constant 0 : index
    %c2 = arith.constant 2 : index
    %c0_93 = arith.constant 0 : index
    %225 = vector.load %arg2[%c0_92, %c2, %c0_93] : memref<2x8x512xf32, #tpu.memory_space<vmem>>, vector<2x1x512xf32>
    %226 = vector.shape_cast %225 : vector<2x1x512xf32> to vector<2x512xf32>
    %c0_94 = arith.constant 0 : index
    %c2_95 = arith.constant 2 : index
    %c0_96 = arith.constant 0 : index
    %227 = vector.load %arg4[%c0_94, %c2_95, %c0_96] : memref<2x8x1xf32, #tpu.memory_space<vmem>>, vector<2x1x1xf32>
    %228 = vector.shape_cast %227 : vector<2x1x1xf32> to vector<2x1xf32>
    %c0_97 = arith.constant 0 : index
    %c0_98 = arith.constant 0 : index
    %229 = vector.load %arg10[%c0_97, %c0_98] : memref<2x128xf32, #tpu.memory_space<vmem>>, vector<2x128xf32>
    %c0_99 = arith.constant 0 : index
    %c0_100 = arith.constant 0 : index
    %230 = vector.load %arg11[%c0_99, %c0_100] : memref<2x128xf32, #tpu.memory_space<vmem>>, vector<2x128xf32>
    %231 = arith.truncf %229 : vector<2x128xf32> to vector<2x128xbf16>
    %cst_101 = arith.constant dense<0.000000e+00> : vector<2x512xf32>
    %232 = tpu.matmul %231, %3, %cst_101 {dimension_numbers = #tpu.dot_dimension_numbers<[1], [0], [0], [1], [0, 0, 1, 1], [], []>} : vector<2x128xbf16>, vector<128x512xbf16>, vector<2x512xf32> -> vector<2x512xf32>
    %233 = arith.addf %226, %232 : vector<2x512xf32>
    %234 = vector.extract_strided_slice %233 {offsets = [0, 0], sizes = [2, 128], strides = [1, 1]} : vector<2x512xf32> to vector<2x128xf32>
    %235 = arith.negf %234 : vector<2x128xf32>
    %236 = math.exp %235 : vector<2x128xf32>
    %cst_102 = arith.constant 1.000000e+00 : f32
    %237 = vector.broadcast %cst_102 : f32 to vector<2x128xf32>
    %238 = arith.addf %237, %236 : vector<2x128xf32>
    %239 = arith.divf %237, %238 : vector<2x128xf32>
    %240 = vector.extract_strided_slice %233 {offsets = [0, 128], sizes = [2, 128], strides = [1, 1]} : vector<2x512xf32> to vector<2x128xf32>
    %241 = arith.negf %240 : vector<2x128xf32>
    %242 = math.exp %241 : vector<2x128xf32>
    %cst_103 = arith.constant 1.000000e+00 : f32
    %243 = vector.broadcast %cst_103 : f32 to vector<2x128xf32>
    %244 = arith.addf %243, %242 : vector<2x128xf32>
    %245 = arith.divf %243, %244 : vector<2x128xf32>
    %246 = vector.extract_strided_slice %233 {offsets = [0, 256], sizes = [2, 128], strides = [1, 1]} : vector<2x512xf32> to vector<2x128xf32>
    %247 = math.tanh %246 : vector<2x128xf32>
    %248 = vector.extract_strided_slice %233 {offsets = [0, 384], sizes = [2, 128], strides = [1, 1]} : vector<2x512xf32> to vector<2x128xf32>
    %249 = arith.negf %248 : vector<2x128xf32>
    %250 = math.exp %249 : vector<2x128xf32>
    %cst_104 = arith.constant 1.000000e+00 : f32
    %251 = vector.broadcast %cst_104 : f32 to vector<2x128xf32>
    %252 = arith.addf %251, %250 : vector<2x128xf32>
    %253 = arith.divf %251, %252 : vector<2x128xf32>
    %254 = arith.mulf %245, %230 : vector<2x128xf32>
    %255 = arith.mulf %239, %247 : vector<2x128xf32>
    %256 = arith.addf %254, %255 : vector<2x128xf32>
    %257 = math.tanh %256 : vector<2x128xf32>
    %258 = arith.mulf %253, %257 : vector<2x128xf32>
    %259 = vector.broadcast %228 : vector<2x1xf32> to vector<2x128xf32>
    %260 = arith.mulf %259, %256 : vector<2x128xf32>
    %cst_105 = arith.constant 1.000000e+00 : f32
    %261 = vector.broadcast %cst_105 : f32 to vector<2x1xf32>
    %262 = arith.subf %261, %228 : vector<2x1xf32>
    %263 = vector.broadcast %262 : vector<2x1xf32> to vector<2x128xf32>
    %264 = arith.mulf %263, %230 : vector<2x128xf32>
    %265 = arith.addf %260, %264 : vector<2x128xf32>
    %c0_106 = arith.constant 0 : index
    %c0_107 = arith.constant 0 : index
    %266 = vector.load %arg11[%c0_106, %c0_107] : memref<2x128xf32, #tpu.memory_space<vmem>>, vector<2x128xf32>
    tpu.vector_store %arg11[%c0_106, %c0_107], %265 {strides = array<i32>} : memref<2x128xf32, #tpu.memory_space<vmem>>, vector<2x128xf32>,
    %267 = vector.broadcast %228 : vector<2x1xf32> to vector<2x128xf32>
    %268 = arith.mulf %267, %258 : vector<2x128xf32>
    %cst_108 = arith.constant 1.000000e+00 : f32
    %269 = vector.broadcast %cst_108 : f32 to vector<2x1xf32>
    %270 = arith.subf %269, %228 : vector<2x1xf32>
    %271 = vector.broadcast %270 : vector<2x1xf32> to vector<2x128xf32>
    %272 = arith.mulf %271, %229 : vector<2x128xf32>
    %273 = arith.addf %268, %272 : vector<2x128xf32>
    %c0_109 = arith.constant 0 : index
    %c0_110 = arith.constant 0 : index
    %274 = vector.load %arg10[%c0_109, %c0_110] : memref<2x128xf32, #tpu.memory_space<vmem>>, vector<2x128xf32>
    tpu.vector_store %arg10[%c0_109, %c0_110], %273 {strides = array<i32>} : memref<2x128xf32, #tpu.memory_space<vmem>>, vector<2x128xf32>,
    %275 = vector.broadcast %228 : vector<2x1xf32> to vector<2x128xf32>
    %276 = arith.mulf %275, %258 : vector<2x128xf32>
    %c0_111 = arith.constant 0 : index
    %c2_112 = arith.constant 2 : index
    %c0_113 = arith.constant 0 : index
    %277 = vector.load %arg8[%c0_111, %c2_112, %c0_113] : memref<2x8x128xf32, #tpu.memory_space<vmem>>, vector<2x1x128xf32>
    %278 = vector.shape_cast %277 : vector<2x1x128xf32> to vector<2x128xf32>
    %279 = vector.shape_cast %276 : vector<2x128xf32> to vector<2x1x128xf32>
    tpu.vector_store %arg8[%c0_111, %c2_112, %c0_113], %279 {strides = array<i32>} : memref<2x8x128xf32, #tpu.memory_space<vmem>>, vector<2x1x128xf32>,
    %c0_114 = arith.constant 0 : index
    %c5 = arith.constant 5 : index
    %c0_115 = arith.constant 0 : index
    %280 = vector.load %arg3[%c0_114, %c5, %c0_115] : memref<2x8x512xf32, #tpu.memory_space<vmem>>, vector<2x1x512xf32>
    %281 = vector.shape_cast %280 : vector<2x1x512xf32> to vector<2x512xf32>
    %c0_116 = arith.constant 0 : index
    %c5_117 = arith.constant 5 : index
    %c0_118 = arith.constant 0 : index
    %282 = vector.load %arg5[%c0_116, %c5_117, %c0_118] : memref<2x8x1xf32, #tpu.memory_space<vmem>>, vector<2x1x1xf32>
    %283 = vector.shape_cast %282 : vector<2x1x1xf32> to vector<2x1xf32>
    %c0_119 = arith.constant 0 : index
    %c0_120 = arith.constant 0 : index
    %284 = vector.load %arg12[%c0_119, %c0_120] : memref<2x128xf32, #tpu.memory_space<vmem>>, vector<2x128xf32>
    %c0_121 = arith.constant 0 : index
    %c0_122 = arith.constant 0 : index
    %285 = vector.load %arg13[%c0_121, %c0_122] : memref<2x128xf32, #tpu.memory_space<vmem>>, vector<2x128xf32>
    %286 = arith.truncf %284 : vector<2x128xf32> to vector<2x128xbf16>
    %cst_123 = arith.constant dense<0.000000e+00> : vector<2x512xf32>
    %287 = tpu.matmul %286, %4, %cst_123 {dimension_numbers = #tpu.dot_dimension_numbers<[1], [0], [0], [1], [0, 0, 1, 1], [], []>} : vector<2x128xbf16>, vector<128x512xbf16>, vector<2x512xf32> -> vector<2x512xf32>
    %288 = arith.addf %281, %287 : vector<2x512xf32>
    %289 = vector.extract_strided_slice %288 {offsets = [0, 0], sizes = [2, 128], strides = [1, 1]} : vector<2x512xf32> to vector<2x128xf32>
    %290 = arith.negf %289 : vector<2x128xf32>
    %291 = math.exp %290 : vector<2x128xf32>
    %cst_124 = arith.constant 1.000000e+00 : f32
    %292 = vector.broadcast %cst_124 : f32 to vector<2x128xf32>
    %293 = arith.addf %292, %291 : vector<2x128xf32>
    %294 = arith.divf %292, %293 : vector<2x128xf32>
    %295 = vector.extract_strided_slice %288 {offsets = [0, 128], sizes = [2, 128], strides = [1, 1]} : vector<2x512xf32> to vector<2x128xf32>
    %296 = arith.negf %295 : vector<2x128xf32>
    %297 = math.exp %296 : vector<2x128xf32>
    %cst_125 = arith.constant 1.000000e+00 : f32
    %298 = vector.broadcast %cst_125 : f32 to vector<2x128xf32>
    %299 = arith.addf %298, %297 : vector<2x128xf32>
    %300 = arith.divf %298, %299 : vector<2x128xf32>
    %301 = vector.extract_strided_slice %288 {offsets = [0, 256], sizes = [2, 128], strides = [1, 1]} : vector<2x512xf32> to vector<2x128xf32>
    %302 = math.tanh %301 : vector<2x128xf32>
    %303 = vector.extract_strided_slice %288 {offsets = [0, 384], sizes = [2, 128], strides = [1, 1]} : vector<2x512xf32> to vector<2x128xf32>
    %304 = arith.negf %303 : vector<2x128xf32>
    %305 = math.exp %304 : vector<2x128xf32>
    %cst_126 = arith.constant 1.000000e+00 : f32
    %306 = vector.broadcast %cst_126 : f32 to vector<2x128xf32>
    %307 = arith.addf %306, %305 : vector<2x128xf32>
    %308 = arith.divf %306, %307 : vector<2x128xf32>
    %309 = arith.mulf %300, %285 : vector<2x128xf32>
    %310 = arith.mulf %294, %302 : vector<2x128xf32>
    %311 = arith.addf %309, %310 : vector<2x128xf32>
    %312 = math.tanh %311 : vector<2x128xf32>
    %313 = arith.mulf %308, %312 : vector<2x128xf32>
    %314 = vector.broadcast %283 : vector<2x1xf32> to vector<2x128xf32>
    %315 = arith.mulf %314, %311 : vector<2x128xf32>
    %cst_127 = arith.constant 1.000000e+00 : f32
    %316 = vector.broadcast %cst_127 : f32 to vector<2x1xf32>
    %317 = arith.subf %316, %283 : vector<2x1xf32>
    %318 = vector.broadcast %317 : vector<2x1xf32> to vector<2x128xf32>
    %319 = arith.mulf %318, %285 : vector<2x128xf32>
    %320 = arith.addf %315, %319 : vector<2x128xf32>
    %c0_128 = arith.constant 0 : index
    %c0_129 = arith.constant 0 : index
    %321 = vector.load %arg13[%c0_128, %c0_129] : memref<2x128xf32, #tpu.memory_space<vmem>>, vector<2x128xf32>
    tpu.vector_store %arg13[%c0_128, %c0_129], %320 {strides = array<i32>} : memref<2x128xf32, #tpu.memory_space<vmem>>, vector<2x128xf32>,
    %322 = vector.broadcast %283 : vector<2x1xf32> to vector<2x128xf32>
    %323 = arith.mulf %322, %313 : vector<2x128xf32>
    %cst_130 = arith.constant 1.000000e+00 : f32
    %324 = vector.broadcast %cst_130 : f32 to vector<2x1xf32>
    %325 = arith.subf %324, %283 : vector<2x1xf32>
    %326 = vector.broadcast %325 : vector<2x1xf32> to vector<2x128xf32>
    %327 = arith.mulf %326, %284 : vector<2x128xf32>
    %328 = arith.addf %323, %327 : vector<2x128xf32>
    %c0_131 = arith.constant 0 : index
    %c0_132 = arith.constant 0 : index
    %329 = vector.load %arg12[%c0_131, %c0_132] : memref<2x128xf32, #tpu.memory_space<vmem>>, vector<2x128xf32>
    tpu.vector_store %arg12[%c0_131, %c0_132], %328 {strides = array<i32>} : memref<2x128xf32, #tpu.memory_space<vmem>>, vector<2x128xf32>,
    %330 = vector.broadcast %283 : vector<2x1xf32> to vector<2x128xf32>
    %331 = arith.mulf %330, %313 : vector<2x128xf32>
    %c0_133 = arith.constant 0 : index
    %c5_134 = arith.constant 5 : index
    %c0_135 = arith.constant 0 : index
    %332 = vector.load %arg9[%c0_133, %c5_134, %c0_135] : memref<2x8x128xf32, #tpu.memory_space<vmem>>, vector<2x1x128xf32>
    %333 = vector.shape_cast %332 : vector<2x1x128xf32> to vector<2x128xf32>
    %334 = vector.shape_cast %331 : vector<2x128xf32> to vector<2x1x128xf32>
    tpu.vector_store %arg9[%c0_133, %c5_134, %c0_135], %334 {strides = array<i32>} : memref<2x8x128xf32, #tpu.memory_space<vmem>>, vector<2x1x128xf32>,
    %c0_136 = arith.constant 0 : index
    %c3 = arith.constant 3 : index
    %c0_137 = arith.constant 0 : index
    %335 = vector.load %arg2[%c0_136, %c3, %c0_137] : memref<2x8x512xf32, #tpu.memory_space<vmem>>, vector<2x1x512xf32>
    %336 = vector.shape_cast %335 : vector<2x1x512xf32> to vector<2x512xf32>
    %c0_138 = arith.constant 0 : index
    %c3_139 = arith.constant 3 : index
    %c0_140 = arith.constant 0 : index
    %337 = vector.load %arg4[%c0_138, %c3_139, %c0_140] : memref<2x8x1xf32, #tpu.memory_space<vmem>>, vector<2x1x1xf32>
    %338 = vector.shape_cast %337 : vector<2x1x1xf32> to vector<2x1xf32>
    %c0_141 = arith.constant 0 : index
    %c0_142 = arith.constant 0 : index
    %339 = vector.load %arg10[%c0_141, %c0_142] : memref<2x128xf32, #tpu.memory_space<vmem>>, vector<2x128xf32>
    %c0_143 = arith.constant 0 : index
    %c0_144 = arith.constant 0 : index
    %340 = vector.load %arg11[%c0_143, %c0_144] : memref<2x128xf32, #tpu.memory_space<vmem>>, vector<2x128xf32>
    %341 = arith.truncf %339 : vector<2x128xf32> to vector<2x128xbf16>
    %cst_145 = arith.constant dense<0.000000e+00> : vector<2x512xf32>
    %342 = tpu.matmul %341, %3, %cst_145 {dimension_numbers = #tpu.dot_dimension_numbers<[1], [0], [0], [1], [0, 0, 1, 1], [], []>} : vector<2x128xbf16>, vector<128x512xbf16>, vector<2x512xf32> -> vector<2x512xf32>
    %343 = arith.addf %336, %342 : vector<2x512xf32>
    %344 = vector.extract_strided_slice %343 {offsets = [0, 0], sizes = [2, 128], strides = [1, 1]} : vector<2x512xf32> to vector<2x128xf32>
    %345 = arith.negf %344 : vector<2x128xf32>
    %346 = math.exp %345 : vector<2x128xf32>
    %cst_146 = arith.constant 1.000000e+00 : f32
    %347 = vector.broadcast %cst_146 : f32 to vector<2x128xf32>
    %348 = arith.addf %347, %346 : vector<2x128xf32>
    %349 = arith.divf %347, %348 : vector<2x128xf32>
    %350 = vector.extract_strided_slice %343 {offsets = [0, 128], sizes = [2, 128], strides = [1, 1]} : vector<2x512xf32> to vector<2x128xf32>
    %351 = arith.negf %350 : vector<2x128xf32>
    %352 = math.exp %351 : vector<2x128xf32>
    %cst_147 = arith.constant 1.000000e+00 : f32
    %353 = vector.broadcast %cst_147 : f32 to vector<2x128xf32>
    %354 = arith.addf %353, %352 : vector<2x128xf32>
    %355 = arith.divf %353, %354 : vector<2x128xf32>
    %356 = vector.extract_strided_slice %343 {offsets = [0, 256], sizes = [2, 128], strides = [1, 1]} : vector<2x512xf32> to vector<2x128xf32>
    %357 = math.tanh %356 : vector<2x128xf32>
    %358 = vector.extract_strided_slice %343 {offsets = [0, 384], sizes = [2, 128], strides = [1, 1]} : vector<2x512xf32> to vector<2x128xf32>
    %359 = arith.negf %358 : vector<2x128xf32>
    %360 = math.exp %359 : vector<2x128xf32>
    %cst_148 = arith.constant 1.000000e+00 : f32
    %361 = vector.broadcast %cst_148 : f32 to vector<2x128xf32>
    %362 = arith.addf %361, %360 : vector<2x128xf32>
    %363 = arith.divf %361, %362 : vector<2x128xf32>
    %364 = arith.mulf %355, %340 : vector<2x128xf32>
    %365 = arith.mulf %349, %357 : vector<2x128xf32>
    %366 = arith.addf %364, %365 : vector<2x128xf32>
    %367 = math.tanh %366 : vector<2x128xf32>
    %368 = arith.mulf %363, %367 : vector<2x128xf32>
    %369 = vector.broadcast %338 : vector<2x1xf32> to vector<2x128xf32>
    %370 = arith.mulf %369, %366 : vector<2x128xf32>
    %cst_149 = arith.constant 1.000000e+00 : f32
    %371 = vector.broadcast %cst_149 : f32 to vector<2x1xf32>
    %372 = arith.subf %371, %338 : vector<2x1xf32>
    %373 = vector.broadcast %372 : vector<2x1xf32> to vector<2x128xf32>
    %374 = arith.mulf %373, %340 : vector<2x128xf32>
    %375 = arith.addf %370, %374 : vector<2x128xf32>
    %c0_150 = arith.constant 0 : index
    %c0_151 = arith.constant 0 : index
    %376 = vector.load %arg11[%c0_150, %c0_151] : memref<2x128xf32, #tpu.memory_space<vmem>>, vector<2x128xf32>
    tpu.vector_store %arg11[%c0_150, %c0_151], %375 {strides = array<i32>} : memref<2x128xf32, #tpu.memory_space<vmem>>, vector<2x128xf32>,
    %377 = vector.broadcast %338 : vector<2x1xf32> to vector<2x128xf32>
    %378 = arith.mulf %377, %368 : vector<2x128xf32>
    %cst_152 = arith.constant 1.000000e+00 : f32
    %379 = vector.broadcast %cst_152 : f32 to vector<2x1xf32>
    %380 = arith.subf %379, %338 : vector<2x1xf32>
    %381 = vector.broadcast %380 : vector<2x1xf32> to vector<2x128xf32>
    %382 = arith.mulf %381, %339 : vector<2x128xf32>
    %383 = arith.addf %378, %382 : vector<2x128xf32>
    %c0_153 = arith.constant 0 : index
    %c0_154 = arith.constant 0 : index
    %384 = vector.load %arg10[%c0_153, %c0_154] : memref<2x128xf32, #tpu.memory_space<vmem>>, vector<2x128xf32>
    tpu.vector_store %arg10[%c0_153, %c0_154], %383 {strides = array<i32>} : memref<2x128xf32, #tpu.memory_space<vmem>>, vector<2x128xf32>,
    %385 = vector.broadcast %338 : vector<2x1xf32> to vector<2x128xf32>
    %386 = arith.mulf %385, %368 : vector<2x128xf32>
    %c0_155 = arith.constant 0 : index
    %c3_156 = arith.constant 3 : index
    %c0_157 = arith.constant 0 : index
    %387 = vector.load %arg8[%c0_155, %c3_156, %c0_157] : memref<2x8x128xf32, #tpu.memory_space<vmem>>, vector<2x1x128xf32>
    %388 = vector.shape_cast %387 : vector<2x1x128xf32> to vector<2x128xf32>
    %389 = vector.shape_cast %386 : vector<2x128xf32> to vector<2x1x128xf32>
    tpu.vector_store %arg8[%c0_155, %c3_156, %c0_157], %389 {strides = array<i32>} : memref<2x8x128xf32, #tpu.memory_space<vmem>>, vector<2x1x128xf32>,
    %c0_158 = arith.constant 0 : index
    %c4 = arith.constant 4 : index
    %c0_159 = arith.constant 0 : index
    %390 = vector.load %arg3[%c0_158, %c4, %c0_159] : memref<2x8x512xf32, #tpu.memory_space<vmem>>, vector<2x1x512xf32>
    %391 = vector.shape_cast %390 : vector<2x1x512xf32> to vector<2x512xf32>
    %c0_160 = arith.constant 0 : index
    %c4_161 = arith.constant 4 : index
    %c0_162 = arith.constant 0 : index
    %392 = vector.load %arg5[%c0_160, %c4_161, %c0_162] : memref<2x8x1xf32, #tpu.memory_space<vmem>>, vector<2x1x1xf32>
    %393 = vector.shape_cast %392 : vector<2x1x1xf32> to vector<2x1xf32>
    %c0_163 = arith.constant 0 : index
    %c0_164 = arith.constant 0 : index
    %394 = vector.load %arg12[%c0_163, %c0_164] : memref<2x128xf32, #tpu.memory_space<vmem>>, vector<2x128xf32>
    %c0_165 = arith.constant 0 : index
    %c0_166 = arith.constant 0 : index
    %395 = vector.load %arg13[%c0_165, %c0_166] : memref<2x128xf32, #tpu.memory_space<vmem>>, vector<2x128xf32>
    %396 = arith.truncf %394 : vector<2x128xf32> to vector<2x128xbf16>
    %cst_167 = arith.constant dense<0.000000e+00> : vector<2x512xf32>
    %397 = tpu.matmul %396, %4, %cst_167 {dimension_numbers = #tpu.dot_dimension_numbers<[1], [0], [0], [1], [0, 0, 1, 1], [], []>} : vector<2x128xbf16>, vector<128x512xbf16>, vector<2x512xf32> -> vector<2x512xf32>
    %398 = arith.addf %391, %397 : vector<2x512xf32>
    %399 = vector.extract_strided_slice %398 {offsets = [0, 0], sizes = [2, 128], strides = [1, 1]} : vector<2x512xf32> to vector<2x128xf32>
    %400 = arith.negf %399 : vector<2x128xf32>
    %401 = math.exp %400 : vector<2x128xf32>
    %cst_168 = arith.constant 1.000000e+00 : f32
    %402 = vector.broadcast %cst_168 : f32 to vector<2x128xf32>
    %403 = arith.addf %402, %401 : vector<2x128xf32>
    %404 = arith.divf %402, %403 : vector<2x128xf32>
    %405 = vector.extract_strided_slice %398 {offsets = [0, 128], sizes = [2, 128], strides = [1, 1]} : vector<2x512xf32> to vector<2x128xf32>
    %406 = arith.negf %405 : vector<2x128xf32>
    %407 = math.exp %406 : vector<2x128xf32>
    %cst_169 = arith.constant 1.000000e+00 : f32
    %408 = vector.broadcast %cst_169 : f32 to vector<2x128xf32>
    %409 = arith.addf %408, %407 : vector<2x128xf32>
    %410 = arith.divf %408, %409 : vector<2x128xf32>
    %411 = vector.extract_strided_slice %398 {offsets = [0, 256], sizes = [2, 128], strides = [1, 1]} : vector<2x512xf32> to vector<2x128xf32>
    %412 = math.tanh %411 : vector<2x128xf32>
    %413 = vector.extract_strided_slice %398 {offsets = [0, 384], sizes = [2, 128], strides = [1, 1]} : vector<2x512xf32> to vector<2x128xf32>
    %414 = arith.negf %413 : vector<2x128xf32>
    %415 = math.exp %414 : vector<2x128xf32>
    %cst_170 = arith.constant 1.000000e+00 : f32
    %416 = vector.broadcast %cst_170 : f32 to vector<2x128xf32>
    %417 = arith.addf %416, %415 : vector<2x128xf32>
    %418 = arith.divf %416, %417 : vector<2x128xf32>
    %419 = arith.mulf %410, %395 : vector<2x128xf32>
    %420 = arith.mulf %404, %412 : vector<2x128xf32>
    %421 = arith.addf %419, %420 : vector<2x128xf32>
    %422 = math.tanh %421 : vector<2x128xf32>
    %423 = arith.mulf %418, %422 : vector<2x128xf32>
    %424 = vector.broadcast %393 : vector<2x1xf32> to vector<2x128xf32>
    %425 = arith.mulf %424, %421 : vector<2x128xf32>
    %cst_171 = arith.constant 1.000000e+00 : f32
    %426 = vector.broadcast %cst_171 : f32 to vector<2x1xf32>
    %427 = arith.subf %426, %393 : vector<2x1xf32>
    %428 = vector.broadcast %427 : vector<2x1xf32> to vector<2x128xf32>
    %429 = arith.mulf %428, %395 : vector<2x128xf32>
    %430 = arith.addf %425, %429 : vector<2x128xf32>
    %c0_172 = arith.constant 0 : index
    %c0_173 = arith.constant 0 : index
    %431 = vector.load %arg13[%c0_172, %c0_173] : memref<2x128xf32, #tpu.memory_space<vmem>>, vector<2x128xf32>
    tpu.vector_store %arg13[%c0_172, %c0_173], %430 {strides = array<i32>} : memref<2x128xf32, #tpu.memory_space<vmem>>, vector<2x128xf32>,
    %432 = vector.broadcast %393 : vector<2x1xf32> to vector<2x128xf32>
    %433 = arith.mulf %432, %423 : vector<2x128xf32>
    %cst_174 = arith.constant 1.000000e+00 : f32
    %434 = vector.broadcast %cst_174 : f32 to vector<2x1xf32>
    %435 = arith.subf %434, %393 : vector<2x1xf32>
    %436 = vector.broadcast %435 : vector<2x1xf32> to vector<2x128xf32>
    %437 = arith.mulf %436, %394 : vector<2x128xf32>
    %438 = arith.addf %433, %437 : vector<2x128xf32>
    %c0_175 = arith.constant 0 : index
    %c0_176 = arith.constant 0 : index
    %439 = vector.load %arg12[%c0_175, %c0_176] : memref<2x128xf32, #tpu.memory_space<vmem>>, vector<2x128xf32>
    tpu.vector_store %arg12[%c0_175, %c0_176], %438 {strides = array<i32>} : memref<2x128xf32, #tpu.memory_space<vmem>>, vector<2x128xf32>,
    %440 = vector.broadcast %393 : vector<2x1xf32> to vector<2x128xf32>
    %441 = arith.mulf %440, %423 : vector<2x128xf32>
    %c0_177 = arith.constant 0 : index
    %c4_178 = arith.constant 4 : index
    %c0_179 = arith.constant 0 : index
    %442 = vector.load %arg9[%c0_177, %c4_178, %c0_179] : memref<2x8x128xf32, #tpu.memory_space<vmem>>, vector<2x1x128xf32>
    %443 = vector.shape_cast %442 : vector<2x1x128xf32> to vector<2x128xf32>
    %444 = vector.shape_cast %441 : vector<2x128xf32> to vector<2x1x128xf32>
    tpu.vector_store %arg9[%c0_177, %c4_178, %c0_179], %444 {strides = array<i32>} : memref<2x8x128xf32, #tpu.memory_space<vmem>>, vector<2x1x128xf32>,
    %c0_180 = arith.constant 0 : index
    %c4_181 = arith.constant 4 : index
    %c0_182 = arith.constant 0 : index
    %445 = vector.load %arg2[%c0_180, %c4_181, %c0_182] : memref<2x8x512xf32, #tpu.memory_space<vmem>>, vector<2x1x512xf32>
    %446 = vector.shape_cast %445 : vector<2x1x512xf32> to vector<2x512xf32>
    %c0_183 = arith.constant 0 : index
    %c4_184 = arith.constant 4 : index
    %c0_185 = arith.constant 0 : index
    %447 = vector.load %arg4[%c0_183, %c4_184, %c0_185] : memref<2x8x1xf32, #tpu.memory_space<vmem>>, vector<2x1x1xf32>
    %448 = vector.shape_cast %447 : vector<2x1x1xf32> to vector<2x1xf32>
    %c0_186 = arith.constant 0 : index
    %c0_187 = arith.constant 0 : index
    %449 = vector.load %arg10[%c0_186, %c0_187] : memref<2x128xf32, #tpu.memory_space<vmem>>, vector<2x128xf32>
    %c0_188 = arith.constant 0 : index
    %c0_189 = arith.constant 0 : index
    %450 = vector.load %arg11[%c0_188, %c0_189] : memref<2x128xf32, #tpu.memory_space<vmem>>, vector<2x128xf32>
    %451 = arith.truncf %449 : vector<2x128xf32> to vector<2x128xbf16>
    %cst_190 = arith.constant dense<0.000000e+00> : vector<2x512xf32>
    %452 = tpu.matmul %451, %3, %cst_190 {dimension_numbers = #tpu.dot_dimension_numbers<[1], [0], [0], [1], [0, 0, 1, 1], [], []>} : vector<2x128xbf16>, vector<128x512xbf16>, vector<2x512xf32> -> vector<2x512xf32>
    %453 = arith.addf %446, %452 : vector<2x512xf32>
    %454 = vector.extract_strided_slice %453 {offsets = [0, 0], sizes = [2, 128], strides = [1, 1]} : vector<2x512xf32> to vector<2x128xf32>
    %455 = arith.negf %454 : vector<2x128xf32>
    %456 = math.exp %455 : vector<2x128xf32>
    %cst_191 = arith.constant 1.000000e+00 : f32
    %457 = vector.broadcast %cst_191 : f32 to vector<2x128xf32>
    %458 = arith.addf %457, %456 : vector<2x128xf32>
    %459 = arith.divf %457, %458 : vector<2x128xf32>
    %460 = vector.extract_strided_slice %453 {offsets = [0, 128], sizes = [2, 128], strides = [1, 1]} : vector<2x512xf32> to vector<2x128xf32>
    %461 = arith.negf %460 : vector<2x128xf32>
    %462 = math.exp %461 : vector<2x128xf32>
    %cst_192 = arith.constant 1.000000e+00 : f32
    %463 = vector.broadcast %cst_192 : f32 to vector<2x128xf32>
    %464 = arith.addf %463, %462 : vector<2x128xf32>
    %465 = arith.divf %463, %464 : vector<2x128xf32>
    %466 = vector.extract_strided_slice %453 {offsets = [0, 256], sizes = [2, 128], strides = [1, 1]} : vector<2x512xf32> to vector<2x128xf32>
    %467 = math.tanh %466 : vector<2x128xf32>
    %468 = vector.extract_strided_slice %453 {offsets = [0, 384], sizes = [2, 128], strides = [1, 1]} : vector<2x512xf32> to vector<2x128xf32>
    %469 = arith.negf %468 : vector<2x128xf32>
    %470 = math.exp %469 : vector<2x128xf32>
    %cst_193 = arith.constant 1.000000e+00 : f32
    %471 = vector.broadcast %cst_193 : f32 to vector<2x128xf32>
    %472 = arith.addf %471, %470 : vector<2x128xf32>
    %473 = arith.divf %471, %472 : vector<2x128xf32>
    %474 = arith.mulf %465, %450 : vector<2x128xf32>
    %475 = arith.mulf %459, %467 : vector<2x128xf32>
    %476 = arith.addf %474, %475 : vector<2x128xf32>
    %477 = math.tanh %476 : vector<2x128xf32>
    %478 = arith.mulf %473, %477 : vector<2x128xf32>
    %479 = vector.broadcast %448 : vector<2x1xf32> to vector<2x128xf32>
    %480 = arith.mulf %479, %476 : vector<2x128xf32>
    %cst_194 = arith.constant 1.000000e+00 : f32
    %481 = vector.broadcast %cst_194 : f32 to vector<2x1xf32>
    %482 = arith.subf %481, %448 : vector<2x1xf32>
    %483 = vector.broadcast %482 : vector<2x1xf32> to vector<2x128xf32>
    %484 = arith.mulf %483, %450 : vector<2x128xf32>
    %485 = arith.addf %480, %484 : vector<2x128xf32>
    %c0_195 = arith.constant 0 : index
    %c0_196 = arith.constant 0 : index
    %486 = vector.load %arg11[%c0_195, %c0_196] : memref<2x128xf32, #tpu.memory_space<vmem>>, vector<2x128xf32>
    tpu.vector_store %arg11[%c0_195, %c0_196], %485 {strides = array<i32>} : memref<2x128xf32, #tpu.memory_space<vmem>>, vector<2x128xf32>,
    %487 = vector.broadcast %448 : vector<2x1xf32> to vector<2x128xf32>
    %488 = arith.mulf %487, %478 : vector<2x128xf32>
    %cst_197 = arith.constant 1.000000e+00 : f32
    %489 = vector.broadcast %cst_197 : f32 to vector<2x1xf32>
    %490 = arith.subf %489, %448 : vector<2x1xf32>
    %491 = vector.broadcast %490 : vector<2x1xf32> to vector<2x128xf32>
    %492 = arith.mulf %491, %449 : vector<2x128xf32>
    %493 = arith.addf %488, %492 : vector<2x128xf32>
    %c0_198 = arith.constant 0 : index
    %c0_199 = arith.constant 0 : index
    %494 = vector.load %arg10[%c0_198, %c0_199] : memref<2x128xf32, #tpu.memory_space<vmem>>, vector<2x128xf32>
    tpu.vector_store %arg10[%c0_198, %c0_199], %493 {strides = array<i32>} : memref<2x128xf32, #tpu.memory_space<vmem>>, vector<2x128xf32>,
    %495 = vector.broadcast %448 : vector<2x1xf32> to vector<2x128xf32>
    %496 = arith.mulf %495, %478 : vector<2x128xf32>
    %c0_200 = arith.constant 0 : index
    %c4_201 = arith.constant 4 : index
    %c0_202 = arith.constant 0 : index
    %497 = vector.load %arg8[%c0_200, %c4_201, %c0_202] : memref<2x8x128xf32, #tpu.memory_space<vmem>>, vector<2x1x128xf32>
    %498 = vector.shape_cast %497 : vector<2x1x128xf32> to vector<2x128xf32>
    %499 = vector.shape_cast %496 : vector<2x128xf32> to vector<2x1x128xf32>
    tpu.vector_store %arg8[%c0_200, %c4_201, %c0_202], %499 {strides = array<i32>} : memref<2x8x128xf32, #tpu.memory_space<vmem>>, vector<2x1x128xf32>,
    %c0_203 = arith.constant 0 : index
    %c3_204 = arith.constant 3 : index
    %c0_205 = arith.constant 0 : index
    %500 = vector.load %arg3[%c0_203, %c3_204, %c0_205] : memref<2x8x512xf32, #tpu.memory_space<vmem>>, vector<2x1x512xf32>
    %501 = vector.shape_cast %500 : vector<2x1x512xf32> to vector<2x512xf32>
    %c0_206 = arith.constant 0 : index
    %c3_207 = arith.constant 3 : index
    %c0_208 = arith.constant 0 : index
    %502 = vector.load %arg5[%c0_206, %c3_207, %c0_208] : memref<2x8x1xf32, #tpu.memory_space<vmem>>, vector<2x1x1xf32>
    %503 = vector.shape_cast %502 : vector<2x1x1xf32> to vector<2x1xf32>
    %c0_209 = arith.constant 0 : index
    %c0_210 = arith.constant 0 : index
    %504 = vector.load %arg12[%c0_209, %c0_210] : memref<2x128xf32, #tpu.memory_space<vmem>>, vector<2x128xf32>
    %c0_211 = arith.constant 0 : index
    %c0_212 = arith.constant 0 : index
    %505 = vector.load %arg13[%c0_211, %c0_212] : memref<2x128xf32, #tpu.memory_space<vmem>>, vector<2x128xf32>
    %506 = arith.truncf %504 : vector<2x128xf32> to vector<2x128xbf16>
    %cst_213 = arith.constant dense<0.000000e+00> : vector<2x512xf32>
    %507 = tpu.matmul %506, %4, %cst_213 {dimension_numbers = #tpu.dot_dimension_numbers<[1], [0], [0], [1], [0, 0, 1, 1], [], []>} : vector<2x128xbf16>, vector<128x512xbf16>, vector<2x512xf32> -> vector<2x512xf32>
    %508 = arith.addf %501, %507 : vector<2x512xf32>
    %509 = vector.extract_strided_slice %508 {offsets = [0, 0], sizes = [2, 128], strides = [1, 1]} : vector<2x512xf32> to vector<2x128xf32>
    %510 = arith.negf %509 : vector<2x128xf32>
    %511 = math.exp %510 : vector<2x128xf32>
    %cst_214 = arith.constant 1.000000e+00 : f32
    %512 = vector.broadcast %cst_214 : f32 to vector<2x128xf32>
    %513 = arith.addf %512, %511 : vector<2x128xf32>
    %514 = arith.divf %512, %513 : vector<2x128xf32>
    %515 = vector.extract_strided_slice %508 {offsets = [0, 128], sizes = [2, 128], strides = [1, 1]} : vector<2x512xf32> to vector<2x128xf32>
    %516 = arith.negf %515 : vector<2x128xf32>
    %517 = math.exp %516 : vector<2x128xf32>
    %cst_215 = arith.constant 1.000000e+00 : f32
    %518 = vector.broadcast %cst_215 : f32 to vector<2x128xf32>
    %519 = arith.addf %518, %517 : vector<2x128xf32>
    %520 = arith.divf %518, %519 : vector<2x128xf32>
    %521 = vector.extract_strided_slice %508 {offsets = [0, 256], sizes = [2, 128], strides = [1, 1]} : vector<2x512xf32> to vector<2x128xf32>
    %522 = math.tanh %521 : vector<2x128xf32>
    %523 = vector.extract_strided_slice %508 {offsets = [0, 384], sizes = [2, 128], strides = [1, 1]} : vector<2x512xf32> to vector<2x128xf32>
    %524 = arith.negf %523 : vector<2x128xf32>
    %525 = math.exp %524 : vector<2x128xf32>
    %cst_216 = arith.constant 1.000000e+00 : f32
    %526 = vector.broadcast %cst_216 : f32 to vector<2x128xf32>
    %527 = arith.addf %526, %525 : vector<2x128xf32>
    %528 = arith.divf %526, %527 : vector<2x128xf32>
    %529 = arith.mulf %520, %505 : vector<2x128xf32>
    %530 = arith.mulf %514, %522 : vector<2x128xf32>
    %531 = arith.addf %529, %530 : vector<2x128xf32>
    %532 = math.tanh %531 : vector<2x128xf32>
    %533 = arith.mulf %528, %532 : vector<2x128xf32>
    %534 = vector.broadcast %503 : vector<2x1xf32> to vector<2x128xf32>
    %535 = arith.mulf %534, %531 : vector<2x128xf32>
    %cst_217 = arith.constant 1.000000e+00 : f32
    %536 = vector.broadcast %cst_217 : f32 to vector<2x1xf32>
    %537 = arith.subf %536, %503 : vector<2x1xf32>
    %538 = vector.broadcast %537 : vector<2x1xf32> to vector<2x128xf32>
    %539 = arith.mulf %538, %505 : vector<2x128xf32>
    %540 = arith.addf %535, %539 : vector<2x128xf32>
    %c0_218 = arith.constant 0 : index
    %c0_219 = arith.constant 0 : index
    %541 = vector.load %arg13[%c0_218, %c0_219] : memref<2x128xf32, #tpu.memory_space<vmem>>, vector<2x128xf32>
    tpu.vector_store %arg13[%c0_218, %c0_219], %540 {strides = array<i32>} : memref<2x128xf32, #tpu.memory_space<vmem>>, vector<2x128xf32>,
    %542 = vector.broadcast %503 : vector<2x1xf32> to vector<2x128xf32>
    %543 = arith.mulf %542, %533 : vector<2x128xf32>
    %cst_220 = arith.constant 1.000000e+00 : f32
    %544 = vector.broadcast %cst_220 : f32 to vector<2x1xf32>
    %545 = arith.subf %544, %503 : vector<2x1xf32>
    %546 = vector.broadcast %545 : vector<2x1xf32> to vector<2x128xf32>
    %547 = arith.mulf %546, %504 : vector<2x128xf32>
    %548 = arith.addf %543, %547 : vector<2x128xf32>
    %c0_221 = arith.constant 0 : index
    %c0_222 = arith.constant 0 : index
    %549 = vector.load %arg12[%c0_221, %c0_222] : memref<2x128xf32, #tpu.memory_space<vmem>>, vector<2x128xf32>
    tpu.vector_store %arg12[%c0_221, %c0_222], %548 {strides = array<i32>} : memref<2x128xf32, #tpu.memory_space<vmem>>, vector<2x128xf32>,
    %550 = vector.broadcast %503 : vector<2x1xf32> to vector<2x128xf32>
    %551 = arith.mulf %550, %533 : vector<2x128xf32>
    %c0_223 = arith.constant 0 : index
    %c3_224 = arith.constant 3 : index
    %c0_225 = arith.constant 0 : index
    %552 = vector.load %arg9[%c0_223, %c3_224, %c0_225] : memref<2x8x128xf32, #tpu.memory_space<vmem>>, vector<2x1x128xf32>
    %553 = vector.shape_cast %552 : vector<2x1x128xf32> to vector<2x128xf32>
    %554 = vector.shape_cast %551 : vector<2x128xf32> to vector<2x1x128xf32>
    tpu.vector_store %arg9[%c0_223, %c3_224, %c0_225], %554 {strides = array<i32>} : memref<2x8x128xf32, #tpu.memory_space<vmem>>, vector<2x1x128xf32>,
    %c0_226 = arith.constant 0 : index
    %c5_227 = arith.constant 5 : index
    %c0_228 = arith.constant 0 : index
    %555 = vector.load %arg2[%c0_226, %c5_227, %c0_228] : memref<2x8x512xf32, #tpu.memory_space<vmem>>, vector<2x1x512xf32>
    %556 = vector.shape_cast %555 : vector<2x1x512xf32> to vector<2x512xf32>
    %c0_229 = arith.constant 0 : index
    %c5_230 = arith.constant 5 : index
    %c0_231 = arith.constant 0 : index
    %557 = vector.load %arg4[%c0_229, %c5_230, %c0_231] : memref<2x8x1xf32, #tpu.memory_space<vmem>>, vector<2x1x1xf32>
    %558 = vector.shape_cast %557 : vector<2x1x1xf32> to vector<2x1xf32>
    %c0_232 = arith.constant 0 : index
    %c0_233 = arith.constant 0 : index
    %559 = vector.load %arg10[%c0_232, %c0_233] : memref<2x128xf32, #tpu.memory_space<vmem>>, vector<2x128xf32>
    %c0_234 = arith.constant 0 : index
    %c0_235 = arith.constant 0 : index
    %560 = vector.load %arg11[%c0_234, %c0_235] : memref<2x128xf32, #tpu.memory_space<vmem>>, vector<2x128xf32>
    %561 = arith.truncf %559 : vector<2x128xf32> to vector<2x128xbf16>
    %cst_236 = arith.constant dense<0.000000e+00> : vector<2x512xf32>
    %562 = tpu.matmul %561, %3, %cst_236 {dimension_numbers = #tpu.dot_dimension_numbers<[1], [0], [0], [1], [0, 0, 1, 1], [], []>} : vector<2x128xbf16>, vector<128x512xbf16>, vector<2x512xf32> -> vector<2x512xf32>
    %563 = arith.addf %556, %562 : vector<2x512xf32>
    %564 = vector.extract_strided_slice %563 {offsets = [0, 0], sizes = [2, 128], strides = [1, 1]} : vector<2x512xf32> to vector<2x128xf32>
    %565 = arith.negf %564 : vector<2x128xf32>
    %566 = math.exp %565 : vector<2x128xf32>
    %cst_237 = arith.constant 1.000000e+00 : f32
    %567 = vector.broadcast %cst_237 : f32 to vector<2x128xf32>
    %568 = arith.addf %567, %566 : vector<2x128xf32>
    %569 = arith.divf %567, %568 : vector<2x128xf32>
    %570 = vector.extract_strided_slice %563 {offsets = [0, 128], sizes = [2, 128], strides = [1, 1]} : vector<2x512xf32> to vector<2x128xf32>
    %571 = arith.negf %570 : vector<2x128xf32>
    %572 = math.exp %571 : vector<2x128xf32>
    %cst_238 = arith.constant 1.000000e+00 : f32
    %573 = vector.broadcast %cst_238 : f32 to vector<2x128xf32>
    %574 = arith.addf %573, %572 : vector<2x128xf32>
    %575 = arith.divf %573, %574 : vector<2x128xf32>
    %576 = vector.extract_strided_slice %563 {offsets = [0, 256], sizes = [2, 128], strides = [1, 1]} : vector<2x512xf32> to vector<2x128xf32>
    %577 = math.tanh %576 : vector<2x128xf32>
    %578 = vector.extract_strided_slice %563 {offsets = [0, 384], sizes = [2, 128], strides = [1, 1]} : vector<2x512xf32> to vector<2x128xf32>
    %579 = arith.negf %578 : vector<2x128xf32>
    %580 = math.exp %579 : vector<2x128xf32>
    %cst_239 = arith.constant 1.000000e+00 : f32
    %581 = vector.broadcast %cst_239 : f32 to vector<2x128xf32>
    %582 = arith.addf %581, %580 : vector<2x128xf32>
    %583 = arith.divf %581, %582 : vector<2x128xf32>
    %584 = arith.mulf %575, %560 : vector<2x128xf32>
    %585 = arith.mulf %569, %577 : vector<2x128xf32>
    %586 = arith.addf %584, %585 : vector<2x128xf32>
    %587 = math.tanh %586 : vector<2x128xf32>
    %588 = arith.mulf %583, %587 : vector<2x128xf32>
    %589 = vector.broadcast %558 : vector<2x1xf32> to vector<2x128xf32>
    %590 = arith.mulf %589, %586 : vector<2x128xf32>
    %cst_240 = arith.constant 1.000000e+00 : f32
    %591 = vector.broadcast %cst_240 : f32 to vector<2x1xf32>
    %592 = arith.subf %591, %558 : vector<2x1xf32>
    %593 = vector.broadcast %592 : vector<2x1xf32> to vector<2x128xf32>
    %594 = arith.mulf %593, %560 : vector<2x128xf32>
    %595 = arith.addf %590, %594 : vector<2x128xf32>
    %c0_241 = arith.constant 0 : index
    %c0_242 = arith.constant 0 : index
    %596 = vector.load %arg11[%c0_241, %c0_242] : memref<2x128xf32, #tpu.memory_space<vmem>>, vector<2x128xf32>
    tpu.vector_store %arg11[%c0_241, %c0_242], %595 {strides = array<i32>} : memref<2x128xf32, #tpu.memory_space<vmem>>, vector<2x128xf32>,
    %597 = vector.broadcast %558 : vector<2x1xf32> to vector<2x128xf32>
    %598 = arith.mulf %597, %588 : vector<2x128xf32>
    %cst_243 = arith.constant 1.000000e+00 : f32
    %599 = vector.broadcast %cst_243 : f32 to vector<2x1xf32>
    %600 = arith.subf %599, %558 : vector<2x1xf32>
    %601 = vector.broadcast %600 : vector<2x1xf32> to vector<2x128xf32>
    %602 = arith.mulf %601, %559 : vector<2x128xf32>
    %603 = arith.addf %598, %602 : vector<2x128xf32>
    %c0_244 = arith.constant 0 : index
    %c0_245 = arith.constant 0 : index
    %604 = vector.load %arg10[%c0_244, %c0_245] : memref<2x128xf32, #tpu.memory_space<vmem>>, vector<2x128xf32>
    tpu.vector_store %arg10[%c0_244, %c0_245], %603 {strides = array<i32>} : memref<2x128xf32, #tpu.memory_space<vmem>>, vector<2x128xf32>,
    %605 = vector.broadcast %558 : vector<2x1xf32> to vector<2x128xf32>
    %606 = arith.mulf %605, %588 : vector<2x128xf32>
    %c0_246 = arith.constant 0 : index
    %c5_247 = arith.constant 5 : index
    %c0_248 = arith.constant 0 : index
    %607 = vector.load %arg8[%c0_246, %c5_247, %c0_248] : memref<2x8x128xf32, #tpu.memory_space<vmem>>, vector<2x1x128xf32>
    %608 = vector.shape_cast %607 : vector<2x1x128xf32> to vector<2x128xf32>
    %609 = vector.shape_cast %606 : vector<2x128xf32> to vector<2x1x128xf32>
    tpu.vector_store %arg8[%c0_246, %c5_247, %c0_248], %609 {strides = array<i32>} : memref<2x8x128xf32, #tpu.memory_space<vmem>>, vector<2x1x128xf32>,
    %c0_249 = arith.constant 0 : index
    %c2_250 = arith.constant 2 : index
    %c0_251 = arith.constant 0 : index
    %610 = vector.load %arg3[%c0_249, %c2_250, %c0_251] : memref<2x8x512xf32, #tpu.memory_space<vmem>>, vector<2x1x512xf32>
    %611 = vector.shape_cast %610 : vector<2x1x512xf32> to vector<2x512xf32>
    %c0_252 = arith.constant 0 : index
    %c2_253 = arith.constant 2 : index
    %c0_254 = arith.constant 0 : index
    %612 = vector.load %arg5[%c0_252, %c2_253, %c0_254] : memref<2x8x1xf32, #tpu.memory_space<vmem>>, vector<2x1x1xf32>
    %613 = vector.shape_cast %612 : vector<2x1x1xf32> to vector<2x1xf32>
    %c0_255 = arith.constant 0 : index
    %c0_256 = arith.constant 0 : index
    %614 = vector.load %arg12[%c0_255, %c0_256] : memref<2x128xf32, #tpu.memory_space<vmem>>, vector<2x128xf32>
    %c0_257 = arith.constant 0 : index
    %c0_258 = arith.constant 0 : index
    %615 = vector.load %arg13[%c0_257, %c0_258] : memref<2x128xf32, #tpu.memory_space<vmem>>, vector<2x128xf32>
    %616 = arith.truncf %614 : vector<2x128xf32> to vector<2x128xbf16>
    %cst_259 = arith.constant dense<0.000000e+00> : vector<2x512xf32>
    %617 = tpu.matmul %616, %4, %cst_259 {dimension_numbers = #tpu.dot_dimension_numbers<[1], [0], [0], [1], [0, 0, 1, 1], [], []>} : vector<2x128xbf16>, vector<128x512xbf16>, vector<2x512xf32> -> vector<2x512xf32>
    %618 = arith.addf %611, %617 : vector<2x512xf32>
    %619 = vector.extract_strided_slice %618 {offsets = [0, 0], sizes = [2, 128], strides = [1, 1]} : vector<2x512xf32> to vector<2x128xf32>
    %620 = arith.negf %619 : vector<2x128xf32>
    %621 = math.exp %620 : vector<2x128xf32>
    %cst_260 = arith.constant 1.000000e+00 : f32
    %622 = vector.broadcast %cst_260 : f32 to vector<2x128xf32>
    %623 = arith.addf %622, %621 : vector<2x128xf32>
    %624 = arith.divf %622, %623 : vector<2x128xf32>
    %625 = vector.extract_strided_slice %618 {offsets = [0, 128], sizes = [2, 128], strides = [1, 1]} : vector<2x512xf32> to vector<2x128xf32>
    %626 = arith.negf %625 : vector<2x128xf32>
    %627 = math.exp %626 : vector<2x128xf32>
    %cst_261 = arith.constant 1.000000e+00 : f32
    %628 = vector.broadcast %cst_261 : f32 to vector<2x128xf32>
    %629 = arith.addf %628, %627 : vector<2x128xf32>
    %630 = arith.divf %628, %629 : vector<2x128xf32>
    %631 = vector.extract_strided_slice %618 {offsets = [0, 256], sizes = [2, 128], strides = [1, 1]} : vector<2x512xf32> to vector<2x128xf32>
    %632 = math.tanh %631 : vector<2x128xf32>
    %633 = vector.extract_strided_slice %618 {offsets = [0, 384], sizes = [2, 128], strides = [1, 1]} : vector<2x512xf32> to vector<2x128xf32>
    %634 = arith.negf %633 : vector<2x128xf32>
    %635 = math.exp %634 : vector<2x128xf32>
    %cst_262 = arith.constant 1.000000e+00 : f32
    %636 = vector.broadcast %cst_262 : f32 to vector<2x128xf32>
    %637 = arith.addf %636, %635 : vector<2x128xf32>
    %638 = arith.divf %636, %637 : vector<2x128xf32>
    %639 = arith.mulf %630, %615 : vector<2x128xf32>
    %640 = arith.mulf %624, %632 : vector<2x128xf32>
    %641 = arith.addf %639, %640 : vector<2x128xf32>
    %642 = math.tanh %641 : vector<2x128xf32>
    %643 = arith.mulf %638, %642 : vector<2x128xf32>
    %644 = vector.broadcast %613 : vector<2x1xf32> to vector<2x128xf32>
    %645 = arith.mulf %644, %641 : vector<2x128xf32>
    %cst_263 = arith.constant 1.000000e+00 : f32
    %646 = vector.broadcast %cst_263 : f32 to vector<2x1xf32>
    %647 = arith.subf %646, %613 : vector<2x1xf32>
    %648 = vector.broadcast %647 : vector<2x1xf32> to vector<2x128xf32>
    %649 = arith.mulf %648, %615 : vector<2x128xf32>
    %650 = arith.addf %645, %649 : vector<2x128xf32>
    %c0_264 = arith.constant 0 : index
    %c0_265 = arith.constant 0 : index
    %651 = vector.load %arg13[%c0_264, %c0_265] : memref<2x128xf32, #tpu.memory_space<vmem>>, vector<2x128xf32>
    tpu.vector_store %arg13[%c0_264, %c0_265], %650 {strides = array<i32>} : memref<2x128xf32, #tpu.memory_space<vmem>>, vector<2x128xf32>,
    %652 = vector.broadcast %613 : vector<2x1xf32> to vector<2x128xf32>
    %653 = arith.mulf %652, %643 : vector<2x128xf32>
    %cst_266 = arith.constant 1.000000e+00 : f32
    %654 = vector.broadcast %cst_266 : f32 to vector<2x1xf32>
    %655 = arith.subf %654, %613 : vector<2x1xf32>
    %656 = vector.broadcast %655 : vector<2x1xf32> to vector<2x128xf32>
    %657 = arith.mulf %656, %614 : vector<2x128xf32>
    %658 = arith.addf %653, %657 : vector<2x128xf32>
    %c0_267 = arith.constant 0 : index
    %c0_268 = arith.constant 0 : index
    %659 = vector.load %arg12[%c0_267, %c0_268] : memref<2x128xf32, #tpu.memory_space<vmem>>, vector<2x128xf32>
    tpu.vector_store %arg12[%c0_267, %c0_268], %658 {strides = array<i32>} : memref<2x128xf32, #tpu.memory_space<vmem>>, vector<2x128xf32>,
    %660 = vector.broadcast %613 : vector<2x1xf32> to vector<2x128xf32>
    %661 = arith.mulf %660, %643 : vector<2x128xf32>
    %c0_269 = arith.constant 0 : index
    %c2_270 = arith.constant 2 : index
    %c0_271 = arith.constant 0 : index
    %662 = vector.load %arg9[%c0_269, %c2_270, %c0_271] : memref<2x8x128xf32, #tpu.memory_space<vmem>>, vector<2x1x128xf32>
    %663 = vector.shape_cast %662 : vector<2x1x128xf32> to vector<2x128xf32>
    %664 = vector.shape_cast %661 : vector<2x128xf32> to vector<2x1x128xf32>
    tpu.vector_store %arg9[%c0_269, %c2_270, %c0_271], %664 {strides = array<i32>} : memref<2x8x128xf32, #tpu.memory_space<vmem>>, vector<2x1x128xf32>,
    %c0_272 = arith.constant 0 : index
    %c6_273 = arith.constant 6 : index
    %c0_274 = arith.constant 0 : index
    %665 = vector.load %arg2[%c0_272, %c6_273, %c0_274] : memref<2x8x512xf32, #tpu.memory_space<vmem>>, vector<2x1x512xf32>
    %666 = vector.shape_cast %665 : vector<2x1x512xf32> to vector<2x512xf32>
    %c0_275 = arith.constant 0 : index
    %c6_276 = arith.constant 6 : index
    %c0_277 = arith.constant 0 : index
    %667 = vector.load %arg4[%c0_275, %c6_276, %c0_277] : memref<2x8x1xf32, #tpu.memory_space<vmem>>, vector<2x1x1xf32>
    %668 = vector.shape_cast %667 : vector<2x1x1xf32> to vector<2x1xf32>
    %c0_278 = arith.constant 0 : index
    %c0_279 = arith.constant 0 : index
    %669 = vector.load %arg10[%c0_278, %c0_279] : memref<2x128xf32, #tpu.memory_space<vmem>>, vector<2x128xf32>
    %c0_280 = arith.constant 0 : index
    %c0_281 = arith.constant 0 : index
    %670 = vector.load %arg11[%c0_280, %c0_281] : memref<2x128xf32, #tpu.memory_space<vmem>>, vector<2x128xf32>
    %671 = arith.truncf %669 : vector<2x128xf32> to vector<2x128xbf16>
    %cst_282 = arith.constant dense<0.000000e+00> : vector<2x512xf32>
    %672 = tpu.matmul %671, %3, %cst_282 {dimension_numbers = #tpu.dot_dimension_numbers<[1], [0], [0], [1], [0, 0, 1, 1], [], []>} : vector<2x128xbf16>, vector<128x512xbf16>, vector<2x512xf32> -> vector<2x512xf32>
    %673 = arith.addf %666, %672 : vector<2x512xf32>
    %674 = vector.extract_strided_slice %673 {offsets = [0, 0], sizes = [2, 128], strides = [1, 1]} : vector<2x512xf32> to vector<2x128xf32>
    %675 = arith.negf %674 : vector<2x128xf32>
    %676 = math.exp %675 : vector<2x128xf32>
    %cst_283 = arith.constant 1.000000e+00 : f32
    %677 = vector.broadcast %cst_283 : f32 to vector<2x128xf32>
    %678 = arith.addf %677, %676 : vector<2x128xf32>
    %679 = arith.divf %677, %678 : vector<2x128xf32>
    %680 = vector.extract_strided_slice %673 {offsets = [0, 128], sizes = [2, 128], strides = [1, 1]} : vector<2x512xf32> to vector<2x128xf32>
    %681 = arith.negf %680 : vector<2x128xf32>
    %682 = math.exp %681 : vector<2x128xf32>
    %cst_284 = arith.constant 1.000000e+00 : f32
    %683 = vector.broadcast %cst_284 : f32 to vector<2x128xf32>
    %684 = arith.addf %683, %682 : vector<2x128xf32>
    %685 = arith.divf %683, %684 : vector<2x128xf32>
    %686 = vector.extract_strided_slice %673 {offsets = [0, 256], sizes = [2, 128], strides = [1, 1]} : vector<2x512xf32> to vector<2x128xf32>
    %687 = math.tanh %686 : vector<2x128xf32>
    %688 = vector.extract_strided_slice %673 {offsets = [0, 384], sizes = [2, 128], strides = [1, 1]} : vector<2x512xf32> to vector<2x128xf32>
    %689 = arith.negf %688 : vector<2x128xf32>
    %690 = math.exp %689 : vector<2x128xf32>
    %cst_285 = arith.constant 1.000000e+00 : f32
    %691 = vector.broadcast %cst_285 : f32 to vector<2x128xf32>
    %692 = arith.addf %691, %690 : vector<2x128xf32>
    %693 = arith.divf %691, %692 : vector<2x128xf32>
    %694 = arith.mulf %685, %670 : vector<2x128xf32>
    %695 = arith.mulf %679, %687 : vector<2x128xf32>
    %696 = arith.addf %694, %695 : vector<2x128xf32>
    %697 = math.tanh %696 : vector<2x128xf32>
    %698 = arith.mulf %693, %697 : vector<2x128xf32>
    %699 = vector.broadcast %668 : vector<2x1xf32> to vector<2x128xf32>
    %700 = arith.mulf %699, %696 : vector<2x128xf32>
    %cst_286 = arith.constant 1.000000e+00 : f32
    %701 = vector.broadcast %cst_286 : f32 to vector<2x1xf32>
    %702 = arith.subf %701, %668 : vector<2x1xf32>
    %703 = vector.broadcast %702 : vector<2x1xf32> to vector<2x128xf32>
    %704 = arith.mulf %703, %670 : vector<2x128xf32>
    %705 = arith.addf %700, %704 : vector<2x128xf32>
    %c0_287 = arith.constant 0 : index
    %c0_288 = arith.constant 0 : index
    %706 = vector.load %arg11[%c0_287, %c0_288] : memref<2x128xf32, #tpu.memory_space<vmem>>, vector<2x128xf32>
    tpu.vector_store %arg11[%c0_287, %c0_288], %705 {strides = array<i32>} : memref<2x128xf32, #tpu.memory_space<vmem>>, vector<2x128xf32>,
    %707 = vector.broadcast %668 : vector<2x1xf32> to vector<2x128xf32>
    %708 = arith.mulf %707, %698 : vector<2x128xf32>
    %cst_289 = arith.constant 1.000000e+00 : f32
    %709 = vector.broadcast %cst_289 : f32 to vector<2x1xf32>
    %710 = arith.subf %709, %668 : vector<2x1xf32>
    %711 = vector.broadcast %710 : vector<2x1xf32> to vector<2x128xf32>
    %712 = arith.mulf %711, %669 : vector<2x128xf32>
    %713 = arith.addf %708, %712 : vector<2x128xf32>
    %c0_290 = arith.constant 0 : index
    %c0_291 = arith.constant 0 : index
    %714 = vector.load %arg10[%c0_290, %c0_291] : memref<2x128xf32, #tpu.memory_space<vmem>>, vector<2x128xf32>
    tpu.vector_store %arg10[%c0_290, %c0_291], %713 {strides = array<i32>} : memref<2x128xf32, #tpu.memory_space<vmem>>, vector<2x128xf32>,
    %715 = vector.broadcast %668 : vector<2x1xf32> to vector<2x128xf32>
    %716 = arith.mulf %715, %698 : vector<2x128xf32>
    %c0_292 = arith.constant 0 : index
    %c6_293 = arith.constant 6 : index
    %c0_294 = arith.constant 0 : index
    %717 = vector.load %arg8[%c0_292, %c6_293, %c0_294] : memref<2x8x128xf32, #tpu.memory_space<vmem>>, vector<2x1x128xf32>
    %718 = vector.shape_cast %717 : vector<2x1x128xf32> to vector<2x128xf32>
    %719 = vector.shape_cast %716 : vector<2x128xf32> to vector<2x1x128xf32>
    tpu.vector_store %arg8[%c0_292, %c6_293, %c0_294], %719 {strides = array<i32>} : memref<2x8x128xf32, #tpu.memory_space<vmem>>, vector<2x1x128xf32>,
    %c0_295 = arith.constant 0 : index
    %c1_296 = arith.constant 1 : index
    %c0_297 = arith.constant 0 : index
    %720 = vector.load %arg3[%c0_295, %c1_296, %c0_297] : memref<2x8x512xf32, #tpu.memory_space<vmem>>, vector<2x1x512xf32>
    %721 = vector.shape_cast %720 : vector<2x1x512xf32> to vector<2x512xf32>
    %c0_298 = arith.constant 0 : index
    %c1_299 = arith.constant 1 : index
    %c0_300 = arith.constant 0 : index
    %722 = vector.load %arg5[%c0_298, %c1_299, %c0_300] : memref<2x8x1xf32, #tpu.memory_space<vmem>>, vector<2x1x1xf32>
    %723 = vector.shape_cast %722 : vector<2x1x1xf32> to vector<2x1xf32>
    %c0_301 = arith.constant 0 : index
    %c0_302 = arith.constant 0 : index
    %724 = vector.load %arg12[%c0_301, %c0_302] : memref<2x128xf32, #tpu.memory_space<vmem>>, vector<2x128xf32>
    %c0_303 = arith.constant 0 : index
    %c0_304 = arith.constant 0 : index
    %725 = vector.load %arg13[%c0_303, %c0_304] : memref<2x128xf32, #tpu.memory_space<vmem>>, vector<2x128xf32>
    %726 = arith.truncf %724 : vector<2x128xf32> to vector<2x128xbf16>
    %cst_305 = arith.constant dense<0.000000e+00> : vector<2x512xf32>
    %727 = tpu.matmul %726, %4, %cst_305 {dimension_numbers = #tpu.dot_dimension_numbers<[1], [0], [0], [1], [0, 0, 1, 1], [], []>} : vector<2x128xbf16>, vector<128x512xbf16>, vector<2x512xf32> -> vector<2x512xf32>
    %728 = arith.addf %721, %727 : vector<2x512xf32>
    %729 = vector.extract_strided_slice %728 {offsets = [0, 0], sizes = [2, 128], strides = [1, 1]} : vector<2x512xf32> to vector<2x128xf32>
    %730 = arith.negf %729 : vector<2x128xf32>
    %731 = math.exp %730 : vector<2x128xf32>
    %cst_306 = arith.constant 1.000000e+00 : f32
    %732 = vector.broadcast %cst_306 : f32 to vector<2x128xf32>
    %733 = arith.addf %732, %731 : vector<2x128xf32>
    %734 = arith.divf %732, %733 : vector<2x128xf32>
    %735 = vector.extract_strided_slice %728 {offsets = [0, 128], sizes = [2, 128], strides = [1, 1]} : vector<2x512xf32> to vector<2x128xf32>
    %736 = arith.negf %735 : vector<2x128xf32>
    %737 = math.exp %736 : vector<2x128xf32>
    %cst_307 = arith.constant 1.000000e+00 : f32
    %738 = vector.broadcast %cst_307 : f32 to vector<2x128xf32>
    %739 = arith.addf %738, %737 : vector<2x128xf32>
    %740 = arith.divf %738, %739 : vector<2x128xf32>
    %741 = vector.extract_strided_slice %728 {offsets = [0, 256], sizes = [2, 128], strides = [1, 1]} : vector<2x512xf32> to vector<2x128xf32>
    %742 = math.tanh %741 : vector<2x128xf32>
    %743 = vector.extract_strided_slice %728 {offsets = [0, 384], sizes = [2, 128], strides = [1, 1]} : vector<2x512xf32> to vector<2x128xf32>
    %744 = arith.negf %743 : vector<2x128xf32>
    %745 = math.exp %744 : vector<2x128xf32>
    %cst_308 = arith.constant 1.000000e+00 : f32
    %746 = vector.broadcast %cst_308 : f32 to vector<2x128xf32>
    %747 = arith.addf %746, %745 : vector<2x128xf32>
    %748 = arith.divf %746, %747 : vector<2x128xf32>
    %749 = arith.mulf %740, %725 : vector<2x128xf32>
    %750 = arith.mulf %734, %742 : vector<2x128xf32>
    %751 = arith.addf %749, %750 : vector<2x128xf32>
    %752 = math.tanh %751 : vector<2x128xf32>
    %753 = arith.mulf %748, %752 : vector<2x128xf32>
    %754 = vector.broadcast %723 : vector<2x1xf32> to vector<2x128xf32>
    %755 = arith.mulf %754, %751 : vector<2x128xf32>
    %cst_309 = arith.constant 1.000000e+00 : f32
    %756 = vector.broadcast %cst_309 : f32 to vector<2x1xf32>
    %757 = arith.subf %756, %723 : vector<2x1xf32>
    %758 = vector.broadcast %757 : vector<2x1xf32> to vector<2x128xf32>
    %759 = arith.mulf %758, %725 : vector<2x128xf32>
    %760 = arith.addf %755, %759 : vector<2x128xf32>
    %c0_310 = arith.constant 0 : index
    %c0_311 = arith.constant 0 : index
    %761 = vector.load %arg13[%c0_310, %c0_311] : memref<2x128xf32, #tpu.memory_space<vmem>>, vector<2x128xf32>
    tpu.vector_store %arg13[%c0_310, %c0_311], %760 {strides = array<i32>} : memref<2x128xf32, #tpu.memory_space<vmem>>, vector<2x128xf32>,
    %762 = vector.broadcast %723 : vector<2x1xf32> to vector<2x128xf32>
    %763 = arith.mulf %762, %753 : vector<2x128xf32>
    %cst_312 = arith.constant 1.000000e+00 : f32
    %764 = vector.broadcast %cst_312 : f32 to vector<2x1xf32>
    %765 = arith.subf %764, %723 : vector<2x1xf32>
    %766 = vector.broadcast %765 : vector<2x1xf32> to vector<2x128xf32>
    %767 = arith.mulf %766, %724 : vector<2x128xf32>
    %768 = arith.addf %763, %767 : vector<2x128xf32>
    %c0_313 = arith.constant 0 : index
    %c0_314 = arith.constant 0 : index
    %769 = vector.load %arg12[%c0_313, %c0_314] : memref<2x128xf32, #tpu.memory_space<vmem>>, vector<2x128xf32>
    tpu.vector_store %arg12[%c0_313, %c0_314], %768 {strides = array<i32>} : memref<2x128xf32, #tpu.memory_space<vmem>>, vector<2x128xf32>,
    %770 = vector.broadcast %723 : vector<2x1xf32> to vector<2x128xf32>
    %771 = arith.mulf %770, %753 : vector<2x128xf32>
    %c0_315 = arith.constant 0 : index
    %c1_316 = arith.constant 1 : index
    %c0_317 = arith.constant 0 : index
    %772 = vector.load %arg9[%c0_315, %c1_316, %c0_317] : memref<2x8x128xf32, #tpu.memory_space<vmem>>, vector<2x1x128xf32>
    %773 = vector.shape_cast %772 : vector<2x1x128xf32> to vector<2x128xf32>
    %774 = vector.shape_cast %771 : vector<2x128xf32> to vector<2x1x128xf32>
    tpu.vector_store %arg9[%c0_315, %c1_316, %c0_317], %774 {strides = array<i32>} : memref<2x8x128xf32, #tpu.memory_space<vmem>>, vector<2x1x128xf32>,
    %c0_318 = arith.constant 0 : index
    %c7_319 = arith.constant 7 : index
    %c0_320 = arith.constant 0 : index
    %775 = vector.load %arg2[%c0_318, %c7_319, %c0_320] : memref<2x8x512xf32, #tpu.memory_space<vmem>>, vector<2x1x512xf32>
    %776 = vector.shape_cast %775 : vector<2x1x512xf32> to vector<2x512xf32>
    %c0_321 = arith.constant 0 : index
    %c7_322 = arith.constant 7 : index
    %c0_323 = arith.constant 0 : index
    %777 = vector.load %arg4[%c0_321, %c7_322, %c0_323] : memref<2x8x1xf32, #tpu.memory_space<vmem>>, vector<2x1x1xf32>
    %778 = vector.shape_cast %777 : vector<2x1x1xf32> to vector<2x1xf32>
    %c0_324 = arith.constant 0 : index
    %c0_325 = arith.constant 0 : index
    %779 = vector.load %arg10[%c0_324, %c0_325] : memref<2x128xf32, #tpu.memory_space<vmem>>, vector<2x128xf32>
    %c0_326 = arith.constant 0 : index
    %c0_327 = arith.constant 0 : index
    %780 = vector.load %arg11[%c0_326, %c0_327] : memref<2x128xf32, #tpu.memory_space<vmem>>, vector<2x128xf32>
    %781 = arith.truncf %779 : vector<2x128xf32> to vector<2x128xbf16>
    %cst_328 = arith.constant dense<0.000000e+00> : vector<2x512xf32>
    %782 = tpu.matmul %781, %3, %cst_328 {dimension_numbers = #tpu.dot_dimension_numbers<[1], [0], [0], [1], [0, 0, 1, 1], [], []>} : vector<2x128xbf16>, vector<128x512xbf16>, vector<2x512xf32> -> vector<2x512xf32>
    %783 = arith.addf %776, %782 : vector<2x512xf32>
    %784 = vector.extract_strided_slice %783 {offsets = [0, 0], sizes = [2, 128], strides = [1, 1]} : vector<2x512xf32> to vector<2x128xf32>
    %785 = arith.negf %784 : vector<2x128xf32>
    %786 = math.exp %785 : vector<2x128xf32>
    %cst_329 = arith.constant 1.000000e+00 : f32
    %787 = vector.broadcast %cst_329 : f32 to vector<2x128xf32>
    %788 = arith.addf %787, %786 : vector<2x128xf32>
    %789 = arith.divf %787, %788 : vector<2x128xf32>
    %790 = vector.extract_strided_slice %783 {offsets = [0, 128], sizes = [2, 128], strides = [1, 1]} : vector<2x512xf32> to vector<2x128xf32>
    %791 = arith.negf %790 : vector<2x128xf32>
    %792 = math.exp %791 : vector<2x128xf32>
    %cst_330 = arith.constant 1.000000e+00 : f32
    %793 = vector.broadcast %cst_330 : f32 to vector<2x128xf32>
    %794 = arith.addf %793, %792 : vector<2x128xf32>
    %795 = arith.divf %793, %794 : vector<2x128xf32>
    %796 = vector.extract_strided_slice %783 {offsets = [0, 256], sizes = [2, 128], strides = [1, 1]} : vector<2x512xf32> to vector<2x128xf32>
    %797 = math.tanh %796 : vector<2x128xf32>
    %798 = vector.extract_strided_slice %783 {offsets = [0, 384], sizes = [2, 128], strides = [1, 1]} : vector<2x512xf32> to vector<2x128xf32>
    %799 = arith.negf %798 : vector<2x128xf32>
    %800 = math.exp %799 : vector<2x128xf32>
    %cst_331 = arith.constant 1.000000e+00 : f32
    %801 = vector.broadcast %cst_331 : f32 to vector<2x128xf32>
    %802 = arith.addf %801, %800 : vector<2x128xf32>
    %803 = arith.divf %801, %802 : vector<2x128xf32>
    %804 = arith.mulf %795, %780 : vector<2x128xf32>
    %805 = arith.mulf %789, %797 : vector<2x128xf32>
    %806 = arith.addf %804, %805 : vector<2x128xf32>
    %807 = math.tanh %806 : vector<2x128xf32>
    %808 = arith.mulf %803, %807 : vector<2x128xf32>
    %809 = vector.broadcast %778 : vector<2x1xf32> to vector<2x128xf32>
    %810 = arith.mulf %809, %806 : vector<2x128xf32>
    %cst_332 = arith.constant 1.000000e+00 : f32
    %811 = vector.broadcast %cst_332 : f32 to vector<2x1xf32>
    %812 = arith.subf %811, %778 : vector<2x1xf32>
    %813 = vector.broadcast %812 : vector<2x1xf32> to vector<2x128xf32>
    %814 = arith.mulf %813, %780 : vector<2x128xf32>
    %815 = arith.addf %810, %814 : vector<2x128xf32>
    %c0_333 = arith.constant 0 : index
    %c0_334 = arith.constant 0 : index
    %816 = vector.load %arg11[%c0_333, %c0_334] : memref<2x128xf32, #tpu.memory_space<vmem>>, vector<2x128xf32>
    tpu.vector_store %arg11[%c0_333, %c0_334], %815 {strides = array<i32>} : memref<2x128xf32, #tpu.memory_space<vmem>>, vector<2x128xf32>,
    %817 = vector.broadcast %778 : vector<2x1xf32> to vector<2x128xf32>
    %818 = arith.mulf %817, %808 : vector<2x128xf32>
    %cst_335 = arith.constant 1.000000e+00 : f32
    %819 = vector.broadcast %cst_335 : f32 to vector<2x1xf32>
    %820 = arith.subf %819, %778 : vector<2x1xf32>
    %821 = vector.broadcast %820 : vector<2x1xf32> to vector<2x128xf32>
    %822 = arith.mulf %821, %779 : vector<2x128xf32>
    %823 = arith.addf %818, %822 : vector<2x128xf32>
    %c0_336 = arith.constant 0 : index
    %c0_337 = arith.constant 0 : index
    %824 = vector.load %arg10[%c0_336, %c0_337] : memref<2x128xf32, #tpu.memory_space<vmem>>, vector<2x128xf32>
    tpu.vector_store %arg10[%c0_336, %c0_337], %823 {strides = array<i32>} : memref<2x128xf32, #tpu.memory_space<vmem>>, vector<2x128xf32>,
    %825 = vector.broadcast %778 : vector<2x1xf32> to vector<2x128xf32>
    %826 = arith.mulf %825, %808 : vector<2x128xf32>
    %c0_338 = arith.constant 0 : index
    %c7_339 = arith.constant 7 : index
    %c0_340 = arith.constant 0 : index
    %827 = vector.load %arg8[%c0_338, %c7_339, %c0_340] : memref<2x8x128xf32, #tpu.memory_space<vmem>>, vector<2x1x128xf32>
    %828 = vector.shape_cast %827 : vector<2x1x128xf32> to vector<2x128xf32>
    %829 = vector.shape_cast %826 : vector<2x128xf32> to vector<2x1x128xf32>
    tpu.vector_store %arg8[%c0_338, %c7_339, %c0_340], %829 {strides = array<i32>} : memref<2x8x128xf32, #tpu.memory_space<vmem>>, vector<2x1x128xf32>,
    %c0_341 = arith.constant 0 : index
    %c0_342 = arith.constant 0 : index
    %c0_343 = arith.constant 0 : index
    %830 = vector.load %arg3[%c0_341, %c0_342, %c0_343] : memref<2x8x512xf32, #tpu.memory_space<vmem>>, vector<2x1x512xf32>
    %831 = vector.shape_cast %830 : vector<2x1x512xf32> to vector<2x512xf32>
    %c0_344 = arith.constant 0 : index
    %c0_345 = arith.constant 0 : index
    %c0_346 = arith.constant 0 : index
    %832 = vector.load %arg5[%c0_344, %c0_345, %c0_346] : memref<2x8x1xf32, #tpu.memory_space<vmem>>, vector<2x1x1xf32>
    %833 = vector.shape_cast %832 : vector<2x1x1xf32> to vector<2x1xf32>
    %c0_347 = arith.constant 0 : index
    %c0_348 = arith.constant 0 : index
    %834 = vector.load %arg12[%c0_347, %c0_348] : memref<2x128xf32, #tpu.memory_space<vmem>>, vector<2x128xf32>
    %c0_349 = arith.constant 0 : index
    %c0_350 = arith.constant 0 : index
    %835 = vector.load %arg13[%c0_349, %c0_350] : memref<2x128xf32, #tpu.memory_space<vmem>>, vector<2x128xf32>
    %836 = arith.truncf %834 : vector<2x128xf32> to vector<2x128xbf16>
    %cst_351 = arith.constant dense<0.000000e+00> : vector<2x512xf32>
    %837 = tpu.matmul %836, %4, %cst_351 {dimension_numbers = #tpu.dot_dimension_numbers<[1], [0], [0], [1], [0, 0, 1, 1], [], []>} : vector<2x128xbf16>, vector<128x512xbf16>, vector<2x512xf32> -> vector<2x512xf32>
    %838 = arith.addf %831, %837 : vector<2x512xf32>
    %839 = vector.extract_strided_slice %838 {offsets = [0, 0], sizes = [2, 128], strides = [1, 1]} : vector<2x512xf32> to vector<2x128xf32>
    %840 = arith.negf %839 : vector<2x128xf32>
    %841 = math.exp %840 : vector<2x128xf32>
    %cst_352 = arith.constant 1.000000e+00 : f32
    %842 = vector.broadcast %cst_352 : f32 to vector<2x128xf32>
    %843 = arith.addf %842, %841 : vector<2x128xf32>
    %844 = arith.divf %842, %843 : vector<2x128xf32>
    %845 = vector.extract_strided_slice %838 {offsets = [0, 128], sizes = [2, 128], strides = [1, 1]} : vector<2x512xf32> to vector<2x128xf32>
    %846 = arith.negf %845 : vector<2x128xf32>
    %847 = math.exp %846 : vector<2x128xf32>
    %cst_353 = arith.constant 1.000000e+00 : f32
    %848 = vector.broadcast %cst_353 : f32 to vector<2x128xf32>
    %849 = arith.addf %848, %847 : vector<2x128xf32>
    %850 = arith.divf %848, %849 : vector<2x128xf32>
    %851 = vector.extract_strided_slice %838 {offsets = [0, 256], sizes = [2, 128], strides = [1, 1]} : vector<2x512xf32> to vector<2x128xf32>
    %852 = math.tanh %851 : vector<2x128xf32>
    %853 = vector.extract_strided_slice %838 {offsets = [0, 384], sizes = [2, 128], strides = [1, 1]} : vector<2x512xf32> to vector<2x128xf32>
    %854 = arith.negf %853 : vector<2x128xf32>
    %855 = math.exp %854 : vector<2x128xf32>
    %cst_354 = arith.constant 1.000000e+00 : f32
    %856 = vector.broadcast %cst_354 : f32 to vector<2x128xf32>
    %857 = arith.addf %856, %855 : vector<2x128xf32>
    %858 = arith.divf %856, %857 : vector<2x128xf32>
    %859 = arith.mulf %850, %835 : vector<2x128xf32>
    %860 = arith.mulf %844, %852 : vector<2x128xf32>
    %861 = arith.addf %859, %860 : vector<2x128xf32>
    %862 = math.tanh %861 : vector<2x128xf32>
    %863 = arith.mulf %858, %862 : vector<2x128xf32>
    %864 = vector.broadcast %833 : vector<2x1xf32> to vector<2x128xf32>
    %865 = arith.mulf %864, %861 : vector<2x128xf32>
    %cst_355 = arith.constant 1.000000e+00 : f32
    %866 = vector.broadcast %cst_355 : f32 to vector<2x1xf32>
    %867 = arith.subf %866, %833 : vector<2x1xf32>
    %868 = vector.broadcast %867 : vector<2x1xf32> to vector<2x128xf32>
    %869 = arith.mulf %868, %835 : vector<2x128xf32>
    %870 = arith.addf %865, %869 : vector<2x128xf32>
    %c0_356 = arith.constant 0 : index
    %c0_357 = arith.constant 0 : index
    %871 = vector.load %arg13[%c0_356, %c0_357] : memref<2x128xf32, #tpu.memory_space<vmem>>, vector<2x128xf32>
    tpu.vector_store %arg13[%c0_356, %c0_357], %870 {strides = array<i32>} : memref<2x128xf32, #tpu.memory_space<vmem>>, vector<2x128xf32>,
    %872 = vector.broadcast %833 : vector<2x1xf32> to vector<2x128xf32>
    %873 = arith.mulf %872, %863 : vector<2x128xf32>
    %cst_358 = arith.constant 1.000000e+00 : f32
    %874 = vector.broadcast %cst_358 : f32 to vector<2x1xf32>
    %875 = arith.subf %874, %833 : vector<2x1xf32>
    %876 = vector.broadcast %875 : vector<2x1xf32> to vector<2x128xf32>
    %877 = arith.mulf %876, %834 : vector<2x128xf32>
    %878 = arith.addf %873, %877 : vector<2x128xf32>
    %c0_359 = arith.constant 0 : index
    %c0_360 = arith.constant 0 : index
    %879 = vector.load %arg12[%c0_359, %c0_360] : memref<2x128xf32, #tpu.memory_space<vmem>>, vector<2x128xf32>
    tpu.vector_store %arg12[%c0_359, %c0_360], %878 {strides = array<i32>} : memref<2x128xf32, #tpu.memory_space<vmem>>, vector<2x128xf32>,
    %880 = vector.broadcast %833 : vector<2x1xf32> to vector<2x128xf32>
    %881 = arith.mulf %880, %863 : vector<2x128xf32>
    %c0_361 = arith.constant 0 : index
    %c0_362 = arith.constant 0 : index
    %c0_363 = arith.constant 0 : index
    %882 = vector.load %arg9[%c0_361, %c0_362, %c0_363] : memref<2x8x128xf32, #tpu.memory_space<vmem>>, vector<2x1x128xf32>
    %883 = vector.shape_cast %882 : vector<2x1x128xf32> to vector<2x128xf32>
    %884 = vector.shape_cast %881 : vector<2x128xf32> to vector<2x1x128xf32>
    tpu.vector_store %arg9[%c0_361, %c0_362, %c0_363], %884 {strides = array<i32>} : memref<2x8x128xf32, #tpu.memory_space<vmem>>, vector<2x1x128xf32>,
    return
  }
  func.func @transform_0(%arg0: i32, %arg1: i32) -> (i32, i32, i32) {
    %c0_i32 = arith.constant 0 : i32
    %c0_i32_0 = arith.constant 0 : i32
    return %arg0, %arg1, %c0_i32 : i32, i32, i32
  }
  func.func @transform_1(%arg0: i32, %arg1: i32) -> (i32, i32, i32) {
    %c0_i32 = arith.constant 0 : i32
    %0 = arith.subi %c0_i32, %arg1 : i32
    %c1_i32 = arith.constant 1 : i32
    %c0_i32_0 = arith.constant 0 : i32
    return %arg0, %0, %c1_i32 : i32, i32, i32
  }
  func.func @transform_2(%arg0: i32, %arg1: i32) -> (i32, i32, i32) {
    %c0_i32 = arith.constant 0 : i32
    %c0_i32_0 = arith.constant 0 : i32
    return %arg0, %arg1, %c0_i32 : i32, i32, i32
  }
  func.func @transform_3(%arg0: i32, %arg1: i32) -> (i32, i32, i32) {
    %c0_i32 = arith.constant 0 : i32
    %0 = arith.subi %c0_i32, %arg1 : i32
    %c0_i32_0 = arith.constant 0 : i32
    %c0_i32_1 = arith.constant 0 : i32
    return %arg0, %0, %c0_i32_0 : i32, i32, i32
  }
  func.func @transform_4(%arg0: i32, %arg1: i32) -> (i32, i32) {
    %c0_i32 = arith.constant 0 : i32
    %c0_i32_0 = arith.constant 0 : i32
    %c0_i32_1 = arith.constant 0 : i32
    return %c0_i32, %c0_i32_0 : i32, i32
  }
  func.func @transform_5(%arg0: i32, %arg1: i32) -> (i32, i32) {
    %c0_i32 = arith.constant 0 : i32
    %c0_i32_0 = arith.constant 0 : i32
    %c0_i32_1 = arith.constant 0 : i32
    return %c0_i32, %c0_i32_0 : i32, i32
  }
  func.func @transform_6(%arg0: i32, %arg1: i32) -> (i32, i32, i32) {
    %c0_i32 = arith.constant 0 : i32
    %c0_i32_0 = arith.constant 0 : i32
    return %arg0, %arg1, %c0_i32 : i32, i32, i32
  }
  func.func @transform_7(%arg0: i32, %arg1: i32) -> (i32, i32, i32) {
    %c0_i32 = arith.constant 0 : i32
    %0 = arith.subi %c0_i32, %arg1 : i32
    %c0_i32_0 = arith.constant 0 : i32
    %c0_i32_1 = arith.constant 0 : i32
    return %arg0, %0, %c0_i32_0 : i32, i32, i32
  }
}

module attributes {stable_mosaic.version = 11 : i64} {
  func.func @_linear_kernel(%arg0: i32, %arg1: i32, %arg2: i32, %arg3: memref<32x128xf32, #tpu.memory_space<vmem>>, %arg4: memref<128x512xbf16, #tpu.memory_space<vmem>>, %arg5: memref<1x512xf32, #tpu.memory_space<vmem>>, %arg6: memref<32x512xf32, #tpu.memory_space<vmem>>, %arg7: memref<32x512xf32, #tpu.memory_space<vmem>>) attributes {dimension_semantics = [#tpu.dimension_semantics<parallel>, #tpu.dimension_semantics<parallel>, #tpu.dimension_semantics<arbitrary>], iteration_bounds = array<i64: 1, 2, 1>, scalar_prefetch = 0 : i64, scratch_operands = 1 : i64, tpu.core_type = #tpu.core_type<tc>, window_params = [{transform_indices = @transform_0, window_bounds = array<i64: 32, 128>}, {transform_indices = @transform_1, window_bounds = array<i64: 128, 512>}, {transform_indices = @transform_2, window_bounds = array<i64: 1, 512>}, {transform_indices = @transform_3, window_bounds = array<i64: 32, 512>}]} {
    %c0_i32 = arith.constant 0 : i32
    %0 = arith.cmpi eq, %arg2, %c0_i32 : i32
    %1 = arith.extui %0 : i1 to i32
    %c0_i32_0 = arith.constant 0 : i32
    %2 = arith.cmpi ne, %1, %c0_i32_0 : i32
    scf.if %2 {
      %cst_10 = arith.constant 0.000000e+00 : f32
      %13 = vector.broadcast %cst_10 : f32 to vector<32x512xf32>
      %c0_11 = arith.constant 0 : index
      %c0_12 = arith.constant 0 : index
      %14 = vector.load %arg7[%c0_11, %c0_12] : memref<32x512xf32, #tpu.memory_space<vmem>>, vector<32x512xf32>
      tpu.vector_store %arg7[%c0_11, %c0_12], %13 {strides = array<i32>} : memref<32x512xf32, #tpu.memory_space<vmem>>, vector<32x512xf32>,
    } else {
    }
    %c0 = arith.constant 0 : index
    %c0_1 = arith.constant 0 : index
    %3 = vector.load %arg7[%c0, %c0_1] : memref<32x512xf32, #tpu.memory_space<vmem>>, vector<32x512xf32>
    %c0_2 = arith.constant 0 : index
    %c0_3 = arith.constant 0 : index
    %4 = vector.load %arg3[%c0_2, %c0_3] : memref<32x128xf32, #tpu.memory_space<vmem>>, vector<32x128xf32>
    %5 = arith.truncf %4 : vector<32x128xf32> to vector<32x128xbf16>
    %c0_4 = arith.constant 0 : index
    %c0_5 = arith.constant 0 : index
    %6 = vector.load %arg4[%c0_4, %c0_5] : memref<128x512xbf16, #tpu.memory_space<vmem>>, vector<128x512xbf16>
    %cst = arith.constant dense<0.000000e+00> : vector<32x512xf32>
    %7 = tpu.matmul %5, %6, %cst {dimension_numbers = #tpu.dot_dimension_numbers<[1], [0], [0], [1], [0, 0, 1, 1], [], []>} : vector<32x128xbf16>, vector<128x512xbf16>, vector<32x512xf32> -> vector<32x512xf32>
    %8 = arith.addf %3, %7 : vector<32x512xf32>
    %c0_6 = arith.constant 0 : index
    %c0_7 = arith.constant 0 : index
    %9 = vector.load %arg7[%c0_6, %c0_7] : memref<32x512xf32, #tpu.memory_space<vmem>>, vector<32x512xf32>
    tpu.vector_store %arg7[%c0_6, %c0_7], %8 {strides = array<i32>} : memref<32x512xf32, #tpu.memory_space<vmem>>, vector<32x512xf32>,
    %c0_i32_8 = arith.constant 0 : i32
    %10 = arith.cmpi eq, %arg2, %c0_i32_8 : i32
    %11 = arith.extui %10 : i1 to i32
    %c0_i32_9 = arith.constant 0 : i32
    %12 = arith.cmpi ne, %11, %c0_i32_9 : i32
    scf.if %12 {
      %c0_10 = arith.constant 0 : index
      %c0_11 = arith.constant 0 : index
      %13 = vector.load %arg7[%c0_10, %c0_11] : memref<32x512xf32, #tpu.memory_space<vmem>>, vector<32x512xf32>
      %c0_12 = arith.constant 0 : index
      %c0_13 = arith.constant 0 : index
      %14 = vector.load %arg5[%c0_12, %c0_13] : memref<1x512xf32, #tpu.memory_space<vmem>>, vector<1x512xf32>
      %15 = vector.broadcast %14 : vector<1x512xf32> to vector<32x512xf32>
      %16 = arith.addf %13, %15 : vector<32x512xf32>
      %c0_14 = arith.constant 0 : index
      %c0_15 = arith.constant 0 : index
      %17 = vector.load %arg6[%c0_14, %c0_15] : memref<32x512xf32, #tpu.memory_space<vmem>>, vector<32x512xf32>
      tpu.vector_store %arg6[%c0_14, %c0_15], %16 {strides = array<i32>} : memref<32x512xf32, #tpu.memory_space<vmem>>, vector<32x512xf32>,
    } else {
    }
    return
  }
  func.func @transform_0(%arg0: i32, %arg1: i32, %arg2: i32) -> (i32, i32) {
    %c0_i32 = arith.constant 0 : i32
    return %arg0, %arg2 : i32, i32
  }
  func.func @transform_1(%arg0: i32, %arg1: i32, %arg2: i32) -> (i32, i32) {
    %c0_i32 = arith.constant 0 : i32
    return %arg2, %arg1 : i32, i32
  }
  func.func @transform_2(%arg0: i32, %arg1: i32, %arg2: i32) -> (i32, i32) {
    %c0_i32 = arith.constant 0 : i32
    %c0_i32_0 = arith.constant 0 : i32
    return %c0_i32, %arg1 : i32, i32
  }
  func.func @transform_3(%arg0: i32, %arg1: i32, %arg2: i32) -> (i32, i32) {
    %c0_i32 = arith.constant 0 : i32
    return %arg0, %arg1 : i32, i32
  }
}

module attributes {stable_mosaic.version = 11 : i64} {
  func.func @_pool_kernel(%arg0: i32, %arg1: memref<2x8x256xf32, #tpu.memory_space<vmem>>, %arg2: memref<2x8x1xf32, #tpu.memory_space<vmem>>, %arg3: memref<2x256xf32, #tpu.memory_space<vmem>>, %arg4: memref<2x256xf32, #tpu.memory_space<vmem>>) attributes {dimension_semantics = [#tpu.dimension_semantics<parallel>], iteration_bounds = array<i64: 1>, scalar_prefetch = 0 : i64, scratch_operands = 0 : i64, tpu.core_type = #tpu.core_type<tc>, window_params = [{transform_indices = @transform_0, window_bounds = array<i64: 2, 8, 256>}, {transform_indices = @transform_1, window_bounds = array<i64: 2, 8, 1>}, {transform_indices = @transform_2, window_bounds = array<i64: 2, 256>}, {transform_indices = @transform_3, window_bounds = array<i64: 2, 256>}]} {
    %c0 = arith.constant 0 : index
    %c0_0 = arith.constant 0 : index
    %c0_1 = arith.constant 0 : index
    %0 = vector.load %arg1[%c0, %c0_0, %c0_1] : memref<2x8x256xf32, #tpu.memory_space<vmem>>, vector<2x8x256xf32>
    %c0_2 = arith.constant 0 : index
    %c0_3 = arith.constant 0 : index
    %c0_4 = arith.constant 0 : index
    %1 = vector.load %arg2[%c0_2, %c0_3, %c0_4] : memref<2x8x1xf32, #tpu.memory_space<vmem>>, vector<2x8x1xf32>
    %2 = vector.broadcast %1 : vector<2x8x1xf32> to vector<2x8x256xf32>
    %3 = arith.mulf %0, %2 : vector<2x8x256xf32>
    %cst = arith.constant dense<0.000000e+00> : vector<2x256xf32>
    %4 = vector.multi_reduction <add>, %3, %cst [1] : vector<2x8x256xf32> to vector<2x256xf32>
    %cst_5 = arith.constant dense<0.000000e+00> : vector<2x1xf32>
    %5 = vector.multi_reduction <add>, %1, %cst_5 [1] : vector<2x8x1xf32> to vector<2x1xf32>
    %6 = vector.broadcast %5 : vector<2x1xf32> to vector<2x256xf32>
    %7 = arith.divf %4, %6 : vector<2x256xf32>
    %c0_6 = arith.constant 0 : index
    %c0_7 = arith.constant 0 : index
    %8 = vector.load %arg3[%c0_6, %c0_7] : memref<2x256xf32, #tpu.memory_space<vmem>>, vector<2x256xf32>
    tpu.vector_store %arg3[%c0_6, %c0_7], %7 {strides = array<i32>} : memref<2x256xf32, #tpu.memory_space<vmem>>, vector<2x256xf32>,
    %9 = vector.broadcast %1 : vector<2x8x1xf32> to vector<2x8x256xf32>
    %10 = arith.mulf %0, %9 : vector<2x8x256xf32>
    %cst_8 = arith.constant 1.000000e+00 : f32
    %11 = vector.broadcast %cst_8 : f32 to vector<2x8x1xf32>
    %12 = arith.subf %11, %1 : vector<2x8x1xf32>
    %cst_9 = arith.constant -1.000000e+07 : f32
    %13 = vector.broadcast %cst_9 : f32 to vector<2x8x1xf32>
    %14 = arith.mulf %13, %12 : vector<2x8x1xf32>
    %15 = vector.broadcast %14 : vector<2x8x1xf32> to vector<2x8x256xf32>
    %16 = arith.addf %10, %15 : vector<2x8x256xf32>
    %cst_10 = arith.constant dense<0xFF800000> : vector<2x256xf32>
    %17 = vector.multi_reduction <maximumf>, %16, %cst_10 [1] : vector<2x8x256xf32> to vector<2x256xf32>
    %c0_11 = arith.constant 0 : index
    %c0_12 = arith.constant 0 : index
    %18 = vector.load %arg4[%c0_11, %c0_12] : memref<2x256xf32, #tpu.memory_space<vmem>>, vector<2x256xf32>
    tpu.vector_store %arg4[%c0_11, %c0_12], %17 {strides = array<i32>} : memref<2x256xf32, #tpu.memory_space<vmem>>, vector<2x256xf32>,
    return
  }
  func.func @transform_0(%arg0: i32) -> (i32, i32, i32) {
    %c0_i32 = arith.constant 0 : i32
    %c0_i32_0 = arith.constant 0 : i32
    %c0_i32_1 = arith.constant 0 : i32
    return %arg0, %c0_i32, %c0_i32_0 : i32, i32, i32
  }
  func.func @transform_1(%arg0: i32) -> (i32, i32, i32) {
    %c0_i32 = arith.constant 0 : i32
    %c0_i32_0 = arith.constant 0 : i32
    %c0_i32_1 = arith.constant 0 : i32
    return %arg0, %c0_i32, %c0_i32_0 : i32, i32, i32
  }
  func.func @transform_2(%arg0: i32) -> (i32, i32) {
    %c0_i32 = arith.constant 0 : i32
    %c0_i32_0 = arith.constant 0 : i32
    return %arg0, %c0_i32 : i32, i32
  }
  func.func @transform_3(%arg0: i32) -> (i32, i32) {
    %c0_i32 = arith.constant 0 : i32
    %c0_i32_0 = arith.constant 0 : i32
    return %arg0, %c0_i32 : i32, i32
  }
}

module attributes {stable_mosaic.version = 11 : i64} {
  func.func @_linear_kernel(%arg0: i32, %arg1: i32, %arg2: i32, %arg3: memref<8x1024xf32, #tpu.memory_space<vmem>>, %arg4: memref<1024x128xbf16, #tpu.memory_space<vmem>>, %arg5: memref<1x128xf32, #tpu.memory_space<vmem>>, %arg6: memref<8x128xf32, #tpu.memory_space<vmem>>, %arg7: memref<8x128xf32, #tpu.memory_space<vmem>>) attributes {dimension_semantics = [#tpu.dimension_semantics<parallel>, #tpu.dimension_semantics<parallel>, #tpu.dimension_semantics<arbitrary>], iteration_bounds = array<i64: 1, 1, 1>, scalar_prefetch = 0 : i64, scratch_operands = 1 : i64, tpu.core_type = #tpu.core_type<tc>, window_params = [{transform_indices = @transform_0, window_bounds = array<i64: 8, 1024>}, {transform_indices = @transform_1, window_bounds = array<i64: 1024, 128>}, {transform_indices = @transform_2, window_bounds = array<i64: 1, 128>}, {transform_indices = @transform_3, window_bounds = array<i64: 8, 128>}]} {
    %c0_i32 = arith.constant 0 : i32
    %0 = arith.cmpi eq, %arg2, %c0_i32 : i32
    %1 = arith.extui %0 : i1 to i32
    %c0_i32_0 = arith.constant 0 : i32
    %2 = arith.cmpi ne, %1, %c0_i32_0 : i32
    scf.if %2 {
      %cst_10 = arith.constant 0.000000e+00 : f32
      %13 = vector.broadcast %cst_10 : f32 to vector<8x128xf32>
      %c0_11 = arith.constant 0 : index
      %c0_12 = arith.constant 0 : index
      %14 = vector.load %arg7[%c0_11, %c0_12] : memref<8x128xf32, #tpu.memory_space<vmem>>, vector<8x128xf32>
      tpu.vector_store %arg7[%c0_11, %c0_12], %13 {strides = array<i32>} : memref<8x128xf32, #tpu.memory_space<vmem>>, vector<8x128xf32>,
    } else {
    }
    %c0 = arith.constant 0 : index
    %c0_1 = arith.constant 0 : index
    %3 = vector.load %arg7[%c0, %c0_1] : memref<8x128xf32, #tpu.memory_space<vmem>>, vector<8x128xf32>
    %c0_2 = arith.constant 0 : index
    %c0_3 = arith.constant 0 : index
    %4 = vector.load %arg3[%c0_2, %c0_3] : memref<8x1024xf32, #tpu.memory_space<vmem>>, vector<8x1024xf32>
    %5 = arith.truncf %4 : vector<8x1024xf32> to vector<8x1024xbf16>
    %c0_4 = arith.constant 0 : index
    %c0_5 = arith.constant 0 : index
    %6 = vector.load %arg4[%c0_4, %c0_5] : memref<1024x128xbf16, #tpu.memory_space<vmem>>, vector<1024x128xbf16>
    %cst = arith.constant dense<0.000000e+00> : vector<8x128xf32>
    %7 = tpu.matmul %5, %6, %cst {dimension_numbers = #tpu.dot_dimension_numbers<[1], [0], [0], [1], [0, 0, 1, 1], [], []>} : vector<8x1024xbf16>, vector<1024x128xbf16>, vector<8x128xf32> -> vector<8x128xf32>
    %8 = arith.addf %3, %7 : vector<8x128xf32>
    %c0_6 = arith.constant 0 : index
    %c0_7 = arith.constant 0 : index
    %9 = vector.load %arg7[%c0_6, %c0_7] : memref<8x128xf32, #tpu.memory_space<vmem>>, vector<8x128xf32>
    tpu.vector_store %arg7[%c0_6, %c0_7], %8 {strides = array<i32>} : memref<8x128xf32, #tpu.memory_space<vmem>>, vector<8x128xf32>,
    %c0_i32_8 = arith.constant 0 : i32
    %10 = arith.cmpi eq, %arg2, %c0_i32_8 : i32
    %11 = arith.extui %10 : i1 to i32
    %c0_i32_9 = arith.constant 0 : i32
    %12 = arith.cmpi ne, %11, %c0_i32_9 : i32
    scf.if %12 {
      %c0_10 = arith.constant 0 : index
      %c0_11 = arith.constant 0 : index
      %13 = vector.load %arg7[%c0_10, %c0_11] : memref<8x128xf32, #tpu.memory_space<vmem>>, vector<8x128xf32>
      %c0_12 = arith.constant 0 : index
      %c0_13 = arith.constant 0 : index
      %14 = vector.load %arg5[%c0_12, %c0_13] : memref<1x128xf32, #tpu.memory_space<vmem>>, vector<1x128xf32>
      %15 = vector.broadcast %14 : vector<1x128xf32> to vector<8x128xf32>
      %16 = arith.addf %13, %15 : vector<8x128xf32>
      %17 = math.tanh %16 : vector<8x128xf32>
      %c0_14 = arith.constant 0 : index
      %c0_15 = arith.constant 0 : index
      %18 = vector.load %arg6[%c0_14, %c0_15] : memref<8x128xf32, #tpu.memory_space<vmem>>, vector<8x128xf32>
      tpu.vector_store %arg6[%c0_14, %c0_15], %17 {strides = array<i32>} : memref<8x128xf32, #tpu.memory_space<vmem>>, vector<8x128xf32>,
    } else {
    }
    return
  }
  func.func @transform_0(%arg0: i32, %arg1: i32, %arg2: i32) -> (i32, i32) {
    %c0_i32 = arith.constant 0 : i32
    return %arg0, %arg2 : i32, i32
  }
  func.func @transform_1(%arg0: i32, %arg1: i32, %arg2: i32) -> (i32, i32) {
    %c0_i32 = arith.constant 0 : i32
    return %arg2, %arg1 : i32, i32
  }
  func.func @transform_2(%arg0: i32, %arg1: i32, %arg2: i32) -> (i32, i32) {
    %c0_i32 = arith.constant 0 : i32
    %c0_i32_0 = arith.constant 0 : i32
    return %c0_i32, %arg1 : i32, i32
  }
  func.func @transform_3(%arg0: i32, %arg1: i32, %arg2: i32) -> (i32, i32) {
    %c0_i32 = arith.constant 0 : i32
    return %arg0, %arg1 : i32, i32
  }
}

module attributes {stable_mosaic.version = 11 : i64} {
  func.func @_linear_kernel(%arg0: i32, %arg1: i32, %arg2: i32, %arg3: memref<8x128xf32, #tpu.memory_space<vmem>>, %arg4: memref<128x128xbf16, #tpu.memory_space<vmem>>, %arg5: memref<1x128xf32, #tpu.memory_space<vmem>>, %arg6: memref<8x128xf32, #tpu.memory_space<vmem>>, %arg7: memref<8x128xf32, #tpu.memory_space<vmem>>) attributes {dimension_semantics = [#tpu.dimension_semantics<parallel>, #tpu.dimension_semantics<parallel>, #tpu.dimension_semantics<arbitrary>], iteration_bounds = array<i64: 1, 1, 1>, scalar_prefetch = 0 : i64, scratch_operands = 1 : i64, tpu.core_type = #tpu.core_type<tc>, window_params = [{transform_indices = @transform_0, window_bounds = array<i64: 8, 128>}, {transform_indices = @transform_1, window_bounds = array<i64: 128, 128>}, {transform_indices = @transform_2, window_bounds = array<i64: 1, 128>}, {transform_indices = @transform_3, window_bounds = array<i64: 8, 128>}]} {
    %c0_i32 = arith.constant 0 : i32
    %0 = arith.cmpi eq, %arg2, %c0_i32 : i32
    %1 = arith.extui %0 : i1 to i32
    %c0_i32_0 = arith.constant 0 : i32
    %2 = arith.cmpi ne, %1, %c0_i32_0 : i32
    scf.if %2 {
      %cst_10 = arith.constant 0.000000e+00 : f32
      %13 = vector.broadcast %cst_10 : f32 to vector<8x128xf32>
      %c0_11 = arith.constant 0 : index
      %c0_12 = arith.constant 0 : index
      %14 = vector.load %arg7[%c0_11, %c0_12] : memref<8x128xf32, #tpu.memory_space<vmem>>, vector<8x128xf32>
      tpu.vector_store %arg7[%c0_11, %c0_12], %13 {strides = array<i32>} : memref<8x128xf32, #tpu.memory_space<vmem>>, vector<8x128xf32>,
    } else {
    }
    %c0 = arith.constant 0 : index
    %c0_1 = arith.constant 0 : index
    %3 = vector.load %arg7[%c0, %c0_1] : memref<8x128xf32, #tpu.memory_space<vmem>>, vector<8x128xf32>
    %c0_2 = arith.constant 0 : index
    %c0_3 = arith.constant 0 : index
    %4 = vector.load %arg3[%c0_2, %c0_3] : memref<8x128xf32, #tpu.memory_space<vmem>>, vector<8x128xf32>
    %5 = arith.truncf %4 : vector<8x128xf32> to vector<8x128xbf16>
    %c0_4 = arith.constant 0 : index
    %c0_5 = arith.constant 0 : index
    %6 = vector.load %arg4[%c0_4, %c0_5] : memref<128x128xbf16, #tpu.memory_space<vmem>>, vector<128x128xbf16>
    %cst = arith.constant dense<0.000000e+00> : vector<8x128xf32>
    %7 = tpu.matmul %5, %6, %cst {dimension_numbers = #tpu.dot_dimension_numbers<[1], [0], [0], [1], [0, 0, 1, 1], [], []>} : vector<8x128xbf16>, vector<128x128xbf16>, vector<8x128xf32> -> vector<8x128xf32>
    %8 = arith.addf %3, %7 : vector<8x128xf32>
    %c0_6 = arith.constant 0 : index
    %c0_7 = arith.constant 0 : index
    %9 = vector.load %arg7[%c0_6, %c0_7] : memref<8x128xf32, #tpu.memory_space<vmem>>, vector<8x128xf32>
    tpu.vector_store %arg7[%c0_6, %c0_7], %8 {strides = array<i32>} : memref<8x128xf32, #tpu.memory_space<vmem>>, vector<8x128xf32>,
    %c0_i32_8 = arith.constant 0 : i32
    %10 = arith.cmpi eq, %arg2, %c0_i32_8 : i32
    %11 = arith.extui %10 : i1 to i32
    %c0_i32_9 = arith.constant 0 : i32
    %12 = arith.cmpi ne, %11, %c0_i32_9 : i32
    scf.if %12 {
      %c0_10 = arith.constant 0 : index
      %c0_11 = arith.constant 0 : index
      %13 = vector.load %arg7[%c0_10, %c0_11] : memref<8x128xf32, #tpu.memory_space<vmem>>, vector<8x128xf32>
      %c0_12 = arith.constant 0 : index
      %c0_13 = arith.constant 0 : index
      %14 = vector.load %arg5[%c0_12, %c0_13] : memref<1x128xf32, #tpu.memory_space<vmem>>, vector<1x128xf32>
      %15 = vector.broadcast %14 : vector<1x128xf32> to vector<8x128xf32>
      %16 = arith.addf %13, %15 : vector<8x128xf32>
      %c0_14 = arith.constant 0 : index
      %c0_15 = arith.constant 0 : index
      %17 = vector.load %arg6[%c0_14, %c0_15] : memref<8x128xf32, #tpu.memory_space<vmem>>, vector<8x128xf32>
      tpu.vector_store %arg6[%c0_14, %c0_15], %16 {strides = array<i32>} : memref<8x128xf32, #tpu.memory_space<vmem>>, vector<8x128xf32>,
    } else {
    }
    return
  }
  func.func @transform_0(%arg0: i32, %arg1: i32, %arg2: i32) -> (i32, i32) {
    %c0_i32 = arith.constant 0 : i32
    return %arg0, %arg2 : i32, i32
  }
  func.func @transform_1(%arg0: i32, %arg1: i32, %arg2: i32) -> (i32, i32) {
    %c0_i32 = arith.constant 0 : i32
    return %arg2, %arg1 : i32, i32
  }
  func.func @transform_2(%arg0: i32, %arg1: i32, %arg2: i32) -> (i32, i32) {
    %c0_i32 = arith.constant 0 : i32
    %c0_i32_0 = arith.constant 0 : i32
    return %c0_i32, %arg1 : i32, i32
  }
  func.func @transform_3(%arg0: i32, %arg1: i32, %arg2: i32) -> (i32, i32) {
    %c0_i32 = arith.constant 0 : i32
    return %arg0, %arg1 : i32, i32
  }
}

</mosaic_0001>

<bundles_post_ra>
// kernel: esim_forward.15
= control target key start
LH: loop header
LB: loop body
LE: loop exit
PB: predicated region body
PF: predicated region fallthrough
CT: control target
= control target key end

     0   :  { %v556_v3 = vmov 0   ;;  %vm139_vm0 = vcmask 64512   ;;  %vm253_vm1 = vcmask 1043456   ;;  %s744_s1 = inlined_call_operand.vmem [shape: f32[2,8,256], index: 1, kind: input, shape index: {}]   ;;  %s745_s0 = inlined_call_operand.vmem [shape: f32[2,8,256], index: 0, kind: input, shape index: {}]   ;;  %s746_s2 = inlined_call_operand.vmem [shape: f32[2,8,1], index: 2, kind: input, shape index: {}]   ;;  %s747_s3 = inlined_call_operand.vmem [shape: f32[2,1,8], index: 3, kind: input, shape index: {}]   ;;  %s748_s4 = inlined_call_operand.vmem [shape: f32[2,8,1], index: 4, kind: input, shape index: {}]   ;;  %s749_s5 = inlined_call_operand.vmem [shape: f32[2,8,256], index: 5, kind: output, shape index: {0}]   ;;  %s750_s6 = inlined_call_operand.vmem [shape: f32[2,8,256], index: 6, kind: output, shape index: {1}]  }
   0x1   :  { %v32_v0 = vld [vmem:[%s744_s1 + $0x8] sm:$0xff]  ;;  %v34_v1 = vld [vmem:[%s744_s1 + $0x18] sm:$0xff]  ;;  %v31_v2 = vld [vmem:[%s744_s1] sm:$0xff]  ;;  %530 = vset.pattern.permute.xlu1 %v556_v3 }
   0x2   :  { %v602_v4 = vpack.c.bf16 %v32_v0, %v32_v0  ;;  %v604_v5 = vpack.c.bf16 %v34_v1, %v34_v1  ;;  %v606_v6 = vpack.c.bf16 %v31_v2, %v31_v2  ;;  %v33_v7 = vld [vmem:[%s744_s1 + $0x10] sm:$0xff]  ;;  %v24_v8 = vld [vmem:[%s745_s0 + $0x8] sm:$0xff]  ;;  %v26_v9 = vld [vmem:[%s745_s0 + $0x18] sm:$0xff] }
   0x3   :  { %v617_v10 = vpack.c.bf16 %v33_v7, %v33_v7  ;;  %v619_v11 = vpack.c.bf16 %v24_v8, %v24_v8  ;;  %v621_v12 = vpack.c.bf16 %v26_v9, %v26_v9  ;;  %v39_v13 = vld [vmem:[%s746_s2] sm:$0xff]  ;;  %v25_v15 = vld [vmem:[%s745_s0 + $0x10] sm:$0xff]  ;;  %v40_v18 = vld [vmem:[%s746_s2 + $0x8] sm:$0xff] }
   0x4   :  { %45 = vmatprep.subr.bf16.mxu0 %v602_v4  ;;  %85 = vmatprep.subr.bf16.mxu1 %v604_v5  ;;  %v23_v14 = vld [vmem:[%s745_s0] sm:$0xff]  ;;  %v640_v17 = vpack.c.bf16 %v25_v15, %v25_v15 }
   0x5   :  { %46 = vmatpush1.bf16.xpose.msra.mxu0 %v606_v6  ;;  %86 = vmatpush1.bf16.xpose.msra.mxu1 %v617_v10  ;;  %v638_v16 = vpack.c.bf16 %v23_v14, %v23_v14  ;;  %v652_v19 = vld [vmem:[%s747_s3 + $0x1] ss:$0 sm:$0xff]  ;;  %v657_v20 = vld [vmem:[%s747_s3] ss:$0 sm:$0xff] }
   0x6   :  { %77 = vmatprep.mubr.bf16.mxu0 %v619_v11  ;;  %117 = vmatprep.mubr.bf16.mxu1 %v621_v12 }
   0x7   :  { %178 = vperm.xlu1 %530, %v39_v13   ;;  %521 = vmatprep.subr.msk.bf16.mxu0 %vm253_vm1, %v602_v4 }
   0x8   :  { %523 = vmatprep.subr.msk.bf16.mxu1 %vm253_vm1, %v604_v5  ;;  %v43_v5 = vld [vmem:[%s748_s4] sm:$0xff] }
   0xb   :  { %183 = vperm.xlu1 %530, %v40_v18  }
   0xc   :  { %78 = vmatmul.mubr.bf16.vlgmr.msra.gmra.mrb[0].mxu0 %v638_v16  ;;  %118 = vmatmul.mubr.bf16.vlgmr.msra.gmra.mrb[0].mxu1 %v640_v17 }
   0xd   :  { %292 = vmatprep.mubr.bf16.mxu0 %v556_v3  ;;  %342 = vmatprep.mubr.bf16.mxu1 %v556_v3 }
  0x86   :  { %v666_v33 = vpop.permute.xlu1 %178 }
  0x8a   :  { %v668_v34 = vpop.permute.xlu1 %183 }
  0xdf   :  { %v659_v21 = vpop.f32.mrb[0].mxu0  ;;  %v119_v22 = vpop.f32.mrb[0].mxu1 }
  0xe0   :  { %v138_v23 = vmul.f32 %v652_v19, %v119_v22  ;;  %v81_v24 = vpop.f32.mrb[1].mxu0  ;;  %v121_v25 = vpop.f32.mrb[1].mxu1  ;;  %v137_v26 = vmul.f32 %v657_v20, %v659_v21  ;;  %v187_v35 = vmul.f32 %v668_v34, %v119_v22 }
  0xe1   :  { %v82_v27 = vpop.f32.mrb[2].mxu0  ;;  %v122_v28 = vpop.f32.mrb[2].mxu1  ;;  %v186_v25 = vmul.f32 %v666_v33, %v659_v21 }
  0xe2   :  { %v83_v29 = vpop.f32.mrb[3].mxu0  ;;  %v123_v30 = vpop.f32.mrb[3].mxu1  ;;  %v140_v31 = vsel %vm139_vm0, %v137_v26, -inf  ;;  %v143_v32 = vsel %vm139_vm0, %v138_v23, -inf  ;;  %v195_v36 = vsel %vm139_vm0, %v187_v35, -inf }
  0xe3   :  { %141 = vmax.xlane.f32.xlu0 %v140_v31  ;;  %v196_v37 = vrot.slane %v195_v36, 4 }
  0xe5   :  { %v197_v38 = vmax.f32 %v195_v36, %v196_v37 }
  0xe7   :  { %144 = vmax.xlane.f32.xlu0 %v143_v32  ;;  %v198_v39 = vrot.slane %v197_v38, 2 }
  0xe9   :  { %v199_v40 = vmax.f32 %v197_v38, %v198_v39 }
  0xeb   :  { %v200_v41 = vrot.slane %v199_v40, 1 }
  0xed   :  { %v201_v42 = vmax.f32 %v199_v40, %v200_v41 }
  0xef   :  { %v203_v43 = vsub.f32 %v187_v35, %v201_v42 }
  0xf1   :  { %v206_v44 = vmul.f32 1.442695, %v203_v43 }
  0xf3   :  { %532 = vpow2.f32 %v206_v44 }
  0xfd   :  { %v533_v45 = vpop.eup %532 }
  0xfe   :  { %v215_v46 = vsel %vm139_vm0, %v533_v45, 0.0 }
  0xff   :  { %v216_v47 = vrot.slane %v215_v46, 4 }
 0x101   :  { %v217_v48 = vadd.f32 %v216_v47, %v215_v46 }
 0x103   :  { %v218_v49 = vrot.slane %v217_v48, 2 }
 0x105   :  { %v219_v50 = vadd.f32 %v218_v49, %v217_v48 }
 0x107   :  { %v220_v51 = vrot.slane %v219_v50, 1 }
 0x109   :  { %v221_v52 = vadd.f32 %v220_v51, %v219_v50 }
 0x10b   :  { %534 = vrcp.f32 %v221_v52 }
 0x115   :  { %v535_v57 = vpop.eup %534 }
 0x116   :  { %v225_v60 = vmul.f32 %v535_v57, %v533_v45 }
 0x118   :  { %v227_v61 = vmul.f32 %v225_v60, %v668_v34 }
 0x11a   :  { %v235_v0 = vsel %vm139_vm0, %v227_v61, 0.0 }
 0x11b   :  { %v236_v2 = vrot.slane %v235_v0, 4 }
 0x11d   :  { %v237_v8 = vadd.f32 %v236_v2, %v235_v0 }
 0x11f   :  { %v238_v9 = vrot.slane %v237_v8, 2 }
 0x121   :  { %v239_v13 = vadd.f32 %v238_v9, %v237_v8 }
 0x123   :  { %v240_v14 = vrot.slane %v239_v13, 1 }
 0x125   :  { %v241_v15 = vadd.f32 %v240_v14, %v239_v13  ;;  %v377_v14 = vsel %vm253_vm1, %v638_v16, 0 }
 0x127   :  { %v243_v18 = vadd.f32 1e-13, %v241_v15 }
 0x170   :  { %v142_v53 = vpop.xlane.xlu0 %141 }
 0x171   :  { %v146_v54 = vsub.f32 %v137_v26, %v142_v53  ;;  %v188_v26 = vsel %vm139_vm0, %v186_v25, -inf }
 0x172   :  { %v189_v27 = vrot.slane %v188_v26, 4 }
 0x173   :  { %v148_v55 = vmul.f32 1.442695, %v146_v54 }
 0x174   :  { %v145_v56 = vpop.xlane.xlu0 %144  ;;  %v190_v28 = vmax.f32 %v188_v26, %v189_v27 }
 0x175   :  { %536 = vpow2.f32 %v148_v55  ;;  %v147_v58 = vsub.f32 %v138_v23, %v145_v56 }
 0x176   :  { %v191_v29 = vrot.slane %v190_v28, 2 }
 0x177   :  { %v150_v59 = vmul.f32 1.442695, %v147_v58 }
 0x178   :  { %v192_v30 = vmax.f32 %v190_v28, %v191_v29 }
 0x179   :  { %538 = vpow2.f32 %v150_v59 }
 0x17a   :  { %540 = vrcp.f32 %v243_v18  ;;  %v193_v31 = vrot.slane %v192_v30, 1 }
 0x17c   :  { %v194_v32 = vmax.f32 %v192_v30, %v193_v31 }
 0x17e   :  { %v202_v35 = vsub.f32 %v186_v25, %v194_v32 }
 0x17f   :  { %v537_v62 = vpop.eup %536 }
 0x180   :  { %v152_v63 = vsel %vm139_vm0, %v537_v62, 0.0  ;;  %v204_v36 = vmul.f32 1.442695, %v202_v35 }
 0x181   :  { %153 = vadd.xlane.f32.xlu0 %v152_v63 }
 0x182   :  { %542 = vpow2.f32 %v204_v36 }
 0x183   :  { %v539_v1 = vpop.eup %538 }
 0x184   :  { %v155_v7 = vsel %vm139_vm0, %v539_v1, 0.0  ;;  %v541_v22 = vpop.eup %540 }
 0x185   :  { %156 = vadd.xlane.f32.xlu1 %v155_v7  ;;  %v247_v23 = vmul.f32 %v541_v22, %v227_v61 }
 0x187   :  { %v356_v24 = vpack.c.bf16 %v247_v23, %v247_v23  ;;  %v443_v23 = vsel %vm253_vm1, %v640_v17, 0 }
 0x18c   :  { %v543_v37 = vpop.eup %542 }
 0x18d   :  { %v208_v38 = vsel %vm139_vm0, %v543_v37, 0.0 }
 0x18e   :  { %v209_v39 = vrot.slane %v208_v38, 4 }
 0x190   :  { %v210_v40 = vadd.f32 %v209_v39, %v208_v38 }
 0x192   :  { %v211_v41 = vrot.slane %v210_v40, 2 }
 0x194   :  { %v212_v42 = vadd.f32 %v211_v41, %v210_v40 }
 0x196   :  { %v213_v43 = vrot.slane %v212_v42, 1 }
 0x198   :  { %v214_v21 = vadd.f32 %v213_v43, %v212_v42 }
 0x19a   :  { %544 = vrcp.f32 %v214_v21 }
 0x1a4   :  { %v545_v46 = vpop.eup %544 }
 0x1a5   :  { %v223_v47 = vmul.f32 %v545_v46, %v543_v37 }
 0x1a7   :  { %v226_v50 = vmul.f32 %v223_v47, %v666_v33 }
 0x1a9   :  { %v228_v55 = vsel %vm139_vm0, %v226_v50, 0.0 }
 0x1aa   :  { %v229_v57 = vrot.slane %v228_v55, 4 }
 0x1ac   :  { %v230_v59 = vadd.f32 %v229_v57, %v228_v55 }
 0x1ae   :  { %v231_v60 = vrot.slane %v230_v59, 2 }
 0x1b0   :  { %v232_v61 = vadd.f32 %v231_v60, %v230_v59 }
 0x1b2   :  { %423 = vxpose.xlu1.c.b16.start.end [1/1] (short) (narrow) %v356_v24, 16 }
 0x20e   :  { %v154_v44 = vpop.xlane.xlu0 %153 }
 0x20f   :  { %546 = vrcp.f32 %v154_v44 }
 0x212   :  { %v157_v45 = vpop.xlane.xlu1 %156 }
 0x213   :  { %548 = vrcp.f32 %v157_v45 }
 0x218   :  { %v431_v16 = vpop.trf.xlu1 }
 0x219   :  { %v547_v48 = vpop.eup %546 }
 0x21a   :  { %v159_v49 = vmul.f32 %v547_v48, %v537_v62  ;;  %v233_v62 = vrot.slane %v232_v61, 1 }
 0x21c   :  { %v162_v51 = vmul.f32 %v657_v20, %v159_v49  ;;  %v234_v63 = vadd.f32 %v233_v62, %v232_v61  ;;  %v305_v20 = vsel %vm253_vm1, %v617_v10, 0 }
 0x21d   :  { %v549_v52 = vpop.eup %548  ;;  %311 = vmatpush1.bf16.msra.mxu1 %v305_v20 }
 0x21e   :  { %v164_v53 = vsel %vm139_vm0, %v162_v51, 0.0  ;;  %v161_v54 = vmul.f32 %v549_v52, %v539_v1  ;;  %v242_v0 = vadd.f32 1e-13, %v234_v63  ;;  %527 = vmatprep.subr.msk.bf16.mxu1 %vm253_vm1, %v621_v12 }
 0x21f   :  { %165 = vadd.xlane.f32.xlu0 %v164_v53 }
 0x220   :  { %v163_v56 = vmul.f32 %v652_v19, %v161_v54  ;;  %v255_v19 = vsel %vm253_vm1, %v606_v6, 0  ;;  %550 = vrcp.f32 %v242_v0  ;;  %v44_v6 = vld [vmem:[%s748_s4 + $0x8] sm:$0xff] }
 0x221   :  { %261 = vmatpush1.bf16.msra.mxu0 %v255_v19 }
 0x222   :  { %v167_v58 = vsel %vm139_vm0, %v163_v56, 0.0  ;;  %525 = vmatprep.subr.msk.bf16.mxu0 %vm253_vm1, %v619_v11 }
 0x223   :  { %168 = vadd.xlane.f32.xlu0 %v167_v58 }
 0x22a   :  { %v551_v1 = vpop.eup %550 }
 0x22b   :  { %v245_v4 = vmul.f32 %v551_v1, %v226_v50 }
 0x22d   :  { %v355_v2 = vpack.c.bf16 %v245_v4, %v245_v4 }
 0x250   :  { %357 = vxpose.xlu0.c.b16.start.end [1/1] (short) (narrow) %v355_v2, 16 }
 0x259   :  { %531 = vset.pattern.permute.xlu0 %v556_v3 }
 0x25a   :  { %491 = vperm.xlu0 %531, %v43_v5  }
 0x25e   :  { %496 = vperm.xlu0 %531, %v44_v6  }
 0x2ac   :  { %v166_v10 = vpop.xlane.xlu0 %165 }
 0x2ad   :  { %v170_v11 = vadd.f32 1e-13, %v166_v10 }
 0x2af   :  { %552 = vrcp.f32 %v170_v11 }
 0x2b0   :  { %v169_v12 = vpop.xlane.xlu0 %168 }
 0x2b1   :  { %v171_v7 = vadd.f32 1e-13, %v169_v12 }
 0x2b3   :  { %554 = vrcp.f32 %v171_v7 }
 0x2b6   :  { %v365_v24 = vpop.trf.xlu0 }
 0x2b9   :  { %v553_v8 = vpop.eup %552 }
 0x2ba   :  { %v173_v9 = vmul.f32 %v553_v8, %v162_v51 }
 0x2bc   :  { %v248_v13 = vpack.c.bf16 %v173_v9, %v173_v9 }
 0x2bd   :  { %v555_v15 = vpop.eup %554 }
 0x2be   :  { %v175_v18 = vmul.f32 %v555_v15, %v163_v56  ;;  %522 = vmatmul.mubr.msk.bf16.vlgmr.msra.gmra.mrb[4].mxu0 %vm139_vm0, %v248_v13 }
 0x2bf   :  { %383 = vmatpush1.bf16.msra.mxu0 %v377_v14  ;;  %414 = vmatprep.mubr.bf16.mxu0 %v556_v3 }
 0x2c0   :  { %v249_v22 = vpack.c.bf16 %v175_v18, %v175_v18 }
 0x2c2   :  { %524 = vmatmul.mubr.msk.bf16.vlgmr.msra.gmra.mrb[4].mxu1 %vm139_vm0, %v249_v22 }
 0x2c3   :  { %449 = vmatpush1.bf16.msra.mxu1 %v443_v23  ;;  %480 = vmatprep.mubr.bf16.mxu1 %v556_v3 }
 0x2c6   :  { %526 = vmatmul.mubr.msk.bf16.vlgmr.msra.gmra.mrb[8].mxu0 %vm139_vm0, %v365_v24 }
 0x2ca   :  { %528 = vmatmul.mubr.msk.bf16.vlgmr.msra.gmra.mrb[8].mxu1 %vm139_vm0, %v431_v16 }
 0x2d9   :  { %v492_v35 = vpop.permute.xlu0 %491 }
 0x2dd   :  { %v497_v42 = vpop.permute.xlu0 %496 }
 0x391   :  { %v294_v25 = vpop.f32.mrb[4].mxu0 }
 0x392   :  { %v351_v26 = vmul.f32 %v294_v25, %v666_v33  ;;  %v296_v27 = vpop.f32.mrb[5].mxu0 }
 0x393   :  { %v352_v28 = vmul.f32 %v296_v27, %v666_v33  ;;  %v298_v29 = vpop.f32.mrb[6].mxu0 }
 0x394   :  { %503 = vst [vmem:[%s749_s5] sm:$0xff] %v351_v26  ;;  %v299_v17 = vpop.f32.mrb[7].mxu0 }
 0x395   :  { %504 = vst [vmem:[%s749_s5 + $0x8] sm:$0xff] %v352_v28  ;;  %v344_v3 = vpop.f32.mrb[4].mxu1 }
 0x396   :  { %v353_v30 = vmul.f32 %v344_v3, %v668_v34  ;;  %v346_v31 = vpop.f32.mrb[5].mxu1 }
 0x397   :  { %v354_v32 = vmul.f32 %v346_v31, %v668_v34  ;;  %v348_v36 = vpop.f32.mrb[6].mxu1 }
 0x398   :  { %505 = vst [vmem:[%s749_s5 + $0x10] sm:$0xff] %v353_v30  ;;  %v349_v33 = vpop.f32.mrb[7].mxu1 }
 0x399   :  { %506 = vst [vmem:[%s749_s5 + $0x18] sm:$0xff] %v354_v32  ;;  %v416_v37 = vpop.f32.mrb[8].mxu0 }
 0x39a   :  { %v499_v38 = vmul.f32 %v492_v35, %v416_v37  ;;  %v418_v39 = vpop.f32.mrb[9].mxu0 }
 0x39b   :  { %v500_v40 = vmul.f32 %v492_v35, %v418_v39  ;;  %v420_v41 = vpop.f32.mrb[10].mxu0 }
 0x39c   :  { %507 = vst [vmem:[%s750_s6] sm:$0xff] %v499_v38  ;;  %v421_v34 = vpop.f32.mrb[11].mxu0 }
 0x39d   :  { %508 = vst [vmem:[%s750_s6 + $0x8] sm:$0xff] %v500_v40  ;;  %v482_v43 = vpop.f32.mrb[8].mxu1 }
 0x39e   :  { %v501_v21 = vmul.f32 %v497_v42, %v482_v43  ;;  %v484_v44 = vpop.f32.mrb[9].mxu1 }
 0x39f   :  { %v502_v45 = vmul.f32 %v497_v42, %v484_v44  ;;  %v486_v46 = vpop.f32.mrb[10].mxu1 }
 0x3a0   :  { %509 = vst [vmem:[%s750_s6 + $0x10] sm:$0xff] %v501_v21  ;;  %v487_v47 = vpop.f32.mrb[11].mxu1 }
 0x3a1   :  { %510 = vst [vmem:[%s750_s6 + $0x18] sm:$0xff] %v502_v45 }

// kernel: esim_forward.12
= control target key start
LH: loop header
LB: loop body
LE: loop exit
PB: predicated region body
PF: predicated region fallthrough
CT: control target
= control target key end

     0   :  { %8 = vsyncpa [#allocation4], 0  ;;  %s1368_s0 = inlined_call_operand.vmem [shape: f32[32,128], index: 0, kind: input, shape index: {}]   ;;  %s1369_s1 = inlined_call_operand.hbm [shape: bf16[128,1024], index: 1, kind: input, shape index: {}]   ;;  %s1370_s2 = inlined_call_operand.vmem [shape: f32[1,1024], index: 2, kind: input, shape index: {}]   ;;  %s1371_s3 = inlined_call_operand.vmem [shape: f32[32,1024], index: 3, kind: output, shape index: {}]  }
   0x1   :  { %10 = vsyncpa [#allocation4 + $0x1], 0  ;;  %s1144_s12 = smov 0   ;;  %s1146_s13 = smov 0  }
   0x2   :  { %s1148_s14 = smov 0   ;;  %s1150_s15 = smov 0  }
   0x3   :  { %s1152_s16 = smov 0   ;;  %s1154_s17 = smov 0  }
   0x4 LB: > { %s879_s18 = sadd.s32 4294967295, %s1117_s17   ;;  %s31_s19 = sadd.s32 1, %s1113_s16  ;;  %s1117_s17 = sphi %s1154_s17, %s16_s17   ;;  %s1113_s16 = sphi %s1152_s16, %s1382_s16   ;;  %s1109_s15 = sphi %s1150_s15, %s1381_s15   ;;  %s1105_s14 = sphi %s1148_s14, %s1380_s14   ;;  %s1101_s13 = sphi %s1146_s13, %s1379_s13   ;;  %s1097_s12 = sphi %s1144_s12, %s1378_s12  }
   0x5   : > { %p33_p0 = scmp.ge.s32.totalorder %s31_s19, 2  ;;  %s72_s20 = sadd.s32 1, %s1105_s14 }
   0x6   : > { %p79_p1 = scmp.ne.s32.totalorder %s1105_s14, %s1101_s13  ;;  %p80_p2 = scmp.eq.s32.totalorder %s1117_s17, 0 }
   0x7   : > { %s1384_s19 = smov (%p33_p0, %s31_s19), 0  ;;  %p85_p4 = scmp.ne.s32.totalorder %s1101_s13, %s1097_s12 }
   0x8   : > { %p1180_p3 = por %p80_p2, %p79_p1  ;;  %s68_s22 = ssub.s32 %s1113_s16, %s1384_s19 }
   0x9   : > { %p86_p5 = scmp.eq.s32.totalorder %s879_s18, 0  ;;  %p70_p6 = scmp.eq.s32.totalorder %s68_s22, 0 }
   0xa   : > { %p137_p7 = scmp.eq.s32.totalorder %s879_s18, 1  ;;  %p936_p10 = scmp.lt.s32.totalorder %s1117_s17, 2 }
   0xb   : > { %p1187_p8 = por %p86_p5, %p85_p4  ;;  %s175_s26 = sand.u32 1, %s1105_s14  }
   0xc   : > { %s1192_s24 = scalar_select %p70_p6, %s1105_s14, %s72_s20  }
   0xd   : > { %p1194_p9 = por %p137_p7, %p79_p1  ;;  %s928_s27 = sshll.u32 %s1113_s16, 8 }
   0xe   : > { %s884_s28 = sshll.u32 %s175_s26, 8  ;;  %s1204_s4 = scalar_lea.hbm %s1369_s1, %s928_s27 }
   0xf   : > { %s1374_s25 = scalar_select %p1194_p9, 1, 0 }
  0x10   : > { %s179_s5 = scalar_lea.vmem [#allocation3], %s884_s28  ;;  %p1208_p11 = pnand %p936_p10, %p1180_p3 }
  0x11   : > { %s189_s6 = sshll.u32 %s179_s5, 4  ;;  %s1215_s8 = scalar_lea.sflag [#allocation4], %s175_s26  ;;  %s1212_s6 = int_to_ptr.vmem [resolvable:$true] %s189_s6 }
  0x12   : > { %s1037_s9 = scalar_lea.hbm %s1204_s4, 4096  ;;  %p1039_p0 = pneg %p1208_p11 }
  0x13   : > { %p1038_p13 = scmp.ne.s32.totalorder %s1204_s4, %s1037_s9  ;;  %s1042_s12 = scalar_lea.hbm %s1369_s1, 8192 }
  0x14   : > { %p1043_p3 = scmp.lt.u32.totalorder %s1204_s4, %s1369_s1  ;;  %p1044_p4 = scmp.lt.u32.totalorder %s1042_s12, %s1037_s9 }
  0x15   : > { %p1040_p1 = pnand %p1039_p0, %p1038_p13  ;;  %p1046_p6 = scmp.lt.u32.totalorder %s1037_s9, %s1204_s4 }
  0x16   : > { %p1045_p5 = por %p1044_p4, %p1043_p3 }
  0x17   : > { %p1041_p2 = pneg %p1040_p1 }
  0x18   : > { %p1047_p7 = por %p1046_p6, %p1045_p5 }
  0x1a   : > { %p1048_p10 = pnand %p1047_p7, %p1041_p2 }
  0x1c   : > { %1051 = shalt.err (!%p1048_p10)
}
  0x1d   : > { %s1052_s21 = scalar_lea.vmem %s1212_s6, 4096  ;;  %s1119_s22 = smov [#allocation3]  }
  0x1e   : > { %p1053_p13 = scmp.ne.s32.totalorder %s1212_s6, %s1052_s21  ;;  %s1057_s26 = sshll.u32 %s1119_s22, 4  ;;  %s1058_s26 = int_to_ptr.vmem [resolvable:$false] %s1057_s26 }
  0x1f   : > { %s1059_s27 = scalar_lea.vmem %s1058_s26, 8192  ;;  %p1060_p9 = scmp.lt.s32.totalorder %s1212_s6, %s1058_s26 }
  0x20   : > { %p1055_p1 = pnand %p1053_p13, %p1039_p0  ;;  %p1061_p3 = scmp.lt.s32.totalorder %s1059_s27, %s1052_s21 }
  0x22   : > { %p1056_p12 = pneg %p1055_p1  ;;  %p1062_p4 = por %p1061_p3, %p1060_p9 }
  0x24   : > { %p1063_p5 = pnand %p1062_p4, %p1056_p12 }
  0x26   : > { %1066 = shalt.err (!%p1063_p5)
}
  0x27   : > { %s1120_s28 = smov 512   ;;  %s1121_s29 = smov 256  }
  0x28   : > { %s1122_s30 = smov 16   ;;  %p205_p0 = scmp.lt.s32.totalorder %s1117_s17, 3 }
  0x29   : > { %935 = dma.hbm_to_vmem [thread:$0]  (!%p1208_p11), %s1204_s4, 4096, %s1212_s6, %s1215_s8, %s1120_s28, %s1121_s29, %s1122_s30  }
  0x2a   : > { %p1376_p2 = scmp.ge.s32.totalorder %s1117_s17, 1 }
  0x2c   : > { %p206_p6 = pnand %p1376_p2, %p205_p0 }
  0x2d   : > { %s1247_s5 = sand.u32 (!%p206_p6), 1, %s1101_s13  }
  0x2e   : > { %209 = sbr.rel (%p206_p6) target bundleno = 322 (0x142), region = 32  ;;  %s888_s9 = sshll.u32 (!%p206_p6), %s1247_s5, 8 }
  0x2f   : > { %s212_s10 = scalar_lea.sflag (!%p206_p6), [#allocation4], %s1247_s5  ;;  %s1251_s11 = scalar_lea.vmem (!%p206_p6), [#allocation3], %s888_s9 }
  0x35   : > { %1092 = dma.done.wait (%p1187_p8), %s212_s10, 4096  }
  0x36   : > { %1094 = vsyncadd (%p1187_p8), %s212_s10, 4294963200  ;;  %v1123_v0 = vmov 0   ;;  %v989_v1 = vld [vmem:[%s1251_s11 + $0x4] ss:$16 sps:$4 sm:$0xff]   ;;  %v991_v2 = vld [vmem:[%s1251_s11 + $0xc] ss:$16 sps:$4 sm:$0xff]   ;;  %v661_v39 = vlaneseq }
  0x37   : > { %534 = vmatprep.mubr.bf16.mxu0 %v1123_v0  ;;  %587 = vmatprep.mubr.bf16.mxu1 %v1123_v0  ;;  %v993_v3 = vld [vmem:[%s1251_s11] ss:$16 sps:$4 sm:$0xff]   ;;  %v994_v4 = vld [vmem:[%s1251_s11 + $0x8] ss:$16 sps:$4 sm:$0xff]   ;;  %v995_v5 = vld [vmem:[%s1251_s11 + $0x24] ss:$16 sps:$4 sm:$0xff]  }
  0x38   : > { %502 = vmatprep.subr.bf16.mxu0 %v989_v1  ;;  %555 = vmatprep.subr.bf16.mxu1 %v991_v2  ;;  %v997_v6 = vld [vmem:[%s1251_s11 + $0x2c] ss:$16 sps:$4 sm:$0xff]   ;;  %v999_v7 = vld [vmem:[%s1251_s11 + $0x20] ss:$16 sps:$4 sm:$0xff]   ;;  %v1000_v8 = vld [vmem:[%s1251_s11 + $0x28] ss:$16 sps:$4 sm:$0xff]  }
  0x39   : > { %503 = vmatpush1.bf16.msra.mxu0 %v993_v3  ;;  %556 = vmatpush1.bf16.msra.mxu1 %v994_v4  ;;  %v1001_v9 = vld [vmem:[%s1251_s11 + $0x44] ss:$16 sps:$4 sm:$0xff]   ;;  %v1003_v10 = vld [vmem:[%s1251_s11 + $0x4c] ss:$16 sps:$4 sm:$0xff]   ;;  %v1005_v11 = vld [vmem:[%s1251_s11 + $0x40] ss:$16 sps:$4 sm:$0xff]  }
  0x3a   : > { %504 = vmatprep.subr.bf16.mxu0 %v995_v5  ;;  %557 = vmatprep.subr.bf16.mxu1 %v997_v6  ;;  %v1006_v12 = vld [vmem:[%s1251_s11 + $0x48] ss:$16 sps:$4 sm:$0xff]   ;;  %v1007_v13 = vld [vmem:[%s1251_s11 + $0x64] ss:$16 sps:$4 sm:$0xff]   ;;  %v1009_v14 = vld [vmem:[%s1251_s11 + $0x6c] ss:$16 sps:$4 sm:$0xff]  }
  0x3b   : > { %v1011_v15 = vld [vmem:[%s1251_s11 + $0x60] ss:$16 sps:$4 sm:$0xff]   ;;  %v1012_v16 = vld [vmem:[%s1251_s11 + $0x68] ss:$16 sps:$4 sm:$0xff]   ;;  %v1013_v17 = vld [vmem:[%s1251_s11 + $0x84] ss:$16 sps:$4 sm:$0xff]  }
  0x3c   : > { %v1015_v18 = vld [vmem:[%s1251_s11 + $0x8c] ss:$16 sps:$4 sm:$0xff]   ;;  %v1017_v19 = vld [vmem:[%s1251_s11 + $0x80] ss:$16 sps:$4 sm:$0xff]   ;;  %v1018_v20 = vld [vmem:[%s1251_s11 + $0x88] ss:$16 sps:$4 sm:$0xff]  }
  0x3d   : > { %505 = vmatpush1.bf16.msra.mxu0 %v999_v7  ;;  %558 = vmatpush1.bf16.msra.mxu1 %v1000_v8  ;;  %v1019_v21 = vld [vmem:[%s1251_s11 + $0xa4] ss:$16 sps:$4 sm:$0xff]   ;;  %v1021_v22 = vld [vmem:[%s1251_s11 + $0xac] ss:$16 sps:$4 sm:$0xff]   ;;  %v1023_v23 = vld [vmem:[%s1251_s11 + $0xa0] ss:$16 sps:$4 sm:$0xff]  }
  0x3e   : > { %506 = vmatprep.subr.bf16.mxu0 %v1001_v9  ;;  %559 = vmatprep.subr.bf16.mxu1 %v1003_v10  ;;  %v1024_v24 = vld [vmem:[%s1251_s11 + $0xa8] ss:$16 sps:$4 sm:$0xff]   ;;  %v1025_v25 = vld [vmem:[%s1251_s11 + $0xc4] ss:$16 sps:$4 sm:$0xff]   ;;  %v1027_v26 = vld [vmem:[%s1251_s11 + $0xcc] ss:$16 sps:$4 sm:$0xff]  }
  0x3f   : > { %v1029_v27 = vld [vmem:[%s1251_s11 + $0xc0] ss:$16 sps:$4 sm:$0xff]   ;;  %v1030_v28 = vld [vmem:[%s1251_s11 + $0xc8] ss:$16 sps:$4 sm:$0xff]   ;;  %v1031_v29 = vld [vmem:[%s1251_s11 + $0xe4] ss:$16 sps:$4 sm:$0xff]  }
  0x40   : > { %v1033_v30 = vld [vmem:[%s1251_s11 + $0xec] ss:$16 sps:$4 sm:$0xff]   ;;  %v1035_v31 = vld [vmem:[%s1251_s11 + $0xe0] ss:$16 sps:$4 sm:$0xff]   ;;  %v1036_v32 = vld [vmem:[%s1251_s11 + $0xe8] ss:$16 sps:$4 sm:$0xff]  }
  0x41   : > { %507 = vmatpush1.bf16.msra.mxu0 %v1005_v11  ;;  %560 = vmatpush1.bf16.msra.mxu1 %v1006_v12  ;;  %v304_v33 = vld [vmem:[%s1368_s0] sm:$0xff]  ;;  %v305_v34 = vld [vmem:[%s1368_s0 + $0x8] sm:$0xff]  ;;  %v306_v36 = vld [vmem:[%s1368_s0 + $0x10] sm:$0xff]  ;;  %s890_s21 = sshll.u32 %s1109_s15, 2  ;;  %v662_v40 = vshrl.u32 %v661_v39, 7  ;;  %s889_s28 = sshll.u32 %s1247_s5, 7 }
  0x42   : > { %508 = vmatprep.subr.bf16.mxu0 %v1007_v13  ;;  %561 = vmatprep.subr.bf16.mxu1 %v1009_v14  ;;  %v308_v35 = vpack.c.bf16 %v305_v34, %v304_v33  ;;  %v307_v37 = vld [vmem:[%s1368_s0 + $0x18] sm:$0xff]  ;;  %p261_p8 = scmp.lt.s32.totalorder %s890_s21, 7  ;;  %s1310_s29 = scalar_lea.vmem [#allocation5], %s889_s28 }
  0x43   : > { %v309_v38 = vpack.c.bf16 %v307_v37, %v306_v36  ;;  %v663_v41 = vsub.s32 0, %v662_v40  ;;  %v671_v42 = vsub.s32 2, %v662_v40  ;;  %v667_v44 = vsub.s32 1, %v662_v40  ;;  %p1377_p9 = scmp.ne.s32.totalorder %s1374_s25, 0 }
  0x44   : > { %s1386_s21 = smov (!%p261_p8, %s890_s21), 7  ;;  %v675_v45 = vsub.s32 3, %v662_v40  ;;  %s929_s30 = sshll.u32 (%p1377_p9), %s1109_s15, 5 }
  0x45   : > { %509 = vmatpush1.bf16.msra.mxu0 %v1011_v15  ;;  %562 = vmatpush1.bf16.msra.mxu1 %v1012_v16  ;;  %s263_s27 = scalar_lea.vmem %s1370_s2, %s1386_s21  ;;  %s725_s10 = scalar_lea.vmem (%p1377_p9), %s1371_s3, %s929_s30 }
  0x46   : > { %510 = vmatprep.subr.bf16.mxu0 %v1013_v17  ;;  %563 = vmatprep.subr.bf16.mxu1 %v1015_v18  ;;  %v659_v43 = vld [vmem:[%s263_s27] sm:$0xf] }
  0x47   : > { %v664_v46 = vrot.slane %v659_v43, %v663_v41  ;;  %v672_v47 = vrot.slane %v659_v43, %v671_v42  ;;  %v668_v48 = vrot.slane %v659_v43, %v667_v44  ;;  %v676_v49 = vrot.slane %v659_v43, %v675_v45 }
  0x49   : > { %511 = vmatpush1.bf16.msra.mxu0 %v1017_v19  ;;  %564 = vmatpush1.bf16.msra.mxu1 %v1018_v20 }
  0x4a   : > { %512 = vmatprep.subr.bf16.mxu0 %v1019_v21  ;;  %565 = vmatprep.subr.bf16.mxu1 %v1021_v22 }
  0x4d   : > { %513 = vmatpush1.bf16.msra.mxu0 %v1023_v23  ;;  %566 = vmatpush1.bf16.msra.mxu1 %v1024_v24 }
  0x4e   : > { %514 = vmatprep.subr.bf16.mxu0 %v1025_v25  ;;  %567 = vmatprep.subr.bf16.mxu1 %v1027_v26 }
  0x51   : > { %515 = vmatpush1.bf16.msra.mxu0 %v1029_v27  ;;  %568 = vmatpush1.bf16.msra.mxu1 %v1030_v28 }
  0x52   : > { %516 = vmatprep.subr.bf16.mxu0 %v1031_v29  ;;  %569 = vmatprep.subr.bf16.mxu1 %v1033_v30 }
  0x55   : > { %517 = vmatpush1.bf16.msra.mxu0 %v1035_v31  ;;  %570 = vmatpush1.bf16.msra.mxu1 %v1036_v32 }
  0x58   : > { %535 = vmatmul.mubr.bf16.vlgmr.msra.gmra.mrb[0].mxu0 %v308_v35  ;;  %588 = vmatmul.mubr.bf16.vlgmr.msra.gmra.mrb[0].mxu1 %v308_v35 }
  0x59   : > { %544 = vmatprep.mubr.bf16.mxu0 %v1123_v0  ;;  %597 = vmatprep.mubr.bf16.mxu1 %v1123_v0 }
  0x60   : > { %545 = vmatmul.mubr.bf16.gmra.mrb[4].mxu0 %v309_v38  ;;  %598 = vmatmul.mubr.bf16.gmra.mrb[4].mxu1 %v309_v38 }
 0x12b   : > { %v536_v50 = vpop.f32.mrb[0].mxu0  ;;  %v589_v51 = vpop.f32.mrb[0].mxu1 }
 0x12c   : > { %v681_v52 = vadd.f32 %v664_v46, %v536_v50  ;;  %v683_v53 = vadd.f32 %v672_v47, %v589_v51  ;;  %v538_v54 = vpop.f32.mrb[1].mxu0  ;;  %v591_v55 = vpop.f32.mrb[1].mxu1 }
 0x12d   : > { %v682_v56 = vadd.f32 %v668_v48, %v538_v54  ;;  %v684_v57 = vadd.f32 %v676_v49, %v591_v55  ;;  %v540_v58 = vpop.f32.mrb[2].mxu0  ;;  %v593_v59 = vpop.f32.mrb[2].mxu1 }
 0x12e   : > { %697 = vst [vmem:[%s1310_s29] sm:$0xff] %v681_v52  ;;  %699 = vst [vmem:[%s1310_s29 + $0x10] sm:$0xff] %v683_v53  ;;  %v685_v60 = vadd.f32 %v664_v46, %v540_v58  ;;  %v687_v61 = vadd.f32 %v672_v47, %v593_v59  ;;  %v542_v62 = vpop.f32.mrb[3].mxu0  ;;  %v595_v63 = vpop.f32.mrb[3].mxu1 }
 0x12f   : > { %698 = vst [vmem:[%s1310_s29 + $0x8] sm:$0xff] %v682_v56  ;;  %700 = vst [vmem:[%s1310_s29 + $0x18] sm:$0xff] %v684_v57  ;;  %v686_v0 = vadd.f32 %v668_v48, %v542_v62  ;;  %v688_v1 = vadd.f32 %v676_v49, %v595_v63 }
 0x130   : > { %701 = vst [vmem:[%s1310_s29 + $0x20] sm:$0xff] %v685_v60  ;;  %703 = vst [vmem:[%s1310_s29 + $0x30] sm:$0xff] %v687_v61 }
 0x131   : > { %702 = vst [vmem:[%s1310_s29 + $0x28] sm:$0xff] %v686_v0  ;;  %704 = vst [vmem:[%s1310_s29 + $0x38] sm:$0xff] %v688_v1 }
 0x133   : > { %v546_v2 = vpop.f32.mrb[4].mxu0  ;;  %v599_v3 = vpop.f32.mrb[4].mxu1  ;;  %719 = sbr.rel (!%p1377_p9) target bundleno = 322 (0x142), region = 48 }
 0x134   : > { %v689_v4 = vadd.f32 %v664_v46, %v546_v2  ;;  %v691_v5 = vadd.f32 %v672_v47, %v599_v3  ;;  %v548_v6 = vpop.f32.mrb[5].mxu0  ;;  %v601_v7 = vpop.f32.mrb[5].mxu1 }
 0x135   : > { %v690_v8 = vadd.f32 %v668_v48, %v548_v6  ;;  %v692_v9 = vadd.f32 %v676_v49, %v601_v7  ;;  %v550_v10 = vpop.f32.mrb[6].mxu0  ;;  %v603_v11 = vpop.f32.mrb[6].mxu1  ;;  %v738_v18 = vld [vmem:[%s1310_s29] sm:$0xff] (%p1377_p9)  ;;  %v742_v20 = vld [vmem:[%s1310_s29 + $0x10] sm:$0xff] (%p1377_p9) }
 0x136   : > { %705 = vst [vmem:[%s1310_s29 + $0x40] sm:$0xff] %v689_v4  ;;  %707 = vst [vmem:[%s1310_s29 + $0x50] sm:$0xff] %v691_v5  ;;  %v693_v12 = vadd.f32 %v664_v46, %v550_v10  ;;  %v695_v13 = vadd.f32 %v672_v47, %v603_v11  ;;  %v552_v14 = vpop.f32.mrb[7].mxu0  ;;  %v605_v15 = vpop.f32.mrb[7].mxu1  ;;  %v740_v19 = vld [vmem:[%s1310_s29 + $0x8] sm:$0xff] (%p1377_p9)  ;;  %v744_v21 = vld [vmem:[%s1310_s29 + $0x18] sm:$0xff] (%p1377_p9) }
 0x137   : > { %706 = vst [vmem:[%s1310_s29 + $0x48] sm:$0xff] %v690_v8  ;;  %708 = vst [vmem:[%s1310_s29 + $0x58] sm:$0xff] %v692_v9  ;;  %v694_v16 = vadd.f32 %v668_v48, %v552_v14  ;;  %v696_v17 = vadd.f32 %v676_v49, %v605_v15  ;;  %v746_v22 = vld [vmem:[%s1310_s29 + $0x20] sm:$0xff] (%p1377_p9)  ;;  %v750_v24 = vld [vmem:[%s1310_s29 + $0x30] sm:$0xff] (%p1377_p9) }
 0x138   : > { %709 = vst [vmem:[%s1310_s29 + $0x60] sm:$0xff] %v693_v12  ;;  %711 = vst [vmem:[%s1310_s29 + $0x70] sm:$0xff] %v695_v13  ;;  %v748_v23 = vld [vmem:[%s1310_s29 + $0x28] sm:$0xff] (%p1377_p9)  ;;  %v752_v25 = vld [vmem:[%s1310_s29 + $0x38] sm:$0xff] (%p1377_p9) }
 0x139   : > { %710 = vst [vmem:[%s1310_s29 + $0x68] sm:$0xff] %v694_v16  ;;  %712 = vst [vmem:[%s1310_s29 + $0x78] sm:$0xff] %v696_v17 }
 0x13a   : > { %739 = vst [vmem:[%s725_s10] sm:$0xff] %v738_v18  ;;  %741 = vst [vmem:[%s725_s10 + $0x8] sm:$0xff] %v740_v19 }
 0x13b   : > { %743 = vst [vmem:[%s725_s10 + $0x10] sm:$0xff] %v742_v20  ;;  %745 = vst [vmem:[%s725_s10 + $0x18] sm:$0xff] %v744_v21 }
 0x13c   : > { %747 = vst [vmem:[%s725_s10 + $0x40] sm:$0xff] %v746_v22  ;;  %749 = vst [vmem:[%s725_s10 + $0x48] sm:$0xff] %v748_v23 }
 0x13d   : > { %v754_v26 = vld [vmem:[%s1310_s29 + $0x40] sm:$0xff]  ;;  %751 = vst [vmem:[%s725_s10 + $0x50] sm:$0xff] %v750_v24  ;;  %753 = vst [vmem:[%s725_s10 + $0x58] sm:$0xff] %v752_v25  ;;  %v758_v28 = vld [vmem:[%s1310_s29 + $0x50] sm:$0xff] }
 0x13e   : > { %755 = vst [vmem:[%s725_s10 + $0x80] sm:$0xff] %v754_v26  ;;  %v756_v27 = vld [vmem:[%s1310_s29 + $0x48] sm:$0xff]  ;;  %v760_v29 = vld [vmem:[%s1310_s29 + $0x58] sm:$0xff]  ;;  %759 = vst [vmem:[%s725_s10 + $0x90] sm:$0xff] %v758_v28 }
 0x13f   : > { %757 = vst [vmem:[%s725_s10 + $0x88] sm:$0xff] %v756_v27  ;;  %761 = vst [vmem:[%s725_s10 + $0x98] sm:$0xff] %v760_v29  ;;  %v762_v30 = vld [vmem:[%s1310_s29 + $0x60] sm:$0xff]  ;;  %v766_v32 = vld [vmem:[%s1310_s29 + $0x70] sm:$0xff] }
 0x140   : > { %v764_v31 = vld [vmem:[%s1310_s29 + $0x68] sm:$0xff]  ;;  %763 = vst [vmem:[%s725_s10 + $0xc0] sm:$0xff] %v762_v30  ;;  %767 = vst [vmem:[%s725_s10 + $0xd0] sm:$0xff] %v766_v32  ;;  %v768_v33 = vld [vmem:[%s1310_s29 + $0x78] sm:$0xff] }
 0x141   : > { %765 = vst [vmem:[%s725_s10 + $0xc8] sm:$0xff] %v764_v31  ;;  %769 = vst [vmem:[%s725_s10 + $0xd8] sm:$0xff] %v768_v33 }
 0x142 PF: > { %s16_s17 = sadd.s32 1, %s1117_s17   ;;  %s1378_s12 = smov %s1101_s13 }
 0x143   : > { %p13_p11 = scmp.ge.s32.totalorder %s16_s17, 4   ;;  %s1379_s13 = smov %s1105_s14 }
 0x144   : > { %s1380_s14 = smov %s1192_s24  ;;  %s1381_s15 = smov %s1113_s16 }
 0x145   : > { %s1382_s16 = smov %s1384_s19  ;;  %15 = sbr.rel (!%p13_p11) target bundleno = 4 (0x4), region = 109 }
 0x14c   :  { %785 = vsyncpa [#allocation4], 1 }
 0x14d   :  { %787 = vsyncpa [#allocation4 + $0x1], 1 }

// kernel: esim_forward.16
= control target key start
LH: loop header
LB: loop body
LE: loop exit
PB: predicated region body
PF: predicated region fallthrough
CT: control target
= control target key end

     0   :  { %s1390_s3 = inlined_call_operand.vmem [shape: bf16[256,128], index: 3, kind: input, shape index: {}]   ;;  %s1391_s2 = inlined_call_operand.vmem [shape: bf16[256,128], index: 2, kind: input, shape index: {}]   ;;  %s1392_s1 = inlined_call_operand.vmem [shape: f32[32,256], index: 1, kind: input, shape index: {}]   ;;  %s1393_s0 = inlined_call_operand.vmem [shape: f32[32,256], index: 0, kind: input, shape index: {}]   ;;  %s1394_s4 = inlined_call_operand.vmem [shape: bf16[256,128], index: 4, kind: input, shape index: {}]   ;;  %s1395_s5 = inlined_call_operand.vmem [shape: bf16[256,128], index: 5, kind: input, shape index: {}]   ;;  %s1396_s6 = inlined_call_operand.vmem [shape: f32[1,128], index: 6, kind: input, shape index: {}]   ;;  %s1397_s7 = inlined_call_operand.vmem [shape: f32[32,128], index: 7, kind: output, shape index: {}]  }
   0x1   :  { %v991_v0 = vld [vmem:[%s1390_s3 + $0x40] sm:$0xff]   ;;  %v995_v4 = vld [vmem:[%s1390_s3 + $0x48] sm:$0xff]   ;;  %v999_v8 = vld [vmem:[%s1390_s3 + $0x50] sm:$0xff]  }
   0x2   :  { %v992_v1 = vld [vmem:[%s1391_s2 + $0x40] sm:$0xff]   ;;  %879 = vmatprep.subr.bf16.mxu0 %v991_v0  ;;  %v996_v5 = vld [vmem:[%s1391_s2 + $0x48] sm:$0xff]   ;;  %v1000_v9 = vld [vmem:[%s1391_s2 + $0x50] sm:$0xff]  }
   0x3   :  { %v993_v2 = vld [vmem:[%s1390_s3] sm:$0xff]   ;;  %907 = vmatprep.subr.bf16.mxu1 %v992_v1  ;;  %v997_v6 = vld [vmem:[%s1390_s3 + $0x8] sm:$0xff]   ;;  %v1001_v10 = vld [vmem:[%s1390_s3 + $0x10] sm:$0xff]  }
   0x4   :  { %v994_v3 = vld [vmem:[%s1391_s2] sm:$0xff]   ;;  %880 = vmatpush3.bf16.msra.mxu0 %v993_v2  ;;  %v998_v7 = vld [vmem:[%s1391_s2 + $0x8] sm:$0xff]   ;;  %v1002_v11 = vld [vmem:[%s1391_s2 + $0x10] sm:$0xff]  }
   0x5   :  { %908 = vmatpush3.bf16.msra.mxu1 %v994_v3  ;;  %881 = vmatprep.subr.bf16.mxu0 %v995_v4  ;;  %v1003_v12 = vld [vmem:[%s1390_s3 + $0x58] sm:$0xff]   ;;  %v1007_v16 = vld [vmem:[%s1390_s3 + $0x60] sm:$0xff]   ;;  %v1011_v20 = vld [vmem:[%s1390_s3 + $0x68] sm:$0xff]  }
   0x6   :  { %909 = vmatprep.subr.bf16.mxu1 %v996_v5  ;;  %v1004_v13 = vld [vmem:[%s1391_s2 + $0x58] sm:$0xff]   ;;  %v1008_v17 = vld [vmem:[%s1391_s2 + $0x60] sm:$0xff]   ;;  %v1012_v21 = vld [vmem:[%s1391_s2 + $0x68] sm:$0xff]  }
   0x7   :  { %v1005_v14 = vld [vmem:[%s1390_s3 + $0x18] sm:$0xff]   ;;  %v1009_v18 = vld [vmem:[%s1390_s3 + $0x20] sm:$0xff]   ;;  %v1013_v22 = vld [vmem:[%s1390_s3 + $0x28] sm:$0xff]  }
   0x8   :  { %882 = vmatpush3.bf16.msra.mxu0 %v997_v6  ;;  %v1006_v15 = vld [vmem:[%s1391_s2 + $0x18] sm:$0xff]   ;;  %v1010_v19 = vld [vmem:[%s1391_s2 + $0x20] sm:$0xff]   ;;  %v1014_v23 = vld [vmem:[%s1391_s2 + $0x28] sm:$0xff]  }
   0x9   :  { %910 = vmatpush3.bf16.msra.mxu1 %v998_v7  ;;  %883 = vmatprep.subr.bf16.mxu0 %v999_v8  ;;  %v1015_v24 = vld [vmem:[%s1390_s3 + $0x70] sm:$0xff]   ;;  %v1019_v28 = vld [vmem:[%s1390_s3 + $0x78] sm:$0xff]   ;;  %v1194_v32 = vld [vmem:[%s1392_s1 + $0x8] sm:$0xff] }
   0xa   :  { %911 = vmatprep.subr.bf16.mxu1 %v1000_v9  ;;  %v1016_v25 = vld [vmem:[%s1391_s2 + $0x70] sm:$0xff]   ;;  %v1020_v29 = vld [vmem:[%s1391_s2 + $0x78] sm:$0xff]   ;;  %v1204_v34 = vld [vmem:[%s1393_s0 + $0x8] sm:$0xff] }
   0xb   :  { %v1017_v26 = vld [vmem:[%s1390_s3 + $0x30] sm:$0xff]   ;;  %v1021_v30 = vld [vmem:[%s1390_s3 + $0x38] sm:$0xff]   ;;  %v1216_v37 = vld [vmem:[%s1392_s1] sm:$0xff]  ;;  %v406_v1 = vsub.f32 %v1204_v34, %v1194_v32  ;;  %v599_v6 = vmul.f32 %v1194_v32, %v1204_v34 }
   0xc   :  { %884 = vmatpush3.bf16.msra.mxu0 %v1001_v10  ;;  %v1018_v27 = vld [vmem:[%s1391_s2 + $0x30] sm:$0xff]   ;;  %v1022_v31 = vld [vmem:[%s1391_s2 + $0x38] sm:$0xff]   ;;  %v1230_v41 = vld [vmem:[%s1393_s0] sm:$0xff] }
   0xd   :  { %912 = vmatpush3.bf16.msra.mxu1 %v1002_v11  ;;  %885 = vmatprep.subr.bf16.mxu0 %v1003_v12  ;;  %v1199_v33 = vld [vmem:[%s1392_s1 + $0x18] sm:$0xff]  ;;  %v1221_v38 = vld [vmem:[%s1392_s1 + $0x10] sm:$0xff]  ;;  %v1023_v44 = vld [vmem:[%s1394_s4 + $0x40] sm:$0xff]  }
   0xe   :  { %913 = vmatprep.subr.bf16.mxu1 %v1004_v13  ;;  %v80_v35 = vpack.c.bf16 %v1199_v33, %v1194_v32  ;;  %v1211_v36 = vld [vmem:[%s1393_s0 + $0x18] sm:$0xff]  ;;  %v79_v40 = vpack.c.bf16 %v1221_v38, %v1216_v37  ;;  %v1235_v42 = vld [vmem:[%s1393_s0 + $0x10] sm:$0xff]  ;;  %v1024_v45 = vld [vmem:[%s1395_s5 + $0x40] sm:$0xff]  }
   0xf   :  { %v44_v39 = vpack.c.bf16 %v1211_v36, %v1204_v34  ;;  %v43_v43 = vpack.c.bf16 %v1235_v42, %v1230_v41  ;;  %v1025_v46 = vld [vmem:[%s1394_s4] sm:$0xff]   ;;  %v1027_v48 = vld [vmem:[%s1394_s4 + $0x48] sm:$0xff]   ;;  %v1031_v52 = vld [vmem:[%s1394_s4 + $0x50] sm:$0xff]   ;;  %v408_v2 = vsub.f32 %v1211_v36, %v1199_v33  ;;  %v601_v7 = vmul.f32 %v1199_v33, %v1211_v36 }
  0x10   :  { %886 = vmatpush3.bf16.msra.mxu0 %v1005_v14  ;;  %243 = vmatprep.mubr.bf16.mxu0 %v80_v35  ;;  %v1026_v47 = vld [vmem:[%s1395_s5] sm:$0xff]   ;;  %v1028_v49 = vld [vmem:[%s1395_s5 + $0x48] sm:$0xff]   ;;  %v1032_v53 = vld [vmem:[%s1395_s5 + $0x50] sm:$0xff]  }
  0x11   :  { %914 = vmatpush3.bf16.msra.mxu1 %v1006_v15  ;;  %887 = vmatprep.subr.bf16.mxu0 %v1007_v16  ;;  %v1029_v50 = vld [vmem:[%s1394_s4 + $0x8] sm:$0xff]   ;;  %v1033_v54 = vld [vmem:[%s1394_s4 + $0x10] sm:$0xff]   ;;  %v1035_v56 = vld [vmem:[%s1394_s4 + $0x58] sm:$0xff]  }
  0x12   :  { %915 = vmatprep.subr.bf16.mxu1 %v1008_v17  ;;  %388 = vmatprep.mubr.bf16.mxu1 %v44_v39  ;;  %v1030_v51 = vld [vmem:[%s1395_s5 + $0x8] sm:$0xff]   ;;  %v1034_v55 = vld [vmem:[%s1395_s5 + $0x10] sm:$0xff]   ;;  %v1036_v57 = vld [vmem:[%s1395_s5 + $0x58] sm:$0xff]   ;;  %v414_v17 = vpack.c.bf16 %v408_v2, %v406_v1 }
  0x13   :  { %v1037_v58 = vld [vmem:[%s1394_s4 + $0x18] sm:$0xff]   ;;  %v1039_v60 = vld [vmem:[%s1394_s4 + $0x60] sm:$0xff]   ;;  %v40_v0 = vld [vmem:[%s1392_s1 + $0x28] sm:$0xff] }
  0x14   :  { %888 = vmatpush3.bf16.msra.mxu0 %v1009_v18  ;;  %v1038_v59 = vld [vmem:[%s1395_s5 + $0x18] sm:$0xff]   ;;  %v1040_v61 = vld [vmem:[%s1395_s5 + $0x60] sm:$0xff]   ;;  %v32_v4 = vld [vmem:[%s1393_s0 + $0x28] sm:$0xff] }
  0x15   :  { %916 = vmatpush3.bf16.msra.mxu1 %v1010_v19  ;;  %889 = vmatprep.subr.bf16.mxu0 %v1011_v20  ;;  %v1041_v62 = vld [vmem:[%s1394_s4 + $0x20] sm:$0xff]   ;;  %v42_v3 = vld [vmem:[%s1392_s1 + $0x38] sm:$0xff]  ;;  %v1043_v10 = vld [vmem:[%s1394_s4 + $0x68] sm:$0xff]   ;;  %v607_v20 = vpack.c.bf16 %v601_v7, %v599_v6  ;;  %v603_v34 = vmul.f32 %v40_v0, %v32_v4 }
  0x16   :  { %917 = vmatprep.subr.bf16.mxu1 %v1012_v21  ;;  %v1042_v63 = vld [vmem:[%s1395_s5 + $0x20] sm:$0xff]   ;;  %v34_v5 = vld [vmem:[%s1393_s0 + $0x38] sm:$0xff]  ;;  %v82_v8 = vpack.c.bf16 %v42_v3, %v40_v0  ;;  %v1044_v11 = vld [vmem:[%s1395_s5 + $0x68] sm:$0xff]  }
  0x17   :  { %v46_v9 = vpack.c.bf16 %v34_v5, %v32_v4  ;;  %v39_v12 = vld [vmem:[%s1392_s1 + $0x20] sm:$0xff]  ;;  %v41_v13 = vld [vmem:[%s1392_s1 + $0x30] sm:$0xff]  ;;  %v1045_v19 = vld [vmem:[%s1394_s4 + $0x28] sm:$0xff]   ;;  %v412_v32 = vsub.f32 %v34_v5, %v42_v3  ;;  %v605_v35 = vmul.f32 %v42_v3, %v34_v5 }
  0x18   :  { %890 = vmatpush3.bf16.msra.mxu0 %v1013_v22  ;;  %v31_v14 = vld [vmem:[%s1393_s0 + $0x20] sm:$0xff]  ;;  %v81_v15 = vpack.c.bf16 %v41_v13, %v39_v12  ;;  %v33_v16 = vld [vmem:[%s1393_s0 + $0x30] sm:$0xff]  ;;  %v1046_v21 = vld [vmem:[%s1395_s5 + $0x28] sm:$0xff]  }
  0x19   :  { %918 = vmatpush3.bf16.msra.mxu1 %v1014_v23  ;;  %891 = vmatprep.subr.bf16.mxu0 %v1015_v24  ;;  %v45_v18 = vpack.c.bf16 %v33_v16, %v31_v14  ;;  %v1047_v22 = vld [vmem:[%s1394_s4 + $0x70] sm:$0xff]   ;;  %v1052_v33 = vld [vmem:[%s1395_s5 + $0x78] sm:$0xff]  }
  0x1a   :  { %919 = vmatprep.subr.bf16.mxu1 %v1016_v25  ;;  %v1048_v23 = vld [vmem:[%s1395_s5 + $0x70] sm:$0xff]   ;;  %v405_v25 = vsub.f32 %v1230_v41, %v1216_v37  ;;  %v1053_v36 = vld [vmem:[%s1394_s4 + $0x38] sm:$0xff]  }
  0x1b   :  { %v1049_v24 = vld [vmem:[%s1394_s4 + $0x30] sm:$0xff]  }
  0x1c   :  { %892 = vmatpush3.bf16.msra.mxu0 %v1017_v26  ;;  %v407_v26 = vsub.f32 %v1235_v42, %v1221_v38 }
  0x1d   :  { %920 = vmatpush3.bf16.msra.mxu1 %v1018_v27  ;;  %893 = vmatprep.subr.bf16.mxu0 %v1019_v28  ;;  %v1050_v27 = vld [vmem:[%s1395_s5 + $0x30] sm:$0xff]   ;;  %v598_v28 = vmul.f32 %v1216_v37, %v1230_v41  ;;  %v609_v41 = vpack.c.bf16 %v605_v35, %v603_v34 }
  0x1e   :  { %921 = vmatprep.subr.bf16.mxu1 %v1020_v29  ;;  %v600_v29 = vmul.f32 %v1221_v38, %v1235_v42  ;;  %v413_v37 = vpack.c.bf16 %v407_v26, %v405_v25  ;;  %v1054_v38 = vld [vmem:[%s1395_s5 + $0x38] sm:$0xff]   ;;  %v409_v42 = vsub.f32 %v31_v14, %v39_v12 }
  0x20   :  { %894 = vmatpush3.bf16.msra.mxu0 %v1021_v30  ;;  %v1051_v30 = vld [vmem:[%s1394_s4 + $0x78] sm:$0xff]   ;;  %v606_v39 = vpack.c.bf16 %v600_v29, %v598_v28 }
  0x21   :  { %922 = vmatpush3.bf16.msra.mxu1 %v1022_v31  ;;  %935 = vmatprep.subr.bf16.mxu0 %v1023_v44  ;;  %v410_v31 = vsub.f32 %v32_v4, %v40_v0  ;;  %v602_v44 = vmul.f32 %v39_v12, %v31_v14 }
  0x22   :  { %963 = vmatprep.subr.bf16.mxu1 %v1024_v45  ;;  %v604_v45 = vmul.f32 %v41_v13, %v33_v16 }
  0x23   :  { %244 = vmatmul.mubr.bf16.vlgmr.msra.gmra.mrb[0].mxu0 %v79_v40  ;;  %v416_v40 = vpack.c.bf16 %v412_v32, %v410_v31 }
  0x24   :  { %389 = vmatmul.mubr.bf16.vlgmr.msra.gmra.mrb[0].mxu1 %v43_v43  ;;  %936 = vmatpush3.bf16.msra.mxu0 %v1025_v46  ;;  %v411_v43 = vsub.f32 %v33_v16, %v41_v13 }
  0x25   :  { %964 = vmatpush3.bf16.msra.mxu1 %v1026_v47  ;;  %937 = vmatprep.subr.bf16.mxu0 %v1027_v48  ;;  %v608_v47 = vpack.c.bf16 %v604_v45, %v602_v44 }
  0x26   :  { %965 = vmatprep.subr.bf16.mxu1 %v1028_v49  ;;  %251 = vmatprep.mubr.bf16.mxu0 %v82_v8  ;;  %v415_v46 = vpack.c.bf16 %v411_v43, %v409_v42 }
  0x27   :  { %396 = vmatprep.mubr.bf16.mxu1 %v46_v9 }
  0x28   :  { %938 = vmatpush3.bf16.msra.mxu0 %v1029_v50 }
  0x29   :  { %966 = vmatpush3.bf16.msra.mxu1 %v1030_v51  ;;  %939 = vmatprep.subr.bf16.mxu0 %v1031_v52 }
  0x2a   :  { %967 = vmatprep.subr.bf16.mxu1 %v1032_v53 }
  0x2b   :  { %252 = vmatmul.mubr.bf16.gmra.mrb[4].mxu0 %v81_v15 }
  0x2c   :  { %940 = vmatpush3.bf16.msra.mxu0 %v1033_v54  ;;  %397 = vmatmul.mubr.bf16.gmra.mrb[4].mxu1 %v45_v18 }
  0x2d   :  { %968 = vmatpush3.bf16.msra.mxu1 %v1034_v55  ;;  %941 = vmatprep.subr.bf16.mxu0 %v1035_v56 }
  0x2e   :  { %969 = vmatprep.subr.bf16.mxu1 %v1036_v57  ;;  %577 = vmatprep.mubr.bf16.mxu0 %v414_v17 }
  0x2f   :  { %770 = vmatprep.mubr.bf16.mxu1 %v607_v20 }
  0x30   :  { %942 = vmatpush3.bf16.msra.mxu0 %v1037_v58 }
  0x31   :  { %970 = vmatpush3.bf16.msra.mxu1 %v1038_v59  ;;  %943 = vmatprep.subr.bf16.mxu0 %v1039_v60 }
  0x32   :  { %971 = vmatprep.subr.bf16.mxu1 %v1040_v61 }
  0x34   :  { %944 = vmatpush3.bf16.msra.mxu0 %v1041_v62 }
  0x35   :  { %972 = vmatpush3.bf16.msra.mxu1 %v1042_v63  ;;  %945 = vmatprep.subr.bf16.mxu0 %v1043_v10 }
  0x36   :  { %973 = vmatprep.subr.bf16.mxu1 %v1044_v11 }
  0x38   :  { %946 = vmatpush3.bf16.msra.mxu0 %v1045_v19 }
  0x39   :  { %974 = vmatpush3.bf16.msra.mxu1 %v1046_v21  ;;  %947 = vmatprep.subr.bf16.mxu0 %v1047_v22 }
  0x3a   :  { %975 = vmatprep.subr.bf16.mxu1 %v1048_v23 }
  0x3c   :  { %948 = vmatpush3.bf16.msra.mxu0 %v1049_v24  ;;  %v878_v24 = vld [vmem:[%s1396_s6] ss:$0 sm:$0xff] }
  0x3d   :  { %976 = vmatpush3.bf16.msra.mxu1 %v1050_v27  ;;  %949 = vmatprep.subr.bf16.mxu0 %v1051_v30 }
  0x3e   :  { %977 = vmatprep.subr.bf16.mxu1 %v1052_v33 }
  0x40   :  { %950 = vmatpush3.bf16.msra.mxu0 %v1053_v36 }
  0x41   :  { %978 = vmatpush3.bf16.msra.mxu1 %v1054_v38 }
  0x43   :  { %578 = vmatmul.mubr.bf16.vlgmr.msra.gmra.mrb[8].mxu0 %v413_v37 }
  0x44   :  { %771 = vmatmul.mubr.bf16.vlgmr.msra.gmra.mrb[8].mxu1 %v606_v39  ;;  %585 = vmatprep.mubr.bf16.mxu0 %v416_v40 }
  0x45   :  { %778 = vmatprep.mubr.bf16.mxu1 %v609_v41 }
  0x4b   :  { %586 = vmatmul.mubr.bf16.gmra.mrb[12].mxu0 %v415_v46 }
  0x4c   :  { %779 = vmatmul.mubr.bf16.gmra.mrb[12].mxu1 %v608_v47 }
  0xf6   :  { %v895_v48 = vpop.f32.mrb[0].mxu0 }
  0xf7   :  { %v923_v49 = vpop.f32.mrb[0].mxu1  ;;  %v896_v50 = vpop.f32.mrb[1].mxu0 }
  0xf8   :  { %v897_v51 = vadd.f32 %v896_v50, %v895_v48  ;;  %v924_v52 = vpop.f32.mrb[1].mxu1  ;;  %v898_v53 = vpop.f32.mrb[2].mxu0 }
  0xf9   :  { %v925_v54 = vadd.f32 %v924_v52, %v923_v49  ;;  %v926_v55 = vpop.f32.mrb[2].mxu1  ;;  %v899_v56 = vpop.f32.mrb[3].mxu0 }
  0xfa   :  { %v900_v57 = vadd.f32 %v899_v56, %v898_v53  ;;  %v927_v58 = vpop.f32.mrb[3].mxu1 }
  0xfb   :  { %v391_v59 = vadd.f32 %v925_v54, %v897_v51  ;;  %v928_v60 = vadd.f32 %v927_v58, %v926_v55 }
  0xfd   :  { %v394_v61 = vadd.f32 %v928_v60, %v900_v57 }
  0xfe   :  { %v901_v62 = vpop.f32.mrb[4].mxu0 }
  0xff   :  { %v929_v63 = vpop.f32.mrb[4].mxu1  ;;  %v902_v0 = vpop.f32.mrb[5].mxu0 }
 0x100   :  { %v903_v1 = vadd.f32 %v902_v0, %v901_v62  ;;  %v930_v2 = vpop.f32.mrb[5].mxu1  ;;  %v904_v3 = vpop.f32.mrb[6].mxu0 }
 0x101   :  { %v931_v4 = vadd.f32 %v930_v2, %v929_v63  ;;  %v932_v5 = vpop.f32.mrb[6].mxu1  ;;  %v905_v6 = vpop.f32.mrb[7].mxu0 }
 0x102   :  { %v906_v7 = vadd.f32 %v905_v6, %v904_v3  ;;  %v933_v8 = vpop.f32.mrb[7].mxu1 }
 0x103   :  { %v399_v9 = vadd.f32 %v931_v4, %v903_v1  ;;  %v934_v10 = vadd.f32 %v933_v8, %v932_v5 }
 0x105   :  { %v402_v11 = vadd.f32 %v934_v10, %v906_v7 }
 0x116   :  { %v951_v12 = vpop.f32.mrb[8].mxu0 }
 0x117   :  { %v979_v13 = vpop.f32.mrb[8].mxu1  ;;  %v952_v14 = vpop.f32.mrb[9].mxu0 }
 0x118   :  { %v953_v15 = vadd.f32 %v952_v14, %v951_v12  ;;  %v980_v16 = vpop.f32.mrb[9].mxu1  ;;  %v954_v17 = vpop.f32.mrb[10].mxu0 }
 0x119   :  { %v981_v18 = vadd.f32 %v980_v16, %v979_v13  ;;  %v982_v19 = vpop.f32.mrb[10].mxu1  ;;  %v955_v20 = vpop.f32.mrb[11].mxu0 }
 0x11a   :  { %v594_v21 = vadd.f32 %v953_v15, %v391_v59  ;;  %v956_v22 = vadd.f32 %v955_v20, %v954_v17  ;;  %v983_v23 = vpop.f32.mrb[11].mxu1 }
 0x11b   :  { %v984_v25 = vadd.f32 %v983_v23, %v982_v19 }
 0x11c   :  { %v787_v26 = vadd.f32 %v981_v18, %v594_v21  ;;  %v595_v27 = vadd.f32 %v956_v22, %v394_v61 }
 0x11e   :  { %v798_v28 = vadd.f32 %v878_v24, %v787_v26  ;;  %v788_v29 = vadd.f32 %v984_v25, %v595_v27  ;;  %v957_v30 = vpop.f32.mrb[12].mxu0 }
 0x11f   :  { %v985_v31 = vpop.f32.mrb[12].mxu1  ;;  %v958_v32 = vpop.f32.mrb[13].mxu0 }
 0x120   :  { %v802_v33 = vmax.f32 %v798_v28, 0.0  ;;  %v799_v34 = vadd.f32 %v878_v24, %v788_v29  ;;  %v959_v35 = vadd.f32 %v958_v32, %v957_v30  ;;  %v986_v36 = vpop.f32.mrb[13].mxu1  ;;  %v960_v37 = vpop.f32.mrb[14].mxu0 }
 0x121   :  { %v987_v38 = vadd.f32 %v986_v36, %v985_v31  ;;  %v988_v39 = vpop.f32.mrb[14].mxu1  ;;  %v961_v40 = vpop.f32.mrb[15].mxu0 }
 0x122   :  { %806 = vst [vmem:[%s1397_s7] sm:$0xff] %v802_v33  ;;  %v803_v41 = vmax.f32 %v799_v34, 0.0  ;;  %v596_v42 = vadd.f32 %v959_v35, %v399_v9  ;;  %v962_v43 = vadd.f32 %v961_v40, %v960_v37  ;;  %v989_v44 = vpop.f32.mrb[15].mxu1 }
 0x123   :  { %v990_v45 = vadd.f32 %v989_v44, %v988_v39 }
 0x124   :  { %807 = vst [vmem:[%s1397_s7 + $0x8] sm:$0xff] %v803_v41  ;;  %v789_v46 = vadd.f32 %v987_v38, %v596_v42  ;;  %v597_v47 = vadd.f32 %v962_v43, %v402_v11 }
 0x126   :  { %v800_v48 = vadd.f32 %v878_v24, %v789_v46  ;;  %v790_v49 = vadd.f32 %v990_v45, %v597_v47 }
 0x128   :  { %v804_v50 = vmax.f32 %v800_v48, 0.0  ;;  %v801_v51 = vadd.f32 %v878_v24, %v790_v49 }
 0x12a   :  { %808 = vst [vmem:[%s1397_s7 + $0x10] sm:$0xff] %v804_v50  ;;  %v805_v52 = vmax.f32 %v801_v51, 0.0 }
 0x12c   :  { %809 = vst [vmem:[%s1397_s7 + $0x18] sm:$0xff] %v805_v52 }

// kernel: esim_forward.21
= control target key start
LH: loop header
LB: loop body
LE: loop exit
PB: predicated region body
PF: predicated region fallthrough
CT: control target
= control target key end

     0   :  { %vm57_vm0 = vcmask 7168   ;;  %v210_v0 = vmov 0   ;;  %v96_v43 = vlaneseq  ;;  %v211_v47 = vmov 1983009808   ;;  %s264_s1 = inlined_call_operand.vmem [shape: f32[2,8,1], index: 1, kind: input, shape index: {}]   ;;  %s265_s0 = inlined_call_operand.vmem [shape: f32[2,8,256], index: 0, kind: input, shape index: {}]   ;;  %s266_s3 = inlined_call_operand.vmem [shape: f32[2,256], index: 3, kind: output, shape index: {1}]   ;;  %s267_s2 = inlined_call_operand.vmem [shape: f32[2,256], index: 2, kind: output, shape index: {0}]  }
   0x1   :  { %204 = vset.pattern.permute.xlu0 %v210_v0  ;;  %v18_v1 = vld [vmem:[%s264_s1 + $0x8] sm:$0xff]  ;;  %205 = vset.pattern.permute.xlu1 %v210_v0  ;;  %v17_v2 = vld [vmem:[%s264_s1] sm:$0xff]  ;;  %v15_v21 = vld [vmem:[%s265_s0 + $0x10] sm:$0xff]  ;;  %v94_v48 = vunpack.c.l.s4 %v211_v47  ;;  %vm113_vm1 = vcmask 1041409   ;;  %vm115_vm2 = vcmask 1043459   ;;  %vm117_vm3 = vcmask 1045509  }
   0x2   :  { %26 = vperm.xlu0 %204, %v18_v1   ;;  %v65_v3 = vsel %vm57_vm0, %v18_v1, 0.0  ;;  %v124_v4 = vsub.f32 1.0, %v18_v1  ;;  %v58_v5 = vsel %vm57_vm0, %v17_v2, 0.0  ;;  %v123_v6 = vsub.f32 1.0, %v17_v2  ;;  %v16_v22 = vld [vmem:[%s265_s0 + $0x18] sm:$0xff]  ;;  %v13_v28 = vld [vmem:[%s265_s0] sm:$0xff] }
   0x3   :  { %v66_v7 = vrot.slane %v65_v3, 4  ;;  %v59_v8 = vrot.slane %v58_v5, 4  ;;  %v14_v29 = vld [vmem:[%s265_s0 + $0x8] sm:$0xff]  ;;  %v97_v58 = vshrl.u32 %v96_v43, 7  ;;  %v95_v63 = vunpack.c.0.s8 %v94_v48 }
   0x4   :  { %v126_v9 = vmul.f32 -10000000.0, %v124_v4  ;;  %v125_v12 = vmul.f32 -10000000.0, %v123_v6  ;;  %vm119_vm4 = vcmask 1047559  }
   0x5   :  { %v67_v10 = vadd.f32 %v66_v7, %v65_v3  ;;  %v60_v11 = vadd.f32 %v59_v8, %v58_v5 }
   0x6   :  { %134 = vperm.xlu1 %205, %v126_v9   ;;  %21 = vperm.xlu0 %204, %v17_v2  }
   0x7   :  { %v68_v13 = vrot.slane %v67_v10, 2  ;;  %v61_v14 = vrot.slane %v60_v11, 2 }
   0x9   :  { %v69_v15 = vadd.f32 %v68_v13, %v67_v10  ;;  %v62_v16 = vadd.f32 %v61_v14, %v60_v11 }
   0xa   :  { %129 = vperm.xlu0 %204, %v125_v12   ;;  %v98_v12 = vsub.s32 %v95_v63, %v97_v58 }
   0xb   :  { %v70_v17 = vrot.slane %v69_v15, 1  ;;  %v63_v18 = vrot.slane %v62_v16, 1 }
   0xd   :  { %v71_v19 = vadd.f32 %v70_v17, %v69_v15  ;;  %v64_v20 = vadd.f32 %v63_v18, %v62_v16 }
   0xf   :  { %79 = vperm.xlu1 %205, %v71_v19  }
  0x13   :  { %74 = vperm.xlu1 %205, %v64_v20  }
  0x81   :  { %v27_v23 = vpop.permute.xlu0 %26 }
  0x82   :  { %v31_v24 = vmul.f32 %v27_v23, %v15_v21  ;;  %v32_v25 = vmul.f32 %v27_v23, %v16_v22 }
  0x84   :  { %v45_v26 = vrot.slane %v31_v24, 4  ;;  %v51_v27 = vrot.slane %v32_v25, 4 }
  0x85   :  { %v135_v30 = vpop.permute.xlu1 %134  ;;  %v22_v31 = vpop.permute.xlu0 %21 }
  0x86   :  { %v139_v32 = vadd.f32 %v135_v30, %v31_v24  ;;  %v140_v33 = vadd.f32 %v135_v30, %v32_v25  ;;  %v46_v34 = vadd.f32 %v45_v26, %v31_v24  ;;  %v29_v35 = vmul.f32 %v22_v31, %v13_v28 }
  0x87   :  { %v30_v36 = vmul.f32 %v22_v31, %v14_v29  ;;  %v52_v37 = vadd.f32 %v51_v27, %v32_v25 }
  0x88   :  { %v153_v38 = vrot.slane %v139_v32, 4  ;;  %v159_v39 = vrot.slane %v140_v33, 4  ;;  %v33_v40 = vrot.slane %v29_v35, 4  ;;  %v47_v46 = vrot.slane %v46_v34, 2 }
  0x89   :  { %v39_v41 = vrot.slane %v30_v36, 4  ;;  %v130_v42 = vpop.permute.xlu0 %129  ;;  %v53_v51 = vrot.slane %v52_v37, 2 }
  0x8a   :  { %v154_v44 = vmax.f32 %v139_v32, %v153_v38  ;;  %v160_v45 = vmax.f32 %v140_v33, %v159_v39  ;;  %v137_v49 = vadd.f32 %v130_v42, %v29_v35  ;;  %v138_v50 = vadd.f32 %v130_v42, %v30_v36 }
  0x8b   :  { %v34_v54 = vadd.f32 %v33_v40, %v29_v35  ;;  %v40_v55 = vadd.f32 %v39_v41, %v30_v36  ;;  %v48_v62 = vadd.f32 %v47_v46, %v46_v34  ;;  %v54_v2 = vadd.f32 %v53_v51, %v52_v37 }
  0x8c   :  { %v155_v52 = vrot.slane %v154_v44, 2  ;;  %v161_v53 = vrot.slane %v160_v45, 2  ;;  %v141_v56 = vrot.slane %v137_v49, 4  ;;  %v147_v57 = vrot.slane %v138_v50, 4 }
  0x8d   :  { %v35_v5 = vrot.slane %v34_v54, 2  ;;  %v41_v6 = vrot.slane %v40_v55, 2  ;;  %v49_v15 = vrot.slane %v48_v62, 1  ;;  %v55_v16 = vrot.slane %v54_v2, 1 }
  0x8e   :  { %v156_v59 = vmax.f32 %v154_v44, %v155_v52  ;;  %v162_v60 = vmax.f32 %v160_v45, %v161_v53  ;;  %v80_v61 = vpop.permute.xlu1 %79  ;;  %v142_v0 = vmax.f32 %v137_v49, %v141_v56  ;;  %v148_v1 = vmax.f32 %v138_v50, %v147_v57 }
  0x8f   :  { %206 = vrcp.f32 %v80_v61  ;;  %v36_v18 = vadd.f32 %v35_v5, %v34_v54  ;;  %v42_v19 = vadd.f32 %v41_v6, %v40_v55  ;;  %v50_v25 = vadd.f32 %v49_v15, %v48_v62 }
  0x90   :  { %v157_v3 = vrot.slane %v156_v59, 1  ;;  %v163_v4 = vrot.slane %v162_v60, 1  ;;  %v143_v7 = vrot.slane %v142_v0, 2  ;;  %v149_v8 = vrot.slane %v148_v1, 2 }
  0x91   :  { %v56_v26 = vadd.f32 %v55_v16, %v54_v2  ;;  %v37_v27 = vrot.slane %v36_v18, 1  ;;  %v43_v28 = vrot.slane %v42_v19, 1 }
  0x92   :  { %v158_v9 = vmax.f32 %v156_v59, %v157_v3  ;;  %v164_v10 = vmax.f32 %v162_v60, %v163_v4  ;;  %v75_v11 = vpop.permute.xlu1 %74  ;;  %v144_v13 = vmax.f32 %v142_v0, %v143_v7  ;;  %v150_v14 = vmax.f32 %v148_v1, %v149_v8 }
  0x93   :  { %208 = vrcp.f32 %v75_v11  ;;  %v38_v35 = vadd.f32 %v37_v27, %v36_v18  ;;  %v44_v36 = vadd.f32 %v43_v28, %v42_v19 }
  0x94   :  { %v177_v17 = vcombine.low %v158_v9, %v164_v10  ;;  %v145_v20 = vrot.slane %v144_v13, 1  ;;  %v151_v21 = vrot.slane %v150_v14, 1 }
  0x96   :  { %v184_v22 = vrot.slane %v177_v17, %v98_v12  ;;  %v146_v23 = vmax.f32 %v144_v13, %v145_v20  ;;  %v152_v24 = vmax.f32 %v150_v14, %v151_v21 }
  0x98   :  { %v169_v29 = vcombine.low %v146_v23, %v152_v24  ;;  %v187_v31 = vrot.slane %v184_v22, 7 }
  0x99   :  { %v207_v30 = vpop.eup %206 }
  0x9a   :  { %v176_v32 = vrot.slane %v169_v29, %v98_v12  ;;  %v86_v33 = vmul.f32 %v207_v30, %v50_v25  ;;  %v87_v34 = vmul.f32 %v207_v30, %v56_v26 }
  0x9c   :  { %v188_v37 = vsel %vm113_vm1, %v187_v31, %v176_v32  ;;  %v100_v38 = vcombine.low %v86_v33, %v87_v34 }
  0x9d   :  { %v209_v39 = vpop.eup %208  ;;  %v189_v40 = vsel %vm115_vm2, %v187_v31, %v188_v37 }
  0x9e   :  { %v190_v41 = vsel %vm117_vm3, %v187_v31, %v189_v40  ;;  %v107_v42 = vrot.slane %v100_v38, %v98_v12  ;;  %v83_v43 = vmul.f32 %v209_v39, %v38_v35  ;;  %v84_v44 = vmul.f32 %v209_v39, %v44_v36 }
  0x9f   :  { %v191_v45 = vsel %vm119_vm4, %v187_v31, %v190_v41 }
  0xa0   :  { %193 = vst [vmem:[%s266_s3] sm:$0xf] %v191_v45  ;;  %v92_v46 = vcombine.low %v83_v43, %v84_v44  ;;  %v112_v47 = vrot.slane %v107_v42, 7 }
  0xa2   :  { %v99_v48 = vrot.slane %v92_v46, %v98_v12 }
  0xa4   :  { %v114_v49 = vsel %vm113_vm1, %v112_v47, %v99_v48 }
  0xa5   :  { %v116_v50 = vsel %vm115_vm2, %v112_v47, %v114_v49 }
  0xa6   :  { %v118_v51 = vsel %vm117_vm3, %v112_v47, %v116_v50 }
  0xa7   :  { %v120_v52 = vsel %vm119_vm4, %v112_v47, %v118_v51 }
  0xa8   :  { %122 = vst [vmem:[%s267_s2] sm:$0xf] %v120_v52 }

// kernel: esim_forward.17
= control target key start
LH: loop header
LB: loop body
LE: loop exit
PB: predicated region body
PF: predicated region fallthrough
CT: control target
= control target key end

     0   :  { %s1137_s12 = smov 0   ;;  %s1139_s13 = smov 0   ;;  %s1369_s0 = inlined_call_operand.vmem [shape: f32[32,128], index: 0, kind: input, shape index: {}]   ;;  %s1370_s1 = inlined_call_operand.vmem [shape: bf16[128,1024], index: 1, kind: input, shape index: {}]   ;;  %s1371_s2 = inlined_call_operand.vmem [shape: f32[1,1024], index: 2, kind: input, shape index: {}]   ;;  %s1372_s3 = inlined_call_operand.vmem [shape: f32[32,1024], index: 3, kind: output, shape index: {}]  }
   0x1   :  { %s1141_s14 = smov 0   ;;  %s1143_s15 = smov 0  }
   0x2   :  { %s1145_s16 = smov 0  }
   0x3 LB: > { %s28_s17 = sadd.s32 1, %s1110_s15  ;;  %s936_s18 = sadd.s32 4294967295, %s1114_s16   ;;  %s1114_s16 = sphi %s1145_s16, %s13_s16   ;;  %s1110_s15 = sphi %s1143_s15, %s1377_s15   ;;  %s1106_s14 = sphi %s1141_s14, %s1376_s14   ;;  %s1102_s13 = sphi %s1139_s13, %s1375_s13   ;;  %s1098_s12 = sphi %s1137_s12, %s1374_s12  }
   0x4   : > { %p30_p0 = scmp.ge.s32.totalorder %s28_s17, 2  ;;  %p76_p1 = scmp.ne.s32.totalorder %s1102_s13, %s1098_s12 }
   0x5   : > { %p77_p2 = scmp.eq.s32.totalorder %s1114_s16, 0  ;;  %p134_p4 = scmp.eq.s32.totalorder %s936_s18, 1 }
   0x6   : > { %s1379_s17 = smov (%p30_p0, %s28_s17), 0  ;;  %s69_s20 = sadd.s32 1, %s1102_s13 }
   0x7   : > { %p78_p3 = por %p77_p2, %p76_p1  ;;  %s65_s19 = ssub.s32 %s1110_s15, %s1379_s17 }
   0x8   : > { %p67_p5 = scmp.eq.s32.totalorder %s65_s19, 0  ;;  %p1172_p6 = por %p134_p4, %p76_p1 }
   0x9   : > { %p940_p7 = scmp.ge.s32.totalorder %s1114_s16, 2 }
   0xa   : > { %s1177_s22 = scalar_select %p67_p5, %s1102_s13, %s69_s20  }
   0xb   : > { %168 = sbr.rel (%p940_p7) target bundleno = 38 (0x26), region = 20 }
  0x12   : > { %171 = sbr.rel (!%p78_p3) target bundleno = 38 (0x26), region = 24  ;;  %s173_s23 = sand.u32 (%p78_p3), 1, %s1102_s13  }
  0x13   : > { %s985_s24 = sshll.u32 (%p78_p3), %s1110_s15, 4  ;;  %s941_s25 = sshll.u32 (%p78_p3), %s173_s23, 8 }
  0x14   : > { %s1185_s28 = scalar_lea.vmem (%p78_p3), %s1370_s1, %s985_s24  ;;  %s1190_s29 = scalar_lea.vmem (%p78_p3), [#allocation3], %s941_s25 }
  0x15   : > { %v194_v0 = vld [vmem:[%s1185_s28] sm:$0xff] (%p78_p3)  ;;  %v196_v1 = vld [vmem:[%s1185_s28 + $0x8] sm:$0xff] (%p78_p3) }
  0x16   : > { %v198_v2 = vld [vmem:[%s1185_s28 + $0x20] sm:$0xff] (%p78_p3)  ;;  %195 = vst [vmem:[%s1190_s29] sm:$0xff] (%p78_p3), %v194_v0  ;;  %197 = vst [vmem:[%s1190_s29 + $0x8] sm:$0xff] (%p78_p3), %v196_v1  ;;  %v200_v3 = vld [vmem:[%s1185_s28 + $0x28] sm:$0xff] (%p78_p3) }
  0x17   : > { %199 = vst [vmem:[%s1190_s29 + $0x10] sm:$0xff] (%p78_p3), %v198_v2  ;;  %v202_v4 = vld [vmem:[%s1185_s28 + $0x40] sm:$0xff] (%p78_p3)  ;;  %v204_v5 = vld [vmem:[%s1185_s28 + $0x48] sm:$0xff] (%p78_p3)  ;;  %201 = vst [vmem:[%s1190_s29 + $0x18] sm:$0xff] (%p78_p3), %v200_v3 }
  0x18   : > { %203 = vst [vmem:[%s1190_s29 + $0x20] sm:$0xff] (%p78_p3), %v202_v4  ;;  %205 = vst [vmem:[%s1190_s29 + $0x28] sm:$0xff] (%p78_p3), %v204_v5  ;;  %v206_v6 = vld [vmem:[%s1185_s28 + $0x60] sm:$0xff] (%p78_p3)  ;;  %v208_v7 = vld [vmem:[%s1185_s28 + $0x68] sm:$0xff] (%p78_p3) }
  0x19   : > { %v210_v8 = vld [vmem:[%s1185_s28 + $0x80] sm:$0xff]  ;;  %207 = vst [vmem:[%s1190_s29 + $0x30] sm:$0xff] %v206_v6  ;;  %209 = vst [vmem:[%s1190_s29 + $0x38] sm:$0xff] %v208_v7  ;;  %v212_v9 = vld [vmem:[%s1185_s28 + $0x88] sm:$0xff] }
  0x1a   : > { %211 = vst [vmem:[%s1190_s29 + $0x40] sm:$0xff] %v210_v8  ;;  %v214_v10 = vld [vmem:[%s1185_s28 + $0xa0] sm:$0xff]  ;;  %v216_v11 = vld [vmem:[%s1185_s28 + $0xa8] sm:$0xff]  ;;  %213 = vst [vmem:[%s1190_s29 + $0x48] sm:$0xff] %v212_v9 }
  0x1b   : > { %215 = vst [vmem:[%s1190_s29 + $0x50] sm:$0xff] %v214_v10  ;;  %217 = vst [vmem:[%s1190_s29 + $0x58] sm:$0xff] %v216_v11  ;;  %v218_v12 = vld [vmem:[%s1185_s28 + $0xc0] sm:$0xff]  ;;  %v220_v13 = vld [vmem:[%s1185_s28 + $0xc8] sm:$0xff] }
  0x1c   : > { %v222_v14 = vld [vmem:[%s1185_s28 + $0xe0] sm:$0xff]  ;;  %219 = vst [vmem:[%s1190_s29 + $0x60] sm:$0xff] %v218_v12  ;;  %221 = vst [vmem:[%s1190_s29 + $0x68] sm:$0xff] %v220_v13  ;;  %v224_v15 = vld [vmem:[%s1185_s28 + $0xe8] sm:$0xff] }
  0x1d   : > { %223 = vst [vmem:[%s1190_s29 + $0x70] sm:$0xff] %v222_v14  ;;  %v226_v16 = vld [vmem:[%s1185_s28 + $0x100] sm:$0xff]  ;;  %v228_v17 = vld [vmem:[%s1185_s28 + $0x108] sm:$0xff]  ;;  %225 = vst [vmem:[%s1190_s29 + $0x78] sm:$0xff] %v224_v15 }
  0x1e   : > { %227 = vst [vmem:[%s1190_s29 + $0x80] sm:$0xff] %v226_v16  ;;  %229 = vst [vmem:[%s1190_s29 + $0x88] sm:$0xff] %v228_v17  ;;  %v230_v18 = vld [vmem:[%s1185_s28 + $0x120] sm:$0xff]  ;;  %v232_v19 = vld [vmem:[%s1185_s28 + $0x128] sm:$0xff] }
  0x1f   : > { %v234_v20 = vld [vmem:[%s1185_s28 + $0x140] sm:$0xff]  ;;  %231 = vst [vmem:[%s1190_s29 + $0x90] sm:$0xff] %v230_v18  ;;  %233 = vst [vmem:[%s1190_s29 + $0x98] sm:$0xff] %v232_v19  ;;  %v236_v21 = vld [vmem:[%s1185_s28 + $0x148] sm:$0xff] }
  0x20   : > { %235 = vst [vmem:[%s1190_s29 + $0xa0] sm:$0xff] %v234_v20  ;;  %v238_v22 = vld [vmem:[%s1185_s28 + $0x160] sm:$0xff]  ;;  %v240_v23 = vld [vmem:[%s1185_s28 + $0x168] sm:$0xff]  ;;  %237 = vst [vmem:[%s1190_s29 + $0xa8] sm:$0xff] %v236_v21 }
  0x21   : > { %239 = vst [vmem:[%s1190_s29 + $0xb0] sm:$0xff] %v238_v22  ;;  %241 = vst [vmem:[%s1190_s29 + $0xb8] sm:$0xff] %v240_v23  ;;  %v242_v24 = vld [vmem:[%s1185_s28 + $0x180] sm:$0xff]  ;;  %v244_v25 = vld [vmem:[%s1185_s28 + $0x188] sm:$0xff] }
  0x22   : > { %v246_v26 = vld [vmem:[%s1185_s28 + $0x1a0] sm:$0xff]  ;;  %243 = vst [vmem:[%s1190_s29 + $0xc0] sm:$0xff] %v242_v24  ;;  %245 = vst [vmem:[%s1190_s29 + $0xc8] sm:$0xff] %v244_v25  ;;  %v248_v27 = vld [vmem:[%s1185_s28 + $0x1a8] sm:$0xff] }
  0x23   : > { %247 = vst [vmem:[%s1190_s29 + $0xd0] sm:$0xff] %v246_v26  ;;  %v250_v28 = vld [vmem:[%s1185_s28 + $0x1c0] sm:$0xff]  ;;  %v252_v29 = vld [vmem:[%s1185_s28 + $0x1c8] sm:$0xff]  ;;  %249 = vst [vmem:[%s1190_s29 + $0xd8] sm:$0xff] %v248_v27 }
  0x24   : > { %251 = vst [vmem:[%s1190_s29 + $0xe0] sm:$0xff] %v250_v28  ;;  %253 = vst [vmem:[%s1190_s29 + $0xe8] sm:$0xff] %v252_v29  ;;  %v254_v30 = vld [vmem:[%s1185_s28 + $0x1e0] sm:$0xff]  ;;  %v256_v31 = vld [vmem:[%s1185_s28 + $0x1e8] sm:$0xff] }
  0x25   : > { %255 = vst [vmem:[%s1190_s29 + $0xf0] sm:$0xff] %v254_v30  ;;  %257 = vst [vmem:[%s1190_s29 + $0xf8] sm:$0xff] %v256_v31 }
  0x26 PF: > { %p944_p8 = scmp.ge.s32.totalorder %s1114_s16, 1  ;;  %p270_p9 = scmp.lt.s32.totalorder %s1114_s16, 3 }
  0x28   : > { %p271_p10 = pnand %p944_p8, %p270_p9 }
  0x29   : > { %s277_s30 = sand.u32 (!%p271_p10), 1, %s1098_s12   ;;  %v1116_v32 = vmov (!%p271_p10), 0   ;;  %v366_v63 = vld [vmem:[%s1369_s0] sm:$0xff] (!%p271_p10)  ;;  %v367_v2 = vld [vmem:[%s1369_s0 + $0x8] sm:$0xff] (!%p271_p10)  ;;  %v368_v4 = vld [vmem:[%s1369_s0 + $0x10] sm:$0xff] (!%p271_p10)  ;;  %s947_s20 = sshll.u32 (!%p271_p10), %s1106_s14, 2  ;;  %v723_v7 = vlaneseq (!%p271_p10) }
  0x2a   : > { %274 = sbr.rel (%p271_p10) target bundleno = 311 (0x137), region = 51  ;;  %s945_s4 = sshll.u32 (!%p271_p10), %s277_s30, 8  ;;  %596 = vmatprep.mubr.bf16.mxu0 (!%p271_p10), %v1116_v32  ;;  %649 = vmatprep.mubr.bf16.mxu1 (!%p271_p10), %v1116_v32  ;;  %v370_v3 = vpack.c.bf16 (!%p271_p10), %v367_v2, %v366_v63  ;;  %v369_v5 = vld [vmem:[%s1369_s0 + $0x18] sm:$0xff] (!%p271_p10) }
  0x2b   : > { %s1260_s5 = scalar_lea.vmem (!%p271_p10), [#allocation3], %s945_s4  ;;  %v371_v6 = vpack.c.bf16 (!%p271_p10), %v369_v5, %v368_v4  ;;  %p323_p11 = scmp.lt.s32.totalorder (!%p271_p10), %s947_s20, 7  ;;  %v724_v8 = vshrl.u32 (!%p271_p10), %v723_v7, 7 }
  0x2c   : > { %v1028_v33 = vld [vmem:[%s1260_s5 + $0x4] ss:$16 sps:$4 sm:$0xff] (!%p271_p10)   ;;  %v1030_v34 = vld [vmem:[%s1260_s5 + $0xc] ss:$16 sps:$4 sm:$0xff] (!%p271_p10)   ;;  %v1032_v35 = vld [vmem:[%s1260_s5] ss:$16 sps:$4 sm:$0xff] (!%p271_p10)  }
  0x2d   : > { %564 = vmatprep.subr.bf16.mxu0 (!%p271_p10), %v1028_v33  ;;  %v1033_v36 = vld [vmem:[%s1260_s5 + $0x8] ss:$16 sps:$4 sm:$0xff] (!%p271_p10)   ;;  %617 = vmatprep.subr.bf16.mxu1 (!%p271_p10), %v1030_v34  ;;  %v1034_v37 = vld [vmem:[%s1260_s5 + $0x24] ss:$16 sps:$4 sm:$0xff] (!%p271_p10)   ;;  %v1036_v38 = vld [vmem:[%s1260_s5 + $0x2c] ss:$16 sps:$4 sm:$0xff] (!%p271_p10)  }
  0x2e   : > { %565 = vmatpush1.bf16.msra.mxu0 (!%p271_p10), %v1032_v35  ;;  %618 = vmatpush1.bf16.msra.mxu1 (!%p271_p10), %v1033_v36  ;;  %v1038_v39 = vld [vmem:[%s1260_s5 + $0x20] ss:$16 sps:$4 sm:$0xff] (!%p271_p10)   ;;  %v1039_v40 = vld [vmem:[%s1260_s5 + $0x28] ss:$16 sps:$4 sm:$0xff] (!%p271_p10)   ;;  %v1040_v41 = vld [vmem:[%s1260_s5 + $0x44] ss:$16 sps:$4 sm:$0xff] (!%p271_p10)  }
  0x2f   : > { %566 = vmatprep.subr.bf16.mxu0 (!%p271_p10), %v1034_v37  ;;  %619 = vmatprep.subr.bf16.mxu1 (!%p271_p10), %v1036_v38  ;;  %v1042_v42 = vld [vmem:[%s1260_s5 + $0x4c] ss:$16 sps:$4 sm:$0xff] (!%p271_p10)   ;;  %v1044_v43 = vld [vmem:[%s1260_s5 + $0x40] ss:$16 sps:$4 sm:$0xff] (!%p271_p10)   ;;  %v1045_v44 = vld [vmem:[%s1260_s5 + $0x48] ss:$16 sps:$4 sm:$0xff] (!%p271_p10)  }
  0x30   : > { %v1046_v45 = vld [vmem:[%s1260_s5 + $0x64] ss:$16 sps:$4 sm:$0xff] (!%p271_p10)   ;;  %v1048_v46 = vld [vmem:[%s1260_s5 + $0x6c] ss:$16 sps:$4 sm:$0xff] (!%p271_p10)   ;;  %v1050_v47 = vld [vmem:[%s1260_s5 + $0x60] ss:$16 sps:$4 sm:$0xff] (!%p271_p10)  }
  0x31   : > { %v1051_v48 = vld [vmem:[%s1260_s5 + $0x68] ss:$16 sps:$4 sm:$0xff]   ;;  %v1052_v49 = vld [vmem:[%s1260_s5 + $0x84] ss:$16 sps:$4 sm:$0xff]   ;;  %v1054_v50 = vld [vmem:[%s1260_s5 + $0x8c] ss:$16 sps:$4 sm:$0xff]  }
  0x32   : > { %567 = vmatpush1.bf16.msra.mxu0 %v1038_v39  ;;  %620 = vmatpush1.bf16.msra.mxu1 %v1039_v40  ;;  %v1056_v51 = vld [vmem:[%s1260_s5 + $0x80] ss:$16 sps:$4 sm:$0xff]   ;;  %v1057_v52 = vld [vmem:[%s1260_s5 + $0x88] ss:$16 sps:$4 sm:$0xff]   ;;  %v1058_v53 = vld [vmem:[%s1260_s5 + $0xa4] ss:$16 sps:$4 sm:$0xff]  }
  0x33   : > { %568 = vmatprep.subr.bf16.mxu0 %v1040_v41  ;;  %621 = vmatprep.subr.bf16.mxu1 %v1042_v42  ;;  %v1060_v54 = vld [vmem:[%s1260_s5 + $0xac] ss:$16 sps:$4 sm:$0xff]   ;;  %v1062_v55 = vld [vmem:[%s1260_s5 + $0xa0] ss:$16 sps:$4 sm:$0xff]   ;;  %v1063_v56 = vld [vmem:[%s1260_s5 + $0xa8] ss:$16 sps:$4 sm:$0xff]  }
  0x34   : > { %v1064_v57 = vld [vmem:[%s1260_s5 + $0xc4] ss:$16 sps:$4 sm:$0xff]   ;;  %v1066_v58 = vld [vmem:[%s1260_s5 + $0xcc] ss:$16 sps:$4 sm:$0xff]   ;;  %v1068_v59 = vld [vmem:[%s1260_s5 + $0xc0] ss:$16 sps:$4 sm:$0xff]  }
  0x35   : > { %v1069_v60 = vld [vmem:[%s1260_s5 + $0xc8] ss:$16 sps:$4 sm:$0xff]   ;;  %v1070_v61 = vld [vmem:[%s1260_s5 + $0xe4] ss:$16 sps:$4 sm:$0xff]   ;;  %v1072_v62 = vld [vmem:[%s1260_s5 + $0xec] ss:$16 sps:$4 sm:$0xff]  }
  0x36   : > { %569 = vmatpush1.bf16.msra.mxu0 %v1044_v43  ;;  %622 = vmatpush1.bf16.msra.mxu1 %v1045_v44  ;;  %v1074_v0 = vld [vmem:[%s1260_s5 + $0xe0] ss:$16 sps:$4 sm:$0xff]   ;;  %v1075_v1 = vld [vmem:[%s1260_s5 + $0xe8] ss:$16 sps:$4 sm:$0xff]   ;;  %s1381_s20 = smov (!%p323_p11, %s947_s20), 7  ;;  %v725_v9 = vsub.s32 0, %v724_v8 }
  0x37   : > { %570 = vmatprep.subr.bf16.mxu0 %v1046_v45  ;;  %623 = vmatprep.subr.bf16.mxu1 %v1048_v46  ;;  %s325_s25 = scalar_lea.vmem %s1371_s2, %s1381_s20  ;;  %v733_v10 = vsub.s32 2, %v724_v8  ;;  %v729_v12 = vsub.s32 1, %v724_v8  ;;  %v737_v13 = vsub.s32 3, %v724_v8  ;;  %s946_s26 = sshll.u32 %s277_s30, 7 }
  0x38   : > { %v721_v11 = vld [vmem:[%s325_s25] sm:$0xf]  ;;  %s1314_s27 = scalar_lea.vmem [#allocation4], %s946_s26  ;;  %s986_s12 = sshll.u32 (%p1172_p6), %s1106_s14, 5 }
  0x39   : > { %v726_v14 = vrot.slane %v721_v11, %v725_v9  ;;  %v734_v15 = vrot.slane %v721_v11, %v733_v10  ;;  %v730_v16 = vrot.slane %v721_v11, %v729_v12  ;;  %v738_v17 = vrot.slane %v721_v11, %v737_v13  ;;  %s787_s30 = scalar_lea.vmem (%p1172_p6), %s1372_s3, %s986_s12 }
  0x3a   : > { %571 = vmatpush1.bf16.msra.mxu0 %v1050_v47  ;;  %624 = vmatpush1.bf16.msra.mxu1 %v1051_v48 }
  0x3b   : > { %572 = vmatprep.subr.bf16.mxu0 %v1052_v49  ;;  %625 = vmatprep.subr.bf16.mxu1 %v1054_v50 }
  0x3e   : > { %573 = vmatpush1.bf16.msra.mxu0 %v1056_v51  ;;  %626 = vmatpush1.bf16.msra.mxu1 %v1057_v52 }
  0x3f   : > { %574 = vmatprep.subr.bf16.mxu0 %v1058_v53  ;;  %627 = vmatprep.subr.bf16.mxu1 %v1060_v54 }
  0x42   : > { %575 = vmatpush1.bf16.msra.mxu0 %v1062_v55  ;;  %628 = vmatpush1.bf16.msra.mxu1 %v1063_v56 }
  0x43   : > { %576 = vmatprep.subr.bf16.mxu0 %v1064_v57  ;;  %629 = vmatprep.subr.bf16.mxu1 %v1066_v58 }
  0x46   : > { %577 = vmatpush1.bf16.msra.mxu0 %v1068_v59  ;;  %630 = vmatpush1.bf16.msra.mxu1 %v1069_v60 }
  0x47   : > { %578 = vmatprep.subr.bf16.mxu0 %v1070_v61  ;;  %631 = vmatprep.subr.bf16.mxu1 %v1072_v62 }
  0x4a   : > { %579 = vmatpush1.bf16.msra.mxu0 %v1074_v0  ;;  %632 = vmatpush1.bf16.msra.mxu1 %v1075_v1 }
  0x4d   : > { %597 = vmatmul.mubr.bf16.vlgmr.msra.gmra.mrb[0].mxu0 %v370_v3  ;;  %650 = vmatmul.mubr.bf16.vlgmr.msra.gmra.mrb[0].mxu1 %v370_v3 }
  0x4e   : > { %606 = vmatprep.mubr.bf16.mxu0 %v1116_v32  ;;  %659 = vmatprep.mubr.bf16.mxu1 %v1116_v32 }
  0x55   : > { %607 = vmatmul.mubr.bf16.gmra.mrb[4].mxu0 %v371_v6  ;;  %660 = vmatmul.mubr.bf16.gmra.mrb[4].mxu1 %v371_v6 }
 0x120   : > { %v598_v18 = vpop.f32.mrb[0].mxu0  ;;  %v651_v19 = vpop.f32.mrb[0].mxu1 }
 0x121   : > { %v743_v20 = vadd.f32 %v726_v14, %v598_v18  ;;  %v745_v21 = vadd.f32 %v734_v15, %v651_v19  ;;  %v600_v22 = vpop.f32.mrb[1].mxu0  ;;  %v653_v23 = vpop.f32.mrb[1].mxu1 }
 0x122   : > { %v744_v24 = vadd.f32 %v730_v16, %v600_v22  ;;  %v746_v25 = vadd.f32 %v738_v17, %v653_v23  ;;  %v602_v26 = vpop.f32.mrb[2].mxu0  ;;  %v655_v27 = vpop.f32.mrb[2].mxu1 }
 0x123   : > { %759 = vst [vmem:[%s1314_s27] sm:$0xff] %v743_v20  ;;  %761 = vst [vmem:[%s1314_s27 + $0x10] sm:$0xff] %v745_v21  ;;  %v747_v28 = vadd.f32 %v726_v14, %v602_v26  ;;  %v749_v29 = vadd.f32 %v734_v15, %v655_v27  ;;  %v604_v30 = vpop.f32.mrb[3].mxu0  ;;  %v657_v31 = vpop.f32.mrb[3].mxu1 }
 0x124   : > { %760 = vst [vmem:[%s1314_s27 + $0x8] sm:$0xff] %v744_v24  ;;  %762 = vst [vmem:[%s1314_s27 + $0x18] sm:$0xff] %v746_v25  ;;  %v748_v32 = vadd.f32 %v730_v16, %v604_v30  ;;  %v750_v33 = vadd.f32 %v738_v17, %v657_v31 }
 0x125   : > { %763 = vst [vmem:[%s1314_s27 + $0x20] sm:$0xff] %v747_v28  ;;  %765 = vst [vmem:[%s1314_s27 + $0x30] sm:$0xff] %v749_v29 }
 0x126   : > { %764 = vst [vmem:[%s1314_s27 + $0x28] sm:$0xff] %v748_v32  ;;  %766 = vst [vmem:[%s1314_s27 + $0x38] sm:$0xff] %v750_v33 }
 0x128   : > { %v608_v34 = vpop.f32.mrb[4].mxu0  ;;  %v661_v35 = vpop.f32.mrb[4].mxu1  ;;  %781 = sbr.rel (!%p1172_p6) target bundleno = 311 (0x137), region = 67 }
 0x129   : > { %v751_v36 = vadd.f32 %v726_v14, %v608_v34  ;;  %v753_v37 = vadd.f32 %v734_v15, %v661_v35  ;;  %v610_v38 = vpop.f32.mrb[5].mxu0  ;;  %v663_v39 = vpop.f32.mrb[5].mxu1 }
 0x12a   : > { %v752_v40 = vadd.f32 %v730_v16, %v610_v38  ;;  %v754_v41 = vadd.f32 %v738_v17, %v663_v39  ;;  %v612_v42 = vpop.f32.mrb[6].mxu0  ;;  %v665_v43 = vpop.f32.mrb[6].mxu1  ;;  %v800_v50 = vld [vmem:[%s1314_s27] sm:$0xff] (%p1172_p6)  ;;  %v804_v52 = vld [vmem:[%s1314_s27 + $0x10] sm:$0xff] (%p1172_p6) }
 0x12b   : > { %767 = vst [vmem:[%s1314_s27 + $0x40] sm:$0xff] %v751_v36  ;;  %769 = vst [vmem:[%s1314_s27 + $0x50] sm:$0xff] %v753_v37  ;;  %v755_v44 = vadd.f32 %v726_v14, %v612_v42  ;;  %v757_v45 = vadd.f32 %v734_v15, %v665_v43  ;;  %v614_v46 = vpop.f32.mrb[7].mxu0  ;;  %v667_v47 = vpop.f32.mrb[7].mxu1  ;;  %v802_v51 = vld [vmem:[%s1314_s27 + $0x8] sm:$0xff] (%p1172_p6)  ;;  %v806_v53 = vld [vmem:[%s1314_s27 + $0x18] sm:$0xff] (%p1172_p6) }
 0x12c   : > { %768 = vst [vmem:[%s1314_s27 + $0x48] sm:$0xff] %v752_v40  ;;  %770 = vst [vmem:[%s1314_s27 + $0x58] sm:$0xff] %v754_v41  ;;  %v756_v48 = vadd.f32 %v730_v16, %v614_v46  ;;  %v758_v49 = vadd.f32 %v738_v17, %v667_v47  ;;  %v808_v54 = vld [vmem:[%s1314_s27 + $0x20] sm:$0xff] (%p1172_p6)  ;;  %v812_v56 = vld [vmem:[%s1314_s27 + $0x30] sm:$0xff] (%p1172_p6) }
 0x12d   : > { %771 = vst [vmem:[%s1314_s27 + $0x60] sm:$0xff] %v755_v44  ;;  %773 = vst [vmem:[%s1314_s27 + $0x70] sm:$0xff] %v757_v45  ;;  %v810_v55 = vld [vmem:[%s1314_s27 + $0x28] sm:$0xff] (%p1172_p6)  ;;  %v814_v57 = vld [vmem:[%s1314_s27 + $0x38] sm:$0xff] (%p1172_p6) }
 0x12e   : > { %772 = vst [vmem:[%s1314_s27 + $0x68] sm:$0xff] %v756_v48  ;;  %774 = vst [vmem:[%s1314_s27 + $0x78] sm:$0xff] %v758_v49 }
 0x12f   : > { %801 = vst [vmem:[%s787_s30] sm:$0xff] %v800_v50  ;;  %803 = vst [vmem:[%s787_s30 + $0x8] sm:$0xff] %v802_v51 }
 0x130   : > { %805 = vst [vmem:[%s787_s30 + $0x10] sm:$0xff] %v804_v52  ;;  %807 = vst [vmem:[%s787_s30 + $0x18] sm:$0xff] %v806_v53 }
 0x131   : > { %809 = vst [vmem:[%s787_s30 + $0x40] sm:$0xff] %v808_v54  ;;  %811 = vst [vmem:[%s787_s30 + $0x48] sm:$0xff] %v810_v55 }
 0x132   : > { %v816_v58 = vld [vmem:[%s1314_s27 + $0x40] sm:$0xff]  ;;  %813 = vst [vmem:[%s787_s30 + $0x50] sm:$0xff] %v812_v56  ;;  %815 = vst [vmem:[%s787_s30 + $0x58] sm:$0xff] %v814_v57  ;;  %v820_v60 = vld [vmem:[%s1314_s27 + $0x50] sm:$0xff] }
 0x133   : > { %817 = vst [vmem:[%s787_s30 + $0x80] sm:$0xff] %v816_v58  ;;  %v818_v59 = vld [vmem:[%s1314_s27 + $0x48] sm:$0xff]  ;;  %v822_v61 = vld [vmem:[%s1314_s27 + $0x58] sm:$0xff]  ;;  %821 = vst [vmem:[%s787_s30 + $0x90] sm:$0xff] %v820_v60 }
 0x134   : > { %819 = vst [vmem:[%s787_s30 + $0x88] sm:$0xff] %v818_v59  ;;  %823 = vst [vmem:[%s787_s30 + $0x98] sm:$0xff] %v822_v61  ;;  %v824_v62 = vld [vmem:[%s1314_s27 + $0x60] sm:$0xff]  ;;  %v828_v0 = vld [vmem:[%s1314_s27 + $0x70] sm:$0xff] }
 0x135   : > { %v826_v63 = vld [vmem:[%s1314_s27 + $0x68] sm:$0xff]  ;;  %825 = vst [vmem:[%s787_s30 + $0xc0] sm:$0xff] %v824_v62  ;;  %829 = vst [vmem:[%s787_s30 + $0xd0] sm:$0xff] %v828_v0  ;;  %v830_v1 = vld [vmem:[%s1314_s27 + $0x78] sm:$0xff] }
 0x136   : > { %827 = vst [vmem:[%s787_s30 + $0xc8] sm:$0xff] %v826_v63  ;;  %831 = vst [vmem:[%s787_s30 + $0xd8] sm:$0xff] %v830_v1 }
 0x137 PF: > { %s13_s16 = sadd.s32 1, %s1114_s16   ;;  %s1374_s12 = smov %s1102_s13 }
 0x138   : > { %p10_p12 = scmp.ge.s32.totalorder %s13_s16, 4   ;;  %s1375_s13 = smov %s1177_s22 }
 0x139   : > { %s1376_s14 = smov %s1110_s15  ;;  %s1377_s15 = smov %s1379_s17 }
 0x13a   :  { %12 = sbr.rel (!%p10_p12) target bundleno = 3 (0x3), region = 127 }

// kernel: esim_forward.23
= control target key start
LH: loop header
LB: loop body
LE: loop exit
PB: predicated region body
PF: predicated region fallthrough
CT: control target
= control target key end

     0   :  { %v194_v0 = vmov 0.0   ;;  %vm195_vm0 = vmmov 0   ;;  %s249_s1 = inlined_call_operand.vmem [shape: bf16[128,128], index: 1, kind: input, shape index: {}]   ;;  %s250_s0 = inlined_call_operand.vmem [shape: f32[8,128], index: 0, kind: input, shape index: {}]   ;;  %s251_s2 = inlined_call_operand.vmem [shape: f32[1,128], index: 2, kind: input, shape index: {}]   ;;  %s252_s3 = inlined_call_operand.vmem [shape: f32[8,128], index: 3, kind: output, shape index: {}]  }
   0x1   :  { %164 = vmatprep.subr.bf16.mxu0 %v194_v0  ;;  %v186_v1 = vld [vmem:[%s249_s1] sm:$0xff]   ;;  %180 = vmatprep.mubr.msk.bf16.mxu0 %vm195_vm0, %v194_v0  ;;  %v187_v2 = vld [vmem:[%s249_s1 + $0x8] sm:$0xff]   ;;  %v188_v3 = vld [vmem:[%s249_s1 + $0x10] sm:$0xff]  }
   0x2   :  { %165 = vmatpush3.bf16.msra.mxu0 %v186_v1  ;;  %v189_v4 = vld [vmem:[%s249_s1 + $0x18] sm:$0xff]   ;;  %v190_v5 = vld [vmem:[%s249_s1 + $0x20] sm:$0xff]   ;;  %v191_v6 = vld [vmem:[%s249_s1 + $0x28] sm:$0xff]  }
   0x3   :  { %166 = vmatprep.subr.bf16.mxu0 %v194_v0  ;;  %v192_v7 = vld [vmem:[%s249_s1 + $0x30] sm:$0xff]   ;;  %v193_v8 = vld [vmem:[%s249_s1 + $0x38] sm:$0xff]   ;;  %v21_v9 = vld [vmem:[%s250_s0] sm:$0xff] }
   0x4   :  { %v22_v10 = vpack.c.bf16 %v21_v9, %v21_v9  ;;  %v154_v11 = vld [vmem:[%s251_s2] ss:$0 sm:$0xff] }
   0x6   :  { %167 = vmatpush3.bf16.msra.mxu0 %v187_v2 }
   0x7   :  { %168 = vmatprep.subr.bf16.mxu0 %v194_v0 }
   0xa   :  { %169 = vmatpush3.bf16.msra.mxu0 %v188_v3 }
   0xb   :  { %170 = vmatprep.subr.bf16.mxu0 %v194_v0 }
   0xe   :  { %171 = vmatpush3.bf16.msra.mxu0 %v189_v4 }
   0xf   :  { %172 = vmatprep.subr.bf16.mxu0 %v194_v0 }
  0x12   :  { %173 = vmatpush3.bf16.msra.mxu0 %v190_v5 }
  0x13   :  { %174 = vmatprep.subr.bf16.mxu0 %v194_v0 }
  0x16   :  { %175 = vmatpush3.bf16.msra.mxu0 %v191_v6 }
  0x17   :  { %176 = vmatprep.subr.bf16.mxu0 %v194_v0 }
  0x1a   :  { %177 = vmatpush3.bf16.msra.mxu0 %v192_v7 }
  0x1b   :  { %178 = vmatprep.subr.bf16.mxu0 %v194_v0 }
  0x1e   :  { %179 = vmatpush3.bf16.msra.mxu0 %v193_v8 }
  0x21   :  { %181 = vmatmul.mubr.bf16.vlgmr.msra.gmra.mrb[0].mxu0 %v22_v10 }
  0xf4   :  { %v121_v12 = vpop.f32.mrb[0].mxu0 }
  0xf5   :  { %v140_v13 = vadd.f32 %v154_v11, %v121_v12  ;;  %v182_v14 = vpop.f32.mrb[1].mxu0 }
  0xf6   :  { %v124_v15 = vpop.f32.mrb[2].mxu0 }
  0xf7   :  { %141 = vst [vmem:[%s252_s3] sm:$0xff] %v140_v13  ;;  %v183_v16 = vpop.f32.mrb[3].mxu0 }

// kernel: esim_forward.22
= control target key start
LH: loop header
LB: loop body
LE: loop exit
PB: predicated region body
PF: predicated region fallthrough
CT: control target
= control target key end

     0   :  { %s1190_s1 = inlined_call_operand.vmem [shape: bf16[1024,128], index: 1, kind: input, shape index: {}]   ;;  %s1191_s0 = inlined_call_operand.vmem [shape: f32[8,1024], index: 0, kind: input, shape index: {}]   ;;  %s1192_s2 = inlined_call_operand.vmem [shape: f32[1,128], index: 2, kind: input, shape index: {}]   ;;  %s1193_s3 = inlined_call_operand.vmem [shape: f32[8,128], index: 3, kind: output, shape index: {}]  }
   0x1   :  { %v882_v0 = vld [vmem:[%s1190_s1 + $0x40] sm:$0xff]   ;;  %v886_v4 = vld [vmem:[%s1190_s1 + $0x48] sm:$0xff]   ;;  %v890_v8 = vld [vmem:[%s1190_s1 + $0x50] sm:$0xff]  }
   0x2   :  { %v883_v1 = vld [vmem:[%s1190_s1 + $0xc0] sm:$0xff]   ;;  %794 = vmatprep.subr.bf16.mxu0 %v882_v0  ;;  %v887_v5 = vld [vmem:[%s1190_s1 + $0xc8] sm:$0xff]   ;;  %v891_v9 = vld [vmem:[%s1190_s1 + $0xd0] sm:$0xff]  }
   0x3   :  { %v884_v2 = vld [vmem:[%s1190_s1] sm:$0xff]   ;;  %816 = vmatprep.subr.bf16.mxu1 %v883_v1  ;;  %v888_v6 = vld [vmem:[%s1190_s1 + $0x8] sm:$0xff]   ;;  %v892_v10 = vld [vmem:[%s1190_s1 + $0x10] sm:$0xff]  }
   0x4   :  { %v885_v3 = vld [vmem:[%s1190_s1 + $0x80] sm:$0xff]   ;;  %795 = vmatpush3.bf16.msra.mxu0 %v884_v2  ;;  %v889_v7 = vld [vmem:[%s1190_s1 + $0x88] sm:$0xff]   ;;  %v893_v11 = vld [vmem:[%s1190_s1 + $0x90] sm:$0xff]  }
   0x5   :  { %817 = vmatpush3.bf16.msra.mxu1 %v885_v3  ;;  %796 = vmatprep.subr.bf16.mxu0 %v886_v4  ;;  %v894_v12 = vld [vmem:[%s1190_s1 + $0x58] sm:$0xff]   ;;  %v898_v16 = vld [vmem:[%s1190_s1 + $0x60] sm:$0xff]   ;;  %v902_v20 = vld [vmem:[%s1190_s1 + $0x68] sm:$0xff]  }
   0x6   :  { %818 = vmatprep.subr.bf16.mxu1 %v887_v5  ;;  %v895_v13 = vld [vmem:[%s1190_s1 + $0xd8] sm:$0xff]   ;;  %v899_v17 = vld [vmem:[%s1190_s1 + $0xe0] sm:$0xff]   ;;  %v903_v21 = vld [vmem:[%s1190_s1 + $0xe8] sm:$0xff]  }
   0x7   :  { %v896_v14 = vld [vmem:[%s1190_s1 + $0x18] sm:$0xff]   ;;  %v900_v18 = vld [vmem:[%s1190_s1 + $0x20] sm:$0xff]   ;;  %v904_v22 = vld [vmem:[%s1190_s1 + $0x28] sm:$0xff]  }
   0x8   :  { %797 = vmatpush3.bf16.msra.mxu0 %v888_v6  ;;  %v897_v15 = vld [vmem:[%s1190_s1 + $0x98] sm:$0xff]   ;;  %v901_v19 = vld [vmem:[%s1190_s1 + $0xa0] sm:$0xff]   ;;  %v905_v23 = vld [vmem:[%s1190_s1 + $0xa8] sm:$0xff]  }
   0x9   :  { %819 = vmatpush3.bf16.msra.mxu1 %v889_v7  ;;  %798 = vmatprep.subr.bf16.mxu0 %v890_v8  ;;  %v906_v24 = vld [vmem:[%s1190_s1 + $0x70] sm:$0xff]   ;;  %v910_v28 = vld [vmem:[%s1190_s1 + $0x78] sm:$0xff]   ;;  %v22_v32 = vld [vmem:[%s1191_s0 + $0x8] sm:$0xff] }
   0xa   :  { %820 = vmatprep.subr.bf16.mxu1 %v891_v9  ;;  %v907_v25 = vld [vmem:[%s1190_s1 + $0xf0] sm:$0xff]   ;;  %v911_v29 = vld [vmem:[%s1190_s1 + $0xf8] sm:$0xff]   ;;  %v21_v34 = vld [vmem:[%s1191_s0] sm:$0xff]  ;;  %v30_v35 = vpack.c.bf16 %v22_v32, %v22_v32 }
   0xb   :  { %v908_v26 = vld [vmem:[%s1190_s1 + $0x30] sm:$0xff]   ;;  %v912_v30 = vld [vmem:[%s1190_s1 + $0x38] sm:$0xff]   ;;  %v29_v37 = vpack.c.bf16 %v21_v34, %v21_v34  ;;  %v914_v40 = vld [vmem:[%s1190_s1 + $0x140] sm:$0xff]  }
   0xc   :  { %799 = vmatpush3.bf16.msra.mxu0 %v892_v10  ;;  %v909_v27 = vld [vmem:[%s1190_s1 + $0xb0] sm:$0xff]   ;;  %v913_v31 = vld [vmem:[%s1190_s1 + $0xb8] sm:$0xff]   ;;  %581 = vmatprep.mubr.bf16.mxu0 %v30_v35  ;;  %v915_v41 = vld [vmem:[%s1190_s1 + $0x1c0] sm:$0xff]  }
   0xd   :  { %821 = vmatpush3.bf16.msra.mxu1 %v893_v11  ;;  %800 = vmatprep.subr.bf16.mxu0 %v894_v12  ;;  %v24_v33 = vld [vmem:[%s1191_s0 + $0x18] sm:$0xff]  ;;  %v23_v38 = vld [vmem:[%s1191_s0 + $0x10] sm:$0xff]  ;;  %v916_v42 = vld [vmem:[%s1190_s1 + $0x100] sm:$0xff]  }
   0xe   :  { %822 = vmatprep.subr.bf16.mxu1 %v895_v13  ;;  %v32_v36 = vpack.c.bf16 %v24_v33, %v24_v33  ;;  %v31_v39 = vpack.c.bf16 %v23_v38, %v23_v38  ;;  %v917_v43 = vld [vmem:[%s1190_s1 + $0x180] sm:$0xff]   ;;  %v918_v44 = vld [vmem:[%s1190_s1 + $0x148] sm:$0xff]   ;;  %v922_v48 = vld [vmem:[%s1190_s1 + $0x150] sm:$0xff]  }
   0xf   :  { %v919_v45 = vld [vmem:[%s1190_s1 + $0x1c8] sm:$0xff]   ;;  %v923_v49 = vld [vmem:[%s1190_s1 + $0x1d0] sm:$0xff]   ;;  %v926_v52 = vld [vmem:[%s1190_s1 + $0x158] sm:$0xff]  }
  0x10   :  { %801 = vmatpush3.bf16.msra.mxu0 %v896_v14  ;;  %621 = vmatprep.mubr.bf16.mxu1 %v32_v36  ;;  %v920_v46 = vld [vmem:[%s1190_s1 + $0x108] sm:$0xff]   ;;  %v924_v50 = vld [vmem:[%s1190_s1 + $0x110] sm:$0xff]   ;;  %v927_v53 = vld [vmem:[%s1190_s1 + $0x1d8] sm:$0xff]  }
  0x11   :  { %823 = vmatpush3.bf16.msra.mxu1 %v897_v15  ;;  %802 = vmatprep.subr.bf16.mxu0 %v898_v16  ;;  %v921_v47 = vld [vmem:[%s1190_s1 + $0x188] sm:$0xff]   ;;  %v925_v51 = vld [vmem:[%s1190_s1 + $0x190] sm:$0xff]   ;;  %v928_v54 = vld [vmem:[%s1190_s1 + $0x118] sm:$0xff]  }
  0x12   :  { %824 = vmatprep.subr.bf16.mxu1 %v899_v17  ;;  %v929_v55 = vld [vmem:[%s1190_s1 + $0x198] sm:$0xff]   ;;  %v930_v56 = vld [vmem:[%s1190_s1 + $0x160] sm:$0xff]   ;;  %v934_v60 = vld [vmem:[%s1190_s1 + $0x168] sm:$0xff]  }
  0x13   :  { %v931_v57 = vld [vmem:[%s1190_s1 + $0x1e0] sm:$0xff]   ;;  %v935_v61 = vld [vmem:[%s1190_s1 + $0x1e8] sm:$0xff]   ;;  %v938_v0 = vld [vmem:[%s1190_s1 + $0x170] sm:$0xff]  }
  0x14   :  { %803 = vmatpush3.bf16.msra.mxu0 %v900_v18  ;;  %v932_v58 = vld [vmem:[%s1190_s1 + $0x120] sm:$0xff]   ;;  %v936_v62 = vld [vmem:[%s1190_s1 + $0x128] sm:$0xff]   ;;  %v939_v1 = vld [vmem:[%s1190_s1 + $0x1f0] sm:$0xff]  }
  0x15   :  { %825 = vmatpush3.bf16.msra.mxu1 %v901_v19  ;;  %804 = vmatprep.subr.bf16.mxu0 %v902_v20  ;;  %v933_v59 = vld [vmem:[%s1190_s1 + $0x1a0] sm:$0xff]   ;;  %v937_v63 = vld [vmem:[%s1190_s1 + $0x1a8] sm:$0xff]   ;;  %v940_v2 = vld [vmem:[%s1190_s1 + $0x130] sm:$0xff]  }
  0x16   :  { %826 = vmatprep.subr.bf16.mxu1 %v903_v21  ;;  %v941_v3 = vld [vmem:[%s1190_s1 + $0x1b0] sm:$0xff]   ;;  %v942_v4 = vld [vmem:[%s1190_s1 + $0x178] sm:$0xff]   ;;  %v26_v8 = vld [vmem:[%s1191_s0 + $0x28] sm:$0xff] }
  0x17   :  { %v943_v5 = vld [vmem:[%s1190_s1 + $0x1f8] sm:$0xff]   ;;  %v34_v10 = vpack.c.bf16 %v26_v8, %v26_v8  ;;  %v25_v12 = vld [vmem:[%s1191_s0 + $0x20] sm:$0xff]  ;;  %v27_v13 = vld [vmem:[%s1191_s0 + $0x30] sm:$0xff] }
  0x18   :  { %805 = vmatpush3.bf16.msra.mxu0 %v904_v22  ;;  %v944_v6 = vld [vmem:[%s1190_s1 + $0x138] sm:$0xff]   ;;  %v33_v14 = vpack.c.bf16 %v25_v12, %v25_v12  ;;  %v35_v15 = vpack.c.bf16 %v27_v13, %v27_v13  ;;  %v793_v38 = vld [vmem:[%s1192_s2] ss:$0 sm:$0xff] }
  0x19   :  { %827 = vmatpush3.bf16.msra.mxu1 %v905_v23  ;;  %806 = vmatprep.subr.bf16.mxu0 %v906_v24  ;;  %v945_v7 = vld [vmem:[%s1190_s1 + $0x1b8] sm:$0xff]  }
  0x1a   :  { %828 = vmatprep.subr.bf16.mxu1 %v907_v25  ;;  %v28_v9 = vld [vmem:[%s1191_s0 + $0x38] sm:$0xff] }
  0x1b   :  { %v36_v11 = vpack.c.bf16 %v28_v9, %v28_v9 }
  0x1c   :  { %807 = vmatpush3.bf16.msra.mxu0 %v908_v26 }
  0x1d   :  { %829 = vmatpush3.bf16.msra.mxu1 %v909_v27  ;;  %808 = vmatprep.subr.bf16.mxu0 %v910_v28 }
  0x1e   :  { %830 = vmatprep.subr.bf16.mxu1 %v911_v29 }
  0x20   :  { %809 = vmatpush3.bf16.msra.mxu0 %v912_v30 }
  0x21   :  { %831 = vmatpush3.bf16.msra.mxu1 %v913_v31  ;;  %838 = vmatprep.subr.bf16.mxu0 %v914_v40 }
  0x22   :  { %860 = vmatprep.subr.bf16.mxu1 %v915_v41 }
  0x23   :  { %582 = vmatmul.mubr.bf16.vlgmr.msra.gmra.mrb[0].mxu0 %v29_v37 }
  0x24   :  { %622 = vmatmul.mubr.bf16.vlgmr.msra.gmra.mrb[0].mxu1 %v31_v39  ;;  %839 = vmatpush3.bf16.msra.mxu0 %v916_v42 }
  0x25   :  { %861 = vmatpush3.bf16.msra.mxu1 %v917_v43  ;;  %840 = vmatprep.subr.bf16.mxu0 %v918_v44 }
  0x26   :  { %862 = vmatprep.subr.bf16.mxu1 %v919_v45  ;;  %661 = vmatprep.mubr.bf16.mxu0 %v34_v10 }
  0x27   :  { %701 = vmatprep.mubr.bf16.mxu1 %v36_v11 }
  0x28   :  { %841 = vmatpush3.bf16.msra.mxu0 %v920_v46 }
  0x29   :  { %863 = vmatpush3.bf16.msra.mxu1 %v921_v47  ;;  %842 = vmatprep.subr.bf16.mxu0 %v922_v48 }
  0x2a   :  { %864 = vmatprep.subr.bf16.mxu1 %v923_v49 }
  0x2c   :  { %843 = vmatpush3.bf16.msra.mxu0 %v924_v50 }
  0x2d   :  { %865 = vmatpush3.bf16.msra.mxu1 %v925_v51  ;;  %844 = vmatprep.subr.bf16.mxu0 %v926_v52 }
  0x2e   :  { %866 = vmatprep.subr.bf16.mxu1 %v927_v53 }
  0x30   :  { %845 = vmatpush3.bf16.msra.mxu0 %v928_v54 }
  0x31   :  { %867 = vmatpush3.bf16.msra.mxu1 %v929_v55  ;;  %846 = vmatprep.subr.bf16.mxu0 %v930_v56 }
  0x32   :  { %868 = vmatprep.subr.bf16.mxu1 %v931_v57 }
  0x34   :  { %847 = vmatpush3.bf16.msra.mxu0 %v932_v58 }
  0x35   :  { %869 = vmatpush3.bf16.msra.mxu1 %v933_v59  ;;  %848 = vmatprep.subr.bf16.mxu0 %v934_v60 }
  0x36   :  { %870 = vmatprep.subr.bf16.mxu1 %v935_v61 }
  0x38   :  { %849 = vmatpush3.bf16.msra.mxu0 %v936_v62 }
  0x39   :  { %871 = vmatpush3.bf16.msra.mxu1 %v937_v63  ;;  %850 = vmatprep.subr.bf16.mxu0 %v938_v0 }
  0x3a   :  { %872 = vmatprep.subr.bf16.mxu1 %v939_v1 }
  0x3c   :  { %851 = vmatpush3.bf16.msra.mxu0 %v940_v2 }
  0x3d   :  { %873 = vmatpush3.bf16.msra.mxu1 %v941_v3  ;;  %852 = vmatprep.subr.bf16.mxu0 %v942_v4 }
  0x3e   :  { %874 = vmatprep.subr.bf16.mxu1 %v943_v5 }
  0x40   :  { %853 = vmatpush3.bf16.msra.mxu0 %v944_v6 }
  0x41   :  { %875 = vmatpush3.bf16.msra.mxu1 %v945_v7 }
  0x43   :  { %662 = vmatmul.mubr.bf16.vlgmr.msra.gmra.mrb[4].mxu0 %v33_v14 }
  0x44   :  { %702 = vmatmul.mubr.bf16.vlgmr.msra.gmra.mrb[4].mxu1 %v35_v15 }
  0xf6   :  { %v810_v16 = vpop.f32.mrb[0].mxu0 }
  0xf7   :  { %v832_v17 = vpop.f32.mrb[0].mxu1  ;;  %v811_v18 = vpop.f32.mrb[1].mxu0 }
  0xf8   :  { %v833_v19 = vpop.f32.mrb[1].mxu1  ;;  %v812_v20 = vadd.f32 %v811_v18, %v810_v16  ;;  %v813_v22 = vpop.f32.mrb[2].mxu0 }
  0xf9   :  { %v834_v21 = vadd.f32 %v833_v19, %v832_v17  ;;  %v835_v23 = vpop.f32.mrb[2].mxu1  ;;  %v814_v24 = vpop.f32.mrb[3].mxu0 }
  0xfa   :  { %v836_v25 = vpop.f32.mrb[3].mxu1 }
  0xfb   :  { %v624_v26 = vadd.f32 %v834_v21, %v812_v20 }
 0x116   :  { %v854_v27 = vpop.f32.mrb[4].mxu0 }
 0x117   :  { %v876_v28 = vpop.f32.mrb[4].mxu1  ;;  %v855_v29 = vpop.f32.mrb[5].mxu0 }
 0x118   :  { %v856_v30 = vadd.f32 %v855_v29, %v854_v27  ;;  %v877_v31 = vpop.f32.mrb[5].mxu1  ;;  %v857_v32 = vpop.f32.mrb[6].mxu0 }
 0x119   :  { %v878_v33 = vadd.f32 %v877_v31, %v876_v28  ;;  %v879_v34 = vpop.f32.mrb[6].mxu1  ;;  %v858_v35 = vpop.f32.mrb[7].mxu0 }
 0x11a   :  { %v664_v36 = vadd.f32 %v856_v30, %v624_v26  ;;  %v880_v37 = vpop.f32.mrb[7].mxu1 }
 0x11c   :  { %v704_v39 = vadd.f32 %v878_v33, %v664_v36 }
 0x11e   :  { %v722_v40 = vadd.f32 %v793_v38, %v704_v39 }
 0x120   :  { %946 = vtanh.f32 %v722_v40 }
 0x12a   :  { %v947_v41 = vpop.eup %946 }
 0x12b   :  { %724 = vst [vmem:[%s1193_s3] sm:$0xff] %v947_v41 }

// kernel: esim_forward.14
= control target key start
LH: loop header
LB: loop body
LE: loop exit
PB: predicated region body
PF: predicated region fallthrough
CT: control target
= control target key end

     0   :  { %v8334_v2 = vmov 0   ;;  %v5904_v3 = vmov 0.0   ;;  %vm609_vm0 = vcmask 1041409   ;;  %s8326_s0 = inlined_call_operand.vmem [shape: f32[2,8,1024], index: 0, kind: input, shape index: {}, may-alias: {0,1}]   ;;  %s8327_s1 = inlined_call_operand.vmem [shape: f32[2,8,1024], index: 1, kind: input, shape index: {}, may-alias: {0,1}]   ;;  %s8328_s2 = inlined_call_operand.vmem [shape: f32[2,8,1], index: 2, kind: input, shape index: {}, may-alias: {2,3}]   ;;  %s8329_s3 = inlined_call_operand.vmem [shape: f32[2,8,1], index: 3, kind: input, shape index: {}, may-alias: {2,3}]   ;;  %s8330_s4 = inlined_call_operand.vmem [shape: bf16[128,512], index: 4, kind: input, shape index: {}]   ;;  %s8331_s5 = inlined_call_operand.vmem [shape: bf16[128,512], index: 5, kind: input, shape index: {}]   ;;  %s8332_s6 = inlined_call_operand.vmem [shape: f32[2,8,128], index: 6, kind: output, shape index: {0}]   ;;  %s8333_s7 = inlined_call_operand.vmem [shape: f32[2,8,128], index: 7, kind: output, shape index: {1}]  }
   0x1   :  { %v5949_v0 = vld [vmem:[%s8330_s4 + $0x4] ss:$16 sps:$4 sm:$0xff]   ;;  %v5954_v1 = vld [vmem:[%s8330_s4 + $0xc] ss:$16 sps:$4 sm:$0xff]   ;;  %398 = vmatprep.mubr.bf16.mxu0 %v8334_v2  ;;  %439 = vmatprep.mubr.bf16.mxu1 %v8334_v2  ;;  %130 = vst [vmem:[#allocation2] sm:$0x3] %v5904_v3 }
   0x2   :  { %131 = vst [vmem:[#allocation3] sm:$0x3] %v5904_v3  ;;  %132 = vst [vmem:[#allocation4] sm:$0x3] %v5904_v3  ;;  %366 = vmatprep.subr.bf16.mxu0 %v5949_v0  ;;  %v5962_v4 = vld [vmem:[%s8330_s4] ss:$16 sps:$4 sm:$0xff]   ;;  %5101 = vset.pattern.permute.xlu0 %v8334_v2 }
   0x3   :  { %133 = vst [vmem:[#allocation5] sm:$0x3] %v5904_v3  ;;  %v5967_v5 = vld [vmem:[%s8330_s4 + $0x8] ss:$16 sps:$4 sm:$0xff]   ;;  %407 = vmatprep.subr.bf16.mxu1 %v5954_v1  ;;  %v5974_v6 = vld [vmem:[%s8330_s4 + $0x24] ss:$16 sps:$4 sm:$0xff]   ;;  %5102 = vset.pattern.permute.xlu1 %v8334_v2 }
   0x4   :  { %367 = vmatpush1.bf16.msra.mxu0 %v5962_v4  ;;  %408 = vmatpush1.bf16.msra.mxu1 %v5967_v5  ;;  %v5982_v7 = vld [vmem:[%s8330_s4 + $0x2c] ss:$16 sps:$4 sm:$0xff]   ;;  %v5987_v8 = vld [vmem:[%s8330_s4 + $0x20] ss:$16 sps:$4 sm:$0xff]   ;;  %v5993_v9 = vld [vmem:[%s8330_s4 + $0x28] ss:$16 sps:$4 sm:$0xff]  }
   0x5   :  { %368 = vmatprep.subr.bf16.mxu0 %v5974_v6  ;;  %409 = vmatprep.subr.bf16.mxu1 %v5982_v7  ;;  %v5999_v10 = vld [vmem:[%s8330_s4 + $0x44] ss:$16 sps:$4 sm:$0xff]   ;;  %v6004_v11 = vld [vmem:[%s8330_s4 + $0x4c] ss:$16 sps:$4 sm:$0xff]   ;;  %v6009_v12 = vld [vmem:[%s8330_s4 + $0x40] ss:$16 sps:$4 sm:$0xff]  }
   0x6   :  { %v6014_v13 = vld [vmem:[%s8330_s4 + $0x48] ss:$16 sps:$4 sm:$0xff]   ;;  %v6021_v14 = vld [vmem:[%s8330_s4 + $0x64] ss:$16 sps:$4 sm:$0xff]   ;;  %v6028_v15 = vld [vmem:[%s8330_s4 + $0x6c] ss:$16 sps:$4 sm:$0xff]  }
   0x7   :  { %v6033_v16 = vld [vmem:[%s8330_s4 + $0x60] ss:$16 sps:$4 sm:$0xff]   ;;  %v6040_v17 = vld [vmem:[%s8330_s4 + $0x68] ss:$16 sps:$4 sm:$0xff]   ;;  %v6045_v18 = vld [vmem:[%s8330_s4 + $0x84] ss:$16 sps:$4 sm:$0xff]  }
   0x8   :  { %369 = vmatpush1.bf16.msra.mxu0 %v5987_v8  ;;  %410 = vmatpush1.bf16.msra.mxu1 %v5993_v9  ;;  %v6052_v19 = vld [vmem:[%s8330_s4 + $0x8c] ss:$16 sps:$4 sm:$0xff]   ;;  %v6057_v20 = vld [vmem:[%s8330_s4 + $0x80] ss:$16 sps:$4 sm:$0xff]   ;;  %v6062_v21 = vld [vmem:[%s8330_s4 + $0x88] ss:$16 sps:$4 sm:$0xff]  }
   0x9   :  { %370 = vmatprep.subr.bf16.mxu0 %v5999_v10  ;;  %411 = vmatprep.subr.bf16.mxu1 %v6004_v11  ;;  %v6069_v22 = vld [vmem:[%s8330_s4 + $0xa4] ss:$16 sps:$4 sm:$0xff]   ;;  %v6076_v23 = vld [vmem:[%s8330_s4 + $0xac] ss:$16 sps:$4 sm:$0xff]   ;;  %v6083_v24 = vld [vmem:[%s8330_s4 + $0xa0] ss:$16 sps:$4 sm:$0xff]  }
   0xa   :  { %v6088_v25 = vld [vmem:[%s8330_s4 + $0xa8] ss:$16 sps:$4 sm:$0xff]   ;;  %v6095_v26 = vld [vmem:[%s8330_s4 + $0xc4] ss:$16 sps:$4 sm:$0xff]   ;;  %v6100_v27 = vld [vmem:[%s8330_s4 + $0xcc] ss:$16 sps:$4 sm:$0xff]  }
   0xb   :  { %v6105_v28 = vld [vmem:[%s8330_s4 + $0xc0] ss:$16 sps:$4 sm:$0xff]   ;;  %v6110_v29 = vld [vmem:[%s8330_s4 + $0xc8] ss:$16 sps:$4 sm:$0xff]   ;;  %v6117_v30 = vld [vmem:[%s8330_s4 + $0xe4] ss:$16 sps:$4 sm:$0xff]  }
   0xc   :  { %371 = vmatpush1.bf16.msra.mxu0 %v6009_v12  ;;  %412 = vmatpush1.bf16.msra.mxu1 %v6014_v13  ;;  %v6124_v31 = vld [vmem:[%s8330_s4 + $0xec] ss:$16 sps:$4 sm:$0xff]   ;;  %v6129_v32 = vld [vmem:[%s8330_s4 + $0xe0] ss:$16 sps:$4 sm:$0xff]   ;;  %v6134_v33 = vld [vmem:[%s8330_s4 + $0xe8] ss:$16 sps:$4 sm:$0xff]  }
   0xd   :  { %372 = vmatprep.subr.bf16.mxu0 %v6021_v14  ;;  %413 = vmatprep.subr.bf16.mxu1 %v6028_v15  ;;  %v6138_v34 = vld [vmem:[#allocation2] sm:$0x3]  ;;  %v6145_v35 = vld [vmem:[%s8331_s5 + $0x4] ss:$16 sps:$4 sm:$0xff]   ;;  %v6150_v36 = vld [vmem:[%s8331_s5 + $0xc] ss:$16 sps:$4 sm:$0xff]  }
   0xe   :  { %v205_v37 = vpack.c.bf16 %v6138_v34, %v6138_v34  ;;  %v6157_v38 = vld [vmem:[%s8331_s5] ss:$16 sps:$4 sm:$0xff]   ;;  %v202_v39 = vld [vmem:[%s8328_s2 + $0x8] sm:$0x1]  ;;  %v6172_v41 = vld [vmem:[%s8331_s5 + $0x24] ss:$16 sps:$4 sm:$0xff]  }
   0xf   :  { %v6167_v40 = vld [vmem:[%s8331_s5 + $0x8] ss:$16 sps:$4 sm:$0xff]   ;;  %v6179_v42 = vld [vmem:[%s8331_s5 + $0x2c] ss:$16 sps:$4 sm:$0xff]   ;;  %v201_v43 = vld [vmem:[%s8328_s2] sm:$0x1]  ;;  %582 = vperm.xlu0 %5101, %v202_v39  }
  0x10   :  { %373 = vmatpush1.bf16.msra.mxu0 %v6033_v16  ;;  %414 = vmatpush1.bf16.msra.mxu1 %v6040_v17  ;;  %v588_v44 = vsub.f32 1.0, %v202_v39  ;;  %v587_v45 = vsub.f32 1.0, %v201_v43  ;;  %v6187_v46 = vld [vmem:[%s8331_s5 + $0x20] ss:$16 sps:$4 sm:$0xff]   ;;  %v6192_v47 = vld [vmem:[%s8331_s5 + $0x28] ss:$16 sps:$4 sm:$0xff]  }
  0x11   :  { %374 = vmatprep.subr.bf16.mxu0 %v6045_v18  ;;  %415 = vmatprep.subr.bf16.mxu1 %v6052_v19  ;;  %v6199_v48 = vld [vmem:[%s8331_s5 + $0x44] ss:$16 sps:$4 sm:$0xff]   ;;  %v6206_v49 = vld [vmem:[%s8331_s5 + $0x4c] ss:$16 sps:$4 sm:$0xff]   ;;  %v6214_v52 = vld [vmem:[%s8331_s5 + $0x40] ss:$16 sps:$4 sm:$0xff]  }
  0x12   :  { %577 = vperm.xlu1 %5102, %v201_v43   ;;  %v636_v50 = vld [vmem:[%s8329_s3 + $0xf] sm:$0x1]  ;;  %v6223_v53 = vld [vmem:[%s8331_s5 + $0x48] ss:$16 sps:$4 sm:$0xff]   ;;  %v635_v54 = vld [vmem:[%s8329_s3 + $0x7] sm:$0x1] }
  0x13   :  { %596 = vperm.xlu0 %5101, %v588_v44   ;;  %v1022_v51 = vsub.f32 1.0, %v636_v50  ;;  %v6233_v55 = vld [vmem:[%s8331_s5 + $0x64] ss:$16 sps:$4 sm:$0xff]   ;;  %v6238_v56 = vld [vmem:[%s8331_s5 + $0x6c] ss:$16 sps:$4 sm:$0xff]   ;;  %v1021_v57 = vsub.f32 1.0, %v635_v54 }
  0x14   :  { %375 = vmatpush1.bf16.msra.mxu0 %v6057_v20  ;;  %416 = vmatpush1.bf16.msra.mxu1 %v6062_v21  ;;  %v1069_v58 = vld [vmem:[%s8328_s2 + $0x9] sm:$0x1]  ;;  %v6248_v59 = vld [vmem:[%s8331_s5 + $0x60] ss:$16 sps:$4 sm:$0xff]   ;;  %v6260_v61 = vld [vmem:[%s8331_s5 + $0x84] ss:$16 sps:$4 sm:$0xff]  }
  0x15   :  { %376 = vmatprep.subr.bf16.mxu0 %v6069_v22  ;;  %417 = vmatprep.subr.bf16.mxu1 %v6076_v23  ;;  %v6253_v60 = vld [vmem:[%s8331_s5 + $0x68] ss:$16 sps:$4 sm:$0xff]   ;;  %v6265_v62 = vld [vmem:[%s8331_s5 + $0x8c] ss:$16 sps:$4 sm:$0xff]   ;;  %v1295_v63 = vsub.f32 1.0, %v1069_v58 }
  0x16   :  { %591 = vperm.xlu1 %5102, %v587_v45   ;;  %v1068_v3 = vld [vmem:[%s8328_s2 + $0x1] sm:$0x1]  ;;  %v6280_v39 = vld [vmem:[%s8331_s5 + $0x88] ss:$16 sps:$4 sm:$0xff]   ;;  %v6287_v43 = vld [vmem:[%s8331_s5 + $0xa4] ss:$16 sps:$4 sm:$0xff]  }
  0x17   :  { %1016 = vperm.xlu0 %5101, %v636_v50   ;;  %8362 = vst [vmem:[#allocation8_spill] sm:$0xff] %v6287_v43  ;;  %v6292_v44 = vld [vmem:[%s8331_s5 + $0xac] ss:$16 sps:$4 sm:$0xff]   ;;  %v1294_v45 = vsub.f32 1.0, %v1068_v3 }
  0x18   :  { %377 = vmatpush1.bf16.msra.mxu0 %v6083_v24  ;;  %418 = vmatpush1.bf16.msra.mxu1 %v6088_v25  ;;  %8363 = vst [vmem:[#allocation9_spill] sm:$0xff] %v6292_v44  ;;  %v1342_v50 = vld [vmem:[%s8329_s3 + $0xe] sm:$0x1] }
  0x19   :  { %378 = vmatprep.subr.bf16.mxu0 %v6095_v26  ;;  %419 = vmatprep.subr.bf16.mxu1 %v6100_v27 }
  0x1a   :  { %1030 = vperm.xlu1 %5102, %v1022_v51   ;;  %v6302_v51 = vld [vmem:[%s8331_s5 + $0xa0] ss:$16 sps:$4 sm:$0xff]  }
  0x1b   :  { %1011 = vperm.xlu0 %5101, %v635_v54   ;;  %8364 = vst [vmem:[#allocation10_spill] sm:$0xff] %v6302_v51  ;;  %v6307_v54 = vld [vmem:[%s8331_s5 + $0xa8] ss:$16 sps:$4 sm:$0xff]  }
  0x1c   :  { %379 = vmatpush1.bf16.msra.mxu0 %v6105_v28  ;;  %420 = vmatpush1.bf16.msra.mxu1 %v6110_v29  ;;  %8365 = vst [vmem:[#allocation11_spill] sm:$0xff] %v6307_v54 }
  0x1d   :  { %380 = vmatprep.subr.bf16.mxu0 %v6117_v30  ;;  %421 = vmatprep.subr.bf16.mxu1 %v6124_v31 }
  0x1e   :  { %1025 = vperm.xlu1 %5102, %v1021_v57   ;;  %v6314_v57 = vld [vmem:[%s8331_s5 + $0xc4] ss:$16 sps:$4 sm:$0xff]  }
  0x1f   :  { %1289 = vperm.xlu0 %5101, %v1069_v58   ;;  %8366 = vst [vmem:[#allocation12_spill] sm:$0xff] %v6314_v57  ;;  %v6319_v58 = vld [vmem:[%s8331_s5 + $0xcc] ss:$16 sps:$4 sm:$0xff]  }
  0x20   :  { %381 = vmatpush1.bf16.msra.mxu0 %v6129_v32  ;;  %422 = vmatpush1.bf16.msra.mxu1 %v6134_v33  ;;  %8367 = vst [vmem:[#allocation13_spill] sm:$0xff] %v6319_v58 }
  0x21   :  { %800 = vmatprep.subr.bf16.mxu0 %v6145_v35  ;;  %841 = vmatprep.subr.bf16.mxu1 %v6150_v36 }
  0x22   :  { %1303 = vperm.xlu1 %5102, %v1295_v63   ;;  %v1568_v63 = vsub.f32 1.0, %v1342_v50 }
  0x23   :  { %399 = vmatmul.mubr.bf16.vlgmr.msra.gmra.mrb[0].mxu0 %v205_v37  ;;  %440 = vmatmul.mubr.bf16.vlgmr.msra.gmra.mrb[0].mxu1 %v205_v37  ;;  %v6275_v37 = vld [vmem:[%s8331_s5 + $0x80] ss:$16 sps:$4 sm:$0xff]  }
  0x24   :  { %801 = vmatpush1.bf16.msra.mxu0 %v6157_v38  ;;  %842 = vmatpush1.bf16.msra.mxu1 %v6167_v40 }
  0x25   :  { %802 = vmatprep.subr.bf16.mxu0 %v6172_v41  ;;  %843 = vmatprep.subr.bf16.mxu1 %v6179_v42 }
  0x26   :  { %832 = vmatprep.mubr.bf16.mxu0 %v8334_v2  ;;  %873 = vmatprep.mubr.bf16.mxu1 %v8334_v2  ;;  %v1341_v2 = vld [vmem:[%s8329_s3 + $0x6] sm:$0x1] }
  0x27   :  { %1284 = vperm.xlu0 %5101, %v1068_v3   ;;  %1298 = vperm.xlu1 %5102, %v1294_v45   ;;  %v6341_v3 = vld [vmem:[%s8331_s5 + $0xe4] ss:$16 sps:$4 sm:$0xff]   ;;  %v6346_v45 = vld [vmem:[%s8331_s5 + $0xec] ss:$16 sps:$4 sm:$0xff]  }
  0x28   :  { %803 = vmatpush1.bf16.msra.mxu0 %v6187_v46  ;;  %844 = vmatpush1.bf16.msra.mxu1 %v6192_v47 }
  0x29   :  { %804 = vmatprep.subr.bf16.mxu0 %v6199_v48  ;;  %845 = vmatprep.subr.bf16.mxu1 %v6206_v49 }
  0x2b   :  { %1562 = vperm.xlu0 %5101, %v1342_v50   ;;  %1576 = vperm.xlu1 %5102, %v1568_v63   ;;  %v6363_v50 = vld [vmem:[#allocation4] sm:$0x3] }
  0x2c   :  { %805 = vmatpush1.bf16.msra.mxu0 %v6214_v52  ;;  %846 = vmatpush1.bf16.msra.mxu1 %v6223_v53 }
  0x2d   :  { %806 = vmatprep.subr.bf16.mxu0 %v6233_v55  ;;  %847 = vmatprep.subr.bf16.mxu1 %v6238_v56 }
  0x2f   :  { %1557 = vperm.xlu0 %5101, %v1341_v2  }
  0x30   :  { %807 = vmatpush1.bf16.msra.mxu0 %v6248_v59  ;;  %848 = vmatpush1.bf16.msra.mxu1 %v6253_v60 }
  0x31   :  { %808 = vmatprep.subr.bf16.mxu0 %v6260_v61  ;;  %849 = vmatprep.subr.bf16.mxu1 %v6265_v62 }
  0x34   :  { %809 = vmatpush1.bf16.msra.mxu0 %v6275_v37  ;;  %850 = vmatpush1.bf16.msra.mxu1 %v6280_v39 }
  0x35   :  { %810 = vmatprep.subr.bf16.mxu0 %v6287_v43  ;;  %851 = vmatprep.subr.bf16.mxu1 %v6292_v44  ;;  %v6329_v44 = vld [vmem:[%s8331_s5 + $0xc0] ss:$16 sps:$4 sm:$0xff]   ;;  %v6334_v43 = vld [vmem:[%s8331_s5 + $0xc8] ss:$16 sps:$4 sm:$0xff]  }
  0x36   :  { %8368 = vst [vmem:[#allocation14_spill] sm:$0xff] %v6329_v44  ;;  %8369 = vst [vmem:[#allocation15_spill] sm:$0xff] %v6334_v43 }
  0x38   :  { %811 = vmatpush1.bf16.msra.mxu0 %v6302_v51  ;;  %852 = vmatpush1.bf16.msra.mxu1 %v6307_v54  ;;  %v1567_v54 = vsub.f32 1.0, %v1341_v2  ;;  %v1615_v51 = vld [vmem:[%s8328_s2 + $0xa] sm:$0x1] }
  0x39   :  { %812 = vmatprep.subr.bf16.mxu0 %v6314_v57  ;;  %853 = vmatprep.subr.bf16.mxu1 %v6319_v58  ;;  %v6356_v58 = vld [vmem:[%s8331_s5 + $0xe0] ss:$16 sps:$4 sm:$0xff]   ;;  %v6361_v57 = vld [vmem:[%s8331_s5 + $0xe8] ss:$16 sps:$4 sm:$0xff]   ;;  %v1841_v63 = vsub.f32 1.0, %v1615_v51 }
  0x3a   :  { %1571 = vperm.xlu1 %5102, %v1567_v54   ;;  %1835 = vperm.xlu0 %5101, %v1615_v51   ;;  %v1888_v54 = vld [vmem:[%s8329_s3 + $0xd] sm:$0x1]  ;;  %v3799_v51 = vld [vmem:[%s8328_s2 + $0xe] sm:$0x1] }
  0x3c   :  { %813 = vmatpush1.bf16.msra.mxu0 %v6329_v44  ;;  %854 = vmatpush1.bf16.msra.mxu1 %v6334_v43  ;;  %v639_v43 = vpack.c.bf16 %v6363_v50, %v6363_v50  ;;  %v1614_v44 = vld [vmem:[%s8328_s2 + $0x2] sm:$0x1] }
  0x3d   :  { %814 = vmatprep.subr.bf16.mxu0 %v6341_v3  ;;  %855 = vmatprep.subr.bf16.mxu1 %v6346_v45  ;;  %v1840_v2 = vsub.f32 1.0, %v1614_v44 }
  0x3e   :  { %1849 = vperm.xlu1 %5102, %v1841_v63   ;;  %1830 = vperm.xlu0 %5101, %v1614_v44   ;;  %v4025_v63 = vsub.f32 1.0, %v3799_v51 }
  0x40   :  { %815 = vmatpush1.bf16.msra.mxu0 %v6356_v58  ;;  %856 = vmatpush1.bf16.msra.mxu1 %v6361_v57 }
  0x41   :  { %1073 = vmatprep.subr.bf16.mxu0 %v5949_v0  ;;  %1114 = vmatprep.subr.bf16.mxu1 %v5954_v1  ;;  %v2114_v0 = vsub.f32 1.0, %v1888_v54  ;;  %v1887_v1 = vld [vmem:[%s8329_s3 + $0x5] sm:$0x1] }
  0x42   :  { %1844 = vperm.xlu1 %5102, %v1840_v2   ;;  %2108 = vperm.xlu0 %5101, %v1888_v54   ;;  %v3798_v2 = vld [vmem:[%s8328_s2 + $0x6] sm:$0x1] }
  0x43   :  { %833 = vmatmul.mubr.bf16.vlgmr.msra.gmra.mrb[4].mxu0 %v639_v43  ;;  %874 = vmatmul.mubr.bf16.vlgmr.msra.gmra.mrb[4].mxu1 %v639_v43  ;;  %v8370_v43 = vmov 0   ;;  %v4024_v54 = vsub.f32 1.0, %v3798_v2 }
  0x44   :  { %1074 = vmatpush1.bf16.msra.mxu0 %v5962_v4  ;;  %1115 = vmatpush1.bf16.msra.mxu1 %v5967_v5  ;;  %v2113_v4 = vsub.f32 1.0, %v1887_v1  ;;  %v2161_v5 = vld [vmem:[%s8328_s2 + $0xb] sm:$0x1] }
  0x45   :  { %1075 = vmatprep.subr.bf16.mxu0 %v5974_v6  ;;  %1116 = vmatprep.subr.bf16.mxu1 %v5982_v7  ;;  %v2387_v6 = vsub.f32 1.0, %v2161_v5  ;;  %v2160_v7 = vld [vmem:[%s8328_s2 + $0x3] sm:$0x1] }
  0x46   :  { %1105 = vmatprep.mubr.bf16.mxu0 %v8370_v43  ;;  %1146 = vmatprep.mubr.bf16.mxu1 %v8370_v43 }
  0x47   :  { %2122 = vperm.xlu1 %5102, %v2114_v0   ;;  %2103 = vperm.xlu0 %5101, %v1887_v1   ;;  %v4072_v0 = vld [vmem:[%s8329_s3 + $0x9] sm:$0x1] }
  0x48   :  { %1076 = vmatpush1.bf16.msra.mxu0 %v5987_v8  ;;  %1117 = vmatpush1.bf16.msra.mxu1 %v5993_v9  ;;  %v2386_v8 = vsub.f32 1.0, %v2160_v7  ;;  %v2434_v9 = vld [vmem:[%s8329_s3 + $0xc] sm:$0x1]  ;;  %v4298_v1 = vsub.f32 1.0, %v4072_v0 }
  0x49   :  { %1077 = vmatprep.subr.bf16.mxu0 %v5999_v10  ;;  %1118 = vmatprep.subr.bf16.mxu1 %v6004_v11  ;;  %v2660_v10 = vsub.f32 1.0, %v2434_v9  ;;  %v2433_v11 = vld [vmem:[%s8329_s3 + $0x4] sm:$0x1] }
  0x4b   :  { %2117 = vperm.xlu1 %5102, %v2113_v4   ;;  %2381 = vperm.xlu0 %5101, %v2161_v5   ;;  %v4071_v4 = vld [vmem:[%s8329_s3 + $0x1] sm:$0x1] }
  0x4c   :  { %1078 = vmatpush1.bf16.msra.mxu0 %v6009_v12  ;;  %1119 = vmatpush1.bf16.msra.mxu1 %v6014_v13  ;;  %v2659_v12 = vsub.f32 1.0, %v2433_v11  ;;  %v2707_v13 = vld [vmem:[%s8328_s2 + $0xc] sm:$0x1]  ;;  %v4297_v5 = vsub.f32 1.0, %v4071_v4 }
  0x4d   :  { %1079 = vmatprep.subr.bf16.mxu0 %v6021_v14  ;;  %1120 = vmatprep.subr.bf16.mxu1 %v6028_v15  ;;  %v2933_v14 = vsub.f32 1.0, %v2707_v13  ;;  %v2706_v15 = vld [vmem:[%s8328_s2 + $0x4] sm:$0x1] }
  0x4f   :  { %2395 = vperm.xlu1 %5102, %v2387_v6   ;;  %2376 = vperm.xlu0 %5101, %v2160_v7   ;;  %v4345_v6 = vld [vmem:[%s8328_s2 + $0xf] sm:$0x1] }
  0x50   :  { %1080 = vmatpush1.bf16.msra.mxu0 %v6033_v16  ;;  %1121 = vmatpush1.bf16.msra.mxu1 %v6040_v17  ;;  %v2932_v16 = vsub.f32 1.0, %v2706_v15  ;;  %v2980_v17 = vld [vmem:[%s8329_s3 + $0xb] sm:$0x1]  ;;  %v4571_v7 = vsub.f32 1.0, %v4345_v6 }
  0x51   :  { %1081 = vmatprep.subr.bf16.mxu0 %v6045_v18  ;;  %1122 = vmatprep.subr.bf16.mxu1 %v6052_v19  ;;  %v3206_v18 = vsub.f32 1.0, %v2980_v17  ;;  %v2979_v19 = vld [vmem:[%s8329_s3 + $0x3] sm:$0x1] }
  0x53   :  { %2390 = vperm.xlu1 %5102, %v2386_v8   ;;  %2654 = vperm.xlu0 %5101, %v2434_v9   ;;  %v4617_v8 = vld [vmem:[%s8329_s3 + $0x8] sm:$0x1] }
  0x54   :  { %1082 = vmatpush1.bf16.msra.mxu0 %v6057_v20  ;;  %1123 = vmatpush1.bf16.msra.mxu1 %v6062_v21  ;;  %v3205_v20 = vsub.f32 1.0, %v2979_v19  ;;  %v3253_v21 = vld [vmem:[%s8328_s2 + $0xd] sm:$0x1]  ;;  %v4843_v9 = vsub.f32 1.0, %v4617_v8 }
  0x55   :  { %1083 = vmatprep.subr.bf16.mxu0 %v6069_v22  ;;  %1124 = vmatprep.subr.bf16.mxu1 %v6076_v23  ;;  %v3479_v22 = vsub.f32 1.0, %v3253_v21  ;;  %v3252_v23 = vld [vmem:[%s8328_s2 + $0x5] sm:$0x1] }
  0x57   :  { %2668 = vperm.xlu1 %5102, %v2660_v10   ;;  %2649 = vperm.xlu0 %5101, %v2433_v11   ;;  %v4344_v10 = vld [vmem:[%s8328_s2 + $0x7] sm:$0x1] }
  0x58   :  { %1084 = vmatpush1.bf16.msra.mxu0 %v6083_v24  ;;  %1125 = vmatpush1.bf16.msra.mxu1 %v6088_v25  ;;  %v3478_v24 = vsub.f32 1.0, %v3252_v23  ;;  %v3526_v25 = vld [vmem:[%s8329_s3 + $0xa] sm:$0x1]  ;;  %v4570_v11 = vsub.f32 1.0, %v4344_v10 }
  0x59   :  { %1085 = vmatprep.subr.bf16.mxu0 %v6095_v26  ;;  %1126 = vmatprep.subr.bf16.mxu1 %v6100_v27  ;;  %v3752_v26 = vsub.f32 1.0, %v3526_v25  ;;  %v3525_v27 = vld [vmem:[%s8329_s3 + $0x2] sm:$0x1] }
  0x5a   :  { %v3751_v44 = vsub.f32 1.0, %v3525_v27 }
  0x5b   :  { %2663 = vperm.xlu1 %5102, %v2659_v12   ;;  %2927 = vperm.xlu0 %5101, %v2707_v13   ;;  %v4616_v12 = vld [vmem:[%s8329_s3] sm:$0x1] }
  0x5c   :  { %1086 = vmatpush1.bf16.msra.mxu0 %v6105_v28  ;;  %1127 = vmatpush1.bf16.msra.mxu1 %v6110_v29  ;;  %v27_v28 = vld [vmem:[%s8326_s0] sm:$0xff]  ;;  %v29_v29 = vld [vmem:[%s8326_s0 + $0x8] sm:$0xff]  ;;  %v4842_v13 = vsub.f32 1.0, %v4616_v12 }
  0x5d   :  { %1087 = vmatprep.subr.bf16.mxu0 %v6117_v30  ;;  %1128 = vmatprep.subr.bf16.mxu1 %v6124_v31  ;;  %v31_v30 = vld [vmem:[%s8326_s0 + $0x10] sm:$0xff]  ;;  %28 = vst [vmem:[#allocation6] sm:$0xff] %v27_v28  ;;  %30 = vst [vmem:[#allocation6 + $0x8] sm:$0xff] %v29_v29  ;;  %v33_v31 = vld [vmem:[%s8326_s0 + $0x18] sm:$0xff] }
  0x5e   :  { %32 = vst [vmem:[#allocation6 + $0x10] sm:$0xff] %v31_v30  ;;  %34 = vst [vmem:[#allocation6 + $0x18] sm:$0xff] %v33_v31 }
  0x5f   :  { %2941 = vperm.xlu1 %5102, %v2933_v14   ;;  %2922 = vperm.xlu0 %5101, %v2706_v15   ;;  %v4930_v14 = vld [vmem:[%s8327_s1 + $0x20] sm:$0xff]  ;;  %v4931_v15 = vld [vmem:[%s8327_s1 + $0x28] sm:$0xff] }
  0x60   :  { %1088 = vmatpush1.bf16.msra.mxu0 %v6129_v32  ;;  %1129 = vmatpush1.bf16.msra.mxu1 %v6134_v33  ;;  %v35_v32 = vld [vmem:[%s8326_s0 + $0x40] sm:$0xff]  ;;  %v37_v33 = vld [vmem:[%s8326_s0 + $0x48] sm:$0xff]  ;;  %66 = vst [vmem:[#allocation7] sm:$0xff] %v4930_v14  ;;  %68 = vst [vmem:[#allocation7 + $0x8] sm:$0xff] %v4931_v15 }
  0x61   :  { %1346 = vmatprep.subr.bf16.mxu0 %v6145_v35  ;;  %1387 = vmatprep.subr.bf16.mxu1 %v6150_v36  ;;  %36 = vst [vmem:[#allocation6 + $0x20] sm:$0xff] %v35_v32  ;;  %38 = vst [vmem:[#allocation6 + $0x28] sm:$0xff] %v37_v33  ;;  %v39_v35 = vld [vmem:[%s8326_s0 + $0x50] sm:$0xff]  ;;  %v41_v36 = vld [vmem:[%s8326_s0 + $0x58] sm:$0xff] }
  0x62   :  { %40 = vst [vmem:[#allocation6 + $0x30] sm:$0xff] %v39_v35  ;;  %42 = vst [vmem:[#allocation6 + $0x38] sm:$0xff] %v41_v36 }
  0x63   :  { %2936 = vperm.xlu1 %5102, %v2932_v16   ;;  %3200 = vperm.xlu0 %5101, %v2980_v17   ;;  %v4932_v16 = vld [vmem:[%s8327_s1 + $0x30] sm:$0xff]  ;;  %v4933_v17 = vld [vmem:[%s8327_s1 + $0x38] sm:$0xff] }
  0x64   :  { %70 = vst [vmem:[#allocation7 + $0x10] sm:$0xff] %v4932_v16  ;;  %72 = vst [vmem:[#allocation7 + $0x18] sm:$0xff] %v4933_v17 }
  0x67   :  { %3214 = vperm.xlu1 %5102, %v3206_v18   ;;  %3195 = vperm.xlu0 %5101, %v2979_v19   ;;  %v4934_v18 = vld [vmem:[%s8327_s1 + $0x60] sm:$0xff]  ;;  %v4935_v19 = vld [vmem:[%s8327_s1 + $0x68] sm:$0xff] }
  0x68   :  { %74 = vst [vmem:[#allocation7 + $0x20] sm:$0xff] %v4934_v18  ;;  %76 = vst [vmem:[#allocation7 + $0x28] sm:$0xff] %v4935_v19 }
  0x6b   :  { %3209 = vperm.xlu1 %5102, %v3205_v20   ;;  %3473 = vperm.xlu0 %5101, %v3253_v21   ;;  %v4936_v20 = vld [vmem:[%s8327_s1 + $0x70] sm:$0xff]  ;;  %v4937_v21 = vld [vmem:[%s8327_s1 + $0x78] sm:$0xff] }
  0x6c   :  { %78 = vst [vmem:[#allocation7 + $0x30] sm:$0xff] %v4936_v20  ;;  %80 = vst [vmem:[#allocation7 + $0x38] sm:$0xff] %v4937_v21 }
  0x6f   :  { %3487 = vperm.xlu1 %5102, %v3479_v22   ;;  %3468 = vperm.xlu0 %5101, %v3252_v23   ;;  %v5905_v22 = vmov 1966171168  }
  0x70   :  { %v455_v23 = vunpack.c.l.s4 %v5905_v22 }
  0x73   :  { %3482 = vperm.xlu1 %5102, %v3478_v24   ;;  %3746 = vperm.xlu0 %5101, %v3526_v25   ;;  %v457_v24 = vlaneseq  ;;  %v456_v25 = vunpack.c.0.s8 %v455_v23 }
  0x77   :  { %3760 = vperm.xlu1 %5102, %v3752_v26   ;;  %3741 = vperm.xlu0 %5101, %v3525_v27   ;;  %v458_v26 = vshrl.u32 %v457_v24, 7 }
  0x79   :  { %v6524_v29 = vsub.s32 %v456_v25, %v458_v26  ;;  %v204_v25 = vld [vmem:[#allocation3] sm:$0x3] }
  0x7b   :  { %3755 = vperm.xlu1 %5102, %v3751_v44   ;;  %4019 = vperm.xlu0 %5101, %v3799_v51  }
  0x7f   :  { %4033 = vperm.xlu1 %5102, %v4025_v63   ;;  %4014 = vperm.xlu0 %5101, %v3798_v2  }
  0x83   :  { %4028 = vperm.xlu1 %5102, %v4024_v54   ;;  %4292 = vperm.xlu0 %5101, %v4072_v0  }
  0x87   :  { %4306 = vperm.xlu1 %5102, %v4298_v1   ;;  %4287 = vperm.xlu0 %5101, %v4071_v4   ;;  %v198_v1 = vld [vmem:[#allocation6] ss:$8 sm:$0xf] }
  0x88   :  { %v200_v4 = vld [vmem:[#allocation6 + $0x20] ss:$8 sm:$0xf] }
  0x8b   :  { %4301 = vperm.xlu1 %5102, %v4297_v5   ;;  %4565 = vperm.xlu0 %5101, %v4345_v6  }
  0x8f   :  { %4579 = vperm.xlu1 %5102, %v4571_v7   ;;  %4837 = vperm.xlu0 %5101, %v4617_v8  }
  0x93   :  { %4851 = vperm.xlu1 %5102, %v4843_v9   ;;  %4560 = vperm.xlu0 %5101, %v4344_v10  }
  0x97   :  { %4574 = vperm.xlu1 %5102, %v4570_v11   ;;  %4832 = vperm.xlu0 %5101, %v4616_v12  }
  0x9b   :  { %4846 = vperm.xlu1 %5102, %v4842_v13  }
  0xf6   :  { %v400_v27 = vpop.f32.mrb[0].mxu0  ;;  %v441_v28 = vpop.f32.mrb[0].mxu1 }
  0xf7   :  { %v402_v30 = vpop.f32.mrb[1].mxu0  ;;  %v443_v31 = vpop.f32.mrb[1].mxu1 }
  0xf8   :  { %v452_v32 = vcombine.low %v400_v27, %v402_v30  ;;  %v453_v33 = vcombine.low %v441_v28, %v443_v31  ;;  %v404_v35 = vpop.f32.mrb[2].mxu0  ;;  %v445_v36 = vpop.f32.mrb[2].mxu1  ;;  %v547_v31 = vrot.slane %v204_v25, %v6524_v29 }
  0xf9   :  { %v405_v44 = vpop.f32.mrb[3].mxu0  ;;  %v446_v51 = vpop.f32.mrb[3].mxu1 }
  0xfa   :  { %v460_v63 = vrot.slane %v452_v32, %v6524_v29  ;;  %v467_v2 = vrot.slane %v453_v33, %v6524_v29  ;;  %v548_v36 = vcombine.high %v547_v31, %v547_v31 }
  0xfc   :  { %v468_v54 = vcombine.low %v460_v63, %v467_v2  ;;  %v469_v0 = vcombine.high %v460_v63, %v467_v2 }
  0xfe   :  { %v476_v5 = vrot.slane %v468_v54, %v6524_v29  ;;  %v483_v6 = vrot.slane %v469_v0, %v6524_v29 }
 0x100   :  { %v486_v7 = vadd.f32 %v476_v5, %v198_v1  ;;  %v487_v8 = vadd.f32 %v483_v6, %v200_v4 }
 0x102   :  { %v4970_v9 = vmul.f32 -1.442695, %v486_v7  ;;  %v4971_v10 = vmul.f32 -1.442695, %v487_v8  ;;  %v502_v11 = vrot.slane %v486_v7, 1  ;;  %v503_v12 = vrot.slane %v487_v8, 1 }
 0x103   :  { %v524_v15 = vrot.slane %v486_v7, 3  ;;  %v525_v16 = vrot.slane %v487_v8, 3  ;;  %v518_v17 = vrot.slane %v486_v7, 2  ;;  %v519_v18 = vrot.slane %v487_v8, 2  ;;  %v6531_v8 = vpop.permute.xlu0 %582 }
 0x104   :  { %5199 = vpow2.f32 %v4970_v9  ;;  %v4972_v13 = vmul.f32 -1.442695, %v502_v11  ;;  %v4973_v14 = vmul.f32 -1.442695, %v503_v12  ;;  %v6533_v9 = vpop.permute.xlu1 %577 }
 0x105   :  { %5201 = vpow2.f32 %v4971_v10  ;;  %v4974_v19 = vmul.f32 -1.442695, %v524_v15  ;;  %v4975_v20 = vmul.f32 -1.442695, %v525_v16  ;;  %v555_v10 = vrot.slane %v547_v31, %v6524_v29 }
 0x106   :  { %5203 = vpow2.f32 %v4972_v13 }
 0x107   :  { %5205 = vpow2.f32 %v4973_v14  ;;  %v562_v14 = vrot.slane %v548_v36, %v6524_v29 }
 0x108   :  { %5207 = vtanh.f32 %v518_v17  ;;  %v632_v17 = vld [vmem:[#allocation7 + $0x7] ss:$8 sm:$0xf]  ;;  %v592_v36 = vpop.permute.xlu1 %591 }
 0x109   :  { %5209 = vtanh.f32 %v519_v18 }
 0x10a   :  { %5211 = vpow2.f32 %v4974_v19 }
 0x10b   :  { %5213 = vpow2.f32 %v4975_v20 }
 0x10e   :  { %v5200_v21 = vpop.eup %5199 }
 0x10f   :  { %v5202_v22 = vpop.eup %5201  ;;  %v494_v23 = vadd.f32 1.0, %v5200_v21  ;;  %v599_v21 = vrot.slane %v204_v25, 1 }
 0x110   :  { %v5204_v24 = vpop.eup %5203  ;;  %v495_v26 = vadd.f32 1.0, %v5202_v22 }
 0x111   :  { %v5206_v27 = vpop.eup %5205  ;;  %5215 = vrcp.f32 %v494_v23  ;;  %v512_v28 = vadd.f32 1.0, %v5204_v24  ;;  %v634_v23 = vld [vmem:[#allocation7 + $0x27] ss:$8 sm:$0xf] }
 0x112   :  { %5217 = vrcp.f32 %v495_v26  ;;  %v513_v30 = vadd.f32 1.0, %v5206_v27  ;;  %v5208_v35 = vpop.eup %5207 }
 0x113   :  { %5219 = vrcp.f32 %v512_v28  ;;  %v5210_v63 = vpop.eup %5209 }
 0x114   :  { %5221 = vrcp.f32 %v513_v30  ;;  %v5212_v4 = vpop.eup %5211 }
 0x115   :  { %v5214_v7 = vpop.eup %5213  ;;  %v534_v16 = vadd.f32 1.0, %v5212_v4 }
 0x116   :  { %v834_v32 = vpop.f32.mrb[4].mxu0  ;;  %v875_v33 = vpop.f32.mrb[4].mxu1  ;;  %v535_v22 = vadd.f32 1.0, %v5214_v7 }
 0x117   :  { %v836_v44 = vpop.f32.mrb[5].mxu0  ;;  %v877_v51 = vpop.f32.mrb[5].mxu1  ;;  %5223 = vrcp.f32 %v534_v16 }
 0x118   :  { %v886_v2 = vcombine.low %v834_v32, %v836_v44  ;;  %v887_v54 = vcombine.low %v875_v33, %v877_v51  ;;  %v838_v0 = vpop.f32.mrb[6].mxu0  ;;  %v879_v1 = vpop.f32.mrb[6].mxu1  ;;  %5225 = vrcp.f32 %v535_v22 }
 0x119   :  { %v839_v5 = vpop.f32.mrb[7].mxu0  ;;  %v880_v6 = vpop.f32.mrb[7].mxu1  ;;  %v602_v0 = vmul.f32 %v592_v36, %v204_v25 }
 0x11a   :  { %v894_v11 = vrot.slane %v886_v2, %v6524_v29  ;;  %v901_v12 = vrot.slane %v887_v54, %v6524_v29  ;;  %v597_v33 = vpop.permute.xlu0 %596 }
 0x11b   :  { %v5216_v13 = vpop.eup %5215  ;;  %v603_v54 = vmul.f32 %v599_v21, %v597_v33 }
 0x11c   :  { %v5218_v15 = vpop.eup %5217  ;;  %v902_v18 = vcombine.low %v894_v11, %v901_v12  ;;  %v903_v19 = vcombine.high %v894_v11, %v901_v12  ;;  %v567_v27 = vmul.f32 %v5216_v13, %v5208_v35 }
 0x11d   :  { %v5220_v20 = vpop.eup %5219  ;;  %v568_v32 = vmul.f32 %v5218_v15, %v5210_v63 }
 0x11e   :  { %v5222_v24 = vpop.eup %5221  ;;  %v565_v26 = vmul.f32 %v5220_v20, %v555_v10  ;;  %v910_v28 = vrot.slane %v902_v18, %v6524_v29  ;;  %v917_v30 = vrot.slane %v903_v19, %v6524_v29  ;;  %v616_v20 = vrot.slane %v6138_v34, 1 }
 0x11f   :  { %v566_v31 = vmul.f32 %v5222_v24, %v562_v14 }
 0x120   :  { %v569_v44 = vadd.f32 %v567_v27, %v565_v26  ;;  %v920_v51 = vadd.f32 %v910_v28, %v632_v17  ;;  %v921_v2 = vadd.f32 %v917_v30, %v634_v23 }
 0x121   :  { %v570_v1 = vadd.f32 %v568_v32, %v566_v31  ;;  %v5224_v17 = vpop.eup %5223  ;;  %v620_v32 = vmul.f32 %v616_v20, %v597_v33  ;;  %v638_v33 = vld [vmem:[#allocation5] sm:$0x3] }
 0x122   :  { %5227 = vtanh.f32 %v569_v44  ;;  %v585_v4 = vmul.f32 %v6533_v9, %v569_v44  ;;  %v5008_v35 = vmul.f32 -1.442695, %v920_v51  ;;  %v5009_v5 = vmul.f32 -1.442695, %v921_v2  ;;  %v5226_v19 = vpop.eup %5225 }
 0x123   :  { %5229 = vtanh.f32 %v570_v1  ;;  %v586_v6 = vmul.f32 %v6531_v8, %v570_v1  ;;  %v936_v7 = vrot.slane %v920_v51, 1  ;;  %v937_v63 = vrot.slane %v921_v2, 1 }
 0x124   :  { %5231 = vpow2.f32 %v5008_v35  ;;  %v604_v13 = vadd.f32 %v602_v0, %v585_v4  ;;  %v958_v14 = vrot.slane %v920_v51, 3  ;;  %v959_v16 = vrot.slane %v921_v2, 3 }
 0x125   :  { %v605_v10 = vadd.f32 %v603_v54, %v586_v6  ;;  %5233 = vpow2.f32 %v5009_v5  ;;  %v5010_v11 = vmul.f32 -1.442695, %v936_v7  ;;  %v5011_v12 = vmul.f32 -1.442695, %v937_v63 }
 0x126   :  { %v952_v18 = vrot.slane %v920_v51, 2  ;;  %v953_v21 = vrot.slane %v921_v2, 2  ;;  %v5012_v23 = vmul.f32 -1.442695, %v958_v14  ;;  %v5013_v27 = vmul.f32 -1.442695, %v959_v16  ;;  %v1017_v16 = vpop.permute.xlu0 %1016 }
 0x127   :  { %v608_v25 = vrot.slane %v605_v10, 7  ;;  %5235 = vpow2.f32 %v5010_v11  ;;  %v619_v51 = vmul.f32 %v592_v36, %v6138_v34  ;;  %v981_v5 = vrot.slane %v638_v33, %v6524_v29 }
 0x128   :  { %5237 = vpow2.f32 %v5011_v12 }
 0x129   :  { %v610_v15 = vsel %vm609_vm0, %v608_v25, %v604_v13  ;;  %5239 = vtanh.f32 %v952_v18  ;;  %v982_v63 = vcombine.high %v981_v5, %v981_v5  ;;  %v989_v13 = vrot.slane %v981_v5, %v6524_v29  ;;  %v8378_v5 = vld [vmem:[#allocation15_spill] sm:$0xff] }
 0x12a   :  { %612 = vst [vmem:[#allocation3] sm:$0x3] %v610_v15  ;;  %5241 = vtanh.f32 %v953_v21 }
 0x12b   :  { %5243 = vpow2.f32 %v5012_v23  ;;  %v996_v14 = vrot.slane %v982_v63, %v6524_v29  ;;  %v6615_v63 = vld [vmem:[%s8330_s4 + $0xc] ss:$16 sps:$4 sm:$0xff]  }
 0x12c   :  { %v5228_v22 = vpop.eup %5227  ;;  %5245 = vpow2.f32 %v5013_v27  ;;  %v1033_v27 = vrot.slane %v638_v33, 1 }
 0x12d   :  { %v5230_v24 = vpop.eup %5229  ;;  %v573_v26 = vmul.f32 %v5228_v22, %v5224_v17  ;;  %v1031_v22 = vpop.permute.xlu1 %1030 }
 0x12e   :  { %v5232_v28 = vpop.eup %5231  ;;  %v574_v30 = vmul.f32 %v5230_v24, %v5226_v19 }
 0x12f   :  { %v5234_v31 = vpop.eup %5233  ;;  %v613_v44 = vmul.f32 %v6533_v9, %v573_v26  ;;  %v928_v54 = vadd.f32 1.0, %v5232_v28 }
 0x130   :  { %v614_v0 = vmul.f32 %v6531_v8, %v574_v30  ;;  %v929_v1 = vadd.f32 1.0, %v5234_v31 }
 0x131   :  { %v5236_v2 = vpop.eup %5235  ;;  %629 = vst [vmem:[%s8332_s6] sm:$0x1] %v613_v44  ;;  %5247 = vrcp.f32 %v928_v54  ;;  %v621_v8 = vadd.f32 %v619_v51, %v613_v44  ;;  %v1012_v44 = vpop.permute.xlu0 %1011  ;;  %v1037_v54 = vmul.f32 %v1033_v27, %v1031_v22  ;;  %v6739_v27 = vld [vmem:[%s8330_s4 + $0xac] ss:$16 sps:$4 sm:$0xff]  }
 0x132   :  { %v5238_v4 = vpop.eup %5237  ;;  %v622_v35 = vadd.f32 %v620_v32, %v614_v0  ;;  %630 = vst [vmem:[%s8332_s6 + $0x8] sm:$0x1] %v614_v0  ;;  %v946_v9 = vadd.f32 1.0, %v5236_v2  ;;  %5249 = vrcp.f32 %v929_v1  ;;  %v1026_v1 = vpop.permute.xlu1 %1025 }
 0x133   :  { %v947_v34 = vadd.f32 1.0, %v5238_v4  ;;  %v5240_v7 = vpop.eup %5239  ;;  %v1036_v2 = vmul.f32 %v1026_v1, %v638_v33 }
 0x134   :  { %v625_v36 = vrot.slane %v622_v35, 7  ;;  %5251 = vrcp.f32 %v946_v9  ;;  %v5242_v10 = vpop.eup %5241 }
 0x135   :  { %5253 = vrcp.f32 %v947_v34  ;;  %v5244_v11 = vpop.eup %5243  ;;  %v8373_v34 = vld [vmem:[#allocation10_spill] sm:$0xff] }
 0x136   :  { %v626_v6 = vsel %vm609_vm0, %v625_v36, %v621_v8  ;;  %v5246_v12 = vpop.eup %5245  ;;  %v968_v17 = vadd.f32 1.0, %v5244_v11  ;;  %v8374_v8 = vld [vmem:[#allocation11_spill] sm:$0xff]  ;;  %v8377_v36 = vld [vmem:[#allocation14_spill] sm:$0xff] }
 0x137   :  { %628 = vst [vmem:[#allocation2] sm:$0x3] %v626_v6  ;;  %v969_v19 = vadd.f32 1.0, %v5246_v12  ;;  %v6649_v11 = vld [vmem:[%s8330_s4 + $0x20] ss:$16 sps:$4 sm:$0xff]  }
 0x138   :  { %5255 = vrcp.f32 %v968_v17  ;;  %v6655_v12 = vld [vmem:[%s8330_s4 + $0x28] ss:$16 sps:$4 sm:$0xff]   ;;  %v6691_v17 = vld [vmem:[%s8330_s4 + $0x6c] ss:$16 sps:$4 sm:$0xff]  }
 0x139   :  { %5257 = vrcp.f32 %v969_v19  ;;  %v6703_v19 = vld [vmem:[%s8330_s4 + $0x68] ss:$16 sps:$4 sm:$0xff]  }
 0x13b   :  { %v5248_v25 = vpop.eup %5247 }
 0x13c   :  { %v5250_v15 = vpop.eup %5249  ;;  %v1001_v24 = vmul.f32 %v5248_v25, %v5240_v7  ;;  %v6609_v7 = vld [vmem:[%s8330_s4 + $0x4] ss:$16 sps:$4 sm:$0xff]   ;;  %v6667_v25 = vld [vmem:[%s8330_s4 + $0x4c] ss:$16 sps:$4 sm:$0xff]  }
 0x13d   :  { %v1002_v30 = vmul.f32 %v5250_v15, %v5242_v10  ;;  %v6641_v10 = vld [vmem:[%s8330_s4 + $0x2c] ss:$16 sps:$4 sm:$0xff]   ;;  %v6679_v15 = vld [vmem:[%s8330_s4 + $0x48] ss:$16 sps:$4 sm:$0xff]  }
 0x13e   :  { %v5252_v18 = vpop.eup %5251  ;;  %v6558_v20 = vld [vmem:[#allocation2] sm:$0x3] }
 0x13f   :  { %v5254_v21 = vpop.eup %5253  ;;  %v999_v23 = vmul.f32 %v5252_v18, %v989_v13  ;;  %v1072_v26 = vpack.c.bf16 %v6558_v20, %v6558_v20  ;;  %v6661_v13 = vld [vmem:[%s8330_s4 + $0x44] ss:$16 sps:$4 sm:$0xff]   ;;  %v6697_v18 = vld [vmem:[%s8330_s4 + $0x60] ss:$16 sps:$4 sm:$0xff]  }
 0x140   :  { %v1000_v28 = vmul.f32 %v5254_v21, %v996_v14  ;;  %v6673_v14 = vld [vmem:[%s8330_s4 + $0x40] ss:$16 sps:$4 sm:$0xff]   ;;  %v6709_v21 = vld [vmem:[%s8330_s4 + $0x84] ss:$16 sps:$4 sm:$0xff]  }
 0x141   :  { %v1003_v31 = vadd.f32 %v1001_v24, %v999_v23  ;;  %1106 = vmatmul.mubr.bf16.vlgmr.msra.gmra.mrb[8].mxu0 %v1072_v26  ;;  %1147 = vmatmul.mubr.bf16.vlgmr.msra.gmra.mrb[8].mxu1 %v1072_v26  ;;  %v6721_v23 = vld [vmem:[%s8330_s4 + $0x80] ss:$16 sps:$4 sm:$0xff]   ;;  %v6727_v24 = vld [vmem:[%s8330_s4 + $0x88] ss:$16 sps:$4 sm:$0xff]   ;;  %v6733_v26 = vld [vmem:[%s8330_s4 + $0xa4] ss:$16 sps:$4 sm:$0xff]  }
 0x142   :  { %v1004_v32 = vadd.f32 %v1002_v30, %v1000_v28  ;;  %1347 = vmatpush1.bf16.msra.mxu0 %v6157_v38  ;;  %1388 = vmatpush1.bf16.msra.mxu1 %v6167_v40  ;;  %v6745_v28 = vld [vmem:[%s8330_s4 + $0xa0] ss:$16 sps:$4 sm:$0xff]   ;;  %v6751_v30 = vld [vmem:[%s8330_s4 + $0xa8] ss:$16 sps:$4 sm:$0xff]  }
 0x143   :  { %5259 = vtanh.f32 %v1003_v31  ;;  %1348 = vmatprep.subr.bf16.mxu0 %v6172_v41  ;;  %1389 = vmatprep.subr.bf16.mxu1 %v6179_v42  ;;  %v1019_v51 = vmul.f32 %v1012_v44, %v1003_v31  ;;  %v5256_v42 = vpop.eup %5255  ;;  %v6757_v31 = vld [vmem:[%s8330_s4 + $0xc4] ss:$16 sps:$4 sm:$0xff]  }
 0x144   :  { %5261 = vtanh.f32 %v1004_v32  ;;  %v1020_v0 = vmul.f32 %v1017_v16, %v1004_v32  ;;  %1378 = vmatprep.mubr.bf16.mxu0 %v8370_v43  ;;  %1419 = vmatprep.mubr.bf16.mxu1 %v8370_v43  ;;  %v6763_v32 = vld [vmem:[%s8330_s4 + $0xcc] ss:$16 sps:$4 sm:$0xff]  }
 0x145   :  { %v1038_v38 = vadd.f32 %v1036_v2, %v1019_v51  ;;  %v6781_v51 = vld [vmem:[%s8330_s4 + $0xe4] ss:$16 sps:$4 sm:$0xff]   ;;  %v6799_v2 = vld [vmem:[%s8330_s4 + $0xe8] ss:$16 sps:$4 sm:$0xff]  }
 0x146   :  { %v1039_v4 = vadd.f32 %v1037_v54, %v1020_v0  ;;  %1349 = vmatpush1.bf16.msra.mxu0 %v6187_v46  ;;  %1390 = vmatpush1.bf16.msra.mxu1 %v6192_v47  ;;  %v5258_v46 = vpop.eup %5257  ;;  %v6775_v54 = vld [vmem:[%s8330_s4 + $0xc8] ss:$16 sps:$4 sm:$0xff]   ;;  %v6787_v0 = vld [vmem:[%s8330_s4 + $0xec] ss:$16 sps:$4 sm:$0xff]   ;;  %8381 = vst [vmem:[#allocation10_spill] sm:$0xff] %v6799_v2 }
 0x147   :  { %1350 = vmatprep.subr.bf16.mxu0 %v6199_v48  ;;  %1391 = vmatprep.subr.bf16.mxu1 %v6206_v49  ;;  %v1049_v48 = vrot.slane %v6363_v50, 1 }
 0x148   :  { %v1042_v40 = vrot.slane %v1039_v4, 7  ;;  %v6805_v4 = vld [vmem:[%s8331_s5 + $0x4] ss:$16 sps:$4 sm:$0xff]  }
 0x149   :  { %8382 = vst [vmem:[#allocation11_spill] sm:$0xff] %v6805_v4 }
 0x14a   :  { %v1043_v41 = vsel %vm609_vm0, %v1042_v40, %v1038_v38  ;;  %1351 = vmatpush1.bf16.msra.mxu0 %v6214_v52  ;;  %1392 = vmatpush1.bf16.msra.mxu1 %v6223_v53  ;;  %v1053_v53 = vmul.f32 %v1049_v48, %v1031_v22  ;;  %v6715_v22 = vld [vmem:[%s8330_s4 + $0x8c] ss:$16 sps:$4 sm:$0xff]  }
 0x14b   :  { %1045 = vst [vmem:[#allocation5] sm:$0x3] %v1043_v41  ;;  %1352 = vmatprep.subr.bf16.mxu0 %v6233_v55  ;;  %1393 = vmatprep.subr.bf16.mxu1 %v6238_v56  ;;  %v1052_v56 = vmul.f32 %v1026_v1, %v6363_v50  ;;  %v8376_v50 = vld [vmem:[#allocation13_spill] sm:$0xff]  ;;  %v6811_v38 = vld [vmem:[%s8331_s5 + $0xc] ss:$16 sps:$4 sm:$0xff]  }
 0x14c   :  { %v6793_v1 = vld [vmem:[%s8330_s4 + $0xe0] ss:$16 sps:$4 sm:$0xff]  }
 0x14d   :  { %v5260_v47 = vpop.eup %5259 }
 0x14e   :  { %v5262_v35 = vpop.eup %5261  ;;  %v1007_v49 = vmul.f32 %v5260_v47, %v5256_v42  ;;  %1353 = vmatpush1.bf16.msra.mxu0 %v6248_v59  ;;  %1394 = vmatpush1.bf16.msra.mxu1 %v6253_v60  ;;  %v8371_v60 = vld [vmem:[#allocation8_spill] sm:$0xff] }
 0x14f   :  { %v1008_v9 = vmul.f32 %v5262_v35, %v5258_v46  ;;  %1354 = vmatprep.subr.bf16.mxu0 %v6260_v61  ;;  %1395 = vmatprep.subr.bf16.mxu1 %v6265_v62  ;;  %v8372_v61 = vld [vmem:[#allocation9_spill] sm:$0xff]  ;;  %8379 = vst [vmem:[#allocation8_spill] sm:$0xff] %v6787_v0 }
 0x150   :  { %v1046_v52 = vmul.f32 %v1012_v44, %v1007_v49  ;;  %v6769_v44 = vld [vmem:[%s8330_s4 + $0xc0] ss:$16 sps:$4 sm:$0xff]   ;;  %8380 = vst [vmem:[#allocation9_spill] sm:$0xff] %v6793_v1 }
 0x151   :  { %v1047_v55 = vmul.f32 %v1017_v16, %v1008_v9  ;;  %v6685_v16 = vld [vmem:[%s8330_s4 + $0x64] ss:$16 sps:$4 sm:$0xff]  }
 0x152   :  { %1062 = vst [vmem:[%s8333_s7 + $0x7] sm:$0x1] %v1046_v52  ;;  %1355 = vmatpush1.bf16.msra.mxu0 %v6275_v37  ;;  %1396 = vmatpush1.bf16.msra.mxu1 %v6280_v39  ;;  %v1054_v62 = vadd.f32 %v1052_v56, %v1046_v52  ;;  %v8375_v39 = vld [vmem:[#allocation12_spill] sm:$0xff] }
 0x153   :  { %v1055_v59 = vadd.f32 %v1053_v53, %v1047_v55  ;;  %1063 = vst [vmem:[%s8333_s7 + $0xf] sm:$0x1] %v1047_v55  ;;  %1356 = vmatprep.subr.bf16.mxu0 %v8371_v60  ;;  %1397 = vmatprep.subr.bf16.mxu1 %v8372_v61  ;;  %8383 = vst [vmem:[#allocation12_spill] sm:$0xff] %v6811_v38  ;;  %v1065_v60 = vld [vmem:[#allocation6 + $0x1] ss:$8 sm:$0xf] }
 0x154   :  { %v1067_v61 = vld [vmem:[#allocation6 + $0x21] ss:$8 sm:$0xf] }
 0x155   :  { %v1058_v33 = vrot.slane %v1055_v59, 7 }
 0x156   :  { %1357 = vmatpush1.bf16.msra.mxu0 %v8373_v34  ;;  %1398 = vmatpush1.bf16.msra.mxu1 %v8374_v8 }
 0x157   :  { %v1059_v37 = vsel %vm609_vm0, %v1058_v33, %v1054_v62  ;;  %1358 = vmatprep.subr.bf16.mxu0 %v8375_v39  ;;  %1399 = vmatprep.subr.bf16.mxu1 %v8376_v50 }
 0x158   :  { %1061 = vst [vmem:[#allocation4] sm:$0x3] %v1059_v37 }
 0x15a   :  { %1359 = vmatpush1.bf16.msra.mxu0 %v8377_v36  ;;  %1400 = vmatpush1.bf16.msra.mxu1 %v8378_v5 }
 0x15b   :  { %1360 = vmatprep.subr.bf16.mxu0 %v6341_v3  ;;  %1401 = vmatprep.subr.bf16.mxu1 %v6346_v45  ;;  %v6629_v3 = vld [vmem:[%s8330_s4 + $0x8] ss:$16 sps:$4 sm:$0xff]   ;;  %v6635_v45 = vld [vmem:[%s8330_s4 + $0x24] ss:$16 sps:$4 sm:$0xff]  }
 0x15e   :  { %1361 = vmatpush1.bf16.msra.mxu0 %v6356_v58  ;;  %1402 = vmatpush1.bf16.msra.mxu1 %v6361_v57  ;;  %v6623_v57 = vld [vmem:[%s8330_s4] ss:$16 sps:$4 sm:$0xff]  }
 0x15f   :  { %v6604_v6 = vld [vmem:[#allocation4] sm:$0x3]  ;;  %1619 = vmatprep.subr.bf16.mxu0 %v6609_v7  ;;  %1660 = vmatprep.subr.bf16.mxu1 %v6615_v63 }
 0x160   :  { %v1345_v58 = vpack.c.bf16 %v6604_v6, %v6604_v6 }
 0x162   :  { %1379 = vmatmul.mubr.bf16.vlgmr.msra.gmra.mrb[12].mxu0 %v1345_v58  ;;  %1420 = vmatmul.mubr.bf16.vlgmr.msra.gmra.mrb[12].mxu1 %v1345_v58 }
 0x163   :  { %1620 = vmatpush1.bf16.msra.mxu0 %v6623_v57  ;;  %1661 = vmatpush1.bf16.msra.mxu1 %v6629_v3 }
 0x164   :  { %1621 = vmatprep.subr.bf16.mxu0 %v6635_v45  ;;  %1662 = vmatprep.subr.bf16.mxu1 %v6641_v10 }
 0x165   :  { %1651 = vmatprep.mubr.bf16.mxu0 %v8370_v43  ;;  %1692 = vmatprep.mubr.bf16.mxu1 %v8370_v43 }
 0x167   :  { %1622 = vmatpush1.bf16.msra.mxu0 %v6649_v11  ;;  %1663 = vmatpush1.bf16.msra.mxu1 %v6655_v12 }
 0x168   :  { %1623 = vmatprep.subr.bf16.mxu0 %v6661_v13  ;;  %1664 = vmatprep.subr.bf16.mxu1 %v6667_v25 }
 0x16b   :  { %1624 = vmatpush1.bf16.msra.mxu0 %v6673_v14  ;;  %1665 = vmatpush1.bf16.msra.mxu1 %v6679_v15 }
 0x16c   :  { %1625 = vmatprep.subr.bf16.mxu0 %v6685_v16  ;;  %1666 = vmatprep.subr.bf16.mxu1 %v6691_v17 }
 0x16f   :  { %1626 = vmatpush1.bf16.msra.mxu0 %v6697_v18  ;;  %1667 = vmatpush1.bf16.msra.mxu1 %v6703_v19 }
 0x170   :  { %1627 = vmatprep.subr.bf16.mxu0 %v6709_v21  ;;  %1668 = vmatprep.subr.bf16.mxu1 %v6715_v22 }
 0x173   :  { %1628 = vmatpush1.bf16.msra.mxu0 %v6721_v23  ;;  %1669 = vmatpush1.bf16.msra.mxu1 %v6727_v24 }
 0x174   :  { %1629 = vmatprep.subr.bf16.mxu0 %v6733_v26  ;;  %1670 = vmatprep.subr.bf16.mxu1 %v6739_v27 }
 0x177   :  { %1630 = vmatpush1.bf16.msra.mxu0 %v6745_v28  ;;  %1671 = vmatpush1.bf16.msra.mxu1 %v6751_v30 }
 0x178   :  { %1631 = vmatprep.subr.bf16.mxu0 %v6757_v31  ;;  %1672 = vmatprep.subr.bf16.mxu1 %v6763_v32 }
 0x17b   :  { %1632 = vmatpush1.bf16.msra.mxu0 %v6769_v44  ;;  %1673 = vmatpush1.bf16.msra.mxu1 %v6775_v54 }
 0x17c   :  { %1633 = vmatprep.subr.bf16.mxu0 %v6781_v51  ;;  %1674 = vmatprep.subr.bf16.mxu1 %v6787_v0 }
 0x17f   :  { %1634 = vmatpush1.bf16.msra.mxu0 %v6793_v1  ;;  %1675 = vmatpush1.bf16.msra.mxu1 %v6799_v2 }
 0x180   :  { %1892 = vmatprep.subr.bf16.mxu0 %v6805_v4  ;;  %1933 = vmatprep.subr.bf16.mxu1 %v6811_v38  ;;  %v1338_v38 = vld [vmem:[#allocation7 + $0x6] ss:$8 sm:$0xf] }
 0x181   :  { %v1340_v4 = vld [vmem:[#allocation7 + $0x26] ss:$8 sm:$0xf] }
 0x214   :  { %v1107_v40 = vpop.f32.mrb[8].mxu0  ;;  %v1148_v41 = vpop.f32.mrb[8].mxu1 }
 0x215   :  { %v1109_v42 = vpop.f32.mrb[9].mxu0  ;;  %v1150_v46 = vpop.f32.mrb[9].mxu1 }
 0x216   :  { %v1159_v47 = vcombine.low %v1107_v40, %v1109_v42  ;;  %v1160_v48 = vcombine.low %v1148_v41, %v1150_v46  ;;  %v1111_v35 = vpop.f32.mrb[10].mxu0  ;;  %v1152_v49 = vpop.f32.mrb[10].mxu1 }
 0x217   :  { %v1112_v9 = vpop.f32.mrb[11].mxu0  ;;  %v1153_v52 = vpop.f32.mrb[11].mxu1 }
 0x218   :  { %v1167_v53 = vrot.slane %v1159_v47, %v6524_v29  ;;  %v1174_v55 = vrot.slane %v1160_v48, %v6524_v29 }
 0x21a   :  { %v1175_v56 = vcombine.low %v1167_v53, %v1174_v55  ;;  %v1176_v59 = vcombine.high %v1167_v53, %v1174_v55 }
 0x21c   :  { %v1183_v62 = vrot.slane %v1175_v56, %v6524_v29  ;;  %v1190_v33 = vrot.slane %v1176_v59, %v6524_v29  ;;  %v1071_v59 = vld [vmem:[#allocation3] sm:$0x3] }
 0x21e   :  { %v1193_v34 = vadd.f32 %v1183_v62, %v1065_v60  ;;  %v1194_v8 = vadd.f32 %v1190_v33, %v1067_v61  ;;  %v1254_v61 = vrot.slane %v1071_v59, %v6524_v29 }
 0x220   :  { %v5014_v37 = vmul.f32 -1.442695, %v1193_v34  ;;  %v5015_v39 = vmul.f32 -1.442695, %v1194_v8  ;;  %v1209_v50 = vrot.slane %v1193_v34, 1  ;;  %v1210_v36 = vrot.slane %v1194_v8, 1 }
 0x221   :  { %v1231_v40 = vrot.slane %v1193_v34, 3  ;;  %v1232_v41 = vrot.slane %v1194_v8, 3  ;;  %v1225_v42 = vrot.slane %v1193_v34, 2  ;;  %v1226_v46 = vrot.slane %v1194_v8, 2 }
 0x222   :  { %5263 = vpow2.f32 %v5014_v37  ;;  %v5016_v5 = vmul.f32 -1.442695, %v1209_v50  ;;  %v5017_v58 = vmul.f32 -1.442695, %v1210_v36  ;;  %v1255_v36 = vcombine.high %v1254_v61, %v1254_v61 }
 0x223   :  { %5265 = vpow2.f32 %v5015_v39  ;;  %v5018_v47 = vmul.f32 -1.442695, %v1231_v40  ;;  %v5019_v48 = vmul.f32 -1.442695, %v1232_v41 }
 0x224   :  { %5267 = vpow2.f32 %v5016_v5 }
 0x225   :  { %5269 = vpow2.f32 %v5017_v58 }
 0x226   :  { %5271 = vtanh.f32 %v1225_v42 }
 0x227   :  { %5273 = vtanh.f32 %v1226_v46 }
 0x228   :  { %5275 = vpow2.f32 %v5018_v47 }
 0x229   :  { %5277 = vpow2.f32 %v5019_v48 }
 0x22c   :  { %v5264_v35 = vpop.eup %5263 }
 0x22d   :  { %v5266_v49 = vpop.eup %5265  ;;  %v1201_v9 = vadd.f32 1.0, %v5264_v35  ;;  %v6819_v35 = vpop.permute.xlu0 %1289 }
 0x22e   :  { %v5268_v52 = vpop.eup %5267  ;;  %v1202_v53 = vadd.f32 1.0, %v5266_v49 }
 0x22f   :  { %v5270_v55 = vpop.eup %5269  ;;  %5279 = vrcp.f32 %v1201_v9  ;;  %v1219_v56 = vadd.f32 1.0, %v5268_v52 }
 0x230   :  { %5281 = vrcp.f32 %v1202_v53  ;;  %v1220_v60 = vadd.f32 1.0, %v5270_v55  ;;  %v5272_v62 = vpop.eup %5271  ;;  %v1262_v55 = vrot.slane %v1254_v61, %v6524_v29 }
 0x231   :  { %5283 = vrcp.f32 %v1219_v56  ;;  %v5274_v8 = vpop.eup %5273  ;;  %v1306_v56 = vrot.slane %v1071_v59, 1  ;;  %v1285_v1 = vpop.permute.xlu0 %1284 }
 0x232   :  { %5285 = vrcp.f32 %v1220_v60  ;;  %v5276_v50 = vpop.eup %5275 }
 0x233   :  { %v5278_v42 = vpop.eup %5277  ;;  %v1241_v53 = vadd.f32 1.0, %v5276_v50 }
 0x235   :  { %v1380_v33 = vpop.f32.mrb[12].mxu0  ;;  %v1421_v34 = vpop.f32.mrb[12].mxu1  ;;  %5287 = vrcp.f32 %v1241_v53 }
 0x236   :  { %v1382_v37 = vpop.f32.mrb[13].mxu0  ;;  %v1423_v39 = vpop.f32.mrb[13].mxu1 }
 0x237   :  { %v1432_v5 = vcombine.low %v1380_v33, %v1382_v37  ;;  %v1433_v58 = vcombine.low %v1421_v34, %v1423_v39  ;;  %v1384_v40 = vpop.f32.mrb[14].mxu0  ;;  %v1425_v41 = vpop.f32.mrb[14].mxu1  ;;  %v1242_v33 = vadd.f32 1.0, %v5278_v42  ;;  %v1269_v34 = vrot.slane %v1255_v36, %v6524_v29 }
 0x238   :  { %v1385_v46 = vpop.f32.mrb[15].mxu0  ;;  %v1426_v47 = vpop.f32.mrb[15].mxu1 }
 0x239   :  { %v5280_v48 = vpop.eup %5279  ;;  %v1440_v49 = vrot.slane %v1432_v5, %v6524_v29  ;;  %v1447_v9 = vrot.slane %v1433_v58, %v6524_v29  ;;  %v1304_v41 = vpop.permute.xlu1 %1303  ;;  %5289 = vrcp.f32 %v1242_v33 }
 0x23a   :  { %v5282_v52 = vpop.eup %5281  ;;  %v1274_v47 = vmul.f32 %v5280_v48, %v5272_v62 }
 0x23b   :  { %v5284_v60 = vpop.eup %5283  ;;  %v1448_v37 = vcombine.low %v1440_v49, %v1447_v9  ;;  %v1449_v39 = vcombine.high %v1440_v49, %v1447_v9  ;;  %v1275_v2 = vmul.f32 %v5282_v52, %v5274_v8  ;;  %v1310_v9 = vmul.f32 %v1306_v56, %v1304_v41 }
 0x23c   :  { %v5286_v40 = vpop.eup %5285  ;;  %v1272_v46 = vmul.f32 %v5284_v60, %v1262_v55 }
 0x23d   :  { %v1273_v5 = vmul.f32 %v5286_v40, %v1269_v34  ;;  %v1456_v58 = vrot.slane %v1448_v37, %v6524_v29  ;;  %v1463_v50 = vrot.slane %v1449_v39, %v6524_v29  ;;  %v1299_v8 = vpop.permute.xlu1 %1298 }
 0x23e   :  { %v1276_v61 = vadd.f32 %v1274_v47, %v1272_v46  ;;  %v1309_v34 = vmul.f32 %v1299_v8, %v1071_v59  ;;  %v1322_v59 = vrot.slane %v6558_v20, 1 }
 0x23f   :  { %v1277_v42 = vadd.f32 %v1275_v2, %v1273_v5  ;;  %v1466_v36 = vadd.f32 %v1456_v58, %v1338_v38  ;;  %v1467_v0 = vadd.f32 %v1463_v50, %v1340_v4  ;;  %v5288_v39 = vpop.eup %5287 }
 0x240   :  { %5291 = vtanh.f32 %v1276_v61  ;;  %v1292_v49 = vmul.f32 %v1285_v1, %v1276_v61 }
 0x241   :  { %5293 = vtanh.f32 %v1277_v42  ;;  %v1293_v62 = vmul.f32 %v6819_v35, %v1277_v42  ;;  %v5020_v48 = vmul.f32 -1.442695, %v1466_v36  ;;  %v5021_v55 = vmul.f32 -1.442695, %v1467_v0 }
 0x242   :  { %v1482_v52 = vrot.slane %v1466_v36, 1  ;;  %v1483_v60 = vrot.slane %v1467_v0, 1  ;;  %v1311_v2 = vadd.f32 %v1309_v34, %v1292_v49  ;;  %v1504_v56 = vrot.slane %v1466_v36, 3 }
 0x243   :  { %v1312_v37 = vadd.f32 %v1310_v9, %v1293_v62  ;;  %5295 = vpow2.f32 %v5020_v48  ;;  %v1505_v40 = vrot.slane %v1467_v0, 3  ;;  %v5290_v46 = vpop.eup %5289  ;;  %v1498_v47 = vrot.slane %v1466_v36, 2 }
 0x244   :  { %5297 = vpow2.f32 %v5021_v55  ;;  %v5022_v53 = vmul.f32 -1.442695, %v1482_v52  ;;  %v5023_v33 = vmul.f32 -1.442695, %v1483_v60  ;;  %v1499_v58 = vrot.slane %v1467_v0, 2 }
 0x245   :  { %v1315_v38 = vrot.slane %v1312_v37, 7  ;;  %v5024_v42 = vmul.f32 -1.442695, %v1504_v56  ;;  %v5025_v49 = vmul.f32 -1.442695, %v1505_v40  ;;  %v1326_v60 = vmul.f32 %v1322_v59, %v1304_v41  ;;  %v6840_v59 = vpop.permute.xlu0 %1562 }
 0x246   :  { %5299 = vpow2.f32 %v5022_v53  ;;  %v1325_v37 = vmul.f32 %v1299_v8, %v6558_v20 }
 0x247   :  { %v1316_v4 = vsel %vm609_vm0, %v1315_v38, %v1311_v2  ;;  %5301 = vpow2.f32 %v5023_v33  ;;  %v1344_v2 = vld [vmem:[#allocation5] sm:$0x3] }
 0x248   :  { %1318 = vst [vmem:[#allocation3] sm:$0x3] %v1316_v4  ;;  %5303 = vtanh.f32 %v1498_v47  ;;  %v1527_v20 = vrot.slane %v1344_v2, %v6524_v29 }
 0x249   :  { %5305 = vtanh.f32 %v1499_v58 }
 0x24a   :  { %v5292_v5 = vpop.eup %5291  ;;  %5307 = vpow2.f32 %v5024_v42  ;;  %v1528_v40 = vcombine.high %v1527_v20, %v1527_v20 }
 0x24b   :  { %v5294_v50 = vpop.eup %5293  ;;  %v1280_v61 = vmul.f32 %v5292_v5, %v5288_v39  ;;  %5309 = vpow2.f32 %v5025_v49 }
 0x24c   :  { %v1281_v9 = vmul.f32 %v5294_v50, %v5290_v46  ;;  %v1535_v50 = vrot.slane %v1527_v20, %v6524_v29  ;;  %v1542_v49 = vrot.slane %v1528_v40, %v6524_v29  ;;  %v6887_v40 = vld [vmem:[%s8331_s5 + $0x28] ss:$16 sps:$4 sm:$0xff]  }
 0x24d   :  { %v5296_v62 = vpop.eup %5295  ;;  %v1319_v48 = vmul.f32 %v1285_v1, %v1280_v61 }
 0x24e   :  { %v5298_v55 = vpop.eup %5297  ;;  %v1320_v52 = vmul.f32 %v6819_v35, %v1281_v9  ;;  %v1474_v34 = vadd.f32 1.0, %v5296_v62 }
 0x24f   :  { %1335 = vst [vmem:[%s8332_s6 + $0x1] sm:$0x1] %v1319_v48  ;;  %v1475_v36 = vadd.f32 1.0, %v5298_v55  ;;  %v1327_v41 = vadd.f32 %v1325_v37, %v1319_v48  ;;  %v6848_v55 = vpop.permute.xlu1 %1576 }
 0x250   :  { %v5300_v0 = vpop.eup %5299  ;;  %v1328_v53 = vadd.f32 %v1326_v60, %v1320_v52  ;;  %1336 = vst [vmem:[%s8332_s6 + $0x9] sm:$0x1] %v1320_v52  ;;  %5311 = vrcp.f32 %v1474_v34 }
 0x251   :  { %v5302_v1 = vpop.eup %5301  ;;  %v1492_v35 = vadd.f32 1.0, %v5300_v0  ;;  %5313 = vrcp.f32 %v1475_v36  ;;  %v1579_v0 = vrot.slane %v1344_v2, 1 }
 0x252   :  { %v1331_v33 = vrot.slane %v1328_v53, 7  ;;  %v1493_v38 = vadd.f32 1.0, %v5302_v1  ;;  %v5304_v8 = vpop.eup %5303  ;;  %v6853_v53 = vld [vmem:[%s8331_s5] ss:$16 sps:$4 sm:$0xff]   ;;  %v6859_v1 = vld [vmem:[%s8331_s5 + $0x8] ss:$16 sps:$4 sm:$0xff]  }
 0x253   :  { %5315 = vrcp.f32 %v1492_v35  ;;  %v5306_v56 = vpop.eup %5305 }
 0x254   :  { %v1332_v4 = vsel %vm609_vm0, %v1331_v33, %v1327_v41  ;;  %5317 = vrcp.f32 %v1493_v38  ;;  %v5308_v39 = vpop.eup %5307  ;;  %v6865_v41 = vld [vmem:[%s8331_s5 + $0x24] ss:$16 sps:$4 sm:$0xff]   ;;  %v6871_v33 = vld [vmem:[%s8331_s5 + $0x2c] ss:$16 sps:$4 sm:$0xff]   ;;  %v1558_v38 = vpop.permute.xlu0 %1557 }
 0x255   :  { %1334 = vst [vmem:[#allocation2] sm:$0x3] %v1332_v4  ;;  %v5310_v46 = vpop.eup %5309  ;;  %v1514_v58 = vadd.f32 1.0, %v5308_v39  ;;  %v6881_v39 = vld [vmem:[%s8331_s5 + $0x20] ss:$16 sps:$4 sm:$0xff]  }
 0x256   :  { %v1515_v9 = vadd.f32 1.0, %v5310_v46 }
 0x257   :  { %5319 = vrcp.f32 %v1514_v58  ;;  %v6899_v58 = vld [vmem:[%s8331_s5 + $0x4c] ss:$16 sps:$4 sm:$0xff]  }
 0x258   :  { %5321 = vrcp.f32 %v1515_v9  ;;  %v6911_v9 = vld [vmem:[%s8331_s5 + $0x48] ss:$16 sps:$4 sm:$0xff]  }
 0x25a   :  { %v5312_v47 = vpop.eup %5311 }
 0x25b   :  { %v5314_v5 = vpop.eup %5313  ;;  %v1547_v60 = vmul.f32 %v5312_v47, %v5304_v8  ;;  %v1583_v8 = vmul.f32 %v1579_v0, %v6848_v55  ;;  %v6931_v0 = vld [vmem:[%s8331_s5 + $0x60] ss:$16 sps:$4 sm:$0xff]  }
 0x25c   :  { %v6843_v61 = vld [vmem:[#allocation2] sm:$0x3]  ;;  %v1548_v36 = vmul.f32 %v5314_v5, %v5306_v56  ;;  %v1572_v56 = vpop.permute.xlu1 %1571  ;;  %v6893_v5 = vld [vmem:[%s8331_s5 + $0x44] ss:$16 sps:$4 sm:$0xff]  }
 0x25d   :  { %v5316_v42 = vpop.eup %5315  ;;  %v1618_v62 = vpack.c.bf16 %v6843_v61, %v6843_v61  ;;  %v1582_v46 = vmul.f32 %v1572_v56, %v1344_v2  ;;  %v6905_v2 = vld [vmem:[%s8331_s5 + $0x40] ss:$16 sps:$4 sm:$0xff]  }
 0x25e   :  { %v5318_v48 = vpop.eup %5317  ;;  %v1545_v52 = vmul.f32 %v5316_v42, %v1535_v50 }
 0x25f   :  { %v1546_v34 = vmul.f32 %v5318_v48, %v1542_v49  ;;  %1652 = vmatmul.mubr.bf16.vlgmr.msra.gmra.mrb[16].mxu0 %v1618_v62  ;;  %1693 = vmatmul.mubr.bf16.vlgmr.msra.gmra.mrb[16].mxu1 %v1618_v62  ;;  %v6918_v62 = vld [vmem:[%s8331_s5 + $0x64] ss:$16 sps:$4 sm:$0xff]   ;;  %v6924_v48 = vld [vmem:[%s8331_s5 + $0x6c] ss:$16 sps:$4 sm:$0xff]  }
 0x260   :  { %v1549_v37 = vadd.f32 %v1547_v60, %v1545_v52  ;;  %1893 = vmatpush1.bf16.msra.mxu0 %v6853_v53  ;;  %1934 = vmatpush1.bf16.msra.mxu1 %v6859_v1 }
 0x261   :  { %v1550_v35 = vadd.f32 %v1548_v36, %v1546_v34  ;;  %1894 = vmatprep.subr.bf16.mxu0 %v6865_v41  ;;  %1935 = vmatprep.subr.bf16.mxu1 %v6871_v33  ;;  %v5320_v52 = vpop.eup %5319  ;;  %v1595_v36 = vrot.slane %v6604_v6, 1 }
 0x262   :  { %5323 = vtanh.f32 %v1549_v37  ;;  %1924 = vmatprep.mubr.bf16.mxu0 %v8370_v43  ;;  %1965 = vmatprep.mubr.bf16.mxu1 %v8370_v43  ;;  %v1565_v4 = vmul.f32 %v1558_v38, %v1549_v37  ;;  %v5322_v60 = vpop.eup %5321  ;;  %v6937_v37 = vld [vmem:[%s8331_s5 + $0x68] ss:$16 sps:$4 sm:$0xff]  }
 0x263   :  { %5325 = vtanh.f32 %v1550_v35  ;;  %v1566_v20 = vmul.f32 %v6840_v59, %v1550_v35 }
 0x264   :  { %1895 = vmatpush1.bf16.msra.mxu0 %v6881_v39  ;;  %1936 = vmatpush1.bf16.msra.mxu1 %v6887_v40  ;;  %v1584_v50 = vadd.f32 %v1582_v46, %v1565_v4 }
 0x265   :  { %v1585_v47 = vadd.f32 %v1583_v8, %v1566_v20  ;;  %1896 = vmatprep.subr.bf16.mxu0 %v6893_v5  ;;  %1937 = vmatprep.subr.bf16.mxu1 %v6899_v58  ;;  %v6943_v20 = vld [vmem:[%s8331_s5 + $0x84] ss:$16 sps:$4 sm:$0xff]   ;;  %v6949_v8 = vld [vmem:[%s8331_s5 + $0x8c] ss:$16 sps:$4 sm:$0xff]  }
 0x267   :  { %v1588_v42 = vrot.slane %v1585_v47, 7 }
 0x268   :  { %1897 = vmatpush1.bf16.msra.mxu0 %v6905_v2  ;;  %1938 = vmatpush1.bf16.msra.mxu1 %v6911_v9 }
 0x269   :  { %v1589_v49 = vsel %vm609_vm0, %v1588_v42, %v1584_v50  ;;  %1898 = vmatprep.subr.bf16.mxu0 %v6918_v62  ;;  %1939 = vmatprep.subr.bf16.mxu1 %v6924_v48  ;;  %v1599_v42 = vmul.f32 %v1595_v36, %v6848_v55  ;;  %v6978_v55 = vld [vmem:[%s8331_s5 + $0xac] ss:$16 sps:$4 sm:$0xff]  }
 0x26a   :  { %1591 = vst [vmem:[#allocation5] sm:$0x3] %v1589_v49  ;;  %v6957_v49 = vld [vmem:[%s8331_s5 + $0x80] ss:$16 sps:$4 sm:$0xff]  }
 0x26c   :  { %v5324_v34 = vpop.eup %5323  ;;  %1899 = vmatpush1.bf16.msra.mxu0 %v6931_v0  ;;  %1940 = vmatpush1.bf16.msra.mxu1 %v6937_v37 }
 0x26d   :  { %v5326_v35 = vpop.eup %5325  ;;  %v1553_v4 = vmul.f32 %v5324_v34, %v5320_v52  ;;  %1900 = vmatprep.subr.bf16.mxu0 %v6943_v20  ;;  %1941 = vmatprep.subr.bf16.mxu1 %v6949_v8  ;;  %v6963_v52 = vld [vmem:[%s8331_s5 + $0x88] ss:$16 sps:$4 sm:$0xff]  }
 0x26e   :  { %v1554_v46 = vmul.f32 %v5326_v35, %v5322_v60  ;;  %v6988_v35 = vld [vmem:[%s8331_s5 + $0xa0] ss:$16 sps:$4 sm:$0xff]  }
 0x26f   :  { %v1592_v47 = vmul.f32 %v1558_v38, %v1553_v4  ;;  %v1598_v38 = vmul.f32 %v1572_v56, %v6604_v6  ;;  %v6994_v4 = vld [vmem:[%s8331_s5 + $0xa8] ss:$16 sps:$4 sm:$0xff]   ;;  %v7000_v6 = vld [vmem:[%s8331_s5 + $0xc4] ss:$16 sps:$4 sm:$0xff]   ;;  %v7006_v56 = vld [vmem:[%s8331_s5 + $0xcc] ss:$16 sps:$4 sm:$0xff]  }
 0x270   :  { %v1593_v50 = vmul.f32 %v6840_v59, %v1554_v46  ;;  %1901 = vmatpush1.bf16.msra.mxu0 %v6957_v49  ;;  %1942 = vmatpush1.bf16.msra.mxu1 %v6963_v52  ;;  %v6972_v59 = vld [vmem:[%s8331_s5 + $0xa4] ss:$16 sps:$4 sm:$0xff]  }
 0x271   :  { %1608 = vst [vmem:[%s8333_s7 + $0x6] sm:$0x1] %v1592_v47  ;;  %1902 = vmatprep.subr.bf16.mxu0 %v6972_v59  ;;  %1943 = vmatprep.subr.bf16.mxu1 %v6978_v55  ;;  %v1600_v34 = vadd.f32 %v1598_v38, %v1592_v47  ;;  %v7013_v47 = vld [vmem:[%s8331_s5 + $0xc0] ss:$16 sps:$4 sm:$0xff]   ;;  %v7031_v38 = vld [vmem:[%s8331_s5 + $0xec] ss:$16 sps:$4 sm:$0xff]  }
 0x272   :  { %v1601_v60 = vadd.f32 %v1599_v42, %v1593_v50  ;;  %1609 = vst [vmem:[%s8333_s7 + $0xe] sm:$0x1] %v1593_v50  ;;  %v7019_v50 = vld [vmem:[%s8331_s5 + $0xc8] ss:$16 sps:$4 sm:$0xff]   ;;  %v7025_v42 = vld [vmem:[%s8331_s5 + $0xe4] ss:$16 sps:$4 sm:$0xff]  }
 0x274   :  { %v1604_v36 = vrot.slane %v1601_v60, 7  ;;  %1903 = vmatpush1.bf16.msra.mxu0 %v6988_v35  ;;  %1944 = vmatpush1.bf16.msra.mxu1 %v6994_v4  ;;  %v7037_v60 = vld [vmem:[%s8331_s5 + $0xe0] ss:$16 sps:$4 sm:$0xff]  }
 0x275   :  { %1904 = vmatprep.subr.bf16.mxu0 %v7000_v6  ;;  %1945 = vmatprep.subr.bf16.mxu1 %v7006_v56 }
 0x276   :  { %v1605_v46 = vsel %vm609_vm0, %v1604_v36, %v1600_v34  ;;  %v7043_v34 = vld [vmem:[%s8331_s5 + $0xe8] ss:$16 sps:$4 sm:$0xff]  }
 0x277   :  { %1607 = vst [vmem:[#allocation4] sm:$0x3] %v1605_v46  ;;  %8384 = vst [vmem:[#allocation13_spill] sm:$0xff] %v7043_v34 }
 0x278   :  { %1905 = vmatpush1.bf16.msra.mxu0 %v7013_v47  ;;  %1946 = vmatpush1.bf16.msra.mxu1 %v7019_v50 }
 0x279   :  { %1906 = vmatprep.subr.bf16.mxu0 %v7025_v42  ;;  %1947 = vmatprep.subr.bf16.mxu1 %v7031_v38 }
 0x27c   :  { %1907 = vmatpush1.bf16.msra.mxu0 %v7037_v60  ;;  %1948 = vmatpush1.bf16.msra.mxu1 %v7043_v34 }
 0x27d   :  { %2165 = vmatprep.subr.bf16.mxu0 %v6609_v7  ;;  %2206 = vmatprep.subr.bf16.mxu1 %v6615_v63  ;;  %v8385_v7 = vld [vmem:[#allocation8_spill] sm:$0xff]  ;;  %v8386_v63 = vld [vmem:[#allocation9_spill] sm:$0xff] }
 0x27e   :  { %v7048_v36 = vld [vmem:[#allocation4] sm:$0x3] }
 0x27f   :  { %v1891_v46 = vpack.c.bf16 %v7048_v36, %v7048_v36 }
 0x281   :  { %1925 = vmatmul.mubr.bf16.vlgmr.msra.gmra.mrb[20].mxu0 %v1891_v46  ;;  %1966 = vmatmul.mubr.bf16.vlgmr.msra.gmra.mrb[20].mxu1 %v1891_v46 }
 0x282   :  { %2166 = vmatpush1.bf16.msra.mxu0 %v6623_v57  ;;  %2207 = vmatpush1.bf16.msra.mxu1 %v6629_v3  ;;  %v8387_v57 = vld [vmem:[#allocation10_spill] sm:$0xff]  ;;  %v8388_v3 = vld [vmem:[#allocation11_spill] sm:$0xff] }
 0x283   :  { %2167 = vmatprep.subr.bf16.mxu0 %v6635_v45  ;;  %2208 = vmatprep.subr.bf16.mxu1 %v6641_v10  ;;  %v8389_v45 = vld [vmem:[#allocation12_spill] sm:$0xff] }
 0x284   :  { %2197 = vmatprep.mubr.bf16.mxu0 %v8370_v43  ;;  %2238 = vmatprep.mubr.bf16.mxu1 %v8370_v43 }
 0x286   :  { %2168 = vmatpush1.bf16.msra.mxu0 %v6649_v11  ;;  %2209 = vmatpush1.bf16.msra.mxu1 %v6655_v12 }
 0x287   :  { %2169 = vmatprep.subr.bf16.mxu0 %v6661_v13  ;;  %2210 = vmatprep.subr.bf16.mxu1 %v6667_v25 }
 0x28a   :  { %2170 = vmatpush1.bf16.msra.mxu0 %v6673_v14  ;;  %2211 = vmatpush1.bf16.msra.mxu1 %v6679_v15 }
 0x28b   :  { %2171 = vmatprep.subr.bf16.mxu0 %v6685_v16  ;;  %2212 = vmatprep.subr.bf16.mxu1 %v6691_v17 }
 0x28e   :  { %2172 = vmatpush1.bf16.msra.mxu0 %v6697_v18  ;;  %2213 = vmatpush1.bf16.msra.mxu1 %v6703_v19 }
 0x28f   :  { %2173 = vmatprep.subr.bf16.mxu0 %v6709_v21  ;;  %2214 = vmatprep.subr.bf16.mxu1 %v6715_v22 }
 0x292   :  { %2174 = vmatpush1.bf16.msra.mxu0 %v6721_v23  ;;  %2215 = vmatpush1.bf16.msra.mxu1 %v6727_v24  ;;  %v1611_v24 = vld [vmem:[#allocation6 + $0x2] ss:$8 sm:$0xf] }
 0x293   :  { %2175 = vmatprep.subr.bf16.mxu0 %v6733_v26  ;;  %2216 = vmatprep.subr.bf16.mxu1 %v6739_v27  ;;  %v1613_v26 = vld [vmem:[#allocation6 + $0x22] ss:$8 sm:$0xf] }
 0x296   :  { %2176 = vmatpush1.bf16.msra.mxu0 %v6745_v28  ;;  %2217 = vmatpush1.bf16.msra.mxu1 %v6751_v30 }
 0x297   :  { %2177 = vmatprep.subr.bf16.mxu0 %v6757_v31  ;;  %2218 = vmatprep.subr.bf16.mxu1 %v6763_v32 }
 0x29a   :  { %2178 = vmatpush1.bf16.msra.mxu0 %v6769_v44  ;;  %2219 = vmatpush1.bf16.msra.mxu1 %v6775_v54 }
 0x29b   :  { %2179 = vmatprep.subr.bf16.mxu0 %v6781_v51  ;;  %2220 = vmatprep.subr.bf16.mxu1 %v8385_v7 }
 0x29e   :  { %2180 = vmatpush1.bf16.msra.mxu0 %v8386_v63  ;;  %2221 = vmatpush1.bf16.msra.mxu1 %v8387_v57 }
 0x29f   :  { %2438 = vmatprep.subr.bf16.mxu0 %v8388_v3  ;;  %2479 = vmatprep.subr.bf16.mxu1 %v8389_v45 }
 0x332   :  { %v1653_v10 = vpop.f32.mrb[16].mxu0  ;;  %v1694_v11 = vpop.f32.mrb[16].mxu1 }
 0x333   :  { %v1655_v12 = vpop.f32.mrb[17].mxu0  ;;  %v1696_v13 = vpop.f32.mrb[17].mxu1 }
 0x334   :  { %v1705_v25 = vcombine.low %v1653_v10, %v1655_v12  ;;  %v1706_v14 = vcombine.low %v1694_v11, %v1696_v13  ;;  %v1657_v15 = vpop.f32.mrb[18].mxu0  ;;  %v1698_v16 = vpop.f32.mrb[18].mxu1 }
 0x335   :  { %v1658_v17 = vpop.f32.mrb[19].mxu0  ;;  %v1699_v18 = vpop.f32.mrb[19].mxu1 }
 0x336   :  { %v1713_v19 = vrot.slane %v1705_v25, %v6524_v29  ;;  %v1720_v21 = vrot.slane %v1706_v14, %v6524_v29  ;;  %v1617_v18 = vld [vmem:[#allocation3] sm:$0x3] }
 0x338   :  { %v1721_v22 = vcombine.low %v1713_v19, %v1720_v21  ;;  %v1722_v23 = vcombine.high %v1713_v19, %v1720_v21  ;;  %v1800_v21 = vrot.slane %v1617_v18, %v6524_v29 }
 0x33a   :  { %v1729_v27 = vrot.slane %v1721_v22, %v6524_v29  ;;  %v1736_v28 = vrot.slane %v1722_v23, %v6524_v29 }
 0x33c   :  { %v1739_v30 = vadd.f32 %v1729_v27, %v1611_v24  ;;  %v1740_v31 = vadd.f32 %v1736_v28, %v1613_v26  ;;  %v1801_v28 = vcombine.high %v1800_v21, %v1800_v21 }
 0x33e   :  { %v5026_v32 = vmul.f32 -1.442695, %v1739_v30  ;;  %v5027_v44 = vmul.f32 -1.442695, %v1740_v31  ;;  %v1755_v54 = vrot.slane %v1739_v30, 1  ;;  %v1756_v51 = vrot.slane %v1740_v31, 1 }
 0x33f   :  { %v1777_v63 = vrot.slane %v1739_v30, 3  ;;  %v1778_v57 = vrot.slane %v1740_v31, 3  ;;  %v1771_v3 = vrot.slane %v1739_v30, 2  ;;  %v1772_v45 = vrot.slane %v1740_v31, 2 }
 0x340   :  { %5327 = vpow2.f32 %v5026_v32  ;;  %v5028_v46 = vmul.f32 -1.442695, %v1755_v54  ;;  %v5029_v7 = vmul.f32 -1.442695, %v1756_v51 }
 0x341   :  { %5329 = vpow2.f32 %v5027_v44  ;;  %v5030_v10 = vmul.f32 -1.442695, %v1777_v63  ;;  %v5031_v11 = vmul.f32 -1.442695, %v1778_v57 }
 0x342   :  { %5331 = vpow2.f32 %v5028_v46 }
 0x343   :  { %5333 = vpow2.f32 %v5029_v7 }
 0x344   :  { %5335 = vtanh.f32 %v1771_v3 }
 0x345   :  { %5337 = vtanh.f32 %v1772_v45  ;;  %v7091_v45 = vpop.permute.xlu0 %1835 }
 0x346   :  { %5339 = vpow2.f32 %v5030_v10 }
 0x347   :  { %5341 = vpow2.f32 %v5031_v11  ;;  %v1808_v11 = vrot.slane %v1800_v21, %v6524_v29 }
 0x34a   :  { %v5328_v12 = vpop.eup %5327 }
 0x34b   :  { %v5330_v13 = vpop.eup %5329  ;;  %v1747_v25 = vadd.f32 1.0, %v5328_v12 }
 0x34c   :  { %v5332_v14 = vpop.eup %5331  ;;  %v1748_v15 = vadd.f32 1.0, %v5330_v13 }
 0x34d   :  { %v5334_v16 = vpop.eup %5333  ;;  %5343 = vrcp.f32 %v1747_v25  ;;  %v1765_v17 = vadd.f32 1.0, %v5332_v14 }
 0x34e   :  { %5345 = vrcp.f32 %v1748_v15  ;;  %v1766_v19 = vadd.f32 1.0, %v5334_v16  ;;  %v5336_v22 = vpop.eup %5335  ;;  %v1815_v15 = vrot.slane %v1801_v28, %v6524_v29  ;;  %v1852_v16 = vrot.slane %v1617_v18, 1  ;;  %v1831_v28 = vpop.permute.xlu0 %1830 }
 0x34f   :  { %5347 = vrcp.f32 %v1765_v17  ;;  %v5338_v23 = vpop.eup %5337 }
 0x350   :  { %5349 = vrcp.f32 %v1766_v19  ;;  %v5340_v27 = vpop.eup %5339  ;;  %v1850_v19 = vpop.permute.xlu1 %1849 }
 0x351   :  { %v5342_v32 = vpop.eup %5341  ;;  %v1787_v10 = vadd.f32 1.0, %v5340_v27  ;;  %v1884_v27 = vld [vmem:[#allocation7 + $0x5] ss:$8 sm:$0xf] }
 0x352   :  { %v1788_v14 = vadd.f32 1.0, %v5342_v32 }
 0x353   :  { %5351 = vrcp.f32 %v1787_v10 }
 0x354   :  { %v1926_v24 = vpop.f32.mrb[20].mxu0  ;;  %v1967_v26 = vpop.f32.mrb[20].mxu1  ;;  %5353 = vrcp.f32 %v1788_v14 }
 0x355   :  { %v1928_v30 = vpop.f32.mrb[21].mxu0  ;;  %v1969_v31 = vpop.f32.mrb[21].mxu1 }
 0x356   :  { %v1978_v44 = vcombine.low %v1926_v24, %v1928_v30  ;;  %v1979_v54 = vcombine.low %v1967_v26, %v1969_v31  ;;  %v1930_v51 = vpop.f32.mrb[22].mxu0  ;;  %v1971_v46 = vpop.f32.mrb[22].mxu1 }
 0x357   :  { %v5344_v7 = vpop.eup %5343  ;;  %v1931_v63 = vpop.f32.mrb[23].mxu0 }
 0x358   :  { %v1972_v57 = vpop.f32.mrb[23].mxu1  ;;  %v5346_v3 = vpop.eup %5345  ;;  %v1986_v12 = vrot.slane %v1978_v44, %v6524_v29  ;;  %v1993_v13 = vrot.slane %v1979_v54, %v6524_v29  ;;  %v1820_v26 = vmul.f32 %v5344_v7, %v5336_v22  ;;  %v1886_v63 = vld [vmem:[#allocation7 + $0x25] ss:$8 sm:$0xf] }
 0x359   :  { %v5348_v25 = vpop.eup %5347  ;;  %v1821_v46 = vmul.f32 %v5346_v3, %v5338_v23  ;;  %v1845_v23 = vpop.permute.xlu1 %1844 }
 0x35a   :  { %v5350_v17 = vpop.eup %5349  ;;  %v1818_v24 = vmul.f32 %v5348_v25, %v1808_v11  ;;  %v1994_v30 = vcombine.low %v1986_v12, %v1993_v13  ;;  %v1995_v31 = vcombine.high %v1986_v12, %v1993_v13  ;;  %v1856_v11 = vmul.f32 %v1852_v16, %v1850_v19 }
 0x35b   :  { %v1819_v51 = vmul.f32 %v5350_v17, %v1815_v15  ;;  %v1855_v13 = vmul.f32 %v1845_v23, %v1617_v18  ;;  %v1868_v18 = vrot.slane %v6843_v61, 1 }
 0x35c   :  { %v1822_v21 = vadd.f32 %v1820_v26, %v1818_v24  ;;  %v2002_v44 = vrot.slane %v1994_v30, %v6524_v29  ;;  %v2009_v54 = vrot.slane %v1995_v31, %v6524_v29 }
 0x35d   :  { %v1823_v32 = vadd.f32 %v1821_v46, %v1819_v51  ;;  %v5352_v51 = vpop.eup %5351 }
 0x35e   :  { %5355 = vtanh.f32 %v1822_v21  ;;  %v2012_v57 = vadd.f32 %v2002_v44, %v1884_v27  ;;  %v2013_v34 = vadd.f32 %v2009_v54, %v1886_v63  ;;  %v1838_v22 = vmul.f32 %v1831_v28, %v1822_v21  ;;  %v5354_v46 = vpop.eup %5353 }
 0x35f   :  { %5357 = vtanh.f32 %v1823_v32  ;;  %v1839_v7 = vmul.f32 %v7091_v45, %v1823_v32 }
 0x360   :  { %v5032_v3 = vmul.f32 -1.442695, %v2012_v57  ;;  %v5033_v12 = vmul.f32 -1.442695, %v2013_v34  ;;  %v2028_v10 = vrot.slane %v2012_v57, 1  ;;  %v2029_v15 = vrot.slane %v2013_v34, 1 }
 0x361   :  { %v1858_v25 = vadd.f32 %v1856_v11, %v1839_v7  ;;  %v1857_v14 = vadd.f32 %v1855_v13, %v1838_v22  ;;  %v2050_v31 = vrot.slane %v2012_v57, 3  ;;  %v2051_v16 = vrot.slane %v2013_v34, 3 }
 0x362   :  { %5359 = vpow2.f32 %v5032_v3  ;;  %v5034_v17 = vmul.f32 -1.442695, %v2028_v10  ;;  %v5035_v26 = vmul.f32 -1.442695, %v2029_v15  ;;  %v2044_v27 = vrot.slane %v2012_v57, 2 }
 0x363   :  { %v1861_v24 = vrot.slane %v1858_v25, 7  ;;  %5361 = vpow2.f32 %v5033_v12  ;;  %v2045_v21 = vrot.slane %v2013_v34, 2  ;;  %v5036_v32 = vmul.f32 -1.442695, %v2050_v31 }
 0x364   :  { %5363 = vpow2.f32 %v5034_v17  ;;  %v5037_v7 = vmul.f32 -1.442695, %v2051_v16  ;;  %v1872_v10 = vmul.f32 %v1868_v18, %v1850_v19  ;;  %v1871_v25 = vmul.f32 %v1845_v23, %v6843_v61  ;;  %v2109_v18 = vpop.permute.xlu0 %2108 }
 0x365   :  { %v1862_v30 = vsel %vm609_vm0, %v1861_v24, %v1857_v14  ;;  %5365 = vpow2.f32 %v5035_v26  ;;  %v1890_v24 = vld [vmem:[#allocation5] sm:$0x3] }
 0x366   :  { %1864 = vst [vmem:[#allocation3] sm:$0x3] %v1862_v30  ;;  %5367 = vtanh.f32 %v2044_v27  ;;  %v2073_v61 = vrot.slane %v1890_v24, %v6524_v29 }
 0x367   :  { %5369 = vtanh.f32 %v2045_v21 }
 0x368   :  { %v5356_v63 = vpop.eup %5355  ;;  %5371 = vpow2.f32 %v5036_v32  ;;  %v2074_v16 = vcombine.high %v2073_v61, %v2073_v61 }
 0x369   :  { %v5358_v44 = vpop.eup %5357  ;;  %v1826_v54 = vmul.f32 %v5356_v63, %v5352_v51  ;;  %5373 = vpow2.f32 %v5037_v7 }
 0x36a   :  { %v1827_v22 = vmul.f32 %v5358_v44, %v5354_v46  ;;  %v2081_v44 = vrot.slane %v2073_v61, %v6524_v29  ;;  %v2088_v7 = vrot.slane %v2074_v16, %v6524_v29  ;;  %v7247_v16 = vld [vmem:[%s8330_s4 + $0x6c] ss:$16 sps:$4 sm:$0xff]  }
 0x36b   :  { %v1865_v11 = vmul.f32 %v1831_v28, %v1826_v54 }
 0x36c   :  { %v5360_v3 = vpop.eup %5359  ;;  %v1866_v12 = vmul.f32 %v7091_v45, %v1827_v22 }
 0x36d   :  { %v5362_v13 = vpop.eup %5361  ;;  %1881 = vst [vmem:[%s8332_s6 + $0x2] sm:$0x1] %v1865_v11  ;;  %v2020_v57 = vadd.f32 1.0, %v5360_v3  ;;  %v1873_v17 = vadd.f32 %v1871_v25, %v1865_v11  ;;  %v2125_v25 = vrot.slane %v1890_v24, 1 }
 0x36e   :  { %v5364_v34 = vpop.eup %5363  ;;  %v1874_v15 = vadd.f32 %v1872_v10, %v1866_v12  ;;  %1882 = vst [vmem:[%s8332_s6 + $0xa] sm:$0x1] %v1866_v12  ;;  %v2021_v28 = vadd.f32 1.0, %v5362_v13  ;;  %v2123_v12 = vpop.permute.xlu1 %2122 }
 0x36f   :  { %v5366_v45 = vpop.eup %5365  ;;  %5375 = vrcp.f32 %v2020_v57  ;;  %v2038_v19 = vadd.f32 1.0, %v5364_v34 }
 0x370   :  { %v1877_v14 = vrot.slane %v1874_v15, 7  ;;  %5377 = vrcp.f32 %v2021_v28  ;;  %v2039_v26 = vadd.f32 1.0, %v5366_v45  ;;  %v5368_v23 = vpop.eup %5367  ;;  %v2104_v45 = vpop.permute.xlu0 %2103 }
 0x371   :  { %5379 = vrcp.f32 %v2038_v19  ;;  %v5370_v31 = vpop.eup %5369 }
 0x372   :  { %v1878_v30 = vsel %vm609_vm0, %v1877_v14, %v1873_v17  ;;  %5381 = vrcp.f32 %v2039_v26  ;;  %v5372_v51 = vpop.eup %5371  ;;  %v2129_v14 = vmul.f32 %v2125_v25, %v2123_v12  ;;  %v2118_v26 = vpop.permute.xlu1 %2117  ;;  %v7349_v25 = vld [vmem:[%s8330_s4 + $0xe0] ss:$16 sps:$4 sm:$0xff]  }
 0x373   :  { %1880 = vst [vmem:[#allocation2] sm:$0x3] %v1878_v30  ;;  %v5374_v46 = vpop.eup %5373  ;;  %v2060_v21 = vadd.f32 1.0, %v5372_v51  ;;  %v7241_v51 = vld [vmem:[%s8330_s4 + $0x64] ss:$16 sps:$4 sm:$0xff]   ;;  %8392 = vst [vmem:[#allocation15_spill] sm:$0xff] %v7349_v25 }
 0x374   :  { %v2061_v22 = vadd.f32 1.0, %v5374_v46  ;;  %v7253_v46 = vld [vmem:[%s8330_s4 + $0x60] ss:$16 sps:$4 sm:$0xff]  }
 0x375   :  { %5383 = vrcp.f32 %v2060_v21  ;;  %v7277_v21 = vld [vmem:[%s8330_s4 + $0x80] ss:$16 sps:$4 sm:$0xff]  }
 0x376   :  { %5385 = vrcp.f32 %v2061_v22  ;;  %v7295_v22 = vld [vmem:[%s8330_s4 + $0xac] ss:$16 sps:$4 sm:$0xff]  }
 0x379   :  { %v5376_v27 = vpop.eup %5375 }
 0x37a   :  { %v5378_v63 = vpop.eup %5377  ;;  %v7113_v54 = vld [vmem:[#allocation2] sm:$0x3]  ;;  %v2093_v13 = vmul.f32 %v5376_v27, %v5368_v23  ;;  %v7259_v27 = vld [vmem:[%s8330_s4 + $0x68] ss:$16 sps:$4 sm:$0xff]  }
 0x37b   :  { %v5380_v32 = vpop.eup %5379  ;;  %v2164_v11 = vpack.c.bf16 %v7113_v54, %v7113_v54  ;;  %v2094_v34 = vmul.f32 %v5378_v63, %v5370_v31  ;;  %v7229_v23 = vld [vmem:[%s8330_s4 + $0x40] ss:$16 sps:$4 sm:$0xff]   ;;  %v7235_v31 = vld [vmem:[%s8330_s4 + $0x48] ss:$16 sps:$4 sm:$0xff]   ;;  %v7265_v63 = vld [vmem:[%s8330_s4 + $0x84] ss:$16 sps:$4 sm:$0xff]  }
 0x37c   :  { %v5382_v3 = vpop.eup %5381  ;;  %v2091_v10 = vmul.f32 %v5380_v32, %v2081_v44  ;;  %v7283_v44 = vld [vmem:[%s8330_s4 + $0x88] ss:$16 sps:$4 sm:$0xff]   ;;  %v7289_v32 = vld [vmem:[%s8330_s4 + $0xa4] ss:$16 sps:$4 sm:$0xff]  }
 0x37d   :  { %v2092_v57 = vmul.f32 %v5382_v3, %v2088_v7  ;;  %2198 = vmatmul.mubr.bf16.vlgmr.msra.gmra.mrb[24].mxu0 %v2164_v11  ;;  %2239 = vmatmul.mubr.bf16.vlgmr.msra.gmra.mrb[24].mxu1 %v2164_v11  ;;  %v7301_v7 = vld [vmem:[%s8330_s4 + $0xa0] ss:$16 sps:$4 sm:$0xff]   ;;  %v7307_v11 = vld [vmem:[%s8330_s4 + $0xa8] ss:$16 sps:$4 sm:$0xff]   ;;  %v7313_v3 = vld [vmem:[%s8330_s4 + $0xc4] ss:$16 sps:$4 sm:$0xff]  }
 0x37e   :  { %v2095_v15 = vadd.f32 %v2093_v13, %v2091_v10  ;;  %2439 = vmatpush1.bf16.msra.mxu0 %v6853_v53  ;;  %2480 = vmatpush1.bf16.msra.mxu1 %v6859_v1  ;;  %v2128_v53 = vmul.f32 %v2118_v26, %v1890_v24  ;;  %v7325_v10 = vld [vmem:[%s8330_s4 + $0xc0] ss:$16 sps:$4 sm:$0xff]   ;;  %v7331_v13 = vld [vmem:[%s8330_s4 + $0xc8] ss:$16 sps:$4 sm:$0xff]  }
 0x37f   :  { %v2096_v28 = vadd.f32 %v2094_v34, %v2092_v57  ;;  %2440 = vmatprep.subr.bf16.mxu0 %v6865_v41  ;;  %2481 = vmatprep.subr.bf16.mxu1 %v6871_v33  ;;  %v7337_v57 = vld [vmem:[%s8330_s4 + $0xe4] ss:$16 sps:$4 sm:$0xff]   ;;  %v7343_v34 = vld [vmem:[%s8330_s4 + $0xec] ss:$16 sps:$4 sm:$0xff]  }
 0x380   :  { %5387 = vtanh.f32 %v2095_v15  ;;  %2470 = vmatprep.mubr.bf16.mxu0 %v8370_v43  ;;  %2511 = vmatprep.mubr.bf16.mxu1 %v8370_v43  ;;  %v2111_v19 = vmul.f32 %v2104_v45, %v2095_v15  ;;  %8391 = vst [vmem:[#allocation14_spill] sm:$0xff] %v7343_v34  ;;  %v7355_v15 = vld [vmem:[%s8330_s4 + $0xe8] ss:$16 sps:$4 sm:$0xff]  }
 0x381   :  { %5389 = vtanh.f32 %v2096_v28  ;;  %v2112_v17 = vmul.f32 %v2109_v18, %v2096_v28  ;;  %8393 = vst [vmem:[#allocation8_spill] sm:$0xff] %v7355_v15  ;;  %v7361_v28 = vld [vmem:[%s8331_s5 + $0x4] ss:$16 sps:$4 sm:$0xff]  }
 0x382   :  { %2441 = vmatpush1.bf16.msra.mxu0 %v6881_v39  ;;  %2482 = vmatpush1.bf16.msra.mxu1 %v6887_v40  ;;  %v2130_v41 = vadd.f32 %v2128_v53, %v2111_v19  ;;  %v5384_v39 = vpop.eup %5383  ;;  %8394 = vst [vmem:[#allocation9_spill] sm:$0xff] %v7361_v28 }
 0x383   :  { %v2131_v1 = vadd.f32 %v2129_v14, %v2112_v17  ;;  %2442 = vmatprep.subr.bf16.mxu0 %v6893_v5  ;;  %2483 = vmatprep.subr.bf16.mxu1 %v6899_v58  ;;  %v5386_v40 = vpop.eup %5385  ;;  %v2141_v5 = vrot.slane %v7048_v36, 1 }
 0x385   :  { %v2134_v33 = vrot.slane %v2131_v1, 7 }
 0x386   :  { %2443 = vmatpush1.bf16.msra.mxu0 %v6905_v2  ;;  %2484 = vmatpush1.bf16.msra.mxu1 %v6911_v9 }
 0x387   :  { %v2135_v30 = vsel %vm609_vm0, %v2134_v33, %v2130_v41  ;;  %2444 = vmatprep.subr.bf16.mxu0 %v6918_v62  ;;  %2485 = vmatprep.subr.bf16.mxu1 %v6924_v48  ;;  %v2145_v48 = vmul.f32 %v2141_v5, %v2123_v12  ;;  %v7319_v12 = vld [vmem:[%s8330_s4 + $0xcc] ss:$16 sps:$4 sm:$0xff]  }
 0x388   :  { %2137 = vst [vmem:[#allocation5] sm:$0x3] %v2135_v30 }
 0x38a   :  { %v5388_v24 = vpop.eup %5387  ;;  %2445 = vmatpush1.bf16.msra.mxu0 %v6931_v0  ;;  %2486 = vmatpush1.bf16.msra.mxu1 %v6937_v37  ;;  %v2144_v0 = vmul.f32 %v2118_v26, %v7048_v36  ;;  %v7223_v36 = vld [vmem:[%s8330_s4 + $0x4c] ss:$16 sps:$4 sm:$0xff]  }
 0x38b   :  { %v5390_v58 = vpop.eup %5389  ;;  %v2099_v2 = vmul.f32 %v5388_v24, %v5384_v39  ;;  %2446 = vmatprep.subr.bf16.mxu0 %v6943_v20  ;;  %2487 = vmatprep.subr.bf16.mxu1 %v6949_v8 }
 0x38c   :  { %v2100_v9 = vmul.f32 %v5390_v58, %v5386_v40 }
 0x38d   :  { %v2138_v62 = vmul.f32 %v2104_v45, %v2099_v2  ;;  %v7367_v45 = vld [vmem:[%s8331_s5 + $0xc] ss:$16 sps:$4 sm:$0xff]   ;;  %v2157_v2 = vld [vmem:[#allocation6 + $0x3] ss:$8 sm:$0xf] }
 0x38e   :  { %v2139_v61 = vmul.f32 %v2109_v18, %v2100_v9  ;;  %2447 = vmatpush1.bf16.msra.mxu0 %v6957_v49  ;;  %2488 = vmatpush1.bf16.msra.mxu1 %v6963_v52  ;;  %v8390_v52 = vld [vmem:[#allocation13_spill] sm:$0xff]  ;;  %v7271_v18 = vld [vmem:[%s8330_s4 + $0x8c] ss:$16 sps:$4 sm:$0xff]   ;;  %8395 = vst [vmem:[#allocation10_spill] sm:$0xff] %v7367_v45 }
 0x38f   :  { %2154 = vst [vmem:[%s8333_s7 + $0x5] sm:$0x1] %v2138_v62  ;;  %2448 = vmatprep.subr.bf16.mxu0 %v6972_v59  ;;  %2489 = vmatprep.subr.bf16.mxu1 %v6978_v55  ;;  %v2146_v20 = vadd.f32 %v2144_v0, %v2138_v62  ;;  %v7163_v59 = vld [vmem:[%s8330_s4 + $0x4] ss:$16 sps:$4 sm:$0xff]   ;;  %v7169_v55 = vld [vmem:[%s8330_s4 + $0xc] ss:$16 sps:$4 sm:$0xff]  }
 0x390   :  { %v2147_v37 = vadd.f32 %v2145_v48, %v2139_v61  ;;  %2155 = vst [vmem:[%s8333_s7 + $0xd] sm:$0x1] %v2139_v61  ;;  %v2159_v9 = vld [vmem:[#allocation6 + $0x23] ss:$8 sm:$0xf] }
 0x392   :  { %v2150_v8 = vrot.slane %v2147_v37, 7  ;;  %2449 = vmatpush1.bf16.msra.mxu0 %v6988_v35  ;;  %2490 = vmatpush1.bf16.msra.mxu1 %v6994_v4 }
 0x393   :  { %2450 = vmatprep.subr.bf16.mxu0 %v7000_v6  ;;  %2491 = vmatprep.subr.bf16.mxu1 %v7006_v56  ;;  %v7179_v6 = vld [vmem:[%s8330_s4] ss:$16 sps:$4 sm:$0xff]   ;;  %v7185_v56 = vld [vmem:[%s8330_s4 + $0x8] ss:$16 sps:$4 sm:$0xff]  }
 0x394   :  { %v2151_v49 = vsel %vm609_vm0, %v2150_v8, %v2146_v20 }
 0x395   :  { %2153 = vst [vmem:[#allocation4] sm:$0x3] %v2151_v49 }
 0x396   :  { %2451 = vmatpush1.bf16.msra.mxu0 %v7013_v47  ;;  %2492 = vmatpush1.bf16.msra.mxu1 %v7019_v50  ;;  %v7191_v47 = vld [vmem:[%s8330_s4 + $0x24] ss:$16 sps:$4 sm:$0xff]   ;;  %v7197_v50 = vld [vmem:[%s8330_s4 + $0x2c] ss:$16 sps:$4 sm:$0xff]  }
 0x397   :  { %2452 = vmatprep.subr.bf16.mxu0 %v7025_v42  ;;  %2493 = vmatprep.subr.bf16.mxu1 %v7031_v38  ;;  %v7205_v42 = vld [vmem:[%s8330_s4 + $0x20] ss:$16 sps:$4 sm:$0xff]   ;;  %v7211_v38 = vld [vmem:[%s8330_s4 + $0x28] ss:$16 sps:$4 sm:$0xff]  }
 0x39a   :  { %2453 = vmatpush1.bf16.msra.mxu0 %v7037_v60  ;;  %2494 = vmatpush1.bf16.msra.mxu1 %v8390_v52  ;;  %v7217_v60 = vld [vmem:[%s8330_s4 + $0x44] ss:$16 sps:$4 sm:$0xff]  }
 0x39b   :  { %2711 = vmatprep.subr.bf16.mxu0 %v7163_v59  ;;  %2752 = vmatprep.subr.bf16.mxu1 %v7169_v55 }
 0x39c   :  { %v7172_v35 = vld [vmem:[#allocation4] sm:$0x3] }
 0x39d   :  { %v2437_v4 = vpack.c.bf16 %v7172_v35, %v7172_v35 }
 0x39f   :  { %2471 = vmatmul.mubr.bf16.vlgmr.msra.gmra.mrb[28].mxu0 %v2437_v4  ;;  %2512 = vmatmul.mubr.bf16.vlgmr.msra.gmra.mrb[28].mxu1 %v2437_v4 }
 0x3a0   :  { %2712 = vmatpush1.bf16.msra.mxu0 %v7179_v6  ;;  %2753 = vmatpush1.bf16.msra.mxu1 %v7185_v56 }
 0x3a1   :  { %2713 = vmatprep.subr.bf16.mxu0 %v7191_v47  ;;  %2754 = vmatprep.subr.bf16.mxu1 %v7197_v50 }
 0x3a2   :  { %2743 = vmatprep.mubr.bf16.mxu0 %v8370_v43  ;;  %2784 = vmatprep.mubr.bf16.mxu1 %v8370_v43 }
 0x3a4   :  { %2714 = vmatpush1.bf16.msra.mxu0 %v7205_v42  ;;  %2755 = vmatpush1.bf16.msra.mxu1 %v7211_v38 }
 0x3a5   :  { %2715 = vmatprep.subr.bf16.mxu0 %v7217_v60  ;;  %2756 = vmatprep.subr.bf16.mxu1 %v7223_v36 }
 0x3a8   :  { %2716 = vmatpush1.bf16.msra.mxu0 %v7229_v23  ;;  %2757 = vmatpush1.bf16.msra.mxu1 %v7235_v31 }
 0x3a9   :  { %2717 = vmatprep.subr.bf16.mxu0 %v7241_v51  ;;  %2758 = vmatprep.subr.bf16.mxu1 %v7247_v16 }
 0x3ac   :  { %2718 = vmatpush1.bf16.msra.mxu0 %v7253_v46  ;;  %2759 = vmatpush1.bf16.msra.mxu1 %v7259_v27 }
 0x3ad   :  { %2719 = vmatprep.subr.bf16.mxu0 %v7265_v63  ;;  %2760 = vmatprep.subr.bf16.mxu1 %v7271_v18 }
 0x3b0   :  { %2720 = vmatpush1.bf16.msra.mxu0 %v7277_v21  ;;  %2761 = vmatpush1.bf16.msra.mxu1 %v7283_v44 }
 0x3b1   :  { %2721 = vmatprep.subr.bf16.mxu0 %v7289_v32  ;;  %2762 = vmatprep.subr.bf16.mxu1 %v7295_v22 }
 0x3b4   :  { %2722 = vmatpush1.bf16.msra.mxu0 %v7301_v7  ;;  %2763 = vmatpush1.bf16.msra.mxu1 %v7307_v11 }
 0x3b5   :  { %2723 = vmatprep.subr.bf16.mxu0 %v7313_v3  ;;  %2764 = vmatprep.subr.bf16.mxu1 %v7319_v12 }
 0x3b8   :  { %2724 = vmatpush1.bf16.msra.mxu0 %v7325_v10  ;;  %2765 = vmatpush1.bf16.msra.mxu1 %v7331_v13 }
 0x3b9   :  { %2725 = vmatprep.subr.bf16.mxu0 %v7337_v57  ;;  %2766 = vmatprep.subr.bf16.mxu1 %v7343_v34 }
 0x3bc   :  { %2726 = vmatpush1.bf16.msra.mxu0 %v7349_v25  ;;  %2767 = vmatpush1.bf16.msra.mxu1 %v7355_v15  ;;  %v2432_v15 = vld [vmem:[#allocation7 + $0x24] ss:$8 sm:$0xf] }
 0x3bd   :  { %2984 = vmatprep.subr.bf16.mxu0 %v7361_v28  ;;  %3025 = vmatprep.subr.bf16.mxu1 %v7367_v45 }
 0x450   :  { %v2199_v19 = vpop.f32.mrb[24].mxu0  ;;  %v2240_v17 = vpop.f32.mrb[24].mxu1 }
 0x451   :  { %v2201_v14 = vpop.f32.mrb[25].mxu0  ;;  %v2242_v26 = vpop.f32.mrb[25].mxu1 }
 0x452   :  { %v2251_v53 = vcombine.low %v2199_v19, %v2201_v14  ;;  %v2252_v1 = vcombine.low %v2240_v17, %v2242_v26  ;;  %v2203_v41 = vpop.f32.mrb[26].mxu0  ;;  %v2244_v33 = vpop.f32.mrb[26].mxu1 }
 0x453   :  { %v2204_v30 = vpop.f32.mrb[27].mxu0  ;;  %v2245_v39 = vpop.f32.mrb[27].mxu1 }
 0x454   :  { %v2259_v40 = vrot.slane %v2251_v53, %v6524_v29  ;;  %v2266_v24 = vrot.slane %v2252_v1, %v6524_v29 }
 0x456   :  { %v2267_v5 = vcombine.low %v2259_v40, %v2266_v24  ;;  %v2268_v58 = vcombine.high %v2259_v40, %v2266_v24 }
 0x458   :  { %v2275_v62 = vrot.slane %v2267_v5, %v6524_v29  ;;  %v2282_v61 = vrot.slane %v2268_v58, %v6524_v29  ;;  %v2163_v58 = vld [vmem:[#allocation3] sm:$0x3] }
 0x45a   :  { %v2285_v48 = vadd.f32 %v2275_v62, %v2157_v2  ;;  %v2286_v0 = vadd.f32 %v2282_v61, %v2159_v9  ;;  %v2346_v9 = vrot.slane %v2163_v58, %v6524_v29 }
 0x45c   :  { %v5038_v37 = vmul.f32 -1.442695, %v2285_v48  ;;  %v5039_v20 = vmul.f32 -1.442695, %v2286_v0  ;;  %v2301_v8 = vrot.slane %v2285_v48, 1  ;;  %v2302_v49 = vrot.slane %v2286_v0, 1 }
 0x45d   :  { %v2323_v19 = vrot.slane %v2285_v48, 3  ;;  %v2324_v17 = vrot.slane %v2286_v0, 3  ;;  %v2317_v14 = vrot.slane %v2285_v48, 2  ;;  %v2318_v26 = vrot.slane %v2286_v0, 2 }
 0x45e   :  { %5391 = vpow2.f32 %v5038_v37  ;;  %v5040_v52 = vmul.f32 -1.442695, %v2301_v8  ;;  %v5041_v4 = vmul.f32 -1.442695, %v2302_v49 }
 0x45f   :  { %5393 = vpow2.f32 %v5039_v20  ;;  %v5042_v53 = vmul.f32 -1.442695, %v2323_v19  ;;  %v5043_v1 = vmul.f32 -1.442695, %v2324_v17  ;;  %v2347_v20 = vcombine.high %v2346_v9, %v2346_v9 }
 0x460   :  { %5395 = vpow2.f32 %v5040_v52 }
 0x461   :  { %5397 = vpow2.f32 %v5041_v4 }
 0x462   :  { %5399 = vtanh.f32 %v2317_v14 }
 0x463   :  { %5401 = vtanh.f32 %v2318_v26 }
 0x464   :  { %5403 = vpow2.f32 %v5042_v53 }
 0x465   :  { %5405 = vpow2.f32 %v5043_v1 }
 0x468   :  { %v5392_v41 = vpop.eup %5391 }
 0x469   :  { %v5394_v33 = vpop.eup %5393  ;;  %v2293_v30 = vadd.f32 1.0, %v5392_v41 }
 0x46a   :  { %v5396_v39 = vpop.eup %5395  ;;  %v2294_v40 = vadd.f32 1.0, %v5394_v33  ;;  %v7375_v33 = vpop.permute.xlu0 %2381 }
 0x46b   :  { %v5398_v24 = vpop.eup %5397  ;;  %5407 = vrcp.f32 %v2293_v30  ;;  %v2311_v5 = vadd.f32 1.0, %v5396_v39  ;;  %v2354_v39 = vrot.slane %v2346_v9, %v6524_v29 }
 0x46c   :  { %5409 = vrcp.f32 %v2294_v40  ;;  %v2312_v2 = vadd.f32 1.0, %v5398_v24  ;;  %v5400_v62 = vpop.eup %5399 }
 0x46d   :  { %5411 = vrcp.f32 %v2311_v5  ;;  %v5402_v61 = vpop.eup %5401 }
 0x46e   :  { %5413 = vrcp.f32 %v2312_v2  ;;  %v5404_v37 = vpop.eup %5403 }
 0x46f   :  { %v5406_v52 = vpop.eup %5405  ;;  %v2333_v30 = vadd.f32 1.0, %v5404_v37  ;;  %v2430_v37 = vld [vmem:[#allocation7 + $0x4] ss:$8 sm:$0xf] }
 0x470   :  { %v2334_v2 = vadd.f32 1.0, %v5406_v52 }
 0x471   :  { %5415 = vrcp.f32 %v2333_v30 }
 0x472   :  { %v2472_v48 = vpop.f32.mrb[28].mxu0  ;;  %v2513_v0 = vpop.f32.mrb[28].mxu1  ;;  %5417 = vrcp.f32 %v2334_v2 }
 0x473   :  { %v2474_v8 = vpop.f32.mrb[29].mxu0  ;;  %v2515_v49 = vpop.f32.mrb[29].mxu1 }
 0x474   :  { %v2524_v4 = vcombine.low %v2472_v48, %v2474_v8  ;;  %v2525_v19 = vcombine.low %v2513_v0, %v2515_v49  ;;  %v2476_v17 = vpop.f32.mrb[30].mxu0  ;;  %v2517_v14 = vpop.f32.mrb[30].mxu1  ;;  %v2361_v48 = vrot.slane %v2347_v20, %v6524_v29  ;;  %v2398_v0 = vrot.slane %v2163_v58, 1 }
 0x475   :  { %v5408_v26 = vpop.eup %5407  ;;  %v2477_v53 = vpop.f32.mrb[31].mxu0 }
 0x476   :  { %v2518_v1 = vpop.f32.mrb[31].mxu1  ;;  %v5410_v41 = vpop.eup %5409  ;;  %v2532_v40 = vrot.slane %v2524_v4, %v6524_v29  ;;  %v2539_v24 = vrot.slane %v2525_v19, %v6524_v29  ;;  %v2366_v14 = vmul.f32 %v5408_v26, %v5400_v62 }
 0x477   :  { %v5412_v5 = vpop.eup %5411  ;;  %v2396_v49 = vpop.permute.xlu1 %2395  ;;  %v2367_v28 = vmul.f32 %v5410_v41, %v5402_v61 }
 0x478   :  { %v5414_v8 = vpop.eup %5413  ;;  %v2364_v17 = vmul.f32 %v5412_v5, %v2354_v39  ;;  %v2540_v53 = vcombine.low %v2532_v40, %v2539_v24  ;;  %v2541_v1 = vcombine.high %v2532_v40, %v2539_v24  ;;  %v2377_v20 = vpop.permute.xlu0 %2376  ;;  %v2402_v39 = vmul.f32 %v2398_v0, %v2396_v49 }
 0x479   :  { %v2365_v45 = vmul.f32 %v5414_v8, %v2361_v48 }
 0x47a   :  { %v2368_v9 = vadd.f32 %v2366_v14, %v2364_v17  ;;  %v2548_v4 = vrot.slane %v2540_v53, %v6524_v29  ;;  %v2555_v19 = vrot.slane %v2541_v1, %v6524_v29 }
 0x47b   :  { %v2369_v52 = vadd.f32 %v2367_v28, %v2365_v45  ;;  %v2391_v61 = vpop.permute.xlu1 %2390  ;;  %v5416_v14 = vpop.eup %5415 }
 0x47c   :  { %5419 = vtanh.f32 %v2368_v9  ;;  %v2558_v25 = vadd.f32 %v2548_v4, %v2430_v37  ;;  %v2559_v34 = vadd.f32 %v2555_v19, %v2432_v15  ;;  %v2384_v62 = vmul.f32 %v2377_v20, %v2368_v9  ;;  %v5418_v53 = vpop.eup %5417 }
 0x47d   :  { %5421 = vtanh.f32 %v2369_v52  ;;  %v2385_v26 = vmul.f32 %v7375_v33, %v2369_v52  ;;  %v2401_v24 = vmul.f32 %v2391_v61, %v2163_v58  ;;  %v2414_v58 = vrot.slane %v7113_v54, 1 }
 0x47e   :  { %v5044_v41 = vmul.f32 -1.442695, %v2558_v25  ;;  %v5045_v40 = vmul.f32 -1.442695, %v2559_v34  ;;  %v2574_v30 = vrot.slane %v2558_v25, 1  ;;  %v2575_v48 = vrot.slane %v2559_v34, 1 }
 0x47f   :  { %v2404_v5 = vadd.f32 %v2402_v39, %v2385_v26  ;;  %v2403_v2 = vadd.f32 %v2401_v24, %v2384_v62  ;;  %v2596_v17 = vrot.slane %v2558_v25, 3  ;;  %v2597_v0 = vrot.slane %v2559_v34, 3 }
 0x480   :  { %5423 = vpow2.f32 %v5044_v41  ;;  %v5046_v8 = vmul.f32 -1.442695, %v2574_v30  ;;  %v5047_v45 = vmul.f32 -1.442695, %v2575_v48  ;;  %v2590_v1 = vrot.slane %v2558_v25, 2 }
 0x481   :  { %v2407_v28 = vrot.slane %v2404_v5, 7  ;;  %5425 = vpow2.f32 %v5045_v40  ;;  %v2591_v9 = vrot.slane %v2559_v34, 2  ;;  %v5048_v52 = vmul.f32 -1.442695, %v2596_v17 }
 0x482   :  { %5427 = vpow2.f32 %v5046_v8  ;;  %v5049_v26 = vmul.f32 -1.442695, %v2597_v0  ;;  %v2418_v30 = vmul.f32 %v2414_v58, %v2396_v49  ;;  %v2417_v5 = vmul.f32 %v2391_v61, %v7113_v54  ;;  %v7396_v58 = vpop.permute.xlu0 %2654 }
 0x483   :  { %v2408_v15 = vsel %vm609_vm0, %v2407_v28, %v2403_v2  ;;  %5429 = vpow2.f32 %v5047_v45  ;;  %v2436_v28 = vld [vmem:[#allocation5] sm:$0x3] }
 0x484   :  { %2410 = vst [vmem:[#allocation3] sm:$0x3] %v2408_v15  ;;  %5431 = vtanh.f32 %v2590_v1  ;;  %v2619_v54 = vrot.slane %v2436_v28, %v6524_v29 }
 0x485   :  { %5433 = vtanh.f32 %v2591_v9 }
 0x486   :  { %v5420_v37 = vpop.eup %5419  ;;  %5435 = vpow2.f32 %v5048_v52  ;;  %v2620_v0 = vcombine.high %v2619_v54, %v2619_v54 }
 0x487   :  { %v5422_v4 = vpop.eup %5421  ;;  %v2372_v19 = vmul.f32 %v5420_v37, %v5416_v14  ;;  %5437 = vpow2.f32 %v5049_v26 }
 0x488   :  { %v2373_v62 = vmul.f32 %v5422_v4, %v5418_v53  ;;  %v2627_v4 = vrot.slane %v2619_v54, %v6524_v29  ;;  %v2634_v26 = vrot.slane %v2620_v0, %v6524_v29  ;;  %v7443_v0 = vld [vmem:[%s8331_s5 + $0x28] ss:$16 sps:$4 sm:$0xff]  }
 0x489   :  { %v2411_v39 = vmul.f32 %v2377_v20, %v2372_v19 }
 0x48a   :  { %v5424_v41 = vpop.eup %5423  ;;  %v2412_v40 = vmul.f32 %v7375_v33, %v2373_v62 }
 0x48b   :  { %v5426_v24 = vpop.eup %5425  ;;  %2427 = vst [vmem:[%s8332_s6 + $0x3] sm:$0x1] %v2411_v39  ;;  %v2566_v25 = vadd.f32 1.0, %v5424_v41  ;;  %v2419_v8 = vadd.f32 %v2417_v5, %v2411_v39  ;;  %v2671_v5 = vrot.slane %v2436_v28, 1 }
 0x48c   :  { %v5428_v34 = vpop.eup %5427  ;;  %v2420_v48 = vadd.f32 %v2418_v30, %v2412_v40  ;;  %2428 = vst [vmem:[%s8332_s6 + $0xb] sm:$0x1] %v2412_v40  ;;  %v2567_v20 = vadd.f32 1.0, %v5426_v24  ;;  %v7404_v40 = vpop.permute.xlu1 %2668 }
 0x48d   :  { %v5430_v33 = vpop.eup %5429  ;;  %5439 = vrcp.f32 %v2566_v25  ;;  %v2584_v49 = vadd.f32 1.0, %v5428_v34 }
 0x48e   :  { %v2423_v2 = vrot.slane %v2420_v48, 7  ;;  %5441 = vrcp.f32 %v2567_v20  ;;  %v2585_v45 = vadd.f32 1.0, %v5430_v33  ;;  %v5432_v61 = vpop.eup %5431  ;;  %v7409_v20 = vld [vmem:[%s8331_s5] ss:$16 sps:$4 sm:$0xff]   ;;  %v7415_v33 = vld [vmem:[%s8331_s5 + $0x8] ss:$16 sps:$4 sm:$0xff]  }
 0x48f   :  { %5443 = vrcp.f32 %v2584_v49  ;;  %v5434_v17 = vpop.eup %5433 }
 0x490   :  { %v2424_v15 = vsel %vm609_vm0, %v2423_v2, %v2419_v8  ;;  %5445 = vrcp.f32 %v2585_v45  ;;  %v5436_v14 = vpop.eup %5435  ;;  %v7421_v8 = vld [vmem:[%s8331_s5 + $0x24] ss:$16 sps:$4 sm:$0xff]   ;;  %v7427_v2 = vld [vmem:[%s8331_s5 + $0x2c] ss:$16 sps:$4 sm:$0xff]   ;;  %v2650_v45 = vpop.permute.xlu0 %2649 }
 0x491   :  { %2426 = vst [vmem:[#allocation2] sm:$0x3] %v2424_v15  ;;  %v5438_v53 = vpop.eup %5437  ;;  %v2606_v9 = vadd.f32 1.0, %v5436_v14  ;;  %v7437_v14 = vld [vmem:[%s8331_s5 + $0x20] ss:$16 sps:$4 sm:$0xff]  }
 0x492   :  { %v2607_v62 = vadd.f32 1.0, %v5438_v53 }
 0x493   :  { %5447 = vrcp.f32 %v2606_v9  ;;  %v7455_v9 = vld [vmem:[%s8331_s5 + $0x4c] ss:$16 sps:$4 sm:$0xff]  }
 0x494   :  { %5449 = vrcp.f32 %v2607_v62  ;;  %v7467_v62 = vld [vmem:[%s8331_s5 + $0x48] ss:$16 sps:$4 sm:$0xff]  }
 0x497   :  { %v5440_v1 = vpop.eup %5439 }
 0x498   :  { %v5442_v37 = vpop.eup %5441  ;;  %v7399_v19 = vld [vmem:[#allocation2] sm:$0x3]  ;;  %v2639_v24 = vmul.f32 %v5440_v1, %v5432_v61  ;;  %v2675_v61 = vmul.f32 %v2671_v5, %v7404_v40 }
 0x499   :  { %v5444_v52 = vpop.eup %5443  ;;  %v2710_v39 = vpack.c.bf16 %v7399_v19, %v7399_v19  ;;  %v2640_v34 = vmul.f32 %v5442_v37, %v5434_v17  ;;  %v2664_v17 = vpop.permute.xlu1 %2663  ;;  %v7449_v37 = vld [vmem:[%s8331_s5 + $0x44] ss:$16 sps:$4 sm:$0xff]   ;;  %v7487_v5 = vld [vmem:[%s8331_s5 + $0x60] ss:$16 sps:$4 sm:$0xff]  }
 0x49a   :  { %v5446_v41 = vpop.eup %5445  ;;  %v2637_v30 = vmul.f32 %v5444_v52, %v2627_v4  ;;  %v2674_v53 = vmul.f32 %v2664_v17, %v2436_v28  ;;  %v7461_v28 = vld [vmem:[%s8331_s5 + $0x40] ss:$16 sps:$4 sm:$0xff]  }
 0x49b   :  { %v2638_v25 = vmul.f32 %v5446_v41, %v2634_v26  ;;  %2744 = vmatmul.mubr.bf16.vlgmr.msra.gmra.mrb[32].mxu0 %v2710_v39  ;;  %2785 = vmatmul.mubr.bf16.vlgmr.msra.gmra.mrb[32].mxu1 %v2710_v39  ;;  %v7474_v39 = vld [vmem:[%s8331_s5 + $0x64] ss:$16 sps:$4 sm:$0xff]   ;;  %v7480_v41 = vld [vmem:[%s8331_s5 + $0x6c] ss:$16 sps:$4 sm:$0xff]  }
 0x49c   :  { %v2641_v48 = vadd.f32 %v2639_v24, %v2637_v30  ;;  %2985 = vmatpush1.bf16.msra.mxu0 %v7409_v20  ;;  %3026 = vmatpush1.bf16.msra.mxu1 %v7415_v33 }
 0x49d   :  { %v2642_v49 = vadd.f32 %v2640_v34, %v2638_v25  ;;  %2986 = vmatprep.subr.bf16.mxu0 %v7421_v8  ;;  %3027 = vmatprep.subr.bf16.mxu1 %v7427_v2  ;;  %v5448_v30 = vpop.eup %5447  ;;  %v2687_v34 = vrot.slane %v7172_v35, 1 }
 0x49e   :  { %5451 = vtanh.f32 %v2641_v48  ;;  %3016 = vmatprep.mubr.bf16.mxu0 %v8370_v43  ;;  %3057 = vmatprep.mubr.bf16.mxu1 %v8370_v43  ;;  %v2657_v15 = vmul.f32 %v2650_v45, %v2641_v48  ;;  %v5450_v24 = vpop.eup %5449  ;;  %v7493_v48 = vld [vmem:[%s8331_s5 + $0x68] ss:$16 sps:$4 sm:$0xff]  }
 0x49f   :  { %5453 = vtanh.f32 %v2642_v49  ;;  %v2658_v54 = vmul.f32 %v7396_v58, %v2642_v49 }
 0x4a0   :  { %2987 = vmatpush1.bf16.msra.mxu0 %v7437_v14  ;;  %3028 = vmatpush1.bf16.msra.mxu1 %v7443_v0  ;;  %v2676_v4 = vadd.f32 %v2674_v53, %v2657_v15 }
 0x4a1   :  { %v2677_v1 = vadd.f32 %v2675_v61, %v2658_v54  ;;  %2988 = vmatprep.subr.bf16.mxu0 %v7449_v37  ;;  %3029 = vmatprep.subr.bf16.mxu1 %v7455_v9  ;;  %v7499_v54 = vld [vmem:[%s8331_s5 + $0x84] ss:$16 sps:$4 sm:$0xff]   ;;  %v7505_v61 = vld [vmem:[%s8331_s5 + $0x8c] ss:$16 sps:$4 sm:$0xff]  }
 0x4a3   :  { %v2680_v52 = vrot.slane %v2677_v1, 7 }
 0x4a4   :  { %2989 = vmatpush1.bf16.msra.mxu0 %v7461_v28  ;;  %3030 = vmatpush1.bf16.msra.mxu1 %v7467_v62 }
 0x4a5   :  { %v2681_v26 = vsel %vm609_vm0, %v2680_v52, %v2676_v4  ;;  %2990 = vmatprep.subr.bf16.mxu0 %v7474_v39  ;;  %3031 = vmatprep.subr.bf16.mxu1 %v7480_v41  ;;  %v2691_v52 = vmul.f32 %v2687_v34, %v7404_v40  ;;  %v7534_v40 = vld [vmem:[%s8331_s5 + $0xac] ss:$16 sps:$4 sm:$0xff]  }
 0x4a6   :  { %2683 = vst [vmem:[#allocation5] sm:$0x3] %v2681_v26  ;;  %v7513_v26 = vld [vmem:[%s8331_s5 + $0x80] ss:$16 sps:$4 sm:$0xff]  }
 0x4a8   :  { %v5452_v25 = vpop.eup %5451  ;;  %2991 = vmatpush1.bf16.msra.mxu0 %v7487_v5  ;;  %3032 = vmatpush1.bf16.msra.mxu1 %v7493_v48 }
 0x4a9   :  { %v5454_v49 = vpop.eup %5453  ;;  %v2645_v15 = vmul.f32 %v5452_v25, %v5448_v30  ;;  %2992 = vmatprep.subr.bf16.mxu0 %v7499_v54  ;;  %3033 = vmatprep.subr.bf16.mxu1 %v7505_v61  ;;  %v7519_v30 = vld [vmem:[%s8331_s5 + $0x88] ss:$16 sps:$4 sm:$0xff]  }
 0x4aa   :  { %v2646_v53 = vmul.f32 %v5454_v49, %v5450_v24  ;;  %v7544_v49 = vld [vmem:[%s8331_s5 + $0xa0] ss:$16 sps:$4 sm:$0xff]  }
 0x4ab   :  { %v2684_v1 = vmul.f32 %v2650_v45, %v2645_v15  ;;  %v2690_v45 = vmul.f32 %v2664_v17, %v7172_v35  ;;  %v7550_v15 = vld [vmem:[%s8331_s5 + $0xa8] ss:$16 sps:$4 sm:$0xff]   ;;  %v7556_v35 = vld [vmem:[%s8331_s5 + $0xc4] ss:$16 sps:$4 sm:$0xff]   ;;  %v7562_v17 = vld [vmem:[%s8331_s5 + $0xcc] ss:$16 sps:$4 sm:$0xff]  }
 0x4ac   :  { %v2685_v4 = vmul.f32 %v7396_v58, %v2646_v53  ;;  %2993 = vmatpush1.bf16.msra.mxu0 %v7513_v26  ;;  %3034 = vmatpush1.bf16.msra.mxu1 %v7519_v30  ;;  %v7528_v58 = vld [vmem:[%s8331_s5 + $0xa4] ss:$16 sps:$4 sm:$0xff]  }
 0x4ad   :  { %2700 = vst [vmem:[%s8333_s7 + $0x4] sm:$0x1] %v2684_v1  ;;  %2994 = vmatprep.subr.bf16.mxu0 %v7528_v58  ;;  %3035 = vmatprep.subr.bf16.mxu1 %v7534_v40  ;;  %v2692_v25 = vadd.f32 %v2690_v45, %v2684_v1  ;;  %v7569_v1 = vld [vmem:[%s8331_s5 + $0xc0] ss:$16 sps:$4 sm:$0xff]   ;;  %v7587_v45 = vld [vmem:[%s8331_s5 + $0xec] ss:$16 sps:$4 sm:$0xff]  }
 0x4ae   :  { %v2693_v24 = vadd.f32 %v2691_v52, %v2685_v4  ;;  %2701 = vst [vmem:[%s8333_s7 + $0xc] sm:$0x1] %v2685_v4  ;;  %v7575_v4 = vld [vmem:[%s8331_s5 + $0xc8] ss:$16 sps:$4 sm:$0xff]   ;;  %v7581_v52 = vld [vmem:[%s8331_s5 + $0xe4] ss:$16 sps:$4 sm:$0xff]  }
 0x4b0   :  { %v2696_v34 = vrot.slane %v2693_v24, 7  ;;  %2995 = vmatpush1.bf16.msra.mxu0 %v7544_v49  ;;  %3036 = vmatpush1.bf16.msra.mxu1 %v7550_v15  ;;  %v7593_v24 = vld [vmem:[%s8331_s5 + $0xe0] ss:$16 sps:$4 sm:$0xff]  }
 0x4b1   :  { %2996 = vmatprep.subr.bf16.mxu0 %v7556_v35  ;;  %3037 = vmatprep.subr.bf16.mxu1 %v7562_v17 }
 0x4b2   :  { %v2697_v53 = vsel %vm609_vm0, %v2696_v34, %v2692_v25  ;;  %v7599_v25 = vld [vmem:[%s8331_s5 + $0xe8] ss:$16 sps:$4 sm:$0xff]  }
 0x4b3   :  { %2699 = vst [vmem:[#allocation4] sm:$0x3] %v2697_v53  ;;  %8396 = vst [vmem:[#allocation11_spill] sm:$0xff] %v7599_v25 }
 0x4b4   :  { %2997 = vmatpush1.bf16.msra.mxu0 %v7569_v1  ;;  %3038 = vmatpush1.bf16.msra.mxu1 %v7575_v4 }
 0x4b5   :  { %2998 = vmatprep.subr.bf16.mxu0 %v7581_v52  ;;  %3039 = vmatprep.subr.bf16.mxu1 %v7587_v45 }
 0x4b8   :  { %2999 = vmatpush1.bf16.msra.mxu0 %v7593_v24  ;;  %3040 = vmatpush1.bf16.msra.mxu1 %v7599_v25 }
 0x4b9   :  { %3257 = vmatprep.subr.bf16.mxu0 %v7163_v59  ;;  %3298 = vmatprep.subr.bf16.mxu1 %v7169_v55  ;;  %v8397_v59 = vld [vmem:[#allocation14_spill] sm:$0xff]  ;;  %v8398_v55 = vld [vmem:[#allocation15_spill] sm:$0xff] }
 0x4ba   :  { %v7604_v34 = vld [vmem:[#allocation4] sm:$0x3] }
 0x4bb   :  { %v2983_v53 = vpack.c.bf16 %v7604_v34, %v7604_v34 }
 0x4bd   :  { %3017 = vmatmul.mubr.bf16.vlgmr.msra.gmra.mrb[36].mxu0 %v2983_v53  ;;  %3058 = vmatmul.mubr.bf16.vlgmr.msra.gmra.mrb[36].mxu1 %v2983_v53 }
 0x4be   :  { %3258 = vmatpush1.bf16.msra.mxu0 %v7179_v6  ;;  %3299 = vmatpush1.bf16.msra.mxu1 %v7185_v56  ;;  %v8399_v6 = vld [vmem:[#allocation8_spill] sm:$0xff]  ;;  %v8400_v56 = vld [vmem:[#allocation9_spill] sm:$0xff] }
 0x4bf   :  { %3259 = vmatprep.subr.bf16.mxu0 %v7191_v47  ;;  %3300 = vmatprep.subr.bf16.mxu1 %v7197_v50  ;;  %v8401_v47 = vld [vmem:[#allocation10_spill] sm:$0xff] }
 0x4c0   :  { %3289 = vmatprep.mubr.bf16.mxu0 %v8370_v43  ;;  %3330 = vmatprep.mubr.bf16.mxu1 %v8370_v43 }
 0x4c2   :  { %3260 = vmatpush1.bf16.msra.mxu0 %v7205_v42  ;;  %3301 = vmatpush1.bf16.msra.mxu1 %v7211_v38 }
 0x4c3   :  { %3261 = vmatprep.subr.bf16.mxu0 %v7217_v60  ;;  %3302 = vmatprep.subr.bf16.mxu1 %v7223_v36 }
 0x4c6   :  { %3262 = vmatpush1.bf16.msra.mxu0 %v7229_v23  ;;  %3303 = vmatpush1.bf16.msra.mxu1 %v7235_v31 }
 0x4c7   :  { %3263 = vmatprep.subr.bf16.mxu0 %v7241_v51  ;;  %3304 = vmatprep.subr.bf16.mxu1 %v7247_v16 }
 0x4ca   :  { %3264 = vmatpush1.bf16.msra.mxu0 %v7253_v46  ;;  %3305 = vmatpush1.bf16.msra.mxu1 %v7259_v27 }
 0x4cb   :  { %3265 = vmatprep.subr.bf16.mxu0 %v7265_v63  ;;  %3306 = vmatprep.subr.bf16.mxu1 %v7271_v18 }
 0x4ce   :  { %3266 = vmatpush1.bf16.msra.mxu0 %v7277_v21  ;;  %3307 = vmatpush1.bf16.msra.mxu1 %v7283_v44  ;;  %v2703_v44 = vld [vmem:[#allocation6 + $0x4] ss:$8 sm:$0xf] }
 0x4cf   :  { %3267 = vmatprep.subr.bf16.mxu0 %v7289_v32  ;;  %3308 = vmatprep.subr.bf16.mxu1 %v7295_v22  ;;  %v2705_v32 = vld [vmem:[#allocation6 + $0x24] ss:$8 sm:$0xf] }
 0x4d2   :  { %3268 = vmatpush1.bf16.msra.mxu0 %v7301_v7  ;;  %3309 = vmatpush1.bf16.msra.mxu1 %v7307_v11 }
 0x4d3   :  { %3269 = vmatprep.subr.bf16.mxu0 %v7313_v3  ;;  %3310 = vmatprep.subr.bf16.mxu1 %v7319_v12 }
 0x4d6   :  { %3270 = vmatpush1.bf16.msra.mxu0 %v7325_v10  ;;  %3311 = vmatpush1.bf16.msra.mxu1 %v7331_v13 }
 0x4d7   :  { %3271 = vmatprep.subr.bf16.mxu0 %v7337_v57  ;;  %3312 = vmatprep.subr.bf16.mxu1 %v8397_v59 }
 0x4da   :  { %3272 = vmatpush1.bf16.msra.mxu0 %v8398_v55  ;;  %3313 = vmatpush1.bf16.msra.mxu1 %v8399_v6 }
 0x4db   :  { %3530 = vmatprep.subr.bf16.mxu0 %v8400_v56  ;;  %3571 = vmatprep.subr.bf16.mxu1 %v8401_v47 }
 0x56e   :  { %v2745_v50 = vpop.f32.mrb[32].mxu0  ;;  %v2786_v42 = vpop.f32.mrb[32].mxu1 }
 0x56f   :  { %v2747_v38 = vpop.f32.mrb[33].mxu0  ;;  %v2788_v60 = vpop.f32.mrb[33].mxu1 }
 0x570   :  { %v2797_v36 = vcombine.low %v2745_v50, %v2747_v38  ;;  %v2798_v23 = vcombine.low %v2786_v42, %v2788_v60  ;;  %v2749_v31 = vpop.f32.mrb[34].mxu0  ;;  %v2790_v51 = vpop.f32.mrb[34].mxu1 }
 0x571   :  { %v2750_v16 = vpop.f32.mrb[35].mxu0  ;;  %v2791_v46 = vpop.f32.mrb[35].mxu1 }
 0x572   :  { %v2805_v27 = vrot.slane %v2797_v36, %v6524_v29  ;;  %v2812_v63 = vrot.slane %v2798_v23, %v6524_v29  ;;  %v2709_v46 = vld [vmem:[#allocation3] sm:$0x3] }
 0x574   :  { %v2813_v18 = vcombine.low %v2805_v27, %v2812_v63  ;;  %v2814_v21 = vcombine.high %v2805_v27, %v2812_v63  ;;  %v2892_v63 = vrot.slane %v2709_v46, %v6524_v29 }
 0x576   :  { %v2821_v22 = vrot.slane %v2813_v18, %v6524_v29  ;;  %v2828_v7 = vrot.slane %v2814_v21, %v6524_v29 }
 0x578   :  { %v2831_v11 = vadd.f32 %v2821_v22, %v2703_v44  ;;  %v2832_v3 = vadd.f32 %v2828_v7, %v2705_v32  ;;  %v2893_v7 = vcombine.high %v2892_v63, %v2892_v63 }
 0x57a   :  { %v5050_v12 = vmul.f32 -1.442695, %v2831_v11  ;;  %v5051_v10 = vmul.f32 -1.442695, %v2832_v3  ;;  %v2847_v13 = vrot.slane %v2831_v11, 1  ;;  %v2848_v57 = vrot.slane %v2832_v3, 1 }
 0x57b   :  { %v2869_v55 = vrot.slane %v2831_v11, 3  ;;  %v2870_v6 = vrot.slane %v2832_v3, 3  ;;  %v2863_v56 = vrot.slane %v2831_v11, 2  ;;  %v2864_v47 = vrot.slane %v2832_v3, 2 }
 0x57c   :  { %5455 = vpow2.f32 %v5050_v12  ;;  %v5052_v53 = vmul.f32 -1.442695, %v2847_v13  ;;  %v5053_v59 = vmul.f32 -1.442695, %v2848_v57 }
 0x57d   :  { %5457 = vpow2.f32 %v5051_v10  ;;  %v5054_v50 = vmul.f32 -1.442695, %v2869_v55  ;;  %v5055_v42 = vmul.f32 -1.442695, %v2870_v6 }
 0x57e   :  { %5459 = vpow2.f32 %v5052_v53 }
 0x57f   :  { %5461 = vpow2.f32 %v5053_v59 }
 0x580   :  { %5463 = vtanh.f32 %v2863_v56 }
 0x581   :  { %5465 = vtanh.f32 %v2864_v47  ;;  %v7647_v47 = vpop.permute.xlu0 %2927 }
 0x582   :  { %5467 = vpow2.f32 %v5054_v50 }
 0x583   :  { %5469 = vpow2.f32 %v5055_v42  ;;  %v2900_v42 = vrot.slane %v2892_v63, %v6524_v29 }
 0x586   :  { %v5456_v38 = vpop.eup %5455 }
 0x587   :  { %v5458_v60 = vpop.eup %5457  ;;  %v2839_v36 = vadd.f32 1.0, %v5456_v38 }
 0x588   :  { %v5460_v23 = vpop.eup %5459  ;;  %v2840_v31 = vadd.f32 1.0, %v5458_v60 }
 0x589   :  { %v5462_v51 = vpop.eup %5461  ;;  %5471 = vrcp.f32 %v2839_v36  ;;  %v2857_v16 = vadd.f32 1.0, %v5460_v23 }
 0x58a   :  { %5473 = vrcp.f32 %v2840_v31  ;;  %v2858_v27 = vadd.f32 1.0, %v5462_v51  ;;  %v5464_v18 = vpop.eup %5463  ;;  %v2907_v31 = vrot.slane %v2893_v7, %v6524_v29  ;;  %v2944_v51 = vrot.slane %v2709_v46, 1  ;;  %v2923_v7 = vpop.permute.xlu0 %2922 }
 0x58b   :  { %5475 = vrcp.f32 %v2857_v16  ;;  %v5466_v21 = vpop.eup %5465 }
 0x58c   :  { %5477 = vrcp.f32 %v2858_v27  ;;  %v5468_v22 = vpop.eup %5467  ;;  %v2942_v27 = vpop.permute.xlu1 %2941 }
 0x58d   :  { %v5470_v12 = vpop.eup %5469  ;;  %v2879_v50 = vadd.f32 1.0, %v5468_v22  ;;  %v2976_v22 = vld [vmem:[#allocation7 + $0x3] ss:$8 sm:$0xf] }
 0x58e   :  { %v2880_v23 = vadd.f32 1.0, %v5470_v12 }
 0x58f   :  { %5479 = vrcp.f32 %v2879_v50 }
 0x590   :  { %v3018_v44 = vpop.f32.mrb[36].mxu0  ;;  %v3059_v32 = vpop.f32.mrb[36].mxu1  ;;  %5481 = vrcp.f32 %v2880_v23 }
 0x591   :  { %v3020_v11 = vpop.f32.mrb[37].mxu0  ;;  %v3061_v3 = vpop.f32.mrb[37].mxu1 }
 0x592   :  { %v3070_v10 = vcombine.low %v3018_v44, %v3020_v11  ;;  %v3071_v13 = vcombine.low %v3059_v32, %v3061_v3  ;;  %v3022_v57 = vpop.f32.mrb[38].mxu0  ;;  %v3063_v53 = vpop.f32.mrb[38].mxu1 }
 0x593   :  { %v5472_v59 = vpop.eup %5471  ;;  %v3023_v55 = vpop.f32.mrb[39].mxu0 }
 0x594   :  { %v3064_v6 = vpop.f32.mrb[39].mxu1  ;;  %v5474_v56 = vpop.eup %5473  ;;  %v3078_v38 = vrot.slane %v3070_v10, %v6524_v29  ;;  %v3085_v60 = vrot.slane %v3071_v13, %v6524_v29  ;;  %v2912_v32 = vmul.f32 %v5472_v59, %v5464_v18  ;;  %v2978_v55 = vld [vmem:[#allocation7 + $0x23] ss:$8 sm:$0xf] }
 0x595   :  { %v5476_v36 = vpop.eup %5475  ;;  %v2913_v53 = vmul.f32 %v5474_v56, %v5466_v21  ;;  %v2937_v21 = vpop.permute.xlu1 %2936 }
 0x596   :  { %v5478_v16 = vpop.eup %5477  ;;  %v2910_v44 = vmul.f32 %v5476_v36, %v2900_v42  ;;  %v3086_v11 = vcombine.low %v3078_v38, %v3085_v60  ;;  %v3087_v3 = vcombine.high %v3078_v38, %v3085_v60  ;;  %v2948_v42 = vmul.f32 %v2944_v51, %v2942_v27 }
 0x597   :  { %v2911_v57 = vmul.f32 %v5478_v16, %v2907_v31  ;;  %v2947_v60 = vmul.f32 %v2937_v21, %v2709_v46  ;;  %v2960_v46 = vrot.slane %v7399_v19, 1 }
 0x598   :  { %v2914_v63 = vadd.f32 %v2912_v32, %v2910_v44  ;;  %v3094_v10 = vrot.slane %v3086_v11, %v6524_v29  ;;  %v3101_v13 = vrot.slane %v3087_v3, %v6524_v29 }
 0x599   :  { %v2915_v12 = vadd.f32 %v2913_v53, %v2911_v57  ;;  %v5480_v57 = vpop.eup %5479 }
 0x59a   :  { %5483 = vtanh.f32 %v2914_v63  ;;  %v3104_v6 = vadd.f32 %v3094_v10, %v2976_v22  ;;  %v3105_v25 = vadd.f32 %v3101_v13, %v2978_v55  ;;  %v2930_v18 = vmul.f32 %v2923_v7, %v2914_v63  ;;  %v5482_v53 = vpop.eup %5481 }
 0x59b   :  { %5485 = vtanh.f32 %v2915_v12  ;;  %v2931_v59 = vmul.f32 %v7647_v47, %v2915_v12 }
 0x59c   :  { %v5056_v56 = vmul.f32 -1.442695, %v3104_v6  ;;  %v5057_v38 = vmul.f32 -1.442695, %v3105_v25  ;;  %v3120_v50 = vrot.slane %v3104_v6, 1  ;;  %v3121_v31 = vrot.slane %v3105_v25, 1 }
 0x59d   :  { %v2950_v36 = vadd.f32 %v2948_v42, %v2931_v59  ;;  %v2949_v23 = vadd.f32 %v2947_v60, %v2930_v18  ;;  %v3142_v3 = vrot.slane %v3104_v6, 3  ;;  %v3143_v51 = vrot.slane %v3105_v25, 3 }
 0x59e   :  { %5487 = vpow2.f32 %v5056_v56  ;;  %v5058_v16 = vmul.f32 -1.442695, %v3120_v50  ;;  %v5059_v32 = vmul.f32 -1.442695, %v3121_v31  ;;  %v3136_v22 = vrot.slane %v3104_v6, 2 }
 0x59f   :  { %v2953_v44 = vrot.slane %v2950_v36, 7  ;;  %5489 = vpow2.f32 %v5057_v38  ;;  %v3137_v63 = vrot.slane %v3105_v25, 2  ;;  %v5060_v12 = vmul.f32 -1.442695, %v3142_v3 }
 0x5a0   :  { %5491 = vpow2.f32 %v5058_v16  ;;  %v5061_v59 = vmul.f32 -1.442695, %v3143_v51  ;;  %v2964_v38 = vmul.f32 %v2960_v46, %v2942_v27  ;;  %v2963_v36 = vmul.f32 %v2937_v21, %v7399_v19  ;;  %v3201_v46 = vpop.permute.xlu0 %3200 }
 0x5a1   :  { %v2954_v11 = vsel %vm609_vm0, %v2953_v44, %v2949_v23  ;;  %5493 = vpow2.f32 %v5059_v32  ;;  %v2982_v44 = vld [vmem:[#allocation5] sm:$0x3] }
 0x5a2   :  { %2956 = vst [vmem:[#allocation3] sm:$0x3] %v2954_v11  ;;  %5495 = vtanh.f32 %v3136_v22  ;;  %v3165_v19 = vrot.slane %v2982_v44, %v6524_v29 }
 0x5a3   :  { %5497 = vtanh.f32 %v3137_v63 }
 0x5a4   :  { %v5484_v55 = vpop.eup %5483  ;;  %5499 = vpow2.f32 %v5060_v12  ;;  %v3166_v51 = vcombine.high %v3165_v19, %v3165_v19 }
 0x5a5   :  { %v5486_v10 = vpop.eup %5485  ;;  %v2918_v13 = vmul.f32 %v5484_v55, %v5480_v57  ;;  %5501 = vpow2.f32 %v5061_v59 }
 0x5a6   :  { %v2919_v18 = vmul.f32 %v5486_v10, %v5482_v53  ;;  %v3173_v10 = vrot.slane %v3165_v19, %v6524_v29  ;;  %v3180_v59 = vrot.slane %v3166_v51, %v6524_v29  ;;  %v7803_v51 = vld [vmem:[%s8330_s4 + $0x6c] ss:$16 sps:$4 sm:$0xff]  }
 0x5a7   :  { %v2957_v42 = vmul.f32 %v2923_v7, %v2918_v13 }
 0x5a8   :  { %v5488_v56 = vpop.eup %5487  ;;  %v2958_v50 = vmul.f32 %v7647_v47, %v2919_v18 }
 0x5a9   :  { %v5490_v60 = vpop.eup %5489  ;;  %2973 = vst [vmem:[%s8332_s6 + $0x4] sm:$0x1] %v2957_v42  ;;  %v3112_v6 = vadd.f32 1.0, %v5488_v56  ;;  %v2965_v16 = vadd.f32 %v2963_v36, %v2957_v42  ;;  %v3217_v36 = vrot.slane %v2982_v44, 1 }
 0x5aa   :  { %v5492_v25 = vpop.eup %5491  ;;  %v2966_v31 = vadd.f32 %v2964_v38, %v2958_v50  ;;  %2974 = vst [vmem:[%s8332_s6 + $0xc] sm:$0x1] %v2958_v50  ;;  %v3113_v7 = vadd.f32 1.0, %v5490_v60  ;;  %v3215_v38 = vpop.permute.xlu1 %3214 }
 0x5ab   :  { %v5494_v27 = vpop.eup %5493  ;;  %5503 = vrcp.f32 %v3112_v6  ;;  %v3130_v47 = vadd.f32 1.0, %v5492_v25 }
 0x5ac   :  { %v2969_v23 = vrot.slane %v2966_v31, 7  ;;  %5505 = vrcp.f32 %v3113_v7  ;;  %v3131_v32 = vadd.f32 1.0, %v5494_v27  ;;  %v5496_v21 = vpop.eup %5495  ;;  %v3196_v27 = vpop.permute.xlu0 %3195 }
 0x5ad   :  { %5507 = vrcp.f32 %v3130_v47  ;;  %v5498_v3 = vpop.eup %5497 }
 0x5ae   :  { %v2970_v11 = vsel %vm609_vm0, %v2969_v23, %v2965_v16  ;;  %5509 = vrcp.f32 %v3131_v32  ;;  %v5500_v57 = vpop.eup %5499  ;;  %v3221_v23 = vmul.f32 %v3217_v36, %v3215_v38  ;;  %v3210_v32 = vpop.permute.xlu1 %3209  ;;  %v7905_v36 = vld [vmem:[%s8330_s4 + $0xe0] ss:$16 sps:$4 sm:$0xff]  }
 0x5af   :  { %2972 = vst [vmem:[#allocation2] sm:$0x3] %v2970_v11  ;;  %v5502_v53 = vpop.eup %5501  ;;  %v3152_v63 = vadd.f32 1.0, %v5500_v57  ;;  %v7797_v57 = vld [vmem:[%s8330_s4 + $0x64] ss:$16 sps:$4 sm:$0xff]   ;;  %8404 = vst [vmem:[#allocation13_spill] sm:$0xff] %v7905_v36 }
 0x5b0   :  { %v3153_v18 = vadd.f32 1.0, %v5502_v53  ;;  %v7809_v53 = vld [vmem:[%s8330_s4 + $0x60] ss:$16 sps:$4 sm:$0xff]  }
 0x5b1   :  { %5511 = vrcp.f32 %v3152_v63  ;;  %v7833_v63 = vld [vmem:[%s8330_s4 + $0x80] ss:$16 sps:$4 sm:$0xff]  }
 0x5b2   :  { %5513 = vrcp.f32 %v3153_v18  ;;  %v7851_v18 = vld [vmem:[%s8330_s4 + $0xac] ss:$16 sps:$4 sm:$0xff]  }
 0x5b5   :  { %v5504_v22 = vpop.eup %5503 }
 0x5b6   :  { %v5506_v55 = vpop.eup %5505  ;;  %v7669_v13 = vld [vmem:[#allocation2] sm:$0x3]  ;;  %v3185_v60 = vmul.f32 %v5504_v22, %v5496_v21  ;;  %v7815_v22 = vld [vmem:[%s8330_s4 + $0x68] ss:$16 sps:$4 sm:$0xff]  }
 0x5b7   :  { %v5508_v12 = vpop.eup %5507  ;;  %v3256_v42 = vpack.c.bf16 %v7669_v13, %v7669_v13  ;;  %v3186_v25 = vmul.f32 %v5506_v55, %v5498_v3  ;;  %v7785_v21 = vld [vmem:[%s8330_s4 + $0x40] ss:$16 sps:$4 sm:$0xff]   ;;  %v7791_v3 = vld [vmem:[%s8330_s4 + $0x48] ss:$16 sps:$4 sm:$0xff]   ;;  %v7821_v55 = vld [vmem:[%s8330_s4 + $0x84] ss:$16 sps:$4 sm:$0xff]  }
 0x5b8   :  { %v5510_v56 = vpop.eup %5509  ;;  %v3183_v50 = vmul.f32 %v5508_v12, %v3173_v10  ;;  %v7839_v10 = vld [vmem:[%s8330_s4 + $0x88] ss:$16 sps:$4 sm:$0xff]   ;;  %v7845_v12 = vld [vmem:[%s8330_s4 + $0xa4] ss:$16 sps:$4 sm:$0xff]  }
 0x5b9   :  { %v3184_v6 = vmul.f32 %v5510_v56, %v3180_v59  ;;  %3290 = vmatmul.mubr.bf16.vlgmr.msra.gmra.mrb[40].mxu0 %v3256_v42  ;;  %3331 = vmatmul.mubr.bf16.vlgmr.msra.gmra.mrb[40].mxu1 %v3256_v42  ;;  %v7857_v59 = vld [vmem:[%s8330_s4 + $0xa0] ss:$16 sps:$4 sm:$0xff]   ;;  %v7863_v42 = vld [vmem:[%s8330_s4 + $0xa8] ss:$16 sps:$4 sm:$0xff]   ;;  %v7869_v56 = vld [vmem:[%s8330_s4 + $0xc4] ss:$16 sps:$4 sm:$0xff]  }
 0x5ba   :  { %v3187_v31 = vadd.f32 %v3185_v60, %v3183_v50  ;;  %3531 = vmatpush1.bf16.msra.mxu0 %v7409_v20  ;;  %3572 = vmatpush1.bf16.msra.mxu1 %v7415_v33  ;;  %v3220_v20 = vmul.f32 %v3210_v32, %v2982_v44  ;;  %v7881_v50 = vld [vmem:[%s8330_s4 + $0xc0] ss:$16 sps:$4 sm:$0xff]   ;;  %v7887_v60 = vld [vmem:[%s8330_s4 + $0xc8] ss:$16 sps:$4 sm:$0xff]  }
 0x5bb   :  { %v3188_v7 = vadd.f32 %v3186_v25, %v3184_v6  ;;  %3532 = vmatprep.subr.bf16.mxu0 %v7421_v8  ;;  %3573 = vmatprep.subr.bf16.mxu1 %v7427_v2  ;;  %v7893_v6 = vld [vmem:[%s8330_s4 + $0xe4] ss:$16 sps:$4 sm:$0xff]   ;;  %v7899_v25 = vld [vmem:[%s8330_s4 + $0xec] ss:$16 sps:$4 sm:$0xff]  }
 0x5bc   :  { %5515 = vtanh.f32 %v3187_v31  ;;  %3562 = vmatprep.mubr.bf16.mxu0 %v8370_v43  ;;  %3603 = vmatprep.mubr.bf16.mxu1 %v8370_v43  ;;  %v3203_v47 = vmul.f32 %v3196_v27, %v3187_v31  ;;  %8403 = vst [vmem:[#allocation12_spill] sm:$0xff] %v7899_v25  ;;  %v7911_v31 = vld [vmem:[%s8330_s4 + $0xe8] ss:$16 sps:$4 sm:$0xff]  }
 0x5bd   :  { %5517 = vtanh.f32 %v3188_v7  ;;  %v3204_v16 = vmul.f32 %v3201_v46, %v3188_v7  ;;  %8405 = vst [vmem:[#allocation14_spill] sm:$0xff] %v7911_v31  ;;  %v7917_v7 = vld [vmem:[%s8331_s5 + $0x4] ss:$16 sps:$4 sm:$0xff]  }
 0x5be   :  { %3533 = vmatpush1.bf16.msra.mxu0 %v7437_v14  ;;  %3574 = vmatpush1.bf16.msra.mxu1 %v7443_v0  ;;  %v3222_v8 = vadd.f32 %v3220_v20, %v3203_v47  ;;  %v5512_v14 = vpop.eup %5511  ;;  %8406 = vst [vmem:[#allocation15_spill] sm:$0xff] %v7917_v7 }
 0x5bf   :  { %v3223_v33 = vadd.f32 %v3221_v23, %v3204_v16  ;;  %3534 = vmatprep.subr.bf16.mxu0 %v7449_v37  ;;  %3575 = vmatprep.subr.bf16.mxu1 %v7455_v9  ;;  %v5514_v0 = vpop.eup %5513  ;;  %v3233_v37 = vrot.slane %v7604_v34, 1 }
 0x5c1   :  { %v3226_v2 = vrot.slane %v3223_v33, 7  ;;  %v3237_v19 = vmul.f32 %v3233_v37, %v3215_v38  ;;  %v7875_v38 = vld [vmem:[%s8330_s4 + $0xcc] ss:$16 sps:$4 sm:$0xff]  }
 0x5c2   :  { %3535 = vmatpush1.bf16.msra.mxu0 %v7461_v28  ;;  %3576 = vmatpush1.bf16.msra.mxu1 %v7467_v62 }
 0x5c3   :  { %v3227_v11 = vsel %vm609_vm0, %v3226_v2, %v3222_v8  ;;  %3536 = vmatprep.subr.bf16.mxu0 %v7474_v39  ;;  %3577 = vmatprep.subr.bf16.mxu1 %v7480_v41 }
 0x5c4   :  { %3229 = vst [vmem:[#allocation5] sm:$0x3] %v3227_v11 }
 0x5c6   :  { %v5516_v44 = vpop.eup %5515  ;;  %3537 = vmatpush1.bf16.msra.mxu0 %v7487_v5  ;;  %3578 = vmatpush1.bf16.msra.mxu1 %v7493_v48  ;;  %v3236_v5 = vmul.f32 %v3210_v32, %v7604_v34  ;;  %v7779_v34 = vld [vmem:[%s8330_s4 + $0x4c] ss:$16 sps:$4 sm:$0xff]  }
 0x5c7   :  { %v5518_v9 = vpop.eup %5517  ;;  %v3191_v28 = vmul.f32 %v5516_v44, %v5512_v14  ;;  %3538 = vmatprep.subr.bf16.mxu0 %v7499_v54  ;;  %3579 = vmatprep.subr.bf16.mxu1 %v7505_v61 }
 0x5c8   :  { %v3192_v62 = vmul.f32 %v5518_v9, %v5514_v0 }
 0x5c9   :  { %v3230_v39 = vmul.f32 %v3196_v27, %v3191_v28  ;;  %v7923_v27 = vld [vmem:[%s8331_s5 + $0xc] ss:$16 sps:$4 sm:$0xff]  }
 0x5ca   :  { %v3231_v41 = vmul.f32 %v3201_v46, %v3192_v62  ;;  %3539 = vmatpush1.bf16.msra.mxu0 %v7513_v26  ;;  %3580 = vmatpush1.bf16.msra.mxu1 %v7519_v30  ;;  %v8402_v30 = vld [vmem:[#allocation11_spill] sm:$0xff]  ;;  %v7827_v46 = vld [vmem:[%s8330_s4 + $0x8c] ss:$16 sps:$4 sm:$0xff]   ;;  %8407 = vst [vmem:[#allocation8_spill] sm:$0xff] %v7923_v27 }
 0x5cb   :  { %3246 = vst [vmem:[%s8333_s7 + $0x3] sm:$0x1] %v3230_v39  ;;  %3540 = vmatprep.subr.bf16.mxu0 %v7528_v58  ;;  %3581 = vmatprep.subr.bf16.mxu1 %v7534_v40  ;;  %v3238_v54 = vadd.f32 %v3236_v5, %v3230_v39  ;;  %v7719_v58 = vld [vmem:[%s8330_s4 + $0x4] ss:$16 sps:$4 sm:$0xff]   ;;  %v7725_v40 = vld [vmem:[%s8330_s4 + $0xc] ss:$16 sps:$4 sm:$0xff]  }
 0x5cc   :  { %v3239_v48 = vadd.f32 %v3237_v19, %v3231_v41  ;;  %3247 = vst [vmem:[%s8333_s7 + $0xb] sm:$0x1] %v3231_v41  ;;  %v3249_v28 = vld [vmem:[#allocation6 + $0x5] ss:$8 sm:$0xf] }
 0x5cd   :  { %v3251_v62 = vld [vmem:[#allocation6 + $0x25] ss:$8 sm:$0xf] }
 0x5ce   :  { %v3242_v61 = vrot.slane %v3239_v48, 7  ;;  %3541 = vmatpush1.bf16.msra.mxu0 %v7544_v49  ;;  %3582 = vmatpush1.bf16.msra.mxu1 %v7550_v15 }
 0x5cf   :  { %3542 = vmatprep.subr.bf16.mxu0 %v7556_v35  ;;  %3583 = vmatprep.subr.bf16.mxu1 %v7562_v17  ;;  %v7735_v35 = vld [vmem:[%s8330_s4] ss:$16 sps:$4 sm:$0xff]   ;;  %v7741_v17 = vld [vmem:[%s8330_s4 + $0x8] ss:$16 sps:$4 sm:$0xff]  }
 0x5d0   :  { %v3243_v26 = vsel %vm609_vm0, %v3242_v61, %v3238_v54 }
 0x5d1   :  { %3245 = vst [vmem:[#allocation4] sm:$0x3] %v3243_v26 }
 0x5d2   :  { %3543 = vmatpush1.bf16.msra.mxu0 %v7569_v1  ;;  %3584 = vmatpush1.bf16.msra.mxu1 %v7575_v4  ;;  %v7747_v1 = vld [vmem:[%s8330_s4 + $0x24] ss:$16 sps:$4 sm:$0xff]   ;;  %v7753_v4 = vld [vmem:[%s8330_s4 + $0x2c] ss:$16 sps:$4 sm:$0xff]  }
 0x5d3   :  { %3544 = vmatprep.subr.bf16.mxu0 %v7581_v52  ;;  %3585 = vmatprep.subr.bf16.mxu1 %v7587_v45  ;;  %v7761_v52 = vld [vmem:[%s8330_s4 + $0x20] ss:$16 sps:$4 sm:$0xff]   ;;  %v7767_v45 = vld [vmem:[%s8330_s4 + $0x28] ss:$16 sps:$4 sm:$0xff]  }
 0x5d6   :  { %3545 = vmatpush1.bf16.msra.mxu0 %v7593_v24  ;;  %3586 = vmatpush1.bf16.msra.mxu1 %v8402_v30  ;;  %v7773_v24 = vld [vmem:[%s8330_s4 + $0x44] ss:$16 sps:$4 sm:$0xff]  }
 0x5d7   :  { %3803 = vmatprep.subr.bf16.mxu0 %v7719_v58  ;;  %3844 = vmatprep.subr.bf16.mxu1 %v7725_v40 }
 0x5d8   :  { %v7728_v49 = vld [vmem:[#allocation4] sm:$0x3] }
 0x5d9   :  { %v3529_v15 = vpack.c.bf16 %v7728_v49, %v7728_v49 }
 0x5db   :  { %3563 = vmatmul.mubr.bf16.vlgmr.msra.gmra.mrb[44].mxu0 %v3529_v15  ;;  %3604 = vmatmul.mubr.bf16.vlgmr.msra.gmra.mrb[44].mxu1 %v3529_v15 }
 0x5dc   :  { %3804 = vmatpush1.bf16.msra.mxu0 %v7735_v35  ;;  %3845 = vmatpush1.bf16.msra.mxu1 %v7741_v17 }
 0x5dd   :  { %3805 = vmatprep.subr.bf16.mxu0 %v7747_v1  ;;  %3846 = vmatprep.subr.bf16.mxu1 %v7753_v4 }
 0x5de   :  { %3835 = vmatprep.mubr.bf16.mxu0 %v8370_v43  ;;  %3876 = vmatprep.mubr.bf16.mxu1 %v8370_v43 }
 0x5e0   :  { %3806 = vmatpush1.bf16.msra.mxu0 %v7761_v52  ;;  %3847 = vmatpush1.bf16.msra.mxu1 %v7767_v45 }
 0x5e1   :  { %3807 = vmatprep.subr.bf16.mxu0 %v7773_v24  ;;  %3848 = vmatprep.subr.bf16.mxu1 %v7779_v34 }
 0x5e4   :  { %3808 = vmatpush1.bf16.msra.mxu0 %v7785_v21  ;;  %3849 = vmatpush1.bf16.msra.mxu1 %v7791_v3 }
 0x5e5   :  { %3809 = vmatprep.subr.bf16.mxu0 %v7797_v57  ;;  %3850 = vmatprep.subr.bf16.mxu1 %v7803_v51 }
 0x5e8   :  { %3810 = vmatpush1.bf16.msra.mxu0 %v7809_v53  ;;  %3851 = vmatpush1.bf16.msra.mxu1 %v7815_v22 }
 0x5e9   :  { %3811 = vmatprep.subr.bf16.mxu0 %v7821_v55  ;;  %3852 = vmatprep.subr.bf16.mxu1 %v7827_v46 }
 0x5ec   :  { %3812 = vmatpush1.bf16.msra.mxu0 %v7833_v63  ;;  %3853 = vmatpush1.bf16.msra.mxu1 %v7839_v10 }
 0x5ed   :  { %3813 = vmatprep.subr.bf16.mxu0 %v7845_v12  ;;  %3854 = vmatprep.subr.bf16.mxu1 %v7851_v18 }
 0x5f0   :  { %3814 = vmatpush1.bf16.msra.mxu0 %v7857_v59  ;;  %3855 = vmatpush1.bf16.msra.mxu1 %v7863_v42 }
 0x5f1   :  { %3815 = vmatprep.subr.bf16.mxu0 %v7869_v56  ;;  %3856 = vmatprep.subr.bf16.mxu1 %v7875_v38 }
 0x5f4   :  { %3816 = vmatpush1.bf16.msra.mxu0 %v7881_v50  ;;  %3857 = vmatpush1.bf16.msra.mxu1 %v7887_v60 }
 0x5f5   :  { %3817 = vmatprep.subr.bf16.mxu0 %v7893_v6  ;;  %3858 = vmatprep.subr.bf16.mxu1 %v7899_v25 }
 0x5f8   :  { %3818 = vmatpush1.bf16.msra.mxu0 %v7905_v36  ;;  %3859 = vmatpush1.bf16.msra.mxu1 %v7911_v31  ;;  %v3524_v31 = vld [vmem:[#allocation7 + $0x22] ss:$8 sm:$0xf] }
 0x5f9   :  { %4076 = vmatprep.subr.bf16.mxu0 %v7917_v7  ;;  %4117 = vmatprep.subr.bf16.mxu1 %v7923_v27 }
 0x68c   :  { %v3291_v47 = vpop.f32.mrb[40].mxu0  ;;  %v3332_v16 = vpop.f32.mrb[40].mxu1 }
 0x68d   :  { %v3293_v23 = vpop.f32.mrb[41].mxu0  ;;  %v3334_v32 = vpop.f32.mrb[41].mxu1 }
 0x68e   :  { %v3343_v20 = vcombine.low %v3291_v47, %v3293_v23  ;;  %v3344_v33 = vcombine.low %v3332_v16, %v3334_v32  ;;  %v3295_v8 = vpop.f32.mrb[42].mxu0  ;;  %v3336_v2 = vpop.f32.mrb[42].mxu1 }
 0x68f   :  { %v3296_v11 = vpop.f32.mrb[43].mxu0  ;;  %v3337_v14 = vpop.f32.mrb[43].mxu1 }
 0x690   :  { %v3351_v0 = vrot.slane %v3343_v20, %v6524_v29  ;;  %v3358_v44 = vrot.slane %v3344_v33, %v6524_v29 }
 0x692   :  { %v3359_v37 = vcombine.low %v3351_v0, %v3358_v44  ;;  %v3360_v9 = vcombine.high %v3351_v0, %v3358_v44 }
 0x694   :  { %v3367_v39 = vrot.slane %v3359_v37, %v6524_v29  ;;  %v3374_v19 = vrot.slane %v3360_v9, %v6524_v29  ;;  %v3255_v9 = vld [vmem:[#allocation3] sm:$0x3] }
 0x696   :  { %v3377_v41 = vadd.f32 %v3367_v39, %v3249_v28  ;;  %v3378_v5 = vadd.f32 %v3374_v19, %v3251_v62  ;;  %v3438_v62 = vrot.slane %v3255_v9, %v6524_v29 }
 0x698   :  { %v5062_v48 = vmul.f32 -1.442695, %v3377_v41  ;;  %v5063_v54 = vmul.f32 -1.442695, %v3378_v5  ;;  %v3393_v61 = vrot.slane %v3377_v41, 1  ;;  %v3394_v26 = vrot.slane %v3378_v5, 1 }
 0x699   :  { %v3415_v47 = vrot.slane %v3377_v41, 3  ;;  %v3416_v16 = vrot.slane %v3378_v5, 3  ;;  %v3409_v23 = vrot.slane %v3377_v41, 2  ;;  %v3410_v32 = vrot.slane %v3378_v5, 2 }
 0x69a   :  { %5519 = vpow2.f32 %v5062_v48  ;;  %v5064_v30 = vmul.f32 -1.442695, %v3393_v61  ;;  %v5065_v15 = vmul.f32 -1.442695, %v3394_v26 }
 0x69b   :  { %5521 = vpow2.f32 %v5063_v54  ;;  %v5066_v20 = vmul.f32 -1.442695, %v3415_v47  ;;  %v5067_v33 = vmul.f32 -1.442695, %v3416_v16  ;;  %v3439_v54 = vcombine.high %v3438_v62, %v3438_v62 }
 0x69c   :  { %5523 = vpow2.f32 %v5064_v30 }
 0x69d   :  { %5525 = vpow2.f32 %v5065_v15 }
 0x69e   :  { %5527 = vtanh.f32 %v3409_v23 }
 0x69f   :  { %5529 = vtanh.f32 %v3410_v32 }
 0x6a0   :  { %5531 = vpow2.f32 %v5066_v20 }
 0x6a1   :  { %5533 = vpow2.f32 %v5067_v33 }
 0x6a4   :  { %v5520_v8 = vpop.eup %5519 }
 0x6a5   :  { %v5522_v2 = vpop.eup %5521  ;;  %v3385_v11 = vadd.f32 1.0, %v5520_v8 }
 0x6a6   :  { %v5524_v14 = vpop.eup %5523  ;;  %v3386_v0 = vadd.f32 1.0, %v5522_v2  ;;  %v7931_v2 = vpop.permute.xlu0 %3473 }
 0x6a7   :  { %v5526_v44 = vpop.eup %5525  ;;  %5535 = vrcp.f32 %v3385_v11  ;;  %v3403_v37 = vadd.f32 1.0, %v5524_v14  ;;  %v3446_v14 = vrot.slane %v3438_v62, %v6524_v29 }
 0x6a8   :  { %5537 = vrcp.f32 %v3386_v0  ;;  %v3404_v28 = vadd.f32 1.0, %v5526_v44  ;;  %v5528_v39 = vpop.eup %5527 }
 0x6a9   :  { %5539 = vrcp.f32 %v3403_v37  ;;  %v5530_v19 = vpop.eup %5529 }
 0x6aa   :  { %5541 = vrcp.f32 %v3404_v28  ;;  %v5532_v48 = vpop.eup %5531 }
 0x6ab   :  { %v5534_v30 = vpop.eup %5533  ;;  %v3425_v11 = vadd.f32 1.0, %v5532_v48  ;;  %v3522_v48 = vld [vmem:[#allocation7 + $0x2] ss:$8 sm:$0xf] }
 0x6ac   :  { %v3426_v28 = vadd.f32 1.0, %v5534_v30 }
 0x6ad   :  { %5543 = vrcp.f32 %v3425_v11 }
 0x6ae   :  { %v3564_v41 = vpop.f32.mrb[44].mxu0  ;;  %v3605_v5 = vpop.f32.mrb[44].mxu1  ;;  %5545 = vrcp.f32 %v3426_v28 }
 0x6af   :  { %v3566_v61 = vpop.f32.mrb[45].mxu0  ;;  %v3607_v26 = vpop.f32.mrb[45].mxu1 }
 0x6b0   :  { %v3616_v15 = vcombine.low %v3564_v41, %v3566_v61  ;;  %v3617_v47 = vcombine.low %v3605_v5, %v3607_v26  ;;  %v3568_v16 = vpop.f32.mrb[46].mxu0  ;;  %v3609_v23 = vpop.f32.mrb[46].mxu1  ;;  %v3453_v41 = vrot.slane %v3439_v54, %v6524_v29  ;;  %v3490_v5 = vrot.slane %v3255_v9, 1 }
 0x6b1   :  { %v5536_v32 = vpop.eup %5535  ;;  %v3569_v20 = vpop.f32.mrb[47].mxu0 }
 0x6b2   :  { %v3610_v33 = vpop.f32.mrb[47].mxu1  ;;  %v5538_v8 = vpop.eup %5537  ;;  %v3624_v0 = vrot.slane %v3616_v15, %v6524_v29  ;;  %v3631_v44 = vrot.slane %v3617_v47, %v6524_v29  ;;  %v3458_v23 = vmul.f32 %v5536_v32, %v5528_v39 }
 0x6b3   :  { %v5540_v37 = vpop.eup %5539  ;;  %v3488_v26 = vpop.permute.xlu1 %3487  ;;  %v3459_v7 = vmul.f32 %v5538_v8, %v5530_v19 }
 0x6b4   :  { %v5542_v61 = vpop.eup %5541  ;;  %v3456_v16 = vmul.f32 %v5540_v37, %v3446_v14  ;;  %v3632_v20 = vcombine.low %v3624_v0, %v3631_v44  ;;  %v3633_v33 = vcombine.high %v3624_v0, %v3631_v44  ;;  %v3469_v54 = vpop.permute.xlu0 %3468  ;;  %v3494_v14 = vmul.f32 %v3490_v5, %v3488_v26 }
 0x6b5   :  { %v3457_v27 = vmul.f32 %v5542_v61, %v3453_v41 }
 0x6b6   :  { %v3460_v62 = vadd.f32 %v3458_v23, %v3456_v16  ;;  %v3640_v15 = vrot.slane %v3632_v20, %v6524_v29  ;;  %v3647_v47 = vrot.slane %v3633_v33, %v6524_v29 }
 0x6b7   :  { %v3461_v30 = vadd.f32 %v3459_v7, %v3457_v27  ;;  %v3483_v19 = vpop.permute.xlu1 %3482  ;;  %v5544_v23 = vpop.eup %5543 }
 0x6b8   :  { %5547 = vtanh.f32 %v3460_v62  ;;  %v3650_v36 = vadd.f32 %v3640_v15, %v3522_v48  ;;  %v3651_v25 = vadd.f32 %v3647_v47, %v3524_v31  ;;  %v3476_v39 = vmul.f32 %v3469_v54, %v3460_v62  ;;  %v5546_v20 = vpop.eup %5545 }
 0x6b9   :  { %5549 = vtanh.f32 %v3461_v30  ;;  %v3477_v32 = vmul.f32 %v7931_v2, %v3461_v30  ;;  %v3493_v44 = vmul.f32 %v3483_v19, %v3255_v9  ;;  %v3506_v9 = vrot.slane %v7669_v13, 1 }
 0x6ba   :  { %v5068_v8 = vmul.f32 -1.442695, %v3650_v36  ;;  %v5069_v0 = vmul.f32 -1.442695, %v3651_v25  ;;  %v3666_v11 = vrot.slane %v3650_v36, 1  ;;  %v3667_v41 = vrot.slane %v3651_v25, 1 }
 0x6bb   :  { %v3496_v37 = vadd.f32 %v3494_v14, %v3477_v32  ;;  %v3495_v28 = vadd.f32 %v3493_v44, %v3476_v39  ;;  %v3688_v16 = vrot.slane %v3650_v36, 3  ;;  %v3689_v5 = vrot.slane %v3651_v25, 3 }
 0x6bc   :  { %5551 = vpow2.f32 %v5068_v8  ;;  %v5070_v61 = vmul.f32 -1.442695, %v3666_v11  ;;  %v5071_v27 = vmul.f32 -1.442695, %v3667_v41  ;;  %v3682_v33 = vrot.slane %v3650_v36, 2 }
 0x6bd   :  { %v3499_v7 = vrot.slane %v3496_v37, 7  ;;  %5553 = vpow2.f32 %v5069_v0  ;;  %v3683_v62 = vrot.slane %v3651_v25, 2  ;;  %v5072_v30 = vmul.f32 -1.442695, %v3688_v16 }
 0x6be   :  { %5555 = vpow2.f32 %v5070_v61  ;;  %v5073_v32 = vmul.f32 -1.442695, %v3689_v5  ;;  %v3510_v0 = vmul.f32 %v3506_v9, %v3488_v26  ;;  %v3509_v37 = vmul.f32 %v3483_v19, %v7669_v13  ;;  %v7952_v9 = vpop.permute.xlu0 %3746 }
 0x6bf   :  { %v3500_v31 = vsel %vm609_vm0, %v3499_v7, %v3495_v28  ;;  %5557 = vpow2.f32 %v5071_v27  ;;  %v3528_v7 = vld [vmem:[#allocation5] sm:$0x3] }
 0x6c0   :  { %3502 = vst [vmem:[#allocation3] sm:$0x3] %v3500_v31  ;;  %5559 = vtanh.f32 %v3682_v33  ;;  %v3711_v13 = vrot.slane %v3528_v7, %v6524_v29 }
 0x6c1   :  { %5561 = vtanh.f32 %v3683_v62 }
 0x6c2   :  { %v5548_v48 = vpop.eup %5547  ;;  %5563 = vpow2.f32 %v5072_v30  ;;  %v3712_v5 = vcombine.high %v3711_v13, %v3711_v13 }
 0x6c3   :  { %v5550_v15 = vpop.eup %5549  ;;  %v3464_v47 = vmul.f32 %v5548_v48, %v5544_v23  ;;  %5565 = vpow2.f32 %v5073_v32 }
 0x6c4   :  { %v3465_v39 = vmul.f32 %v5550_v15, %v5546_v20  ;;  %v3719_v15 = vrot.slane %v3711_v13, %v6524_v29  ;;  %v3726_v32 = vrot.slane %v3712_v5, %v6524_v29  ;;  %v7999_v5 = vld [vmem:[%s8331_s5 + $0x28] ss:$16 sps:$4 sm:$0xff]  }
 0x6c5   :  { %v3503_v14 = vmul.f32 %v3469_v54, %v3464_v47 }
 0x6c6   :  { %v5552_v8 = vpop.eup %5551  ;;  %v3504_v11 = vmul.f32 %v7931_v2, %v3465_v39 }
 0x6c7   :  { %v5554_v44 = vpop.eup %5553  ;;  %3519 = vst [vmem:[%s8332_s6 + $0x5] sm:$0x1] %v3503_v14  ;;  %v3658_v36 = vadd.f32 1.0, %v5552_v8  ;;  %v3511_v61 = vadd.f32 %v3509_v37, %v3503_v14  ;;  %v3763_v37 = vrot.slane %v3528_v7, 1 }
 0x6c8   :  { %v5556_v25 = vpop.eup %5555  ;;  %v3512_v41 = vadd.f32 %v3510_v0, %v3504_v11  ;;  %3520 = vst [vmem:[%s8332_s6 + $0xd] sm:$0x1] %v3504_v11  ;;  %v3659_v54 = vadd.f32 1.0, %v5554_v44  ;;  %v7960_v0 = vpop.permute.xlu1 %3760 }
 0x6c9   :  { %v5558_v26 = vpop.eup %5557  ;;  %5567 = vrcp.f32 %v3658_v36  ;;  %v3676_v2 = vadd.f32 1.0, %v5556_v25 }
 0x6ca   :  { %v3515_v28 = vrot.slane %v3512_v41, 7  ;;  %5569 = vrcp.f32 %v3659_v54  ;;  %v3677_v27 = vadd.f32 1.0, %v5558_v26  ;;  %v5560_v19 = vpop.eup %5559  ;;  %v7965_v54 = vld [vmem:[%s8331_s5] ss:$16 sps:$4 sm:$0xff]   ;;  %v7971_v26 = vld [vmem:[%s8331_s5 + $0x8] ss:$16 sps:$4 sm:$0xff]  }
 0x6cb   :  { %5571 = vrcp.f32 %v3676_v2  ;;  %v5562_v16 = vpop.eup %5561 }
 0x6cc   :  { %v3516_v31 = vsel %vm609_vm0, %v3515_v28, %v3511_v61  ;;  %5573 = vrcp.f32 %v3677_v27  ;;  %v5564_v23 = vpop.eup %5563  ;;  %v7977_v61 = vld [vmem:[%s8331_s5 + $0x24] ss:$16 sps:$4 sm:$0xff]   ;;  %v7983_v28 = vld [vmem:[%s8331_s5 + $0x2c] ss:$16 sps:$4 sm:$0xff]   ;;  %v3742_v27 = vpop.permute.xlu0 %3741 }
 0x6cd   :  { %3518 = vst [vmem:[#allocation2] sm:$0x3] %v3516_v31  ;;  %v5566_v20 = vpop.eup %5565  ;;  %v3698_v62 = vadd.f32 1.0, %v5564_v23  ;;  %v7993_v23 = vld [vmem:[%s8331_s5 + $0x20] ss:$16 sps:$4 sm:$0xff]  }
 0x6ce   :  { %v3699_v39 = vadd.f32 1.0, %v5566_v20 }
 0x6cf   :  { %5575 = vrcp.f32 %v3698_v62  ;;  %v8011_v62 = vld [vmem:[%s8331_s5 + $0x4c] ss:$16 sps:$4 sm:$0xff]  }
 0x6d0   :  { %5577 = vrcp.f32 %v3699_v39  ;;  %v8023_v39 = vld [vmem:[%s8331_s5 + $0x48] ss:$16 sps:$4 sm:$0xff]  }
 0x6d3   :  { %v5568_v33 = vpop.eup %5567 }
 0x6d4   :  { %v5570_v48 = vpop.eup %5569  ;;  %v7955_v47 = vld [vmem:[#allocation2] sm:$0x3]  ;;  %v3731_v44 = vmul.f32 %v5568_v33, %v5560_v19  ;;  %v3767_v19 = vmul.f32 %v3763_v37, %v7960_v0 }
 0x6d5   :  { %v5572_v30 = vpop.eup %5571  ;;  %v3802_v14 = vpack.c.bf16 %v7955_v47, %v7955_v47  ;;  %v3732_v25 = vmul.f32 %v5570_v48, %v5562_v16  ;;  %v3756_v16 = vpop.permute.xlu1 %3755  ;;  %v8005_v48 = vld [vmem:[%s8331_s5 + $0x44] ss:$16 sps:$4 sm:$0xff]   ;;  %v8043_v37 = vld [vmem:[%s8331_s5 + $0x60] ss:$16 sps:$4 sm:$0xff]  }
 0x6d6   :  { %v5574_v8 = vpop.eup %5573  ;;  %v3729_v11 = vmul.f32 %v5572_v30, %v3719_v15  ;;  %v3766_v20 = vmul.f32 %v3756_v16, %v3528_v7  ;;  %v8017_v7 = vld [vmem:[%s8331_s5 + $0x40] ss:$16 sps:$4 sm:$0xff]  }
 0x6d7   :  { %v3730_v36 = vmul.f32 %v5574_v8, %v3726_v32  ;;  %3836 = vmatmul.mubr.bf16.vlgmr.msra.gmra.mrb[48].mxu0 %v3802_v14  ;;  %3877 = vmatmul.mubr.bf16.vlgmr.msra.gmra.mrb[48].mxu1 %v3802_v14  ;;  %v8030_v14 = vld [vmem:[%s8331_s5 + $0x64] ss:$16 sps:$4 sm:$0xff]   ;;  %v8036_v8 = vld [vmem:[%s8331_s5 + $0x6c] ss:$16 sps:$4 sm:$0xff]  }
 0x6d8   :  { %v3733_v41 = vadd.f32 %v3731_v44, %v3729_v11  ;;  %4077 = vmatpush1.bf16.msra.mxu0 %v7965_v54  ;;  %4118 = vmatpush1.bf16.msra.mxu1 %v7971_v26 }
 0x6d9   :  { %v3734_v2 = vadd.f32 %v3732_v25, %v3730_v36  ;;  %4078 = vmatprep.subr.bf16.mxu0 %v7977_v61  ;;  %4119 = vmatprep.subr.bf16.mxu1 %v7983_v28  ;;  %v5576_v11 = vpop.eup %5575  ;;  %v3779_v25 = vrot.slane %v7728_v49, 1 }
 0x6da   :  { %5579 = vtanh.f32 %v3733_v41  ;;  %4108 = vmatprep.mubr.bf16.mxu0 %v8370_v43  ;;  %4149 = vmatprep.mubr.bf16.mxu1 %v8370_v43  ;;  %v3749_v31 = vmul.f32 %v3742_v27, %v3733_v41  ;;  %v5578_v44 = vpop.eup %5577  ;;  %v8049_v41 = vld [vmem:[%s8331_s5 + $0x68] ss:$16 sps:$4 sm:$0xff]  }
 0x6db   :  { %5581 = vtanh.f32 %v3734_v2  ;;  %v3750_v13 = vmul.f32 %v7952_v9, %v3734_v2 }
 0x6dc   :  { %4079 = vmatpush1.bf16.msra.mxu0 %v7993_v23  ;;  %4120 = vmatpush1.bf16.msra.mxu1 %v7999_v5  ;;  %v3768_v15 = vadd.f32 %v3766_v20, %v3749_v31 }
 0x6dd   :  { %v3769_v33 = vadd.f32 %v3767_v19, %v3750_v13  ;;  %4080 = vmatprep.subr.bf16.mxu0 %v8005_v48  ;;  %4121 = vmatprep.subr.bf16.mxu1 %v8011_v62  ;;  %v8055_v13 = vld [vmem:[%s8331_s5 + $0x84] ss:$16 sps:$4 sm:$0xff]   ;;  %v8061_v19 = vld [vmem:[%s8331_s5 + $0x8c] ss:$16 sps:$4 sm:$0xff]  }
 0x6df   :  { %v3772_v30 = vrot.slane %v3769_v33, 7 }
 0x6e0   :  { %4081 = vmatpush1.bf16.msra.mxu0 %v8017_v7  ;;  %4122 = vmatpush1.bf16.msra.mxu1 %v8023_v39 }
 0x6e1   :  { %v3773_v32 = vsel %vm609_vm0, %v3772_v30, %v3768_v15  ;;  %4082 = vmatprep.subr.bf16.mxu0 %v8030_v14  ;;  %4123 = vmatprep.subr.bf16.mxu1 %v8036_v8  ;;  %v3783_v15 = vmul.f32 %v3779_v25, %v7960_v0  ;;  %v8090_v0 = vld [vmem:[%s8331_s5 + $0xac] ss:$16 sps:$4 sm:$0xff]  }
 0x6e2   :  { %3775 = vst [vmem:[#allocation5] sm:$0x3] %v3773_v32  ;;  %v8069_v32 = vld [vmem:[%s8331_s5 + $0x80] ss:$16 sps:$4 sm:$0xff]  }
 0x6e4   :  { %v5580_v36 = vpop.eup %5579  ;;  %4083 = vmatpush1.bf16.msra.mxu0 %v8043_v37  ;;  %4124 = vmatpush1.bf16.msra.mxu1 %v8049_v41 }
 0x6e5   :  { %v5582_v2 = vpop.eup %5581  ;;  %v3737_v31 = vmul.f32 %v5580_v36, %v5576_v11  ;;  %4084 = vmatprep.subr.bf16.mxu0 %v8055_v13  ;;  %4125 = vmatprep.subr.bf16.mxu1 %v8061_v19  ;;  %v8075_v11 = vld [vmem:[%s8331_s5 + $0x88] ss:$16 sps:$4 sm:$0xff]  }
 0x6e6   :  { %v3738_v20 = vmul.f32 %v5582_v2, %v5578_v44  ;;  %v8100_v2 = vld [vmem:[%s8331_s5 + $0xa0] ss:$16 sps:$4 sm:$0xff]  }
 0x6e7   :  { %v3776_v33 = vmul.f32 %v3742_v27, %v3737_v31  ;;  %v3782_v27 = vmul.f32 %v3756_v16, %v7728_v49  ;;  %v8106_v31 = vld [vmem:[%s8331_s5 + $0xa8] ss:$16 sps:$4 sm:$0xff]   ;;  %v8112_v49 = vld [vmem:[%s8331_s5 + $0xc4] ss:$16 sps:$4 sm:$0xff]   ;;  %v8118_v16 = vld [vmem:[%s8331_s5 + $0xcc] ss:$16 sps:$4 sm:$0xff]  }
 0x6e8   :  { %v3777_v30 = vmul.f32 %v7952_v9, %v3738_v20  ;;  %4085 = vmatpush1.bf16.msra.mxu0 %v8069_v32  ;;  %4126 = vmatpush1.bf16.msra.mxu1 %v8075_v11  ;;  %v8084_v9 = vld [vmem:[%s8331_s5 + $0xa4] ss:$16 sps:$4 sm:$0xff]  }
 0x6e9   :  { %3792 = vst [vmem:[%s8333_s7 + $0x2] sm:$0x1] %v3776_v33  ;;  %4086 = vmatprep.subr.bf16.mxu0 %v8084_v9  ;;  %4127 = vmatprep.subr.bf16.mxu1 %v8090_v0  ;;  %v3784_v36 = vadd.f32 %v3782_v27, %v3776_v33  ;;  %v8125_v33 = vld [vmem:[%s8331_s5 + $0xc0] ss:$16 sps:$4 sm:$0xff]   ;;  %v8143_v27 = vld [vmem:[%s8331_s5 + $0xec] ss:$16 sps:$4 sm:$0xff]  }
 0x6ea   :  { %v3785_v44 = vadd.f32 %v3783_v15, %v3777_v30  ;;  %3793 = vst [vmem:[%s8333_s7 + $0xa] sm:$0x1] %v3777_v30  ;;  %v8131_v15 = vld [vmem:[%s8331_s5 + $0xc8] ss:$16 sps:$4 sm:$0xff]   ;;  %v8137_v30 = vld [vmem:[%s8331_s5 + $0xe4] ss:$16 sps:$4 sm:$0xff]  }
 0x6ec   :  { %v3788_v25 = vrot.slane %v3785_v44, 7  ;;  %4087 = vmatpush1.bf16.msra.mxu0 %v8100_v2  ;;  %4128 = vmatpush1.bf16.msra.mxu1 %v8106_v31  ;;  %v8149_v44 = vld [vmem:[%s8331_s5 + $0xe0] ss:$16 sps:$4 sm:$0xff]  }
 0x6ed   :  { %4088 = vmatprep.subr.bf16.mxu0 %v8112_v49  ;;  %4129 = vmatprep.subr.bf16.mxu1 %v8118_v16 }
 0x6ee   :  { %v3789_v20 = vsel %vm609_vm0, %v3788_v25, %v3784_v36  ;;  %v8155_v36 = vld [vmem:[%s8331_s5 + $0xe8] ss:$16 sps:$4 sm:$0xff]  }
 0x6ef   :  { %3791 = vst [vmem:[#allocation4] sm:$0x3] %v3789_v20  ;;  %8408 = vst [vmem:[#allocation9_spill] sm:$0xff] %v8155_v36 }
 0x6f0   :  { %4089 = vmatpush1.bf16.msra.mxu0 %v8125_v33  ;;  %4130 = vmatpush1.bf16.msra.mxu1 %v8131_v15 }
 0x6f1   :  { %4090 = vmatprep.subr.bf16.mxu0 %v8137_v30  ;;  %4131 = vmatprep.subr.bf16.mxu1 %v8143_v27 }
 0x6f4   :  { %4091 = vmatpush1.bf16.msra.mxu0 %v8149_v44  ;;  %4132 = vmatpush1.bf16.msra.mxu1 %v8155_v36 }
 0x6f5   :  { %4349 = vmatprep.subr.bf16.mxu0 %v7719_v58  ;;  %4390 = vmatprep.subr.bf16.mxu1 %v7725_v40  ;;  %v8409_v58 = vld [vmem:[#allocation12_spill] sm:$0xff]  ;;  %v8410_v40 = vld [vmem:[#allocation13_spill] sm:$0xff] }
 0x6f6   :  { %v8160_v25 = vld [vmem:[#allocation4] sm:$0x3] }
 0x6f7   :  { %v4075_v20 = vpack.c.bf16 %v8160_v25, %v8160_v25 }
 0x6f9   :  { %4109 = vmatmul.mubr.bf16.vlgmr.msra.gmra.mrb[52].mxu0 %v4075_v20  ;;  %4150 = vmatmul.mubr.bf16.vlgmr.msra.gmra.mrb[52].mxu1 %v4075_v20 }
 0x6fa   :  { %4350 = vmatpush1.bf16.msra.mxu0 %v7735_v35  ;;  %4391 = vmatpush1.bf16.msra.mxu1 %v7741_v17  ;;  %v8411_v35 = vld [vmem:[#allocation14_spill] sm:$0xff]  ;;  %v8412_v17 = vld [vmem:[#allocation15_spill] sm:$0xff] }
 0x6fb   :  { %4351 = vmatprep.subr.bf16.mxu0 %v7747_v1  ;;  %4392 = vmatprep.subr.bf16.mxu1 %v7753_v4  ;;  %v8413_v1 = vld [vmem:[#allocation8_spill] sm:$0xff] }
 0x6fc   :  { %4381 = vmatprep.mubr.bf16.mxu0 %v8370_v43  ;;  %4422 = vmatprep.mubr.bf16.mxu1 %v8370_v43 }
 0x6fe   :  { %4352 = vmatpush1.bf16.msra.mxu0 %v7761_v52  ;;  %4393 = vmatpush1.bf16.msra.mxu1 %v7767_v45 }
 0x6ff   :  { %4353 = vmatprep.subr.bf16.mxu0 %v7773_v24  ;;  %4394 = vmatprep.subr.bf16.mxu1 %v7779_v34 }
 0x702   :  { %4354 = vmatpush1.bf16.msra.mxu0 %v7785_v21  ;;  %4395 = vmatpush1.bf16.msra.mxu1 %v7791_v3 }
 0x703   :  { %4355 = vmatprep.subr.bf16.mxu0 %v7797_v57  ;;  %4396 = vmatprep.subr.bf16.mxu1 %v7803_v51 }
 0x706   :  { %4356 = vmatpush1.bf16.msra.mxu0 %v7809_v53  ;;  %4397 = vmatpush1.bf16.msra.mxu1 %v7815_v22 }
 0x707   :  { %4357 = vmatprep.subr.bf16.mxu0 %v7821_v55  ;;  %4398 = vmatprep.subr.bf16.mxu1 %v7827_v46 }
 0x70a   :  { %4358 = vmatpush1.bf16.msra.mxu0 %v7833_v63  ;;  %4399 = vmatpush1.bf16.msra.mxu1 %v7839_v10  ;;  %v3795_v10 = vld [vmem:[#allocation6 + $0x6] ss:$8 sm:$0xf] }
 0x70b   :  { %4359 = vmatprep.subr.bf16.mxu0 %v7845_v12  ;;  %4400 = vmatprep.subr.bf16.mxu1 %v7851_v18  ;;  %v3797_v12 = vld [vmem:[#allocation6 + $0x26] ss:$8 sm:$0xf] }
 0x70e   :  { %4360 = vmatpush1.bf16.msra.mxu0 %v7857_v59  ;;  %4401 = vmatpush1.bf16.msra.mxu1 %v7863_v42 }
 0x70f   :  { %4361 = vmatprep.subr.bf16.mxu0 %v7869_v56  ;;  %4402 = vmatprep.subr.bf16.mxu1 %v7875_v38 }
 0x712   :  { %4362 = vmatpush1.bf16.msra.mxu0 %v7881_v50  ;;  %4403 = vmatpush1.bf16.msra.mxu1 %v7887_v60 }
 0x713   :  { %4363 = vmatprep.subr.bf16.mxu0 %v7893_v6  ;;  %4404 = vmatprep.subr.bf16.mxu1 %v8409_v58 }
 0x716   :  { %4364 = vmatpush1.bf16.msra.mxu0 %v8410_v40  ;;  %4405 = vmatpush1.bf16.msra.mxu1 %v8411_v35 }
 0x717   :  { %4621 = vmatprep.subr.bf16.mxu0 %v8412_v17  ;;  %4662 = vmatprep.subr.bf16.mxu1 %v8413_v1 }
 0x7aa   :  { %v3837_v4 = vpop.f32.mrb[48].mxu0  ;;  %v3878_v52 = vpop.f32.mrb[48].mxu1 }
 0x7ab   :  { %v3839_v45 = vpop.f32.mrb[49].mxu0  ;;  %v3880_v24 = vpop.f32.mrb[49].mxu1 }
 0x7ac   :  { %v3889_v34 = vcombine.low %v3837_v4, %v3839_v45  ;;  %v3890_v21 = vcombine.low %v3878_v52, %v3880_v24  ;;  %v3841_v3 = vpop.f32.mrb[50].mxu0  ;;  %v3882_v57 = vpop.f32.mrb[50].mxu1 }
 0x7ad   :  { %v3842_v51 = vpop.f32.mrb[51].mxu0  ;;  %v3883_v53 = vpop.f32.mrb[51].mxu1 }
 0x7ae   :  { %v3897_v22 = vrot.slane %v3889_v34, %v6524_v29  ;;  %v3904_v55 = vrot.slane %v3890_v21, %v6524_v29  ;;  %v3801_v53 = vld [vmem:[#allocation3] sm:$0x3] }
 0x7b0   :  { %v3905_v46 = vcombine.low %v3897_v22, %v3904_v55  ;;  %v3906_v63 = vcombine.high %v3897_v22, %v3904_v55  ;;  %v3984_v55 = vrot.slane %v3801_v53, %v6524_v29 }
 0x7b2   :  { %v3913_v18 = vrot.slane %v3905_v46, %v6524_v29  ;;  %v3920_v59 = vrot.slane %v3906_v63, %v6524_v29 }
 0x7b4   :  { %v3923_v42 = vadd.f32 %v3913_v18, %v3795_v10  ;;  %v3924_v56 = vadd.f32 %v3920_v59, %v3797_v12  ;;  %v3985_v59 = vcombine.high %v3984_v55, %v3984_v55 }
 0x7b6   :  { %v5074_v38 = vmul.f32 -1.442695, %v3923_v42  ;;  %v5075_v50 = vmul.f32 -1.442695, %v3924_v56  ;;  %v3939_v60 = vrot.slane %v3923_v42, 1  ;;  %v3940_v6 = vrot.slane %v3924_v56, 1 }
 0x7b7   :  { %v3961_v40 = vrot.slane %v3923_v42, 3  ;;  %v3962_v35 = vrot.slane %v3924_v56, 3  ;;  %v3955_v17 = vrot.slane %v3923_v42, 2  ;;  %v3956_v1 = vrot.slane %v3924_v56, 2 }
 0x7b8   :  { %5583 = vpow2.f32 %v5074_v38  ;;  %v5076_v20 = vmul.f32 -1.442695, %v3939_v60  ;;  %v5077_v58 = vmul.f32 -1.442695, %v3940_v6 }
 0x7b9   :  { %5585 = vpow2.f32 %v5075_v50  ;;  %v5078_v4 = vmul.f32 -1.442695, %v3961_v40  ;;  %v5079_v52 = vmul.f32 -1.442695, %v3962_v35 }
 0x7ba   :  { %5587 = vpow2.f32 %v5076_v20 }
 0x7bb   :  { %5589 = vpow2.f32 %v5077_v58 }
 0x7bc   :  { %5591 = vtanh.f32 %v3955_v17 }
 0x7bd   :  { %5593 = vtanh.f32 %v3956_v1  ;;  %v8203_v1 = vpop.permute.xlu0 %4019 }
 0x7be   :  { %5595 = vpow2.f32 %v5078_v4 }
 0x7bf   :  { %5597 = vpow2.f32 %v5079_v52  ;;  %v3992_v52 = vrot.slane %v3984_v55, %v6524_v29 }
 0x7c2   :  { %v5584_v45 = vpop.eup %5583 }
 0x7c3   :  { %v5586_v24 = vpop.eup %5585  ;;  %v3931_v34 = vadd.f32 1.0, %v5584_v45 }
 0x7c4   :  { %v5588_v21 = vpop.eup %5587  ;;  %v3932_v3 = vadd.f32 1.0, %v5586_v24 }
 0x7c5   :  { %v5590_v57 = vpop.eup %5589  ;;  %5599 = vrcp.f32 %v3931_v34  ;;  %v3949_v51 = vadd.f32 1.0, %v5588_v21 }
 0x7c6   :  { %5601 = vrcp.f32 %v3932_v3  ;;  %v3950_v22 = vadd.f32 1.0, %v5590_v57  ;;  %v5592_v46 = vpop.eup %5591  ;;  %v3999_v3 = vrot.slane %v3985_v59, %v6524_v29  ;;  %v4036_v57 = vrot.slane %v3801_v53, 1  ;;  %v4015_v59 = vpop.permute.xlu0 %4014 }
 0x7c7   :  { %5603 = vrcp.f32 %v3949_v51  ;;  %v5594_v63 = vpop.eup %5593 }
 0x7c8   :  { %5605 = vrcp.f32 %v3950_v22  ;;  %v5596_v18 = vpop.eup %5595  ;;  %v4034_v22 = vpop.permute.xlu1 %4033 }
 0x7c9   :  { %v5598_v38 = vpop.eup %5597  ;;  %v3971_v4 = vadd.f32 1.0, %v5596_v18  ;;  %v4068_v18 = vld [vmem:[#allocation7 + $0x1] ss:$8 sm:$0xf] }
 0x7ca   :  { %v3972_v21 = vadd.f32 1.0, %v5598_v38 }
 0x7cb   :  { %5607 = vrcp.f32 %v3971_v4 }
 0x7cc   :  { %v4110_v10 = vpop.f32.mrb[52].mxu0  ;;  %v4151_v12 = vpop.f32.mrb[52].mxu1  ;;  %5609 = vrcp.f32 %v3972_v21 }
 0x7cd   :  { %v4112_v42 = vpop.f32.mrb[53].mxu0  ;;  %v4153_v56 = vpop.f32.mrb[53].mxu1 }
 0x7ce   :  { %v4162_v50 = vcombine.low %v4110_v10, %v4112_v42  ;;  %v4163_v60 = vcombine.low %v4151_v12, %v4153_v56  ;;  %v4114_v6 = vpop.f32.mrb[54].mxu0  ;;  %v4155_v20 = vpop.f32.mrb[54].mxu1 }
 0x7cf   :  { %v5600_v58 = vpop.eup %5599  ;;  %v4115_v40 = vpop.f32.mrb[55].mxu0 }
 0x7d0   :  { %v4156_v35 = vpop.f32.mrb[55].mxu1  ;;  %v5602_v17 = vpop.eup %5601  ;;  %v4170_v45 = vrot.slane %v4162_v50, %v6524_v29  ;;  %v4177_v24 = vrot.slane %v4163_v60, %v6524_v29  ;;  %v4004_v12 = vmul.f32 %v5600_v58, %v5592_v46  ;;  %v4070_v40 = vld [vmem:[#allocation7 + $0x21] ss:$8 sm:$0xf] }
 0x7d1   :  { %v5604_v34 = vpop.eup %5603  ;;  %v4005_v20 = vmul.f32 %v5602_v17, %v5594_v63  ;;  %v4029_v63 = vpop.permute.xlu1 %4028 }
 0x7d2   :  { %v5606_v51 = vpop.eup %5605  ;;  %v4002_v10 = vmul.f32 %v5604_v34, %v3992_v52  ;;  %v4178_v42 = vcombine.low %v4170_v45, %v4177_v24  ;;  %v4179_v56 = vcombine.high %v4170_v45, %v4177_v24  ;;  %v4040_v52 = vmul.f32 %v4036_v57, %v4034_v22 }
 0x7d3   :  { %v4003_v6 = vmul.f32 %v5606_v51, %v3999_v3  ;;  %v4039_v24 = vmul.f32 %v4029_v63, %v3801_v53  ;;  %v4052_v53 = vrot.slane %v7955_v47, 1 }
 0x7d4   :  { %v4006_v55 = vadd.f32 %v4004_v12, %v4002_v10  ;;  %v4186_v50 = vrot.slane %v4178_v42, %v6524_v29  ;;  %v4193_v60 = vrot.slane %v4179_v56, %v6524_v29 }
 0x7d5   :  { %v4007_v38 = vadd.f32 %v4005_v20, %v4003_v6  ;;  %v5608_v6 = vpop.eup %5607 }
 0x7d6   :  { %5611 = vtanh.f32 %v4006_v55  ;;  %v4196_v35 = vadd.f32 %v4186_v50, %v4068_v18  ;;  %v4197_v36 = vadd.f32 %v4193_v60, %v4070_v40  ;;  %v4022_v46 = vmul.f32 %v4015_v59, %v4006_v55  ;;  %v5610_v20 = vpop.eup %5609 }
 0x7d7   :  { %5613 = vtanh.f32 %v4007_v38  ;;  %v4023_v58 = vmul.f32 %v8203_v1, %v4007_v38 }
 0x7d8   :  { %v5080_v17 = vmul.f32 -1.442695, %v4196_v35  ;;  %v5081_v45 = vmul.f32 -1.442695, %v4197_v36  ;;  %v4212_v4 = vrot.slane %v4196_v35, 1  ;;  %v4213_v3 = vrot.slane %v4197_v36, 1 }
 0x7d9   :  { %v4042_v34 = vadd.f32 %v4040_v52, %v4023_v58  ;;  %v4041_v21 = vadd.f32 %v4039_v24, %v4022_v46  ;;  %v4234_v56 = vrot.slane %v4196_v35, 3  ;;  %v4235_v57 = vrot.slane %v4197_v36, 3 }
 0x7da   :  { %5615 = vpow2.f32 %v5080_v17  ;;  %v5082_v51 = vmul.f32 -1.442695, %v4212_v4  ;;  %v5083_v12 = vmul.f32 -1.442695, %v4213_v3  ;;  %v4228_v18 = vrot.slane %v4196_v35, 2 }
 0x7db   :  { %v4045_v10 = vrot.slane %v4042_v34, 7  ;;  %5617 = vpow2.f32 %v5081_v45  ;;  %v4229_v55 = vrot.slane %v4197_v36, 2  ;;  %v5084_v38 = vmul.f32 -1.442695, %v4234_v56 }
 0x7dc   :  { %5619 = vpow2.f32 %v5082_v51  ;;  %v5085_v58 = vmul.f32 -1.442695, %v4235_v57  ;;  %v4056_v45 = vmul.f32 %v4052_v53, %v4034_v22  ;;  %v4055_v34 = vmul.f32 %v4029_v63, %v7955_v47  ;;  %v4293_v53 = vpop.permute.xlu0 %4292 }
 0x7dd   :  { %v4046_v42 = vsel %vm609_vm0, %v4045_v10, %v4041_v21  ;;  %5621 = vpow2.f32 %v5083_v12  ;;  %v4074_v10 = vld [vmem:[#allocation5] sm:$0x3] }
 0x7de   :  { %4048 = vst [vmem:[#allocation3] sm:$0x3] %v4046_v42  ;;  %5623 = vtanh.f32 %v4228_v18  ;;  %v4257_v47 = vrot.slane %v4074_v10, %v6524_v29 }
 0x7df   :  { %5625 = vtanh.f32 %v4229_v55 }
 0x7e0   :  { %v5612_v40 = vpop.eup %5611  ;;  %5627 = vpow2.f32 %v5084_v38  ;;  %v4258_v57 = vcombine.high %v4257_v47, %v4257_v47 }
 0x7e1   :  { %v5614_v50 = vpop.eup %5613  ;;  %v4010_v60 = vmul.f32 %v5612_v40, %v5608_v6  ;;  %5629 = vpow2.f32 %v5085_v58 }
 0x7e2   :  { %v4011_v46 = vmul.f32 %v5614_v50, %v5610_v20  ;;  %v4265_v50 = vrot.slane %v4257_v47, %v6524_v29  ;;  %v4272_v58 = vrot.slane %v4258_v57, %v6524_v29  ;;  %v4341_v57 = vld [vmem:[#allocation6 + $0x7] ss:$8 sm:$0xf] }
 0x7e3   :  { %v4049_v52 = vmul.f32 %v4015_v59, %v4010_v60 }
 0x7e4   :  { %v5616_v17 = vpop.eup %5615  ;;  %v4050_v4 = vmul.f32 %v8203_v1, %v4011_v46 }
 0x7e5   :  { %v5618_v24 = vpop.eup %5617  ;;  %4065 = vst [vmem:[%s8332_s6 + $0x6] sm:$0x1] %v4049_v52  ;;  %v4204_v35 = vadd.f32 1.0, %v5616_v17  ;;  %v4057_v51 = vadd.f32 %v4055_v34, %v4049_v52  ;;  %v4309_v34 = vrot.slane %v4074_v10, 1 }
 0x7e6   :  { %v5620_v36 = vpop.eup %5619  ;;  %v4058_v3 = vadd.f32 %v4056_v45, %v4050_v4  ;;  %4066 = vst [vmem:[%s8332_s6 + $0xe] sm:$0x1] %v4050_v4  ;;  %v4205_v59 = vadd.f32 1.0, %v5618_v24  ;;  %v4307_v45 = vpop.permute.xlu1 %4306 }
 0x7e7   :  { %v5622_v22 = vpop.eup %5621  ;;  %5631 = vrcp.f32 %v4204_v35  ;;  %v4222_v1 = vadd.f32 1.0, %v5620_v36 }
 0x7e8   :  { %v4061_v21 = vrot.slane %v4058_v3, 7  ;;  %5633 = vrcp.f32 %v4205_v59  ;;  %v4223_v12 = vadd.f32 1.0, %v5622_v22  ;;  %v5624_v63 = vpop.eup %5623  ;;  %v4288_v22 = vpop.permute.xlu0 %4287 }
 0x7e9   :  { %5635 = vrcp.f32 %v4222_v1  ;;  %v5626_v56 = vpop.eup %5625 }
 0x7ea   :  { %v4062_v42 = vsel %vm609_vm0, %v4061_v21, %v4057_v51  ;;  %5637 = vrcp.f32 %v4223_v12  ;;  %v5628_v6 = vpop.eup %5627  ;;  %v4313_v21 = vmul.f32 %v4309_v34, %v4307_v45  ;;  %v4302_v12 = vpop.permute.xlu1 %4301 }
 0x7eb   :  { %4064 = vst [vmem:[#allocation2] sm:$0x3] %v4062_v42  ;;  %v5630_v20 = vpop.eup %5629  ;;  %v4244_v55 = vadd.f32 1.0, %v5628_v6 }
 0x7ec   :  { %v4245_v46 = vadd.f32 1.0, %v5630_v20  ;;  %v4343_v20 = vld [vmem:[#allocation6 + $0x27] ss:$8 sm:$0xf] }
 0x7ed   :  { %5639 = vrcp.f32 %v4244_v55 }
 0x7ee   :  { %5641 = vrcp.f32 %v4245_v46 }
 0x7f1   :  { %v5632_v18 = vpop.eup %5631 }
 0x7f2   :  { %v5634_v40 = vpop.eup %5633  ;;  %v8225_v60 = vld [vmem:[#allocation2] sm:$0x3]  ;;  %v4277_v24 = vmul.f32 %v5632_v18, %v5624_v63 }
 0x7f3   :  { %v5636_v38 = vpop.eup %5635  ;;  %v4348_v52 = vpack.c.bf16 %v8225_v60, %v8225_v60  ;;  %v4278_v36 = vmul.f32 %v5634_v40, %v5626_v56 }
 0x7f4   :  { %v5638_v17 = vpop.eup %5637  ;;  %v4275_v4 = vmul.f32 %v5636_v38, %v4265_v50 }
 0x7f5   :  { %v4276_v35 = vmul.f32 %v5638_v17, %v4272_v58  ;;  %4382 = vmatmul.mubr.bf16.vlgmr.msra.gmra.mrb[56].mxu0 %v4348_v52  ;;  %4423 = vmatmul.mubr.bf16.vlgmr.msra.gmra.mrb[56].mxu1 %v4348_v52 }
 0x7f6   :  { %v4279_v3 = vadd.f32 %v4277_v24, %v4275_v4  ;;  %4622 = vmatpush1.bf16.msra.mxu0 %v7965_v54  ;;  %4663 = vmatpush1.bf16.msra.mxu1 %v7971_v26  ;;  %v4312_v54 = vmul.f32 %v4302_v12, %v4074_v10 }
 0x7f7   :  { %v4280_v59 = vadd.f32 %v4278_v36, %v4276_v35  ;;  %4623 = vmatprep.subr.bf16.mxu0 %v7977_v61  ;;  %4664 = vmatprep.subr.bf16.mxu1 %v7983_v28 }
 0x7f8   :  { %5643 = vtanh.f32 %v4279_v3  ;;  %4653 = vmatprep.mubr.bf16.mxu0 %v8370_v43  ;;  %4694 = vmatprep.mubr.bf16.mxu1 %v8370_v43  ;;  %v4295_v1 = vmul.f32 %v4288_v22, %v4279_v3 }
 0x7f9   :  { %5645 = vtanh.f32 %v4280_v59  ;;  %v4296_v51 = vmul.f32 %v4293_v53, %v4280_v59 }
 0x7fa   :  { %4624 = vmatpush1.bf16.msra.mxu0 %v7993_v23  ;;  %4665 = vmatpush1.bf16.msra.mxu1 %v7999_v5  ;;  %v4314_v61 = vadd.f32 %v4312_v54, %v4295_v1  ;;  %v5640_v23 = vpop.eup %5639  ;;  %v4347_v54 = vld [vmem:[#allocation3] sm:$0x3] }
 0x7fb   :  { %v4315_v26 = vadd.f32 %v4313_v21, %v4296_v51  ;;  %4625 = vmatprep.subr.bf16.mxu0 %v8005_v48  ;;  %4666 = vmatprep.subr.bf16.mxu1 %v8011_v62  ;;  %v5642_v5 = vpop.eup %5641  ;;  %v4325_v48 = vrot.slane %v8160_v25, 1 }
 0x7fd   :  { %v4318_v28 = vrot.slane %v4315_v26, 7  ;;  %v4329_v42 = vmul.f32 %v4325_v48, %v4307_v45 }
 0x7fe   :  { %4626 = vmatpush1.bf16.msra.mxu0 %v8017_v7  ;;  %4667 = vmatpush1.bf16.msra.mxu1 %v8023_v39 }
 0x7ff   :  { %v4319_v43 = vsel %vm609_vm0, %v4318_v28, %v4314_v61  ;;  %4627 = vmatprep.subr.bf16.mxu0 %v8030_v14  ;;  %4668 = vmatprep.subr.bf16.mxu1 %v8036_v8  ;;  %v4530_v61 = vrot.slane %v4347_v54, %v6524_v29  ;;  %v8281_v28 = vpop.permute.xlu0 %4565 }
 0x800   :  { %4321 = vst [vmem:[#allocation5] sm:$0x3] %v4319_v43 }
 0x802   :  { %v5644_v10 = vpop.eup %5643  ;;  %4628 = vmatpush1.bf16.msra.mxu0 %v8043_v37  ;;  %4669 = vmatpush1.bf16.msra.mxu1 %v8049_v41  ;;  %v4328_v37 = vmul.f32 %v4302_v12, %v8160_v25 }
 0x803   :  { %v5646_v62 = vpop.eup %5645  ;;  %v4283_v7 = vmul.f32 %v5644_v10, %v5640_v23  ;;  %4629 = vmatprep.subr.bf16.mxu0 %v8055_v13  ;;  %4670 = vmatprep.subr.bf16.mxu1 %v8061_v19  ;;  %v8283_v23 = vpop.permute.xlu1 %4579 }
 0x804   :  { %v4284_v39 = vmul.f32 %v5646_v62, %v5642_v5 }
 0x805   :  { %v4322_v14 = vmul.f32 %v4288_v22, %v4283_v7  ;;  %v4531_v7 = vcombine.high %v4530_v61, %v4530_v61 }
 0x806   :  { %v4323_v8 = vmul.f32 %v4293_v53, %v4284_v39  ;;  %4630 = vmatpush1.bf16.msra.mxu0 %v8069_v32  ;;  %4671 = vmatpush1.bf16.msra.mxu1 %v8075_v11  ;;  %v8414_v11 = vld [vmem:[#allocation9_spill] sm:$0xff] }
 0x807   :  { %4338 = vst [vmem:[%s8333_s7 + $0x1] sm:$0x1] %v4322_v14  ;;  %4631 = vmatprep.subr.bf16.mxu0 %v8084_v9  ;;  %4672 = vmatprep.subr.bf16.mxu1 %v8090_v0  ;;  %v4330_v13 = vadd.f32 %v4328_v37, %v4322_v14 }
 0x808   :  { %v4331_v41 = vadd.f32 %v4329_v42, %v4323_v8  ;;  %4339 = vst [vmem:[%s8333_s7 + $0x9] sm:$0x1] %v4323_v8 }
 0x80a   :  { %v4334_v19 = vrot.slane %v4331_v41, 7  ;;  %4632 = vmatpush1.bf16.msra.mxu0 %v8100_v2  ;;  %4673 = vmatpush1.bf16.msra.mxu1 %v8106_v31 }
 0x80b   :  { %4633 = vmatprep.subr.bf16.mxu0 %v8112_v49  ;;  %4674 = vmatprep.subr.bf16.mxu1 %v8118_v16 }
 0x80c   :  { %v4335_v32 = vsel %vm609_vm0, %v4334_v19, %v4330_v13 }
 0x80d   :  { %4337 = vst [vmem:[#allocation4] sm:$0x3] %v4335_v32 }
 0x80e   :  { %4634 = vmatpush1.bf16.msra.mxu0 %v8125_v33  ;;  %4675 = vmatpush1.bf16.msra.mxu1 %v8131_v15 }
 0x80f   :  { %4635 = vmatprep.subr.bf16.mxu0 %v8137_v30  ;;  %4676 = vmatprep.subr.bf16.mxu1 %v8143_v27 }
 0x812   :  { %4636 = vmatpush1.bf16.msra.mxu0 %v8149_v44  ;;  %4677 = vmatpush1.bf16.msra.mxu1 %v8414_v11 }
 0x814   :  { %v8272_v9 = vld [vmem:[#allocation4] sm:$0x3] }
 0x815   :  { %v4620_v0 = vpack.c.bf16 %v8272_v9, %v8272_v9 }
 0x817   :  { %4654 = vmatmul.mubr.bf16.vlgmr.msra.gmra.mrb[60].mxu0 %v4620_v0  ;;  %4695 = vmatmul.mubr.bf16.vlgmr.msra.gmra.mrb[60].mxu1 %v4620_v0 }
 0x8c8   :  { %v4383_v2 = vpop.f32.mrb[56].mxu0  ;;  %v4424_v31 = vpop.f32.mrb[56].mxu1 }
 0x8c9   :  { %v4385_v49 = vpop.f32.mrb[57].mxu0  ;;  %v4426_v16 = vpop.f32.mrb[57].mxu1 }
 0x8ca   :  { %v4435_v33 = vcombine.low %v4383_v2, %v4385_v49  ;;  %v4436_v15 = vcombine.low %v4424_v31, %v4426_v16  ;;  %v4387_v30 = vpop.f32.mrb[58].mxu0  ;;  %v4428_v25 = vpop.f32.mrb[58].mxu1  ;;  %v4538_v49 = vrot.slane %v4530_v61, %v6524_v29 }
 0x8cb   :  { %v4388_v27 = vpop.f32.mrb[59].mxu0  ;;  %v4429_v47 = vpop.f32.mrb[59].mxu1  ;;  %v4545_v25 = vrot.slane %v4531_v7, %v6524_v29 }
 0x8cc   :  { %v4443_v44 = vrot.slane %v4435_v33, %v6524_v29  ;;  %v4450_v63 = vrot.slane %v4436_v15, %v6524_v29  ;;  %v8285_v2 = vpop.permute.xlu0 %4837  ;;  %v4582_v27 = vrot.slane %v4347_v54, 1 }
 0x8ce   :  { %v4451_v56 = vcombine.low %v4443_v44, %v4450_v63  ;;  %v4452_v6 = vcombine.high %v4443_v44, %v4450_v63  ;;  %v8291_v44 = vpop.permute.xlu1 %4851 }
 0x8d0   :  { %v4459_v18 = vrot.slane %v4451_v56, %v6524_v29  ;;  %v4466_v40 = vrot.slane %v4452_v6, %v6524_v29 }
 0x8d2   :  { %v4469_v53 = vadd.f32 %v4459_v18, %v4341_v57  ;;  %v4470_v55 = vadd.f32 %v4466_v40, %v4343_v20  ;;  %v4613_v40 = vld [vmem:[#allocation7] ss:$8 sm:$0xf] }
 0x8d4   :  { %v5086_v50 = vmul.f32 -1.442695, %v4469_v53  ;;  %v5087_v38 = vmul.f32 -1.442695, %v4470_v55  ;;  %v4485_v46 = vrot.slane %v4469_v53, 1  ;;  %v4486_v58 = vrot.slane %v4470_v55, 1 }
 0x8d5   :  { %v4507_v45 = vrot.slane %v4469_v53, 3  ;;  %v4508_v4 = vrot.slane %v4470_v55, 3  ;;  %v4501_v24 = vrot.slane %v4469_v53, 2  ;;  %v4502_v35 = vrot.slane %v4470_v55, 2 }
 0x8d6   :  { %5647 = vpow2.f32 %v5086_v50  ;;  %v5088_v52 = vmul.f32 -1.442695, %v4485_v46  ;;  %v5089_v17 = vmul.f32 -1.442695, %v4486_v58  ;;  %v4561_v58 = vpop.permute.xlu0 %4560 }
 0x8d7   :  { %5649 = vpow2.f32 %v5087_v38  ;;  %v5090_v36 = vmul.f32 -1.442695, %v4507_v45  ;;  %v5091_v34 = vmul.f32 -1.442695, %v4508_v4 }
 0x8d8   :  { %5651 = vpow2.f32 %v5088_v52  ;;  %v4615_v53 = vld [vmem:[#allocation7 + $0x20] ss:$8 sm:$0xf] }
 0x8d9   :  { %5653 = vpow2.f32 %v5089_v17 }
 0x8da   :  { %5655 = vtanh.f32 %v4501_v24  ;;  %v4586_v24 = vmul.f32 %v4582_v27, %v8283_v23  ;;  %v4619_v27 = vld [vmem:[#allocation5] sm:$0x3] }
 0x8db   :  { %5657 = vtanh.f32 %v4502_v35  ;;  %v4575_v35 = vpop.permute.xlu1 %4574 }
 0x8dc   :  { %5659 = vpow2.f32 %v5090_v36 }
 0x8dd   :  { %5661 = vpow2.f32 %v5091_v34 }
 0x8e0   :  { %v5648_v3 = vpop.eup %5647 }
 0x8e1   :  { %v5650_v59 = vpop.eup %5649  ;;  %v4477_v22 = vadd.f32 1.0, %v5648_v3 }
 0x8e2   :  { %v5652_v1 = vpop.eup %5651  ;;  %v4478_v51 = vadd.f32 1.0, %v5650_v59  ;;  %v4585_v59 = vmul.f32 %v4575_v35, %v4347_v54  ;;  %v4598_v54 = vrot.slane %v8225_v60, 1 }
 0x8e3   :  { %v5654_v21 = vpop.eup %5653  ;;  %5663 = vrcp.f32 %v4477_v22  ;;  %v4495_v12 = vadd.f32 1.0, %v5652_v1 }
 0x8e4   :  { %5665 = vrcp.f32 %v4478_v51  ;;  %v4496_v26 = vadd.f32 1.0, %v5654_v21  ;;  %v5656_v43 = vpop.eup %5655 }
 0x8e5   :  { %5667 = vrcp.f32 %v4495_v12  ;;  %v5658_v5 = vpop.eup %5657 }
 0x8e6   :  { %5669 = vrcp.f32 %v4496_v26  ;;  %v5660_v62 = vpop.eup %5659 }
 0x8e7   :  { %v5662_v42 = vpop.eup %5661  ;;  %v4517_v31 = vadd.f32 1.0, %v5660_v62 }
 0x8e8   :  { %v4518_v30 = vadd.f32 1.0, %v5662_v42 }
 0x8e9   :  { %5671 = vrcp.f32 %v4517_v31 }
 0x8ea   :  { %v4655_v10 = vpop.f32.mrb[60].mxu0  ;;  %v4696_v48 = vpop.f32.mrb[60].mxu1  ;;  %5673 = vrcp.f32 %v4518_v30 }
 0x8eb   :  { %v4657_v39 = vpop.f32.mrb[61].mxu0  ;;  %v4698_v14 = vpop.f32.mrb[61].mxu1 }
 0x8ec   :  { %v4707_v8 = vcombine.low %v4655_v10, %v4657_v39  ;;  %v4708_v37 = vcombine.low %v4696_v48, %v4698_v14  ;;  %v4659_v41 = vpop.f32.mrb[62].mxu0  ;;  %v4700_v13 = vpop.f32.mrb[62].mxu1 }
 0x8ed   :  { %v5664_v19 = vpop.eup %5663  ;;  %v4660_v32 = vpop.f32.mrb[63].mxu0 }
 0x8ee   :  { %v4701_v11 = vpop.f32.mrb[63].mxu1  ;;  %v5666_v0 = vpop.eup %5665  ;;  %v4715_v16 = vrot.slane %v4707_v8, %v6524_v29  ;;  %v4722_v33 = vrot.slane %v4708_v37, %v6524_v29  ;;  %v4550_v56 = vmul.f32 %v5664_v19, %v5656_v43  ;;  %v4602_v32 = vmul.f32 %v4598_v54, %v8283_v23 }
 0x8ef   :  { %v5668_v15 = vpop.eup %5667  ;;  %v4551_v18 = vmul.f32 %v5666_v0, %v5658_v5 }
 0x8f0   :  { %v5670_v47 = vpop.eup %5669  ;;  %v4548_v63 = vmul.f32 %v5668_v15, %v4538_v49  ;;  %v4723_v6 = vcombine.low %v4715_v16, %v4722_v33  ;;  %v4724_v57 = vcombine.high %v4715_v16, %v4722_v33  ;;  %v4601_v16 = vmul.f32 %v4575_v35, %v8225_v60 }
 0x8f1   :  { %v4549_v20 = vmul.f32 %v5670_v47, %v4545_v25  ;;  %v4802_v60 = vrot.slane %v4619_v27, %v6524_v29  ;;  %v4854_v35 = vrot.slane %v4619_v27, 1 }
 0x8f2   :  { %v4552_v55 = vadd.f32 %v4550_v56, %v4548_v63  ;;  %v4731_v50 = vrot.slane %v4723_v6, %v6524_v29  ;;  %v4738_v38 = vrot.slane %v4724_v57, %v6524_v29 }
 0x8f3   :  { %v4553_v46 = vadd.f32 %v4551_v18, %v4549_v20  ;;  %v5672_v5 = vpop.eup %5671  ;;  %v4803_v20 = vcombine.high %v4802_v60, %v4802_v60 }
 0x8f4   :  { %5675 = vtanh.f32 %v4552_v55  ;;  %v4741_v52 = vadd.f32 %v4731_v50, %v4613_v40  ;;  %v4742_v17 = vadd.f32 %v4738_v38, %v4615_v53  ;;  %v4568_v45 = vmul.f32 %v4561_v58, %v4552_v55  ;;  %v5674_v48 = vpop.eup %5673 }
 0x8f5   :  { %5677 = vtanh.f32 %v4553_v46  ;;  %v4569_v4 = vmul.f32 %v8281_v28, %v4553_v46  ;;  %v4810_v50 = vrot.slane %v4802_v60, %v6524_v29 }
 0x8f6   :  { %v5092_v36 = vmul.f32 -1.442695, %v4741_v52  ;;  %v5093_v34 = vmul.f32 -1.442695, %v4742_v17  ;;  %v4757_v3 = vrot.slane %v4741_v52, 1  ;;  %v4758_v1 = vrot.slane %v4742_v17, 1 }
 0x8f7   :  { %v4588_v22 = vadd.f32 %v4586_v24, %v4569_v4  ;;  %v4587_v21 = vadd.f32 %v4585_v59, %v4568_v45  ;;  %v4779_v43 = vrot.slane %v4741_v52, 3  ;;  %v4780_v10 = vrot.slane %v4742_v17, 3 }
 0x8f8   :  { %5679 = vpow2.f32 %v5092_v36  ;;  %v5094_v51 = vmul.f32 -1.442695, %v4757_v3  ;;  %v5095_v26 = vmul.f32 -1.442695, %v4758_v1  ;;  %v4773_v62 = vrot.slane %v4741_v52, 2  ;;  %v4833_v3 = vpop.permute.xlu0 %4832 }
 0x8f9   :  { %v4591_v12 = vrot.slane %v4588_v22, 7  ;;  %5681 = vpow2.f32 %v5093_v34  ;;  %v4774_v39 = vrot.slane %v4742_v17, 2  ;;  %v5096_v8 = vmul.f32 -1.442695, %v4779_v43 }
 0x8fa   :  { %5683 = vpow2.f32 %v5094_v51  ;;  %v5097_v41 = vmul.f32 -1.442695, %v4780_v10  ;;  %v4858_v1 = vmul.f32 %v4854_v35, %v8291_v44  ;;  %v4847_v51 = vpop.permute.xlu1 %4846 }
 0x8fb   :  { %v4592_v61 = vsel %vm609_vm0, %v4591_v12, %v4587_v21  ;;  %5685 = vpow2.f32 %v5095_v26 }
 0x8fc   :  { %4594 = vst [vmem:[#allocation3] sm:$0x3] %v4592_v61  ;;  %5687 = vtanh.f32 %v4773_v62 }
 0x8fd   :  { %5689 = vtanh.f32 %v4774_v39 }
 0x8fe   :  { %v5676_v7 = vpop.eup %5675  ;;  %5691 = vpow2.f32 %v5096_v8  ;;  %v4873_v8 = vmul.f32 %v4847_v51, %v8272_v9 }
 0x8ff   :  { %v5678_v14 = vpop.eup %5677  ;;  %v4556_v42 = vmul.f32 %v5676_v7, %v5672_v5  ;;  %5693 = vpow2.f32 %v5097_v41 }
 0x900   :  { %v4557_v37 = vmul.f32 %v5678_v14, %v5674_v48  ;;  %v4870_v48 = vrot.slane %v8272_v9, 1 }
 0x901   :  { %v4595_v13 = vmul.f32 %v4561_v58, %v4556_v42  ;;  %v4817_v58 = vrot.slane %v4803_v20, %v6524_v29  ;;  %v4857_v29 = vmul.f32 %v4847_v51, %v4619_v27 }
 0x902   :  { %v5680_v19 = vpop.eup %5679  ;;  %v4596_v11 = vmul.f32 %v8281_v28, %v4557_v37  ;;  %v4874_v14 = vmul.f32 %v4870_v48, %v8291_v44 }
 0x903   :  { %v5682_v0 = vpop.eup %5681  ;;  %4611 = vst [vmem:[%s8332_s6 + $0x7] sm:$0x1] %v4595_v13  ;;  %v4749_v31 = vadd.f32 1.0, %v5680_v19  ;;  %v4603_v30 = vadd.f32 %v4601_v16, %v4595_v13 }
 0x904   :  { %v5684_v49 = vpop.eup %5683  ;;  %v4604_v33 = vadd.f32 %v4602_v32, %v4596_v11  ;;  %4612 = vst [vmem:[%s8332_s6 + $0xf] sm:$0x1] %v4596_v11  ;;  %v4750_v15 = vadd.f32 1.0, %v5682_v0 }
 0x905   :  { %v5686_v23 = vpop.eup %5685  ;;  %5695 = vrcp.f32 %v4749_v31  ;;  %v4767_v28 = vadd.f32 1.0, %v5684_v49 }
 0x906   :  { %v4607_v25 = vrot.slane %v4604_v33, 7  ;;  %5697 = vrcp.f32 %v4750_v15  ;;  %v4768_v47 = vadd.f32 1.0, %v5686_v23  ;;  %v5688_v56 = vpop.eup %5687 }
 0x907   :  { %5699 = vrcp.f32 %v4767_v28  ;;  %v5690_v6 = vpop.eup %5689 }
 0x908   :  { %v4608_v63 = vsel %vm609_vm0, %v4607_v25, %v4603_v30  ;;  %5701 = vrcp.f32 %v4768_v47  ;;  %v5692_v57 = vpop.eup %5691 }
 0x909   :  { %4610 = vst [vmem:[#allocation2] sm:$0x3] %v4608_v63  ;;  %v5694_v18 = vpop.eup %5693  ;;  %v4789_v55 = vadd.f32 1.0, %v5692_v57 }
 0x90a   :  { %v4790_v46 = vadd.f32 1.0, %v5694_v18 }
 0x90b   :  { %5703 = vrcp.f32 %v4789_v55 }
 0x90c   :  { %5705 = vrcp.f32 %v4790_v46 }
 0x90f   :  { %v5696_v40 = vpop.eup %5695 }
 0x910   :  { %v5698_v53 = vpop.eup %5697  ;;  %v4822_v45 = vmul.f32 %v5696_v40, %v5688_v56 }
 0x911   :  { %v5700_v38 = vpop.eup %5699  ;;  %v4823_v24 = vmul.f32 %v5698_v53, %v5690_v6 }
 0x912   :  { %v5702_v52 = vpop.eup %5701  ;;  %v4820_v17 = vmul.f32 %v5700_v38, %v4810_v50 }
 0x913   :  { %v4821_v4 = vmul.f32 %v5702_v52, %v4817_v58 }
 0x914   :  { %v4824_v36 = vadd.f32 %v4822_v45, %v4820_v17 }
 0x915   :  { %v4825_v34 = vadd.f32 %v4823_v24, %v4821_v4  ;;  %v5704_v43 = vpop.eup %5703 }
 0x916   :  { %5707 = vtanh.f32 %v4824_v36  ;;  %v4840_v59 = vmul.f32 %v4833_v3, %v4824_v36  ;;  %v5706_v5 = vpop.eup %5705 }
 0x917   :  { %5709 = vtanh.f32 %v4825_v34  ;;  %v4841_v22 = vmul.f32 %v8285_v2, %v4825_v34 }
 0x918   :  { %v4859_v12 = vadd.f32 %v4857_v29, %v4840_v59 }
 0x919   :  { %v4860_v21 = vadd.f32 %v4858_v1, %v4841_v22 }
 0x91b   :  { %v4863_v26 = vrot.slane %v4860_v21, 7 }
 0x91d   :  { %v4864_v61 = vsel %vm609_vm0, %v4863_v26, %v4859_v12 }
 0x91e   :  { %4866 = vst [vmem:[#allocation5] sm:$0x3] %v4864_v61 }
 0x920   :  { %v5708_v10 = vpop.eup %5707 }
 0x921   :  { %v5710_v62 = vpop.eup %5709  ;;  %v4828_v7 = vmul.f32 %v5708_v10, %v5704_v43 }
 0x922   :  { %v4829_v54 = vmul.f32 %v5710_v62, %v5706_v5 }
 0x923   :  { %v4867_v39 = vmul.f32 %v4833_v3, %v4828_v7 }
 0x924   :  { %v4868_v42 = vmul.f32 %v8285_v2, %v4829_v54 }
 0x925   :  { %4883 = vst [vmem:[%s8333_s7] sm:$0x1] %v4867_v39  ;;  %v4875_v41 = vadd.f32 %v4873_v8, %v4867_v39 }
 0x926   :  { %v4876_v37 = vadd.f32 %v4874_v14, %v4868_v42  ;;  %4884 = vst [vmem:[%s8333_s7 + $0x8] sm:$0x1] %v4868_v42 }
 0x928   :  { %v4879_v13 = vrot.slane %v4876_v37, 7 }
 0x92a   :  { %v4880_v19 = vsel %vm609_vm0, %v4879_v13, %v4875_v41 }
 0x92b   :  { %4882 = vst [vmem:[#allocation4] sm:$0x3] %v4880_v19 }

</bundles_post_ra>
